<compile_context>
chip_gen: v6e
topology: v6e:2x2x1
jax: 0.10.0
libtpu: 0.0.40
codegen_flags: <defaults>
</compile_context>

<pallas_src>
import functools

import jax
import jax.numpy as jnp
from jax.experimental import pallas as pl
from jax.experimental.pallas import tpu as pltpu


def _bn_kernel(x_ref, gb_ref, o_ref, *, eps, n_valid):
    # x_ref:  (Cb, M)  Cb = channel block (sublanes), M = N*H*W (lanes)
    # gb_ref: (Cb, 2)  column 0 = gamma, column 1 = beta (float32)
    inv_n = 1.0 / float(n_valid)

    # ---- Stats pass (biased variance, as PyTorch uses for the normalization
    # itself in training mode).  `xf` is not reused afterwards, so its live
    # range ends here and does not span the normalize pass.
    xf = x_ref[...].astype(jnp.float32)
    s1 = jnp.sum(xf, axis=1, keepdims=True)        # (Cb, 1)
    s2 = jnp.sum(xf * xf, axis=1, keepdims=True)   # (Cb, 1)
    mean = s1 * inv_n
    var = jnp.maximum(s2 * inv_n - mean * mean, 0.0)

    inv_std = jax.lax.rsqrt(var + eps)
    gamma = gb_ref[:, 0:1]                         # (Cb, 1)
    beta = gb_ref[:, 1:2]                          # (Cb, 1)
    scale = gamma * inv_std                        # (Cb, 1)
    shift = beta - mean * scale                    # (Cb, 1)

    # ---- Normalize pass: RE-READ the ref (compiler streams (8,128) tiles with
    # bounded vreg pressure instead of spilling a half-MiB live value).
    o_ref[...] = (x_ref[...].astype(jnp.float32) * scale + shift).astype(o_ref.dtype)


def _is_multi_tensorcore():
    """Explicit allow-list of 2-TensorCore-per-device chips."""
    try:
        kind = jax.devices()[0].device_kind.lower()
    except Exception:
        return False
    return any(tag in kind for tag in ("v4", "v5p", "v7", "tpu7"))


def batchnorm2d_pallas(x_nchw, gamma, beta, eps=1e-5):
    """Training-mode BatchNorm2d forward. x_nchw: (N, C, H, W)."""
    n, c, h, w = x_nchw.shape
    m = n * h * w

    if n == 1:
        # Free reshape: NCHW with N==1 -> (C, H*W), no data movement.
        x2d = x_nchw.reshape(c, m)
    else:
        # General fallback (not hit for this module): fold N into the lane axis.
        x2d = jnp.transpose(x_nchw, (1, 0, 2, 3)).reshape(c, m)

    # Pack affine params into one operand: column 0 = gamma, column 1 = beta.
    gb = jnp.stack(
        [gamma.astype(jnp.float32), beta.astype(jnp.float32)], axis=1)  # (C, 2)

    kernel = functools.partial(_bn_kernel, eps=eps, n_valid=m)
    nblk = 2 if (_is_multi_tensorcore() and c % 16 == 0) else 1

    if nblk == 1:
        # Gridless, whole-array-in-VMEM path: no pipeline bookkeeping, no
        # unused double buffers — this kernel is launch/overhead-dominated.
        out2d = pl.pallas_call(
            kernel,
            out_shape=jax.ShapeDtypeStruct((c, m), x_nchw.dtype),
            in_specs=[
                pl.BlockSpec(memory_space=pltpu.MemorySpace.VMEM),
                pl.BlockSpec(memory_space=pltpu.MemorySpace.VMEM),
            ],
            out_specs=pl.BlockSpec(memory_space=pltpu.MemorySpace.VMEM),
        )(x2d, gb)
    else:
        cb = c // nblk
        out2d = pl.pallas_call(
            kernel,
            out_shape=jax.ShapeDtypeStruct((c, m), x_nchw.dtype),
            grid=(nblk,),
            in_specs=[
                pl.BlockSpec((cb, m), lambda i: (i, 0)),
                pl.BlockSpec((cb, 2), lambda i: (i, 0)),
            ],
            out_specs=pl.BlockSpec((cb, m), lambda i: (i, 0)),
            compiler_params=pltpu.CompilerParams(
                dimension_semantics=("parallel",)),
        )(x2d, gb)

    if n == 1:
        return out2d.reshape(1, c, h, w)   # free reshape back
    return jnp.transpose(out2d.reshape(c, n, h, w), (1, 0, 2, 3))


def _reference(x_nchw, gamma, beta, eps=1e-5):
    x = x_nchw.astype(jnp.float32)
    mean = jnp.mean(x, axis=(0, 2, 3), keepdims=True)
    var = jnp.mean((x - mean) ** 2, axis=(0, 2, 3), keepdims=True)
    y = (x - mean) * jax.lax.rsqrt(var + eps)
    return y * gamma.reshape(1, -1, 1, 1) + beta.reshape(1, -1, 1, 1)


if __name__ == "__main__":
    key = jax.random.PRNGKey(0)
    k_x, k_g, k_b = jax.random.split(key, 3)

    N, C, H, W = 1, 992, 7, 7  # matches the module's forward input shape
    x = jax.random.normal(k_x, (N, C, H, W), dtype=jnp.float32)
    # PyTorch default affine init is weight=1, bias=0; perturb slightly so the
    # affine path is actually exercised.
    gamma = 1.0 + 0.1 * jax.random.normal(k_g, (C,), dtype=jnp.float32)
    beta = 0.1 * jax.random.normal(k_b, (C,), dtype=jnp.float32)

    out = batchnorm2d_pallas(x, gamma, beta, eps=1e-5)
    out = jax.block_until_ready(out)

    ref = _reference(x, gamma, beta, eps=1e-5)
    assert out.shape == (N, C, H, W)
    assert jnp.allclose(out, ref, atol=1e-4, rtol=1e-4)

    print("KERNEL_OK")
</pallas_src>

<mosaic_0001>
module attributes {stable_mosaic.version = 11 : i64} {
  func.func @_bn_kernel(%arg0: memref<992x49xf32, #tpu.memory_space<vmem>>, %arg1: memref<992x2xf32, #tpu.memory_space<vmem>>, %arg2: memref<992x49xf32, #tpu.memory_space<vmem>>) attributes {dimension_semantics = [], scalar_prefetch = 0 : i64, scratch_operands = 0 : i64, tpu.core_type = #tpu.core_type<tc>} {
    %c0 = arith.constant 0 : index
    %c0_0 = arith.constant 0 : index
    %0 = vector.load %arg0[%c0, %c0_0] : memref<992x49xf32, #tpu.memory_space<vmem>>, vector<992x49xf32>
    %cst = arith.constant dense<0.000000e+00> : vector<992xf32>
    %1 = vector.multi_reduction <add>, %0, %cst [1] : vector<992x49xf32> to vector<992xf32>
    %2 = vector.shape_cast %1 : vector<992xf32> to vector<992x1xf32>
    %3 = arith.mulf %0, %0 : vector<992x49xf32>
    %cst_1 = arith.constant dense<0.000000e+00> : vector<992xf32>
    %4 = vector.multi_reduction <add>, %3, %cst_1 [1] : vector<992x49xf32> to vector<992xf32>
    %5 = vector.shape_cast %4 : vector<992xf32> to vector<992x1xf32>
    %cst_2 = arith.constant 0.0204081628 : f32
    %6 = vector.broadcast %cst_2 : f32 to vector<992x1xf32>
    %7 = arith.mulf %2, %6 : vector<992x1xf32>
    %cst_3 = arith.constant 0.0204081628 : f32
    %8 = vector.broadcast %cst_3 : f32 to vector<992x1xf32>
    %9 = arith.mulf %5, %8 : vector<992x1xf32>
    %10 = arith.mulf %7, %7 : vector<992x1xf32>
    %11 = arith.subf %9, %10 : vector<992x1xf32>
    %cst_4 = arith.constant 0.000000e+00 : f32
    %12 = vector.broadcast %cst_4 : f32 to vector<992x1xf32>
    %13 = arith.maximumf %11, %12 : vector<992x1xf32>
    %cst_5 = arith.constant 9.99999974E-6 : f32
    %14 = vector.broadcast %cst_5 : f32 to vector<992x1xf32>
    %15 = arith.addf %13, %14 : vector<992x1xf32>
    %16 = math.rsqrt %15 : vector<992x1xf32>
    %c0_6 = arith.constant 0 : index
    %c0_7 = arith.constant 0 : index
    %17 = vector.load %arg1[%c0_6, %c0_7] : memref<992x2xf32, #tpu.memory_space<vmem>>, vector<992x1xf32>
    %c0_8 = arith.constant 0 : index
    %c1 = arith.constant 1 : index
    %18 = vector.load %arg1[%c0_8, %c1] : memref<992x2xf32, #tpu.memory_space<vmem>>, vector<992x1xf32>
    %19 = arith.mulf %17, %16 : vector<992x1xf32>
    %20 = arith.mulf %7, %19 : vector<992x1xf32>
    %21 = arith.subf %18, %20 : vector<992x1xf32>
    %c0_9 = arith.constant 0 : index
    %c0_10 = arith.constant 0 : index
    %22 = vector.load %arg0[%c0_9, %c0_10] : memref<992x49xf32, #tpu.memory_space<vmem>>, vector<992x49xf32>
    %23 = vector.broadcast %19 : vector<992x1xf32> to vector<992x49xf32>
    %24 = arith.mulf %22, %23 : vector<992x49xf32>
    %25 = vector.broadcast %21 : vector<992x1xf32> to vector<992x49xf32>
    %26 = arith.addf %24, %25 : vector<992x49xf32>
    %c0_11 = arith.constant 0 : index
    %c0_12 = arith.constant 0 : index
    %27 = vector.load %arg2[%c0_11, %c0_12] : memref<992x49xf32, #tpu.memory_space<vmem>>, vector<992x49xf32>
    tpu.vector_store %arg2[%c0_11, %c0_12], %26 {strides = array<i32>} : memref<992x49xf32, #tpu.memory_space<vmem>>, vector<992x49xf32>,
    return
  }
}

</mosaic_0001>

<bundles_post_ra>
// kernel: tpu_custom_call.1
= control target key start
LH: loop header
LB: loop body
LE: loop exit
PB: predicated region body
PF: predicated region fallthrough
CT: control target
= control target key end

     0   :  { %vm135_vm0 = vcmask 400384   ;;  %s5030_s23 = smov 1   ;;  %s10972_s0 = inlined_call_operand.vmem [shape: f32[992,49], index: 0, kind: input, shape index: {}]   ;;  %s10973_s1 = inlined_call_operand.vmem [shape: f32[992,2], index: 1, kind: input, shape index: {}]   ;;  %s10974_s2 = inlined_call_operand.vmem [shape: f32[992,49], index: 2, kind: output, shape index: {}]  }
   0x1   :  { %v5051_v0 = vld [vmem:[%s10972_s0 + $0x10] sm:$0xff]  ;;  %v5056_v1 = vld [vmem:[%s10972_s0] sm:$0xff]  ;;  %v5061_v2 = vld [vmem:[%s10972_s0 + $0x18] sm:$0xff] }
   0x2   :  { %v142_v3 = vsel %vm135_vm0, %v5051_v0, 0.0  ;;  %v136_v4 = vsel %vm135_vm0, %v5056_v1, 0.0  ;;  %v5070_v5 = vld [vmem:[%s10972_s0 + $0x8] sm:$0xff]  ;;  %v145_v6 = vsel %vm135_vm0, %v5061_v2, 0.0  ;;  %v5084_v9 = vld [vmem:[%s10972_s0 + $0x20] sm:$0xff]  ;;  %v5093_v12 = vld [vmem:[%s10972_s0 + $0x38] sm:$0xff] }
   0x3   :  { %143 = vadd.xlane.f32.xlu1 %v142_v3  ;;  %137 = vadd.xlane.f32.xlu0 %v136_v4  ;;  %v139_v7 = vsel %vm135_vm0, %v5070_v5, 0.0  ;;  %v5079_v8 = vld [vmem:[%s10972_s0 + $0x28] sm:$0xff]  ;;  %v148_v11 = vsel %vm135_vm0, %v5084_v9, 0.0  ;;  %v5098_v13 = vld [vmem:[%s10972_s0 + $0x30] sm:$0xff]  ;;  %v157_v14 = vsel %vm135_vm0, %v5093_v12, 0.0  ;;  %v5112_v17 = vld [vmem:[%s10972_s0 + $0x40] sm:$0xff] }
   0x4   :  { %v151_v10 = vsel %vm135_vm0, %v5079_v8, 0.0  ;;  %v154_v15 = vsel %vm135_vm0, %v5098_v13, 0.0  ;;  %v5107_v16 = vld [vmem:[%s10972_s0 + $0x48] sm:$0xff]  ;;  %v160_v19 = vsel %vm135_vm0, %v5112_v17, 0.0  ;;  %v5121_v20 = vld [vmem:[%s10972_s0 + $0x58] sm:$0xff]  ;;  %v5126_v21 = vld [vmem:[%s10972_s0 + $0x50] sm:$0xff] }
   0x5   :  { %v163_v18 = vsel %vm135_vm0, %v5107_v16, 0.0  ;;  %v169_v22 = vsel %vm135_vm0, %v5121_v20, 0.0  ;;  %v166_v23 = vsel %vm135_vm0, %v5126_v21, 0.0  ;;  %v5135_v24 = vld [vmem:[%s10972_s0 + $0x68] sm:$0xff]  ;;  %v5140_v25 = vld [vmem:[%s10972_s0 + $0x60] sm:$0xff]  ;;  %v5149_v28 = vld [vmem:[%s10972_s0 + $0x78] sm:$0xff] }
   0x6   :  { %v175_v26 = vsel %vm135_vm0, %v5135_v24, 0.0  ;;  %v172_v27 = vsel %vm135_vm0, %v5140_v25, 0.0  ;;  %v5154_v29 = vld [vmem:[%s10972_s0 + $0x70] sm:$0xff]  ;;  %v181_v30 = vsel %vm135_vm0, %v5149_v28, 0.0  ;;  %v5163_v32 = vld [vmem:[%s10972_s0 + $0x88] sm:$0xff]  ;;  %v5168_v33 = vld [vmem:[%s10972_s0 + $0x80] sm:$0xff] }
   0x7   :  { %146 = vadd.xlane.f32.xlu1 %v145_v6  ;;  %140 = vadd.xlane.f32.xlu0 %v139_v7  ;;  %v178_v31 = vsel %vm135_vm0, %v5154_v29, 0.0  ;;  %v187_v34 = vsel %vm135_vm0, %v5163_v32, 0.0  ;;  %v184_v35 = vsel %vm135_vm0, %v5168_v33, 0.0  ;;  %v5177_v36 = vld [vmem:[%s10972_s0 + $0x98] sm:$0xff]  ;;  %v5182_v37 = vld [vmem:[%s10972_s0 + $0x90] sm:$0xff]  ;;  %v5191_v40 = vld [vmem:[%s10972_s0 + $0xa8] sm:$0xff] }
   0x8   :  { %v193_v38 = vsel %vm135_vm0, %v5177_v36, 0.0  ;;  %v190_v39 = vsel %vm135_vm0, %v5182_v37, 0.0  ;;  %v5196_v41 = vld [vmem:[%s10972_s0 + $0xa0] sm:$0xff]  ;;  %v199_v42 = vsel %vm135_vm0, %v5191_v40, 0.0  ;;  %v5205_v44 = vld [vmem:[%s10972_s0 + $0xb8] sm:$0xff]  ;;  %v5210_v45 = vld [vmem:[%s10972_s0 + $0xb0] sm:$0xff] }
   0x9   :  { %v196_v43 = vsel %vm135_vm0, %v5196_v41, 0.0  ;;  %v205_v46 = vsel %vm135_vm0, %v5205_v44, 0.0  ;;  %v202_v47 = vsel %vm135_vm0, %v5210_v45, 0.0  ;;  %v5219_v48 = vld [vmem:[%s10972_s0 + $0xc8] sm:$0xff]  ;;  %v5224_v49 = vld [vmem:[%s10972_s0 + $0xc0] sm:$0xff]  ;;  %v5233_v52 = vld [vmem:[%s10972_s0 + $0xd8] sm:$0xff] }
   0xa   :  { %v211_v50 = vsel %vm135_vm0, %v5219_v48, 0.0  ;;  %v208_v51 = vsel %vm135_vm0, %v5224_v49, 0.0  ;;  %v5238_v53 = vld [vmem:[%s10972_s0 + $0xd0] sm:$0xff]  ;;  %v217_v54 = vsel %vm135_vm0, %v5233_v52, 0.0  ;;  %v5247_v56 = vld [vmem:[%s10972_s0 + $0xe8] sm:$0xff]  ;;  %v5252_v57 = vld [vmem:[%s10972_s0 + $0xe0] sm:$0xff] }
   0xb   :  { %152 = vadd.xlane.f32.xlu1 %v151_v10  ;;  %149 = vadd.xlane.f32.xlu0 %v148_v11  ;;  %v214_v55 = vsel %vm135_vm0, %v5238_v53, 0.0  ;;  %v223_v58 = vsel %vm135_vm0, %v5247_v56, 0.0  ;;  %v220_v59 = vsel %vm135_vm0, %v5252_v57, 0.0  ;;  %v5261_v60 = vld [vmem:[%s10972_s0 + $0xf8] sm:$0xff]  ;;  %v5266_v61 = vld [vmem:[%s10972_s0 + $0xf0] sm:$0xff]  ;;  %v5275_v3 = vld [vmem:[%s10972_s0 + $0x108] sm:$0xff] }
   0xc   :  { %v229_v62 = vsel %vm135_vm0, %v5261_v60, 0.0  ;;  %v226_v63 = vsel %vm135_vm0, %v5266_v61, 0.0  ;;  %v5280_v4 = vld [vmem:[%s10972_s0 + $0x100] sm:$0xff]  ;;  %v235_v6 = vsel %vm135_vm0, %v5275_v3, 0.0  ;;  %v5289_v10 = vld [vmem:[%s10972_s0 + $0x118] sm:$0xff]  ;;  %v5294_v11 = vld [vmem:[%s10972_s0 + $0x110] sm:$0xff] }
   0xd   :  { %v232_v7 = vsel %vm135_vm0, %v5280_v4, 0.0 }
   0xf   :  { %158 = vadd.xlane.f32.xlu1 %v157_v14  ;;  %155 = vadd.xlane.f32.xlu0 %v154_v15  ;;  %v241_v14 = vsel %vm135_vm0, %v5289_v10, 0.0  ;;  %v238_v15 = vsel %vm135_vm0, %v5294_v11, 0.0 }
  0x13   :  { %164 = vadd.xlane.f32.xlu1 %v163_v18  ;;  %161 = vadd.xlane.f32.xlu0 %v160_v19  ;;  %v5303_v18 = vld [vmem:[%s10972_s0 + $0x128] sm:$0xff]  ;;  %v5308_v19 = vld [vmem:[%s10972_s0 + $0x120] sm:$0xff] }
  0x17   :  { %170 = vadd.xlane.f32.xlu1 %v169_v22  ;;  %167 = vadd.xlane.f32.xlu0 %v166_v23  ;;  %v247_v22 = vsel %vm135_vm0, %v5303_v18, 0.0  ;;  %v244_v23 = vsel %vm135_vm0, %v5308_v19, 0.0 }
  0x1b   :  { %176 = vadd.xlane.f32.xlu1 %v175_v26  ;;  %173 = vadd.xlane.f32.xlu0 %v172_v27  ;;  %v5317_v26 = vld [vmem:[%s10972_s0 + $0x138] sm:$0xff]  ;;  %v5322_v27 = vld [vmem:[%s10972_s0 + $0x130] sm:$0xff] }
  0x1f   :  { %182 = vadd.xlane.f32.xlu1 %v181_v30  ;;  %179 = vadd.xlane.f32.xlu0 %v178_v31  ;;  %v253_v30 = vsel %vm135_vm0, %v5317_v26, 0.0  ;;  %v250_v31 = vsel %vm135_vm0, %v5322_v27, 0.0 }
  0x23   :  { %188 = vadd.xlane.f32.xlu1 %v187_v34  ;;  %185 = vadd.xlane.f32.xlu0 %v184_v35  ;;  %v5331_v34 = vld [vmem:[%s10972_s0 + $0x148] sm:$0xff]  ;;  %v5336_v35 = vld [vmem:[%s10972_s0 + $0x140] sm:$0xff] }
  0x27   :  { %194 = vadd.xlane.f32.xlu1 %v193_v38  ;;  %191 = vadd.xlane.f32.xlu0 %v190_v39  ;;  %v259_v38 = vsel %vm135_vm0, %v5331_v34, 0.0  ;;  %v256_v39 = vsel %vm135_vm0, %v5336_v35, 0.0 }
  0x2b   :  { %200 = vadd.xlane.f32.xlu1 %v199_v42  ;;  %197 = vadd.xlane.f32.xlu0 %v196_v43  ;;  %v5345_v42 = vld [vmem:[%s10972_s0 + $0x158] sm:$0xff]  ;;  %v5350_v43 = vld [vmem:[%s10972_s0 + $0x150] sm:$0xff] }
  0x2f   :  { %206 = vadd.xlane.f32.xlu1 %v205_v46  ;;  %203 = vadd.xlane.f32.xlu0 %v202_v47  ;;  %v265_v46 = vsel %vm135_vm0, %v5345_v42, 0.0  ;;  %v262_v47 = vsel %vm135_vm0, %v5350_v43, 0.0 }
  0x33   :  { %212 = vadd.xlane.f32.xlu1 %v211_v50  ;;  %209 = vadd.xlane.f32.xlu0 %v208_v51  ;;  %v5359_v50 = vld [vmem:[%s10972_s0 + $0x168] sm:$0xff]  ;;  %v5364_v51 = vld [vmem:[%s10972_s0 + $0x160] sm:$0xff] }
  0x37   :  { %218 = vadd.xlane.f32.xlu1 %v217_v54  ;;  %215 = vadd.xlane.f32.xlu0 %v214_v55  ;;  %v271_v54 = vsel %vm135_vm0, %v5359_v50, 0.0  ;;  %v268_v55 = vsel %vm135_vm0, %v5364_v51, 0.0 }
  0x3b   :  { %224 = vadd.xlane.f32.xlu1 %v223_v58  ;;  %221 = vadd.xlane.f32.xlu0 %v220_v59  ;;  %v5373_v58 = vld [vmem:[%s10972_s0 + $0x178] sm:$0xff]  ;;  %v5378_v59 = vld [vmem:[%s10972_s0 + $0x170] sm:$0xff] }
  0x3f   :  { %230 = vadd.xlane.f32.xlu1 %v229_v62  ;;  %227 = vadd.xlane.f32.xlu0 %v226_v63  ;;  %v277_v62 = vsel %vm135_vm0, %v5373_v58, 0.0  ;;  %v274_v63 = vsel %vm135_vm0, %v5378_v59, 0.0 }
  0x43   :  { %236 = vadd.xlane.f32.xlu1 %v235_v6  ;;  %233 = vadd.xlane.f32.xlu0 %v232_v7  ;;  %v5387_v6 = vld [vmem:[%s10972_s0 + $0x188] sm:$0xff]  ;;  %v5392_v7 = vld [vmem:[%s10972_s0 + $0x180] sm:$0xff] }
  0x47   :  { %242 = vadd.xlane.f32.xlu1 %v241_v14  ;;  %239 = vadd.xlane.f32.xlu0 %v238_v15  ;;  %v283_v14 = vsel %vm135_vm0, %v5387_v6, 0.0  ;;  %v280_v15 = vsel %vm135_vm0, %v5392_v7, 0.0 }
  0x4b   :  { %248 = vadd.xlane.f32.xlu1 %v247_v22  ;;  %245 = vadd.xlane.f32.xlu0 %v244_v23  ;;  %v5401_v22 = vld [vmem:[%s10972_s0 + $0x198] sm:$0xff]  ;;  %v5406_v23 = vld [vmem:[%s10972_s0 + $0x190] sm:$0xff] }
  0x4f   :  { %254 = vadd.xlane.f32.xlu1 %v253_v30  ;;  %251 = vadd.xlane.f32.xlu0 %v250_v31  ;;  %v289_v30 = vsel %vm135_vm0, %v5401_v22, 0.0  ;;  %v286_v31 = vsel %vm135_vm0, %v5406_v23, 0.0 }
  0x53   :  { %260 = vadd.xlane.f32.xlu1 %v259_v38  ;;  %257 = vadd.xlane.f32.xlu0 %v256_v39  ;;  %v5415_v38 = vld [vmem:[%s10972_s0 + $0x1a8] sm:$0xff]  ;;  %v5420_v39 = vld [vmem:[%s10972_s0 + $0x1a0] sm:$0xff] }
  0x54   :  { %11206 = vst [vmem:[#allocation2_spill] sm:$0xff] %v5420_v39 }
  0x57   :  { %266 = vadd.xlane.f32.xlu1 %v265_v46  ;;  %263 = vadd.xlane.f32.xlu0 %v262_v47  ;;  %v295_v46 = vsel %vm135_vm0, %v5415_v38, 0.0  ;;  %v292_v47 = vsel %vm135_vm0, %v5420_v39, 0.0 }
  0x5b   :  { %272 = vadd.xlane.f32.xlu1 %v271_v54  ;;  %269 = vadd.xlane.f32.xlu0 %v268_v55  ;;  %v5429_v54 = vld [vmem:[%s10972_s0 + $0x1b8] sm:$0xff]  ;;  %v5434_v55 = vld [vmem:[%s10972_s0 + $0x1b0] sm:$0xff] }
  0x5c   :  { %11207 = vst [vmem:[#allocation3_spill] sm:$0xff] %v5429_v54  ;;  %11208 = vst [vmem:[#allocation4_spill] sm:$0xff] %v5434_v55 }
  0x5f   :  { %278 = vadd.xlane.f32.xlu1 %v277_v62  ;;  %275 = vadd.xlane.f32.xlu0 %v274_v63  ;;  %v301_v62 = vsel %vm135_vm0, %v5429_v54, 0.0  ;;  %v298_v63 = vsel %vm135_vm0, %v5434_v55, 0.0  ;;  %v5559_v55 = vld [vmem:[%s10972_s0 + $0x248] sm:$0xff]  ;;  %v89_v54 = vld [vmem:[%s10972_s0 + $0x270] sm:$0xff] }
  0x60   :  { %11227 = vst [vmem:[#allocation23_spill] sm:$0xff] %v5559_v55 }
  0x63   :  { %284 = vadd.xlane.f32.xlu1 %v283_v14  ;;  %281 = vadd.xlane.f32.xlu0 %v280_v15  ;;  %v5443_v14 = vld [vmem:[%s10972_s0 + $0x1c8] sm:$0xff]  ;;  %v5448_v15 = vld [vmem:[%s10972_s0 + $0x1c0] sm:$0xff] }
  0x64   :  { %11209 = vst [vmem:[#allocation5_spill] sm:$0xff] %v5443_v14  ;;  %11210 = vst [vmem:[#allocation6_spill] sm:$0xff] %v5448_v15 }
  0x67   :  { %290 = vadd.xlane.f32.xlu1 %v289_v30  ;;  %287 = vadd.xlane.f32.xlu0 %v286_v31  ;;  %v307_v30 = vsel %vm135_vm0, %v5443_v14, 0.0  ;;  %v304_v31 = vsel %vm135_vm0, %v5448_v15, 0.0  ;;  %v5471_v15 = vld [vmem:[%s10972_s0 + $0x1e8] sm:$0xff]  ;;  %v5476_v14 = vld [vmem:[%s10972_s0 + $0x1e0] sm:$0xff] }
  0x68   :  { %11213 = vst [vmem:[#allocation9_spill] sm:$0xff] %v5471_v15  ;;  %11214 = vst [vmem:[#allocation10_spill] sm:$0xff] %v5476_v14 }
  0x6b   :  { %296 = vadd.xlane.f32.xlu1 %v295_v46  ;;  %293 = vadd.xlane.f32.xlu0 %v292_v47  ;;  %v5457_v46 = vld [vmem:[%s10972_s0 + $0x1d8] sm:$0xff]  ;;  %v5462_v47 = vld [vmem:[%s10972_s0 + $0x1d0] sm:$0xff] }
  0x6c   :  { %11211 = vst [vmem:[#allocation7_spill] sm:$0xff] %v5457_v46  ;;  %11212 = vst [vmem:[#allocation8_spill] sm:$0xff] %v5462_v47 }
  0x6f   :  { %302 = vadd.xlane.f32.xlu1 %v301_v62  ;;  %299 = vadd.xlane.f32.xlu0 %v298_v63  ;;  %v313_v62 = vsel %vm135_vm0, %v5457_v46, 0.0  ;;  %v310_v63 = vsel %vm135_vm0, %v5462_v47, 0.0  ;;  %v5485_v47 = vld [vmem:[%s10972_s0 + $0x1f8] sm:$0xff]  ;;  %v5490_v46 = vld [vmem:[%s10972_s0 + $0x1f0] sm:$0xff] }
  0x70   :  { %11215 = vst [vmem:[#allocation11_spill] sm:$0xff] %v5485_v47  ;;  %11216 = vst [vmem:[#allocation12_spill] sm:$0xff] %v5490_v46 }
  0x73   :  { %308 = vadd.xlane.f32.xlu1 %v307_v30  ;;  %305 = vadd.xlane.f32.xlu0 %v304_v31  ;;  %v319_v30 = vsel %vm135_vm0, %v5471_v15, 0.0  ;;  %v316_v31 = vsel %vm135_vm0, %v5476_v14, 0.0  ;;  %v5499_v14 = vld [vmem:[%s10972_s0 + $0x208] sm:$0xff]  ;;  %v5504_v15 = vld [vmem:[%s10972_s0 + $0x200] sm:$0xff] }
  0x74   :  { %11217 = vst [vmem:[#allocation13_spill] sm:$0xff] %v5499_v14  ;;  %11218 = vst [vmem:[#allocation14_spill] sm:$0xff] %v5504_v15 }
  0x77   :  { %314 = vadd.xlane.f32.xlu1 %v313_v62  ;;  %311 = vadd.xlane.f32.xlu0 %v310_v63  ;;  %v325_v62 = vsel %vm135_vm0, %v5485_v47, 0.0  ;;  %v322_v63 = vsel %vm135_vm0, %v5490_v46, 0.0  ;;  %v5513_v46 = vld [vmem:[%s10972_s0 + $0x218] sm:$0xff]  ;;  %v5518_v47 = vld [vmem:[%s10972_s0 + $0x210] sm:$0xff] }
  0x78   :  { %11219 = vst [vmem:[#allocation15_spill] sm:$0xff] %v5513_v46  ;;  %11220 = vst [vmem:[#allocation16_spill] sm:$0xff] %v5518_v47 }
  0x7b   :  { %320 = vadd.xlane.f32.xlu1 %v319_v30  ;;  %317 = vadd.xlane.f32.xlu0 %v316_v31  ;;  %v331_v30 = vsel %vm135_vm0, %v5499_v14, 0.0  ;;  %v328_v31 = vsel %vm135_vm0, %v5504_v15, 0.0  ;;  %v5527_v15 = vld [vmem:[%s10972_s0 + $0x228] sm:$0xff]  ;;  %v5532_v14 = vld [vmem:[%s10972_s0 + $0x220] sm:$0xff] }
  0x7c   :  { %11221 = vst [vmem:[#allocation17_spill] sm:$0xff] %v5527_v15  ;;  %11222 = vst [vmem:[#allocation18_spill] sm:$0xff] %v5532_v14 }
  0x7f   :  { %326 = vadd.xlane.f32.xlu1 %v325_v62  ;;  %323 = vadd.xlane.f32.xlu0 %v322_v63  ;;  %v337_v62 = vsel %vm135_vm0, %v5513_v46, 0.0  ;;  %v334_v63 = vsel %vm135_vm0, %v5518_v47, 0.0  ;;  %v5541_v47 = vld [vmem:[%s10972_s0 + $0x238] sm:$0xff]  ;;  %v5546_v46 = vld [vmem:[%s10972_s0 + $0x230] sm:$0xff] }
  0x80   :  { %11223 = vst [vmem:[#allocation19_spill] sm:$0xff] %v5541_v47  ;;  %11224 = vst [vmem:[#allocation20_spill] sm:$0xff] %v5546_v46 }
  0x83   :  { %332 = vadd.xlane.f32.xlu1 %v331_v30  ;;  %329 = vadd.xlane.f32.xlu0 %v328_v31  ;;  %v343_v30 = vsel %vm135_vm0, %v5527_v15, 0.0  ;;  %v340_v31 = vsel %vm135_vm0, %v5532_v14, 0.0  ;;  %v349_v15 = vsel %vm135_vm0, %v5541_v47, 0.0  ;;  %v346_v14 = vsel %vm135_vm0, %v5546_v46, 0.0 }
  0x84   :  { %v355_v47 = vsel %vm135_vm0, %v5559_v55, 0.0 }
  0x87   :  { %338 = vadd.xlane.f32.xlu1 %v337_v62  ;;  %335 = vadd.xlane.f32.xlu0 %v334_v63 }
  0x8b   :  { %344 = vadd.xlane.f32.xlu1 %v343_v30  ;;  %341 = vadd.xlane.f32.xlu0 %v340_v31  ;;  %v5564_v30 = vld [vmem:[%s10972_s0 + $0x240] sm:$0xff] }
  0x8c   :  { %v5548_v62 = vpop.xlane.xlu1 %143  ;;  %v5550_v63 = vpop.xlane.xlu0 %137  ;;  %11228 = vst [vmem:[#allocation24_spill] sm:$0xff] %v5564_v30  ;;  %v352_v46 = vsel %vm135_vm0, %v5564_v30, 0.0 }
  0x8d   :  { %11225 = vst [vmem:[#allocation21_spill] sm:$0xff] %v5548_v62  ;;  %11226 = vst [vmem:[#allocation22_spill] sm:$0xff] %v5550_v63  ;;  %v5577_v63 = vld [vmem:[%s10972_s0 + $0x258] sm:$0xff] }
  0x8e   :  { %11231 = vst [vmem:[#allocation27_spill] sm:$0xff] %v5577_v63  ;;  %v361_v55 = vsel %vm135_vm0, %v5577_v63, 0.0  ;;  %v90_v63 = vld [vmem:[%s10972_s0 + $0x278] sm:$0xff] }
  0x8f   :  { %350 = vadd.xlane.f32.xlu1 %v349_v15  ;;  %347 = vadd.xlane.f32.xlu0 %v346_v14  ;;  %v5582_v15 = vld [vmem:[%s10972_s0 + $0x250] sm:$0xff] }
  0x90   :  { %v5566_v31 = vpop.xlane.xlu1 %146  ;;  %v5568_v62 = vpop.xlane.xlu0 %140  ;;  %11232 = vst [vmem:[#allocation28_spill] sm:$0xff] %v5582_v15  ;;  %v358_v30 = vsel %vm135_vm0, %v5582_v15, 0.0 }
  0x91   :  { %11229 = vst [vmem:[#allocation25_spill] sm:$0xff] %v5566_v31  ;;  %11230 = vst [vmem:[#allocation26_spill] sm:$0xff] %v5568_v62  ;;  %v5595_v62 = vld [vmem:[%s10972_s0 + $0x268] sm:$0xff] }
  0x92   :  { %11235 = vst [vmem:[#allocation31_spill] sm:$0xff] %v5595_v62 }
  0x93   :  { %356 = vadd.xlane.f32.xlu1 %v355_v47  ;;  %353 = vadd.xlane.f32.xlu0 %v352_v46  ;;  %v87_v47 = vld [vmem:[%s10972_s0 + $0x260] sm:$0xff] }
  0x94   :  { %v5584_v14 = vpop.xlane.xlu1 %152  ;;  %v5586_v31 = vpop.xlane.xlu0 %149  ;;  %v364_v15 = vsel %vm135_vm0, %v87_v47, 0.0  ;;  %v92_v47 = vld [vmem:[%s10972_s0 + $0x288] sm:$0xff] }
  0x95   :  { %11233 = vst [vmem:[#allocation29_spill] sm:$0xff] %v5584_v14  ;;  %11234 = vst [vmem:[#allocation30_spill] sm:$0xff] %v5586_v31  ;;  %v367_v14 = vsel %vm135_vm0, %v5595_v62, 0.0  ;;  %v370_v62 = vsel %vm135_vm0, %v89_v54, 0.0  ;;  %v94_v54 = vld [vmem:[%s10972_s0 + $0x298] sm:$0xff] }
  0x97   :  { %362 = vadd.xlane.f32.xlu1 %v361_v55  ;;  %359 = vadd.xlane.f32.xlu0 %v358_v30 }
  0x98   :  { %v5600_v46 = vpop.xlane.xlu1 %158  ;;  %v5602_v31 = vpop.xlane.xlu0 %155 }
  0x99   :  { %11236 = vst [vmem:[#allocation32_spill] sm:$0xff] %v5600_v46  ;;  %11237 = vst [vmem:[#allocation33_spill] sm:$0xff] %v5602_v31  ;;  %v373_v31 = vsel %vm135_vm0, %v90_v63, 0.0  ;;  %v91_v46 = vld [vmem:[%s10972_s0 + $0x280] sm:$0xff] }
  0x9a   :  { %v376_v63 = vsel %vm135_vm0, %v91_v46, 0.0  ;;  %v96_v46 = vld [vmem:[%s10972_s0 + $0x2a8] sm:$0xff] }
  0x9b   :  { %368 = vadd.xlane.f32.xlu1 %v367_v14  ;;  %365 = vadd.xlane.f32.xlu0 %v364_v15 }
  0x9c   :  { %v5613_v55 = vpop.xlane.xlu1 %164  ;;  %v5615_v30 = vpop.xlane.xlu0 %161 }
  0x9d   :  { %11238 = vst [vmem:[#allocation34_spill] sm:$0xff] %v5613_v55  ;;  %11239 = vst [vmem:[#allocation35_spill] sm:$0xff] %v5615_v30  ;;  %v379_v30 = vsel %vm135_vm0, %v92_v47, 0.0  ;;  %v93_v55 = vld [vmem:[%s10972_s0 + $0x290] sm:$0xff] }
  0x9e   :  { %v382_v47 = vsel %vm135_vm0, %v93_v55, 0.0  ;;  %v98_v55 = vld [vmem:[%s10972_s0 + $0x2b8] sm:$0xff] }
  0x9f   :  { %374 = vadd.xlane.f32.xlu1 %v373_v31  ;;  %371 = vadd.xlane.f32.xlu0 %v370_v62 }
  0xa0   :  { %v5625_v14 = vpop.xlane.xlu1 %170  ;;  %v5627_v15 = vpop.xlane.xlu0 %167 }
  0xa1   :  { %11240 = vst [vmem:[#allocation36_spill] sm:$0xff] %v5625_v14  ;;  %11241 = vst [vmem:[#allocation37_spill] sm:$0xff] %v5627_v15  ;;  %v385_v15 = vsel %vm135_vm0, %v94_v54, 0.0  ;;  %v95_v14 = vld [vmem:[%s10972_s0 + $0x2a0] sm:$0xff] }
  0xa2   :  { %v388_v54 = vsel %vm135_vm0, %v95_v14, 0.0  ;;  %v100_v14 = vld [vmem:[%s10972_s0 + $0x2c8] sm:$0xff] }
  0xa3   :  { %380 = vadd.xlane.f32.xlu1 %v379_v30  ;;  %377 = vadd.xlane.f32.xlu0 %v376_v63 }
  0xa4   :  { %v5637_v31 = vpop.xlane.xlu1 %176  ;;  %v5639_v62 = vpop.xlane.xlu0 %173 }
  0xa5   :  { %11242 = vst [vmem:[#allocation38_spill] sm:$0xff] %v5637_v31  ;;  %11243 = vst [vmem:[#allocation39_spill] sm:$0xff] %v5639_v62  ;;  %v391_v62 = vsel %vm135_vm0, %v96_v46, 0.0  ;;  %v97_v31 = vld [vmem:[%s10972_s0 + $0x2b0] sm:$0xff] }
  0xa6   :  { %v394_v46 = vsel %vm135_vm0, %v97_v31, 0.0  ;;  %v102_v31 = vld [vmem:[%s10972_s0 + $0x2d8] sm:$0xff] }
  0xa7   :  { %386 = vadd.xlane.f32.xlu1 %v385_v15  ;;  %383 = vadd.xlane.f32.xlu0 %v382_v47 }
  0xa8   :  { %v5649_v30 = vpop.xlane.xlu1 %182  ;;  %v5651_v63 = vpop.xlane.xlu0 %179 }
  0xa9   :  { %11244 = vst [vmem:[#allocation40_spill] sm:$0xff] %v5649_v30  ;;  %11245 = vst [vmem:[#allocation41_spill] sm:$0xff] %v5651_v63  ;;  %v397_v63 = vsel %vm135_vm0, %v98_v55, 0.0  ;;  %v99_v30 = vld [vmem:[%s10972_s0 + $0x2c0] sm:$0xff] }
  0xaa   :  { %v400_v55 = vsel %vm135_vm0, %v99_v30, 0.0  ;;  %v104_v30 = vld [vmem:[%s10972_s0 + $0x2e8] sm:$0xff] }
  0xab   :  { %392 = vadd.xlane.f32.xlu1 %v391_v62  ;;  %389 = vadd.xlane.f32.xlu0 %v388_v54 }
  0xac   :  { %v5661_v15 = vpop.xlane.xlu1 %188  ;;  %v5663_v47 = vpop.xlane.xlu0 %185 }
  0xad   :  { %11246 = vst [vmem:[#allocation42_spill] sm:$0xff] %v5661_v15  ;;  %11247 = vst [vmem:[#allocation43_spill] sm:$0xff] %v5663_v47  ;;  %v403_v47 = vsel %vm135_vm0, %v100_v14, 0.0  ;;  %v101_v15 = vld [vmem:[%s10972_s0 + $0x2d0] sm:$0xff] }
  0xae   :  { %v406_v14 = vsel %vm135_vm0, %v101_v15, 0.0  ;;  %v106_v15 = vld [vmem:[%s10972_s0 + $0x2f8] sm:$0xff] }
  0xaf   :  { %398 = vadd.xlane.f32.xlu1 %v397_v63  ;;  %395 = vadd.xlane.f32.xlu0 %v394_v46 }
  0xb0   :  { %v5673_v62 = vpop.xlane.xlu1 %194  ;;  %v5675_v54 = vpop.xlane.xlu0 %191 }
  0xb1   :  { %11248 = vst [vmem:[#allocation44_spill] sm:$0xff] %v5673_v62  ;;  %11249 = vst [vmem:[#allocation45_spill] sm:$0xff] %v5675_v54  ;;  %v409_v54 = vsel %vm135_vm0, %v102_v31, 0.0  ;;  %v103_v62 = vld [vmem:[%s10972_s0 + $0x2e0] sm:$0xff] }
  0xb2   :  { %v412_v31 = vsel %vm135_vm0, %v103_v62, 0.0  ;;  %v108_v62 = vld [vmem:[%s10972_s0 + $0x308] sm:$0xff] }
  0xb3   :  { %404 = vadd.xlane.f32.xlu1 %v403_v47  ;;  %401 = vadd.xlane.f32.xlu0 %v400_v55 }
  0xb4   :  { %v5685_v63 = vpop.xlane.xlu1 %200  ;;  %v5687_v46 = vpop.xlane.xlu0 %197 }
  0xb5   :  { %11250 = vst [vmem:[#allocation46_spill] sm:$0xff] %v5685_v63  ;;  %11251 = vst [vmem:[#allocation47_spill] sm:$0xff] %v5687_v46  ;;  %v415_v46 = vsel %vm135_vm0, %v104_v30, 0.0  ;;  %v105_v63 = vld [vmem:[%s10972_s0 + $0x2f0] sm:$0xff] }
  0xb6   :  { %v418_v30 = vsel %vm135_vm0, %v105_v63, 0.0  ;;  %v110_v63 = vld [vmem:[%s10972_s0 + $0x318] sm:$0xff] }
  0xb7   :  { %410 = vadd.xlane.f32.xlu1 %v409_v54  ;;  %407 = vadd.xlane.f32.xlu0 %v406_v14 }
  0xb8   :  { %v5697_v47 = vpop.xlane.xlu1 %206  ;;  %v5699_v55 = vpop.xlane.xlu0 %203 }
  0xb9   :  { %11252 = vst [vmem:[#allocation48_spill] sm:$0xff] %v5697_v47  ;;  %11253 = vst [vmem:[#allocation49_spill] sm:$0xff] %v5699_v55  ;;  %v421_v55 = vsel %vm135_vm0, %v106_v15, 0.0  ;;  %v107_v47 = vld [vmem:[%s10972_s0 + $0x300] sm:$0xff] }
  0xba   :  { %v424_v15 = vsel %vm135_vm0, %v107_v47, 0.0  ;;  %v112_v47 = vld [vmem:[%s10972_s0 + $0x328] sm:$0xff] }
  0xbb   :  { %416 = vadd.xlane.f32.xlu1 %v415_v46  ;;  %413 = vadd.xlane.f32.xlu0 %v412_v31 }
  0xbc   :  { %v5709_v54 = vpop.xlane.xlu1 %212  ;;  %v5711_v14 = vpop.xlane.xlu0 %209 }
  0xbd   :  { %11254 = vst [vmem:[#allocation50_spill] sm:$0xff] %v5709_v54  ;;  %11255 = vst [vmem:[#allocation51_spill] sm:$0xff] %v5711_v14  ;;  %v427_v14 = vsel %vm135_vm0, %v108_v62, 0.0  ;;  %v109_v54 = vld [vmem:[%s10972_s0 + $0x310] sm:$0xff] }
  0xbe   :  { %v430_v62 = vsel %vm135_vm0, %v109_v54, 0.0  ;;  %v114_v54 = vld [vmem:[%s10972_s0 + $0x338] sm:$0xff] }
  0xbf   :  { %422 = vadd.xlane.f32.xlu1 %v421_v55  ;;  %419 = vadd.xlane.f32.xlu0 %v418_v30 }
  0xc0   :  { %v5721_v46 = vpop.xlane.xlu1 %218  ;;  %v5723_v31 = vpop.xlane.xlu0 %215 }
  0xc1   :  { %11256 = vst [vmem:[#allocation52_spill] sm:$0xff] %v5721_v46  ;;  %11257 = vst [vmem:[#allocation53_spill] sm:$0xff] %v5723_v31  ;;  %v433_v31 = vsel %vm135_vm0, %v110_v63, 0.0  ;;  %v111_v46 = vld [vmem:[%s10972_s0 + $0x320] sm:$0xff] }
  0xc2   :  { %v436_v63 = vsel %vm135_vm0, %v111_v46, 0.0  ;;  %v116_v46 = vld [vmem:[%s10972_s0 + $0x348] sm:$0xff] }
  0xc3   :  { %428 = vadd.xlane.f32.xlu1 %v427_v14  ;;  %425 = vadd.xlane.f32.xlu0 %v424_v15 }
  0xc4   :  { %v5733_v55 = vpop.xlane.xlu1 %224  ;;  %v5735_v30 = vpop.xlane.xlu0 %221 }
  0xc5   :  { %11258 = vst [vmem:[#allocation54_spill] sm:$0xff] %v5733_v55  ;;  %11259 = vst [vmem:[#allocation55_spill] sm:$0xff] %v5735_v30  ;;  %v439_v30 = vsel %vm135_vm0, %v112_v47, 0.0  ;;  %v113_v55 = vld [vmem:[%s10972_s0 + $0x330] sm:$0xff] }
  0xc6   :  { %v442_v47 = vsel %vm135_vm0, %v113_v55, 0.0  ;;  %v118_v55 = vld [vmem:[%s10972_s0 + $0x358] sm:$0xff] }
  0xc7   :  { %434 = vadd.xlane.f32.xlu1 %v433_v31  ;;  %431 = vadd.xlane.f32.xlu0 %v430_v62 }
  0xc8   :  { %v5745_v14 = vpop.xlane.xlu1 %230  ;;  %v5747_v15 = vpop.xlane.xlu0 %227 }
  0xc9   :  { %11260 = vst [vmem:[#allocation56_spill] sm:$0xff] %v5745_v14  ;;  %11261 = vst [vmem:[#allocation57_spill] sm:$0xff] %v5747_v15  ;;  %v445_v15 = vsel %vm135_vm0, %v114_v54, 0.0  ;;  %v115_v14 = vld [vmem:[%s10972_s0 + $0x340] sm:$0xff] }
  0xca   :  { %v448_v54 = vsel %vm135_vm0, %v115_v14, 0.0  ;;  %v120_v14 = vld [vmem:[%s10972_s0 + $0x368] sm:$0xff] }
  0xcb   :  { %440 = vadd.xlane.f32.xlu1 %v439_v30  ;;  %437 = vadd.xlane.f32.xlu0 %v436_v63 }
  0xcc   :  { %v5757_v31 = vpop.xlane.xlu1 %236  ;;  %v5759_v62 = vpop.xlane.xlu0 %233 }
  0xcd   :  { %11262 = vst [vmem:[#allocation58_spill] sm:$0xff] %v5757_v31  ;;  %11263 = vst [vmem:[#allocation59_spill] sm:$0xff] %v5759_v62  ;;  %v451_v62 = vsel %vm135_vm0, %v116_v46, 0.0  ;;  %v117_v31 = vld [vmem:[%s10972_s0 + $0x350] sm:$0xff] }
  0xce   :  { %v454_v46 = vsel %vm135_vm0, %v117_v31, 0.0  ;;  %v122_v31 = vld [vmem:[%s10972_s0 + $0x378] sm:$0xff] }
  0xcf   :  { %446 = vadd.xlane.f32.xlu1 %v445_v15  ;;  %443 = vadd.xlane.f32.xlu0 %v442_v47 }
  0xd0   :  { %v5769_v30 = vpop.xlane.xlu1 %242  ;;  %v5771_v63 = vpop.xlane.xlu0 %239 }
  0xd1   :  { %11264 = vst [vmem:[#allocation60_spill] sm:$0xff] %v5769_v30  ;;  %11265 = vst [vmem:[#allocation61_spill] sm:$0xff] %v5771_v63  ;;  %v457_v63 = vsel %vm135_vm0, %v118_v55, 0.0  ;;  %v119_v30 = vld [vmem:[%s10972_s0 + $0x360] sm:$0xff] }
  0xd2   :  { %v460_v55 = vsel %vm135_vm0, %v119_v30, 0.0  ;;  %v124_v30 = vld [vmem:[%s10972_s0 + $0x388] sm:$0xff] }
  0xd3   :  { %452 = vadd.xlane.f32.xlu1 %v451_v62  ;;  %449 = vadd.xlane.f32.xlu0 %v448_v54 }
  0xd4   :  { %v5781_v15 = vpop.xlane.xlu1 %248  ;;  %v5783_v47 = vpop.xlane.xlu0 %245 }
  0xd5   :  { %11266 = vst [vmem:[#allocation62_spill] sm:$0xff] %v5781_v15  ;;  %11267 = vst [vmem:[#allocation63_spill] sm:$0xff] %v5783_v47  ;;  %v463_v47 = vsel %vm135_vm0, %v120_v14, 0.0  ;;  %v121_v15 = vld [vmem:[%s10972_s0 + $0x370] sm:$0xff] }
  0xd6   :  { %v466_v14 = vsel %vm135_vm0, %v121_v15, 0.0  ;;  %v126_v15 = vld [vmem:[%s10972_s0 + $0x398] sm:$0xff] }
  0xd7   :  { %458 = vadd.xlane.f32.xlu1 %v457_v63  ;;  %455 = vadd.xlane.f32.xlu0 %v454_v46 }
  0xd8   :  { %v5793_v62 = vpop.xlane.xlu1 %254  ;;  %v5795_v54 = vpop.xlane.xlu0 %251 }
  0xd9   :  { %11268 = vst [vmem:[#allocation64_spill] sm:$0xff] %v5793_v62  ;;  %11269 = vst [vmem:[#allocation65_spill] sm:$0xff] %v5795_v54  ;;  %v469_v54 = vsel %vm135_vm0, %v122_v31, 0.0  ;;  %v123_v62 = vld [vmem:[%s10972_s0 + $0x380] sm:$0xff] }
  0xda   :  { %v472_v31 = vsel %vm135_vm0, %v123_v62, 0.0  ;;  %v128_v62 = vld [vmem:[%s10972_s0 + $0x3a8] sm:$0xff] }
  0xdb   :  { %464 = vadd.xlane.f32.xlu1 %v463_v47  ;;  %461 = vadd.xlane.f32.xlu0 %v460_v55 }
  0xdc   :  { %v5805_v63 = vpop.xlane.xlu1 %260  ;;  %v5807_v46 = vpop.xlane.xlu0 %257 }
  0xdd   :  { %11270 = vst [vmem:[#allocation66_spill] sm:$0xff] %v5805_v63  ;;  %11271 = vst [vmem:[#allocation67_spill] sm:$0xff] %v5807_v46  ;;  %v475_v46 = vsel %vm135_vm0, %v124_v30, 0.0  ;;  %v125_v63 = vld [vmem:[%s10972_s0 + $0x390] sm:$0xff] }
  0xde   :  { %v478_v30 = vsel %vm135_vm0, %v125_v63, 0.0  ;;  %v130_v63 = vld [vmem:[%s10972_s0 + $0x3b8] sm:$0xff] }
  0xdf   :  { %470 = vadd.xlane.f32.xlu1 %v469_v54  ;;  %467 = vadd.xlane.f32.xlu0 %v466_v14 }
  0xe0   :  { %v5817_v47 = vpop.xlane.xlu1 %266  ;;  %v5819_v55 = vpop.xlane.xlu0 %263 }
  0xe1   :  { %11272 = vst [vmem:[#allocation68_spill] sm:$0xff] %v5817_v47  ;;  %11273 = vst [vmem:[#allocation69_spill] sm:$0xff] %v5819_v55  ;;  %v481_v55 = vsel %vm135_vm0, %v126_v15, 0.0  ;;  %v127_v47 = vld [vmem:[%s10972_s0 + $0x3a0] sm:$0xff] }
  0xe2   :  { %v484_v15 = vsel %vm135_vm0, %v127_v47, 0.0  ;;  %v132_v47 = vld [vmem:[%s10972_s0 + $0x3c8] sm:$0xff] }
  0xe3   :  { %476 = vadd.xlane.f32.xlu1 %v475_v46  ;;  %473 = vadd.xlane.f32.xlu0 %v472_v31 }
  0xe4   :  { %v5829_v54 = vpop.xlane.xlu1 %272  ;;  %v5831_v14 = vpop.xlane.xlu0 %269 }
  0xe5   :  { %11274 = vst [vmem:[#allocation70_spill] sm:$0xff] %v5829_v54  ;;  %11275 = vst [vmem:[#allocation71_spill] sm:$0xff] %v5831_v14  ;;  %v487_v14 = vsel %vm135_vm0, %v128_v62, 0.0  ;;  %v129_v54 = vld [vmem:[%s10972_s0 + $0x3b0] sm:$0xff] }
  0xe6   :  { %v490_v62 = vsel %vm135_vm0, %v129_v54, 0.0  ;;  %v134_v54 = vld [vmem:[%s10972_s0 + $0x3d8] sm:$0xff] }
  0xe7   :  { %482 = vadd.xlane.f32.xlu1 %v481_v55  ;;  %479 = vadd.xlane.f32.xlu0 %v478_v30 }
  0xe8   :  { %v5841_v46 = vpop.xlane.xlu1 %278  ;;  %v5843_v31 = vpop.xlane.xlu0 %275 }
  0xe9   :  { %11276 = vst [vmem:[#allocation72_spill] sm:$0xff] %v5841_v46  ;;  %11277 = vst [vmem:[#allocation73_spill] sm:$0xff] %v5843_v31  ;;  %v493_v31 = vsel %vm135_vm0, %v130_v63, 0.0  ;;  %v131_v46 = vld [vmem:[%s10972_s0 + $0x3c0] sm:$0xff] }
  0xea   :  { %v496_v63 = vsel %vm135_vm0, %v131_v46, 0.0  ;;  %v509_v46 = vmul.f32 %v5070_v5, %v5070_v5 }
  0xeb   :  { %488 = vadd.xlane.f32.xlu1 %v487_v14  ;;  %485 = vadd.xlane.f32.xlu0 %v484_v15 }
  0xec   :  { %v5853_v55 = vpop.xlane.xlu1 %284  ;;  %v5855_v30 = vpop.xlane.xlu0 %281 }
  0xed   :  { %11278 = vst [vmem:[#allocation74_spill] sm:$0xff] %v5853_v55  ;;  %11279 = vst [vmem:[#allocation75_spill] sm:$0xff] %v5855_v30  ;;  %v499_v30 = vsel %vm135_vm0, %v132_v47, 0.0  ;;  %v133_v55 = vld [vmem:[%s10972_s0 + $0x3d0] sm:$0xff] }
  0xee   :  { %v502_v47 = vsel %vm135_vm0, %v133_v55, 0.0  ;;  %v510_v55 = vmul.f32 %v5051_v0, %v5051_v0 }
  0xef   :  { %494 = vadd.xlane.f32.xlu1 %v493_v31  ;;  %491 = vadd.xlane.f32.xlu0 %v490_v62 }
  0xf0   :  { %v5865_v14 = vpop.xlane.xlu1 %290  ;;  %v5867_v15 = vpop.xlane.xlu0 %287 }
  0xf1   :  { %11280 = vst [vmem:[#allocation76_spill] sm:$0xff] %v5865_v14  ;;  %11281 = vst [vmem:[#allocation77_spill] sm:$0xff] %v5867_v15  ;;  %v505_v15 = vsel %vm135_vm0, %v134_v54, 0.0  ;;  %v508_v14 = vmul.f32 %v5056_v1, %v5056_v1  ;;  %v511_v54 = vmul.f32 %v5061_v2, %v5061_v2 }
  0xf3   :  { %500 = vadd.xlane.f32.xlu1 %v499_v30  ;;  %497 = vadd.xlane.f32.xlu0 %v496_v63  ;;  %v635_v63 = vsel %vm135_vm0, %v509_v46, 0.0  ;;  %v513_v46 = vmul.f32 %v5079_v8, %v5079_v8 }
  0xf4   :  { %v5877_v31 = vpop.xlane.xlu1 %296  ;;  %v5879_v62 = vpop.xlane.xlu0 %293 }
  0xf5   :  { %11282 = vst [vmem:[#allocation78_spill] sm:$0xff] %v5879_v62  ;;  %v632_v62 = vsel %vm135_vm0, %v508_v14, 0.0  ;;  %v512_v14 = vmul.f32 %v5084_v9, %v5084_v9 }
  0xf7   :  { %506 = vadd.xlane.f32.xlu1 %v505_v15  ;;  %503 = vadd.xlane.f32.xlu0 %v502_v47  ;;  %v641_v15 = vsel %vm135_vm0, %v511_v54, 0.0  ;;  %v638_v47 = vsel %vm135_vm0, %v510_v55, 0.0  ;;  %v515_v54 = vmul.f32 %v5093_v12, %v5093_v12  ;;  %v514_v55 = vmul.f32 %v5098_v13, %v5098_v13 }
  0xf8   :  { %v5887_v39 = vpop.xlane.xlu1 %302  ;;  %v5889_v30 = vpop.xlane.xlu0 %299 }
  0xfb   :  { %636 = vadd.xlane.f32.xlu1 %v635_v63  ;;  %633 = vadd.xlane.f32.xlu0 %v632_v62  ;;  %v647_v62 = vsel %vm135_vm0, %v513_v46, 0.0  ;;  %v644_v63 = vsel %vm135_vm0, %v512_v14, 0.0  ;;  %v517_v46 = vmul.f32 %v5107_v16, %v5107_v16  ;;  %v516_v14 = vmul.f32 %v5112_v17, %v5112_v17 }
  0xfc   :  { %v5897_v5 = vpop.xlane.xlu1 %308  ;;  %v5899_v1 = vpop.xlane.xlu0 %305 }
  0xff   :  { %642 = vadd.xlane.f32.xlu1 %v641_v15  ;;  %639 = vadd.xlane.f32.xlu0 %v638_v47  ;;  %v653_v15 = vsel %vm135_vm0, %v515_v54, 0.0  ;;  %v650_v47 = vsel %vm135_vm0, %v514_v55, 0.0  ;;  %v519_v54 = vmul.f32 %v5121_v20, %v5121_v20  ;;  %v518_v55 = vmul.f32 %v5126_v21, %v5126_v21 }
 0x100   :  { %v5907_v2 = vpop.xlane.xlu1 %314  ;;  %v5909_v0 = vpop.xlane.xlu0 %311 }
 0x103   :  { %648 = vadd.xlane.f32.xlu1 %v647_v62  ;;  %645 = vadd.xlane.f32.xlu0 %v644_v63  ;;  %v659_v62 = vsel %vm135_vm0, %v517_v46, 0.0  ;;  %v656_v63 = vsel %vm135_vm0, %v516_v14, 0.0  ;;  %v521_v46 = vmul.f32 %v5135_v24, %v5135_v24  ;;  %v520_v14 = vmul.f32 %v5140_v25, %v5140_v25 }
 0x104   :  { %v5917_v8 = vpop.xlane.xlu1 %320  ;;  %v5919_v9 = vpop.xlane.xlu0 %317 }
 0x107   :  { %654 = vadd.xlane.f32.xlu1 %v653_v15  ;;  %651 = vadd.xlane.f32.xlu0 %v650_v47  ;;  %v665_v15 = vsel %vm135_vm0, %v519_v54, 0.0  ;;  %v662_v47 = vsel %vm135_vm0, %v518_v55, 0.0  ;;  %v523_v54 = vmul.f32 %v5149_v28, %v5149_v28  ;;  %v522_v55 = vmul.f32 %v5154_v29, %v5154_v29 }
 0x108   :  { %v5927_v12 = vpop.xlane.xlu1 %326  ;;  %v5929_v13 = vpop.xlane.xlu0 %323 }
 0x10b   :  { %660 = vadd.xlane.f32.xlu1 %v659_v62  ;;  %657 = vadd.xlane.f32.xlu0 %v656_v63  ;;  %v671_v62 = vsel %vm135_vm0, %v521_v46, 0.0  ;;  %v668_v63 = vsel %vm135_vm0, %v520_v14, 0.0  ;;  %v525_v46 = vmul.f32 %v5163_v32, %v5163_v32  ;;  %v524_v14 = vmul.f32 %v5168_v33, %v5168_v33 }
 0x10c   :  { %v5937_v16 = vpop.xlane.xlu1 %332  ;;  %v5939_v17 = vpop.xlane.xlu0 %329 }
 0x10f   :  { %666 = vadd.xlane.f32.xlu1 %v665_v15  ;;  %663 = vadd.xlane.f32.xlu0 %v662_v47  ;;  %v677_v15 = vsel %vm135_vm0, %v523_v54, 0.0  ;;  %v674_v47 = vsel %vm135_vm0, %v522_v55, 0.0  ;;  %v527_v54 = vmul.f32 %v5177_v36, %v5177_v36  ;;  %v526_v55 = vmul.f32 %v5182_v37, %v5182_v37 }
 0x110   :  { %v5947_v20 = vpop.xlane.xlu1 %338  ;;  %v5949_v21 = vpop.xlane.xlu0 %335 }
 0x111   :  { %11283 = vst [vmem:[#allocation79_spill] sm:$0xff] %v5947_v20  ;;  %11284 = vst [vmem:[#allocation80_spill] sm:$0xff] %v5949_v21 }
 0x113   :  { %672 = vadd.xlane.f32.xlu1 %v671_v62  ;;  %669 = vadd.xlane.f32.xlu0 %v668_v63  ;;  %v683_v62 = vsel %vm135_vm0, %v525_v46, 0.0  ;;  %v680_v63 = vsel %vm135_vm0, %v524_v14, 0.0  ;;  %v529_v46 = vmul.f32 %v5191_v40, %v5191_v40  ;;  %v528_v14 = vmul.f32 %v5196_v41, %v5196_v41 }
 0x114   :  { %v5957_v24 = vpop.xlane.xlu1 %344  ;;  %v5959_v25 = vpop.xlane.xlu0 %341 }
 0x115   :  { %11285 = vst [vmem:[#allocation81_spill] sm:$0xff] %v5957_v24  ;;  %11286 = vst [vmem:[#allocation82_spill] sm:$0xff] %v5959_v25 }
 0x117   :  { %678 = vadd.xlane.f32.xlu1 %v677_v15  ;;  %675 = vadd.xlane.f32.xlu0 %v674_v47  ;;  %v689_v15 = vsel %vm135_vm0, %v527_v54, 0.0  ;;  %v686_v47 = vsel %vm135_vm0, %v526_v55, 0.0  ;;  %v531_v54 = vmul.f32 %v5205_v44, %v5205_v44  ;;  %v530_v55 = vmul.f32 %v5210_v45, %v5210_v45 }
 0x118   :  { %v5967_v28 = vpop.xlane.xlu1 %350  ;;  %v5969_v29 = vpop.xlane.xlu0 %347 }
 0x119   :  { %11287 = vst [vmem:[#allocation83_spill] sm:$0xff] %v5967_v28  ;;  %11288 = vst [vmem:[#allocation84_spill] sm:$0xff] %v5969_v29 }
 0x11b   :  { %684 = vadd.xlane.f32.xlu1 %v683_v62  ;;  %681 = vadd.xlane.f32.xlu0 %v680_v63  ;;  %v695_v62 = vsel %vm135_vm0, %v529_v46, 0.0  ;;  %v692_v63 = vsel %vm135_vm0, %v528_v14, 0.0  ;;  %v533_v46 = vmul.f32 %v5219_v48, %v5219_v48  ;;  %v532_v14 = vmul.f32 %v5224_v49, %v5224_v49 }
 0x11c   :  { %v5977_v32 = vpop.xlane.xlu1 %356  ;;  %v5979_v33 = vpop.xlane.xlu0 %353 }
 0x11d   :  { %11289 = vst [vmem:[#allocation85_spill] sm:$0xff] %v5977_v32  ;;  %11290 = vst [vmem:[#allocation86_spill] sm:$0xff] %v5979_v33 }
 0x11f   :  { %690 = vadd.xlane.f32.xlu1 %v689_v15  ;;  %687 = vadd.xlane.f32.xlu0 %v686_v47  ;;  %v701_v15 = vsel %vm135_vm0, %v531_v54, 0.0  ;;  %v698_v47 = vsel %vm135_vm0, %v530_v55, 0.0  ;;  %v535_v54 = vmul.f32 %v5233_v52, %v5233_v52  ;;  %v534_v55 = vmul.f32 %v5238_v53, %v5238_v53 }
 0x120   :  { %v5987_v36 = vpop.xlane.xlu1 %362  ;;  %v5989_v37 = vpop.xlane.xlu0 %359 }
 0x121   :  { %11291 = vst [vmem:[#allocation87_spill] sm:$0xff] %v5987_v36  ;;  %11292 = vst [vmem:[#allocation88_spill] sm:$0xff] %v5989_v37 }
 0x123   :  { %696 = vadd.xlane.f32.xlu1 %v695_v62  ;;  %693 = vadd.xlane.f32.xlu0 %v692_v63  ;;  %v707_v62 = vsel %vm135_vm0, %v533_v46, 0.0  ;;  %v704_v63 = vsel %vm135_vm0, %v532_v14, 0.0  ;;  %v537_v46 = vmul.f32 %v5247_v56, %v5247_v56  ;;  %v536_v14 = vmul.f32 %v5252_v57, %v5252_v57 }
 0x124   :  { %v5997_v40 = vpop.xlane.xlu1 %368  ;;  %v5999_v41 = vpop.xlane.xlu0 %365 }
 0x125   :  { %11293 = vst [vmem:[#allocation89_spill] sm:$0xff] %v5997_v40  ;;  %11294 = vst [vmem:[#allocation90_spill] sm:$0xff] %v5999_v41 }
 0x127   :  { %702 = vadd.xlane.f32.xlu1 %v701_v15  ;;  %699 = vadd.xlane.f32.xlu0 %v698_v47  ;;  %v713_v15 = vsel %vm135_vm0, %v535_v54, 0.0  ;;  %v710_v47 = vsel %vm135_vm0, %v534_v55, 0.0  ;;  %v539_v54 = vmul.f32 %v5261_v60, %v5261_v60  ;;  %v538_v55 = vmul.f32 %v5266_v61, %v5266_v61 }
 0x128   :  { %v6007_v44 = vpop.xlane.xlu1 %374  ;;  %v6009_v45 = vpop.xlane.xlu0 %371 }
 0x129   :  { %11295 = vst [vmem:[#allocation91_spill] sm:$0xff] %v6007_v44  ;;  %11296 = vst [vmem:[#allocation92_spill] sm:$0xff] %v6009_v45 }
 0x12b   :  { %708 = vadd.xlane.f32.xlu1 %v707_v62  ;;  %705 = vadd.xlane.f32.xlu0 %v704_v63  ;;  %v719_v62 = vsel %vm135_vm0, %v537_v46, 0.0  ;;  %v716_v63 = vsel %vm135_vm0, %v536_v14, 0.0  ;;  %v541_v46 = vmul.f32 %v5275_v3, %v5275_v3  ;;  %v540_v14 = vmul.f32 %v5280_v4, %v5280_v4 }
 0x12c   :  { %v6017_v48 = vpop.xlane.xlu1 %380  ;;  %v6019_v49 = vpop.xlane.xlu0 %377 }
 0x12d   :  { %11297 = vst [vmem:[#allocation93_spill] sm:$0xff] %v6017_v48  ;;  %11298 = vst [vmem:[#allocation94_spill] sm:$0xff] %v6019_v49 }
 0x12f   :  { %714 = vadd.xlane.f32.xlu1 %v713_v15  ;;  %711 = vadd.xlane.f32.xlu0 %v710_v47  ;;  %v725_v15 = vsel %vm135_vm0, %v539_v54, 0.0  ;;  %v722_v47 = vsel %vm135_vm0, %v538_v55, 0.0  ;;  %v543_v54 = vmul.f32 %v5289_v10, %v5289_v10  ;;  %v542_v55 = vmul.f32 %v5294_v11, %v5294_v11 }
 0x130   :  { %v6027_v52 = vpop.xlane.xlu1 %386  ;;  %v6029_v53 = vpop.xlane.xlu0 %383 }
 0x131   :  { %11299 = vst [vmem:[#allocation95_spill] sm:$0xff] %v6027_v52  ;;  %11300 = vst [vmem:[#allocation96_spill] sm:$0xff] %v6029_v53  ;;  %v11382_v52 = vld [vmem:[#allocation35_spill] sm:$0xff] }
 0x132   :  { %v6352_v49 = vmul.f32 0.020408163, %v11382_v52 }
 0x133   :  { %720 = vadd.xlane.f32.xlu1 %v719_v62  ;;  %717 = vadd.xlane.f32.xlu0 %v716_v63  ;;  %v731_v62 = vsel %vm135_vm0, %v541_v46, 0.0  ;;  %v728_v63 = vsel %vm135_vm0, %v540_v14, 0.0  ;;  %v545_v46 = vmul.f32 %v5303_v18, %v5303_v18  ;;  %v544_v14 = vmul.f32 %v5308_v19, %v5308_v19 }
 0x134   :  { %v6037_v56 = vpop.xlane.xlu1 %392  ;;  %v6039_v57 = vpop.xlane.xlu0 %389 }
 0x135   :  { %11301 = vst [vmem:[#allocation97_spill] sm:$0xff] %v6037_v56  ;;  %11302 = vst [vmem:[#allocation98_spill] sm:$0xff] %v6039_v57 }
 0x137   :  { %726 = vadd.xlane.f32.xlu1 %v725_v15  ;;  %723 = vadd.xlane.f32.xlu0 %v722_v47  ;;  %v737_v15 = vsel %vm135_vm0, %v543_v54, 0.0  ;;  %v734_v47 = vsel %vm135_vm0, %v542_v55, 0.0  ;;  %v547_v54 = vmul.f32 %v5317_v26, %v5317_v26  ;;  %v546_v55 = vmul.f32 %v5322_v27, %v5322_v27 }
 0x138   :  { %v6047_v60 = vpop.xlane.xlu1 %398  ;;  %v6049_v61 = vpop.xlane.xlu0 %395 }
 0x139   :  { %11303 = vst [vmem:[#allocation99_spill] sm:$0xff] %v6047_v60  ;;  %11304 = vst [vmem:[#allocation100_spill] sm:$0xff] %v6049_v61 }
 0x13b   :  { %732 = vadd.xlane.f32.xlu1 %v731_v62  ;;  %729 = vadd.xlane.f32.xlu0 %v728_v63  ;;  %v743_v62 = vsel %vm135_vm0, %v545_v46, 0.0  ;;  %v740_v63 = vsel %vm135_vm0, %v544_v14, 0.0  ;;  %v549_v46 = vmul.f32 %v5331_v34, %v5331_v34  ;;  %v548_v14 = vmul.f32 %v5336_v35, %v5336_v35 }
 0x13c   :  { %v6057_v3 = vpop.xlane.xlu1 %404  ;;  %v6059_v4 = vpop.xlane.xlu0 %401 }
 0x13d   :  { %11305 = vst [vmem:[#allocation101_spill] sm:$0xff] %v6057_v3  ;;  %11306 = vst [vmem:[#allocation102_spill] sm:$0xff] %v6059_v4 }
 0x13f   :  { %738 = vadd.xlane.f32.xlu1 %v737_v15  ;;  %735 = vadd.xlane.f32.xlu0 %v734_v47  ;;  %v749_v15 = vsel %vm135_vm0, %v547_v54, 0.0  ;;  %v746_v47 = vsel %vm135_vm0, %v546_v55, 0.0  ;;  %v551_v54 = vmul.f32 %v5345_v42, %v5345_v42  ;;  %v550_v55 = vmul.f32 %v5350_v43, %v5350_v43 }
 0x140   :  { %v6067_v10 = vpop.xlane.xlu1 %410  ;;  %v6069_v11 = vpop.xlane.xlu0 %407 }
 0x141   :  { %11307 = vst [vmem:[#allocation103_spill] sm:$0xff] %v6067_v10  ;;  %11308 = vst [vmem:[#allocation104_spill] sm:$0xff] %v6069_v11 }
 0x143   :  { %744 = vadd.xlane.f32.xlu1 %v743_v62  ;;  %741 = vadd.xlane.f32.xlu0 %v740_v63  ;;  %v755_v62 = vsel %vm135_vm0, %v549_v46, 0.0  ;;  %v752_v63 = vsel %vm135_vm0, %v548_v14, 0.0  ;;  %v553_v46 = vmul.f32 %v5359_v50, %v5359_v50  ;;  %v552_v14 = vmul.f32 %v5364_v51, %v5364_v51 }
 0x144   :  { %v6077_v18 = vpop.xlane.xlu1 %416  ;;  %v6079_v19 = vpop.xlane.xlu0 %413 }
 0x145   :  { %11309 = vst [vmem:[#allocation105_spill] sm:$0xff] %v6077_v18  ;;  %11310 = vst [vmem:[#allocation106_spill] sm:$0xff] %v6079_v19  ;;  %v11371_v19 = vld [vmem:[#allocation29_spill] sm:$0xff] }
 0x147   :  { %750 = vadd.xlane.f32.xlu1 %v749_v15  ;;  %747 = vadd.xlane.f32.xlu0 %v746_v47  ;;  %v761_v15 = vsel %vm135_vm0, %v551_v54, 0.0  ;;  %v758_v47 = vsel %vm135_vm0, %v550_v55, 0.0  ;;  %v555_v54 = vmul.f32 %v5373_v58, %v5373_v58  ;;  %v554_v55 = vmul.f32 %v5378_v59, %v5378_v59 }
 0x148   :  { %v6087_v26 = vpop.xlane.xlu1 %422  ;;  %v6089_v27 = vpop.xlane.xlu0 %419 }
 0x149   :  { %11311 = vst [vmem:[#allocation107_spill] sm:$0xff] %v6087_v26  ;;  %11312 = vst [vmem:[#allocation108_spill] sm:$0xff] %v6089_v27  ;;  %v11370_v27 = vld [vmem:[#allocation28_spill] sm:$0xff] }
 0x14a   :  { %v582_v26 = vmul.f32 %v11370_v27, %v11370_v27 }
 0x14b   :  { %756 = vadd.xlane.f32.xlu1 %v755_v62  ;;  %753 = vadd.xlane.f32.xlu0 %v752_v63  ;;  %v767_v62 = vsel %vm135_vm0, %v553_v46, 0.0  ;;  %v764_v63 = vsel %vm135_vm0, %v552_v14, 0.0  ;;  %v557_v46 = vmul.f32 %v5387_v6, %v5387_v6  ;;  %v556_v14 = vmul.f32 %v5392_v7, %v5392_v7 }
 0x14c   :  { %v6097_v34 = vpop.xlane.xlu1 %428  ;;  %v6099_v35 = vpop.xlane.xlu0 %425 }
 0x14d   :  { %11313 = vst [vmem:[#allocation109_spill] sm:$0xff] %v6097_v34  ;;  %11314 = vst [vmem:[#allocation110_spill] sm:$0xff] %v6099_v35 }
 0x14f   :  { %762 = vadd.xlane.f32.xlu1 %v761_v15  ;;  %759 = vadd.xlane.f32.xlu0 %v758_v47  ;;  %v773_v15 = vsel %vm135_vm0, %v555_v54, 0.0  ;;  %v770_v47 = vsel %vm135_vm0, %v554_v55, 0.0  ;;  %v559_v54 = vmul.f32 %v5401_v22, %v5401_v22  ;;  %v558_v55 = vmul.f32 %v5406_v23, %v5406_v23 }
 0x150   :  { %v6107_v42 = vpop.xlane.xlu1 %434  ;;  %v6109_v43 = vpop.xlane.xlu0 %431 }
 0x151   :  { %11315 = vst [vmem:[#allocation111_spill] sm:$0xff] %v6107_v42  ;;  %11316 = vst [vmem:[#allocation112_spill] sm:$0xff] %v6109_v43 }
 0x153   :  { %768 = vadd.xlane.f32.xlu1 %v767_v62  ;;  %765 = vadd.xlane.f32.xlu0 %v764_v63  ;;  %v779_v62 = vsel %vm135_vm0, %v557_v46, 0.0  ;;  %v776_v63 = vsel %vm135_vm0, %v556_v14, 0.0  ;;  %v561_v46 = vmul.f32 %v5415_v38, %v5415_v38  ;;  %v11323_v14 = vld [vmem:[#allocation2_spill] sm:$0xff] }
 0x154   :  { %v6117_v50 = vpop.xlane.xlu1 %440  ;;  %v6119_v51 = vpop.xlane.xlu0 %437 }
 0x155   :  { %11317 = vst [vmem:[#allocation113_spill] sm:$0xff] %v6117_v50  ;;  %11318 = vst [vmem:[#allocation114_spill] sm:$0xff] %v6119_v51 }
 0x157   :  { %774 = vadd.xlane.f32.xlu1 %v773_v15  ;;  %771 = vadd.xlane.f32.xlu0 %v770_v47  ;;  %v785_v15 = vsel %vm135_vm0, %v559_v54, 0.0  ;;  %v782_v47 = vsel %vm135_vm0, %v558_v55, 0.0  ;;  %v11327_v55 = vld [vmem:[#allocation4_spill] sm:$0xff] }
 0x158   :  { %v6127_v58 = vpop.xlane.xlu1 %446  ;;  %v6129_v59 = vpop.xlane.xlu0 %443 }
 0x159   :  { %11319 = vst [vmem:[#allocation115_spill] sm:$0xff] %v6127_v58  ;;  %11320 = vst [vmem:[#allocation116_spill] sm:$0xff] %v6129_v59  ;;  %v560_v59 = vmul.f32 %v11323_v14, %v11323_v14 }
 0x15b   :  { %780 = vadd.xlane.f32.xlu1 %v779_v62  ;;  %777 = vadd.xlane.f32.xlu0 %v776_v63  ;;  %v791_v62 = vsel %vm135_vm0, %v561_v46, 0.0  ;;  %v788_v63 = vsel %vm135_vm0, %v560_v59, 0.0  ;;  %v11331_v59 = vld [vmem:[#allocation6_spill] sm:$0xff] }
 0x15c   :  { %v6137_v6 = vpop.xlane.xlu1 %452  ;;  %v6139_v7 = vpop.xlane.xlu0 %449 }
 0x15d   :  { %11321 = vst [vmem:[#allocation117_spill] sm:$0xff] %v6137_v6  ;;  %11322 = vst [vmem:[#allocation118_spill] sm:$0xff] %v6139_v7  ;;  %v11326_v7 = vld [vmem:[#allocation3_spill] sm:$0xff]  ;;  %v562_v6 = vmul.f32 %v11327_v55, %v11327_v55 }
 0x15e   :  { %v563_v54 = vmul.f32 %v11326_v7, %v11326_v7 }
 0x15f   :  { %786 = vadd.xlane.f32.xlu1 %v785_v15  ;;  %783 = vadd.xlane.f32.xlu0 %v782_v47  ;;  %v794_v14 = vsel %vm135_vm0, %v562_v6, 0.0  ;;  %v11335_v6 = vld [vmem:[#allocation8_spill] sm:$0xff] }
 0x160   :  { %v6147_v22 = vpop.xlane.xlu1 %458  ;;  %v6149_v23 = vpop.xlane.xlu0 %455  ;;  %v797_v47 = vsel %vm135_vm0, %v563_v54, 0.0 }
 0x161   :  { %11324 = vst [vmem:[#allocation2_spill] sm:$0xff] %v6147_v22  ;;  %11325 = vst [vmem:[#allocation119_spill] sm:$0xff] %v6149_v23  ;;  %v11330_v23 = vld [vmem:[#allocation5_spill] sm:$0xff]  ;;  %v564_v22 = vmul.f32 %v11331_v59, %v11331_v59 }
 0x162   :  { %v565_v46 = vmul.f32 %v11330_v23, %v11330_v23 }
 0x163   :  { %792 = vadd.xlane.f32.xlu1 %v791_v62  ;;  %789 = vadd.xlane.f32.xlu0 %v788_v63  ;;  %v800_v55 = vsel %vm135_vm0, %v564_v22, 0.0  ;;  %v11339_v22 = vld [vmem:[#allocation10_spill] sm:$0xff] }
 0x164   :  { %v6157_v38 = vpop.xlane.xlu1 %464  ;;  %v6159_v15 = vpop.xlane.xlu0 %461  ;;  %v803_v63 = vsel %vm135_vm0, %v565_v46, 0.0 }
 0x165   :  { %11328 = vst [vmem:[#allocation3_spill] sm:$0xff] %v6157_v38  ;;  %11329 = vst [vmem:[#allocation4_spill] sm:$0xff] %v6159_v15  ;;  %v11334_v15 = vld [vmem:[#allocation7_spill] sm:$0xff]  ;;  %v566_v38 = vmul.f32 %v11335_v6, %v11335_v6 }
 0x166   :  { %v567_v54 = vmul.f32 %v11334_v15, %v11334_v15 }
 0x167   :  { %798 = vadd.xlane.f32.xlu1 %v797_v47  ;;  %795 = vadd.xlane.f32.xlu0 %v794_v14  ;;  %v806_v59 = vsel %vm135_vm0, %v566_v38, 0.0  ;;  %v11343_v38 = vld [vmem:[#allocation12_spill] sm:$0xff] }
 0x168   :  { %v6167_v7 = vpop.xlane.xlu1 %470  ;;  %v6169_v62 = vpop.xlane.xlu0 %467  ;;  %v809_v14 = vsel %vm135_vm0, %v567_v54, 0.0 }
 0x169   :  { %11332 = vst [vmem:[#allocation5_spill] sm:$0xff] %v6167_v7  ;;  %11333 = vst [vmem:[#allocation6_spill] sm:$0xff] %v6169_v62  ;;  %v11338_v62 = vld [vmem:[#allocation9_spill] sm:$0xff]  ;;  %v568_v7 = vmul.f32 %v11339_v22, %v11339_v22 }
 0x16a   :  { %v569_v46 = vmul.f32 %v11338_v62, %v11338_v62 }
 0x16b   :  { %804 = vadd.xlane.f32.xlu1 %v803_v63  ;;  %801 = vadd.xlane.f32.xlu0 %v800_v55  ;;  %v812_v6 = vsel %vm135_vm0, %v568_v7, 0.0  ;;  %v11347_v7 = vld [vmem:[#allocation14_spill] sm:$0xff] }
 0x16c   :  { %v6177_v23 = vpop.xlane.xlu1 %476  ;;  %v6179_v47 = vpop.xlane.xlu0 %473  ;;  %v815_v55 = vsel %vm135_vm0, %v569_v46, 0.0 }
 0x16d   :  { %11336 = vst [vmem:[#allocation7_spill] sm:$0xff] %v6177_v23  ;;  %11337 = vst [vmem:[#allocation8_spill] sm:$0xff] %v6179_v47  ;;  %v11342_v47 = vld [vmem:[#allocation11_spill] sm:$0xff]  ;;  %v570_v23 = vmul.f32 %v11343_v38, %v11343_v38 }
 0x16e   :  { %v571_v54 = vmul.f32 %v11342_v47, %v11342_v47 }
 0x16f   :  { %810 = vadd.xlane.f32.xlu1 %v809_v14  ;;  %807 = vadd.xlane.f32.xlu0 %v806_v59  ;;  %v818_v22 = vsel %vm135_vm0, %v570_v23, 0.0  ;;  %v11351_v23 = vld [vmem:[#allocation16_spill] sm:$0xff] }
 0x170   :  { %v6187_v15 = vpop.xlane.xlu1 %482  ;;  %v6189_v63 = vpop.xlane.xlu0 %479  ;;  %v821_v59 = vsel %vm135_vm0, %v571_v54, 0.0 }
 0x171   :  { %11340 = vst [vmem:[#allocation9_spill] sm:$0xff] %v6187_v15  ;;  %11341 = vst [vmem:[#allocation10_spill] sm:$0xff] %v6189_v63  ;;  %v11346_v63 = vld [vmem:[#allocation13_spill] sm:$0xff]  ;;  %v572_v15 = vmul.f32 %v11347_v7, %v11347_v7 }
 0x172   :  { %v573_v46 = vmul.f32 %v11346_v63, %v11346_v63 }
 0x173   :  { %816 = vadd.xlane.f32.xlu1 %v815_v55  ;;  %813 = vadd.xlane.f32.xlu0 %v812_v6  ;;  %v824_v38 = vsel %vm135_vm0, %v572_v15, 0.0  ;;  %v11355_v15 = vld [vmem:[#allocation18_spill] sm:$0xff] }
 0x174   :  { %v6197_v62 = vpop.xlane.xlu1 %488  ;;  %v6199_v14 = vpop.xlane.xlu0 %485  ;;  %v827_v6 = vsel %vm135_vm0, %v573_v46, 0.0 }
 0x175   :  { %11344 = vst [vmem:[#allocation11_spill] sm:$0xff] %v6197_v62  ;;  %11345 = vst [vmem:[#allocation12_spill] sm:$0xff] %v6199_v14  ;;  %v11350_v14 = vld [vmem:[#allocation15_spill] sm:$0xff]  ;;  %v574_v62 = vmul.f32 %v11351_v23, %v11351_v23 }
 0x176   :  { %v575_v54 = vmul.f32 %v11350_v14, %v11350_v14  ;;  %v11356_v14 = vld [vmem:[#allocation22_spill] sm:$0xff] }
 0x177   :  { %822 = vadd.xlane.f32.xlu1 %v821_v59  ;;  %819 = vadd.xlane.f32.xlu0 %v818_v22  ;;  %v830_v7 = vsel %vm135_vm0, %v574_v62, 0.0  ;;  %v6228_v58 = vmul.f32 0.020408163, %v11356_v14  ;;  %v11360_v62 = vld [vmem:[#allocation19_spill] sm:$0xff]  ;;  %v11363_v14 = vld [vmem:[#allocation21_spill] sm:$0xff] }
 0x178   :  { %v6207_v47 = vpop.xlane.xlu1 %494  ;;  %v6209_v55 = vpop.xlane.xlu0 %491  ;;  %v833_v22 = vsel %vm135_vm0, %v575_v54, 0.0 }
 0x179   :  { %11348 = vst [vmem:[#allocation13_spill] sm:$0xff] %v6207_v47  ;;  %11349 = vst [vmem:[#allocation14_spill] sm:$0xff] %v6209_v55  ;;  %v11354_v55 = vld [vmem:[#allocation17_spill] sm:$0xff]  ;;  %v576_v47 = vmul.f32 %v11355_v15, %v11355_v15  ;;  %v11362_v15 = vld [vmem:[#allocation26_spill] sm:$0xff] }
 0x17a   :  { %v577_v46 = vmul.f32 %v11354_v55, %v11354_v55  ;;  %11357 = vst [vmem:[#allocation17_spill] sm:$0xff] %v6228_v58  ;;  %v11361_v55 = vld [vmem:[#allocation20_spill] sm:$0xff]  ;;  %v6241_v51 = vmul.f32 0.020408163, %v11362_v15 }
 0x17b   :  { %828 = vadd.xlane.f32.xlu1 %v827_v6  ;;  %825 = vadd.xlane.f32.xlu0 %v824_v38  ;;  %v836_v54 = vsel %vm135_vm0, %v576_v47, 0.0  ;;  %v11366_v15 = vld [vmem:[#allocation24_spill] sm:$0xff] }
 0x17c   :  { %v6217_v63 = vpop.xlane.xlu1 %500  ;;  %v6219_v59 = vpop.xlane.xlu0 %497  ;;  %v839_v23 = vsel %vm135_vm0, %v577_v46, 0.0  ;;  %v580_v50 = vmul.f32 %v11366_v15, %v11366_v15  ;;  %v6261_v42 = vmul.f32 %v6241_v51, %v6241_v51 }
 0x17d   :  { %11352 = vst [vmem:[#allocation15_spill] sm:$0xff] %v6217_v63  ;;  %11353 = vst [vmem:[#allocation16_spill] sm:$0xff] %v6219_v59  ;;  %v579_v59 = vmul.f32 %v11360_v62, %v11360_v62  ;;  %v578_v63 = vmul.f32 %v11361_v55, %v11361_v55 }
 0x17f   :  { %834 = vadd.xlane.f32.xlu1 %v833_v22  ;;  %831 = vadd.xlane.f32.xlu0 %v830_v7  ;;  %v6244_v22 = vmul.f32 0.020408163, %v11363_v14  ;;  %v6248_v7 = vmul.f32 %v6228_v58, %v6228_v58  ;;  %v842_v62 = vsel %vm135_vm0, %v578_v63, 0.0  ;;  %v11367_v14 = vld [vmem:[#allocation25_spill] sm:$0xff] }
 0x180   :  { %v6230_v6 = vpop.xlane.xlu1 %506  ;;  %v6232_v38 = vpop.xlane.xlu0 %503  ;;  %v6257_v43 = vmul.f32 0.020408163, %v11367_v14 }
 0x181   :  { %11358 = vst [vmem:[#allocation18_spill] sm:$0xff] %v6230_v6  ;;  %11359 = vst [vmem:[#allocation22_spill] sm:$0xff] %v6232_v38  ;;  %v845_v6 = vsel %vm135_vm0, %v579_v59, 0.0  ;;  %v11365_v38 = vld [vmem:[#allocation23_spill] sm:$0xff]  ;;  %v6269_v63 = vmul.f32 %v6244_v22, %v6244_v22 }
 0x182   :  { %11364 = vst [vmem:[#allocation19_spill] sm:$0xff] %v6244_v22  ;;  %v581_v55 = vmul.f32 %v11365_v38, %v11365_v38  ;;  %11368 = vst [vmem:[#allocation20_spill] sm:$0xff] %v6257_v43  ;;  %v6283_v59 = vmul.f32 %v6257_v43, %v6257_v43  ;;  %v6286_v38 = vmul.f32 0.020408163, %v11371_v19  ;;  %v11377_v19 = vld [vmem:[#allocation31_spill] sm:$0xff] }
 0x183   :  { %840 = vadd.xlane.f32.xlu1 %v839_v23  ;;  %837 = vadd.xlane.f32.xlu0 %v836_v54  ;;  %v11400_v43 = vld [vmem:[#allocation43_spill] sm:$0xff] }
 0x184   :  { %v637_v46 = vpop.xlane.xlu1 %636  ;;  %v634_v47 = vpop.xlane.xlu0 %633  ;;  %v851_v35 = vsel %vm135_vm0, %v581_v55, 0.0  ;;  %11372 = vst [vmem:[#allocation26_spill] sm:$0xff] %v6286_v38  ;;  %v11373_v55 = vld [vmem:[#allocation30_spill] sm:$0xff]  ;;  %v6311_v27 = vmul.f32 %v6286_v38, %v6286_v38  ;;  %v6472_v25 = vmul.f32 0.020408163, %v11400_v43 }
 0x185   :  { %v6263_v23 = vmul.f32 0.020408163, %v637_v46  ;;  %v6265_v54 = vmul.f32 0.020408163, %v634_v47  ;;  %v848_v46 = vsel %vm135_vm0, %v580_v50, 0.0  ;;  %v11369_v47 = vld [vmem:[#allocation27_spill] sm:$0xff] }
 0x186   :  { %v583_v34 = vmul.f32 %v11369_v47, %v11369_v47  ;;  %v6293_v18 = vmul.f32 0.020408163, %v11373_v55  ;;  %v11375_v50 = vld [vmem:[#allocation32_spill] sm:$0xff]  ;;  %v854_v55 = vsel %vm135_vm0, %v582_v26, 0.0  ;;  %11383 = vst [vmem:[#allocation27_spill] sm:$0xff] %v6352_v49 }
 0x187   :  { %846 = vadd.xlane.f32.xlu1 %v845_v6  ;;  %843 = vadd.xlane.f32.xlu0 %v842_v62  ;;  %v6296_v11 = vmul.f32 0.020408163, %v11375_v50  ;;  %v4735_v50 = vld [vmem:[%s10972_s0 + $0x260] sm:$0xff] }
 0x188   :  { %v643_v15 = vpop.xlane.xlu1 %642  ;;  %v640_v14 = vpop.xlane.xlu0 %639  ;;  %11374 = vst [vmem:[#allocation21_spill] sm:$0xff] %v6293_v18  ;;  %v857_v4 = vsel %vm135_vm0, %v583_v34, 0.0  ;;  %v584_v3 = vmul.f32 %v4735_v50, %v4735_v50  ;;  %v4737_v50 = vld [vmem:[%s10972_s0 + $0x270] sm:$0xff] }
 0x189   :  { %v6288_v6 = vmul.f32 0.020408163, %v643_v15  ;;  %v6290_v62 = vmul.f32 0.020408163, %v640_v14  ;;  %11376 = vst [vmem:[#allocation23_spill] sm:$0xff] %v6296_v11  ;;  %v585_v15 = vmul.f32 %v11377_v19, %v11377_v19  ;;  %v6320_v19 = vmul.f32 %v6293_v18, %v6293_v18 }
 0x18a   :  { %v6326_v26 = vmul.f32 %v6296_v11, %v6296_v11  ;;  %v860_v57 = vsel %vm135_vm0, %v584_v3, 0.0  ;;  %v11390_v11 = vld [vmem:[#allocation39_spill] sm:$0xff] }
 0x18b   :  { %852 = vadd.xlane.f32.xlu1 %v851_v35  ;;  %849 = vadd.xlane.f32.xlu0 %v848_v46  ;;  %v11378_v35 = vld [vmem:[#allocation33_spill] sm:$0xff] }
 0x18c   :  { %v649_v10 = vpop.xlane.xlu1 %648  ;;  %v646_v14 = vpop.xlane.xlu0 %645  ;;  %v6314_v46 = vmul.f32 0.020408163, %v11378_v35  ;;  %v863_v35 = vsel %vm135_vm0, %v585_v15, 0.0 }
 0x18d   :  { %v6316_v47 = vmul.f32 0.020408163, %v649_v10  ;;  %v6322_v34 = vmul.f32 0.020408163, %v646_v14  ;;  %v4736_v14 = vld [vmem:[%s10972_s0 + $0x278] sm:$0xff] }
 0x18e   :  { %11379 = vst [vmem:[#allocation24_spill] sm:$0xff] %v6314_v46  ;;  %v587_v56 = vmul.f32 %v4736_v14, %v4736_v14  ;;  %v6342_v15 = vmul.f32 %v6314_v46, %v6314_v46  ;;  %v11384_v14 = vld [vmem:[#allocation36_spill] sm:$0xff]  ;;  %v6412_v46 = vmul.f32 0.020408163, %v11390_v11 }
 0x18f   :  { %858 = vadd.xlane.f32.xlu1 %v857_v4  ;;  %855 = vadd.xlane.f32.xlu0 %v854_v55  ;;  %v586_v4 = vmul.f32 %v4737_v50, %v4737_v50  ;;  %v11380_v55 = vld [vmem:[#allocation34_spill] sm:$0xff]  ;;  %v6355_v48 = vmul.f32 0.020408163, %v11384_v14 }
 0x190   :  { %v655_v61 = vpop.xlane.xlu1 %654  ;;  %v652_v60 = vpop.xlane.xlu0 %651  ;;  %v6345_v10 = vmul.f32 0.020408163, %v11380_v55  ;;  %v869_v52 = vsel %vm135_vm0, %v587_v56, 0.0  ;;  %v4739_v50 = vld [vmem:[%s10972_s0 + $0x280] sm:$0xff]  ;;  %11391 = vst [vmem:[#allocation32_spill] sm:$0xff] %v6412_v46 }
 0x191   :  { %v6347_v53 = vmul.f32 0.020408163, %v655_v61  ;;  %v6349_v3 = vmul.f32 0.020408163, %v652_v60  ;;  %11385 = vst [vmem:[#allocation28_spill] sm:$0xff] %v6355_v48  ;;  %v4738_v61 = vld [vmem:[%s10972_s0 + $0x288] sm:$0xff]  ;;  %v588_v41 = vmul.f32 %v4739_v50, %v4739_v50 }
 0x192   :  { %11381 = vst [vmem:[#allocation25_spill] sm:$0xff] %v6345_v10  ;;  %v589_v60 = vmul.f32 %v4738_v61, %v4738_v61  ;;  %v866_v14 = vsel %vm135_vm0, %v586_v4, 0.0  ;;  %v6380_v61 = vmul.f32 %v6352_v49, %v6352_v49  ;;  %v6386_v4 = vmul.f32 %v6355_v48, %v6355_v48  ;;  %v4741_v50 = vld [vmem:[%s10972_s0 + $0x290] sm:$0xff] }
 0x193   :  { %864 = vadd.xlane.f32.xlu1 %v863_v35  ;;  %861 = vadd.xlane.f32.xlu0 %v860_v57  ;;  %v6371_v35 = vmul.f32 %v6345_v10, %v6345_v10  ;;  %v11386_v57 = vld [vmem:[#allocation37_spill] sm:$0xff]  ;;  %v872_v36 = vsel %vm135_vm0, %v588_v41, 0.0 }
 0x194   :  { %v661_v55 = vpop.xlane.xlu1 %660  ;;  %v658_v44 = vpop.xlane.xlu0 %657  ;;  %v6374_v45 = vmul.f32 0.020408163, %v11386_v57  ;;  %v875_v57 = vsel %vm135_vm0, %v589_v60, 0.0  ;;  %11401 = vst [vmem:[#allocation37_spill] sm:$0xff] %v6472_v25 }
 0x195   :  { %v6376_v40 = vmul.f32 0.020408163, %v661_v55  ;;  %v6382_v56 = vmul.f32 0.020408163, %v658_v44  ;;  %v4740_v44 = vld [vmem:[%s10972_s0 + $0x298] sm:$0xff] }
 0x196   :  { %11387 = vst [vmem:[#allocation29_spill] sm:$0xff] %v6374_v45  ;;  %v591_v48 = vmul.f32 %v4740_v44, %v4740_v44  ;;  %v6402_v60 = vmul.f32 %v6374_v45, %v6374_v45  ;;  %v11392_v44 = vld [vmem:[#allocation40_spill] sm:$0xff] }
 0x197   :  { %870 = vadd.xlane.f32.xlu1 %v869_v52  ;;  %867 = vadd.xlane.f32.xlu0 %v866_v14  ;;  %v590_v52 = vmul.f32 %v4741_v50, %v4741_v50  ;;  %v11388_v14 = vld [vmem:[#allocation38_spill] sm:$0xff]  ;;  %v6415_v38 = vmul.f32 0.020408163, %v11392_v44 }
 0x198   :  { %v667_v10 = vpop.xlane.xlu1 %666  ;;  %v664_v37 = vpop.xlane.xlu0 %663  ;;  %v6405_v55 = vmul.f32 0.020408163, %v11388_v14  ;;  %v881_v11 = vsel %vm135_vm0, %v591_v48, 0.0  ;;  %v4743_v50 = vld [vmem:[%s10972_s0 + $0x2a0] sm:$0xff] }
 0x199   :  { %v6407_v49 = vmul.f32 0.020408163, %v667_v10  ;;  %v6409_v41 = vmul.f32 0.020408163, %v664_v37  ;;  %11393 = vst [vmem:[#allocation31_spill] sm:$0xff] %v6415_v38  ;;  %v4742_v10 = vld [vmem:[%s10972_s0 + $0x2a8] sm:$0xff]  ;;  %v592_v32 = vmul.f32 %v4743_v50, %v4743_v50 }
 0x19a   :  { %11389 = vst [vmem:[#allocation30_spill] sm:$0xff] %v6405_v55  ;;  %v593_v37 = vmul.f32 %v4742_v10, %v4742_v10  ;;  %v878_v44 = vsel %vm135_vm0, %v590_v52, 0.0  ;;  %v6440_v10 = vmul.f32 %v6412_v46, %v6412_v46  ;;  %v6446_v52 = vmul.f32 %v6415_v38, %v6415_v38  ;;  %v4745_v50 = vld [vmem:[%s10972_s0 + $0x2b0] sm:$0xff] }
 0x19b   :  { %876 = vadd.xlane.f32.xlu1 %v875_v57  ;;  %873 = vadd.xlane.f32.xlu0 %v872_v36  ;;  %v6431_v57 = vmul.f32 %v6405_v55, %v6405_v55  ;;  %v11394_v36 = vld [vmem:[#allocation41_spill] sm:$0xff]  ;;  %v884_v46 = vsel %vm135_vm0, %v592_v32, 0.0 }
 0x19c   :  { %v673_v14 = vpop.xlane.xlu1 %672  ;;  %v670_v33 = vpop.xlane.xlu0 %669  ;;  %v6434_v45 = vmul.f32 0.020408163, %v11394_v36  ;;  %11396 = vst [vmem:[#allocation34_spill] sm:$0xff] %v6446_v52  ;;  %v887_v36 = vsel %vm135_vm0, %v593_v37, 0.0 }
 0x19d   :  { %v6436_v29 = vmul.f32 0.020408163, %v673_v14  ;;  %v6442_v48 = vmul.f32 0.020408163, %v670_v33  ;;  %v4744_v33 = vld [vmem:[%s10972_s0 + $0x2b8] sm:$0xff] }
 0x19e   :  { %11395 = vst [vmem:[#allocation33_spill] sm:$0xff] %v6434_v45  ;;  %v595_v38 = vmul.f32 %v4744_v33, %v4744_v33  ;;  %v6462_v37 = vmul.f32 %v6434_v45, %v6434_v45  ;;  %v11402_v33 = vld [vmem:[#allocation44_spill] sm:$0xff] }
 0x19f   :  { %882 = vadd.xlane.f32.xlu1 %v881_v11  ;;  %879 = vadd.xlane.f32.xlu0 %v878_v44  ;;  %v594_v11 = vmul.f32 %v4745_v50, %v4745_v50  ;;  %v11397_v44 = vld [vmem:[#allocation42_spill] sm:$0xff]  ;;  %v6475_v24 = vmul.f32 0.020408163, %v11402_v33 }
 0x1a0   :  { %v679_v55 = vpop.xlane.xlu1 %678  ;;  %v676_v28 = vpop.xlane.xlu0 %675  ;;  %v6465_v14 = vmul.f32 0.020408163, %v11397_v44  ;;  %v893_v43 = vsel %vm135_vm0, %v595_v38, 0.0  ;;  %v4747_v50 = vld [vmem:[%s10972_s0 + $0x2c0] sm:$0xff] }
 0x1a1   :  { %v6467_v18 = vmul.f32 0.020408163, %v679_v55  ;;  %v6469_v32 = vmul.f32 0.020408163, %v676_v28  ;;  %11403 = vst [vmem:[#allocation38_spill] sm:$0xff] %v6475_v24  ;;  %v4746_v55 = vld [vmem:[%s10972_s0 + $0x2c8] sm:$0xff]  ;;  %v596_v58 = vmul.f32 %v4747_v50, %v4747_v50 }
 0x1a2   :  { %11398 = vst [vmem:[#allocation35_spill] sm:$0xff] %v6465_v14  ;;  %v597_v28 = vmul.f32 %v4746_v55, %v4746_v55  ;;  %v890_v33 = vsel %vm135_vm0, %v594_v11, 0.0  ;;  %v6500_v55 = vmul.f32 %v6472_v25, %v6472_v25  ;;  %v6506_v11 = vmul.f32 %v6475_v24, %v6475_v24  ;;  %v4749_v50 = vld [vmem:[%s10972_s0 + $0x2d0] sm:$0xff] }
 0x1a3   :  { %11399 = vst [vmem:[#allocation36_spill] sm:$0xff] %v6467_v18  ;;  %888 = vadd.xlane.f32.xlu1 %v887_v36  ;;  %885 = vadd.xlane.f32.xlu0 %v884_v46  ;;  %v6491_v36 = vmul.f32 %v6465_v14, %v6465_v14  ;;  %v11405_v46 = vld [vmem:[#allocation45_spill] sm:$0xff]  ;;  %v896_v25 = vsel %vm135_vm0, %v596_v58, 0.0 }
 0x1a4   :  { %v685_v44 = vpop.xlane.xlu1 %684  ;;  %v682_v21 = vpop.xlane.xlu0 %681  ;;  %v6494_v45 = vmul.f32 0.020408163, %v11405_v46  ;;  %11408 = vst [vmem:[#allocation42_spill] sm:$0xff] %v6500_v55  ;;  %11410 = vst [vmem:[#allocation44_spill] sm:$0xff] %v6506_v11  ;;  %v899_v46 = vsel %vm135_vm0, %v597_v28, 0.0 }
 0x1a5   :  { %11404 = vst [vmem:[#allocation39_spill] sm:$0xff] %v6491_v36  ;;  %v6496_v22 = vmul.f32 0.020408163, %v685_v44  ;;  %v6502_v38 = vmul.f32 0.020408163, %v682_v21  ;;  %v4748_v21 = vld [vmem:[%s10972_s0 + $0x2d8] sm:$0xff] }
 0x1a6   :  { %11406 = vst [vmem:[#allocation40_spill] sm:$0xff] %v6494_v45  ;;  %v599_v24 = vmul.f32 %v4748_v21, %v4748_v21  ;;  %v6522_v28 = vmul.f32 %v6494_v45, %v6494_v45  ;;  %v11418_v21 = vld [vmem:[#allocation48_spill] sm:$0xff] }
 0x1a7   :  { %11407 = vst [vmem:[#allocation41_spill] sm:$0xff] %v6496_v22  ;;  %11409 = vst [vmem:[#allocation43_spill] sm:$0xff] %v6502_v38  ;;  %894 = vadd.xlane.f32.xlu1 %v893_v43  ;;  %891 = vadd.xlane.f32.xlu0 %v890_v33  ;;  %v598_v43 = vmul.f32 %v4749_v50, %v4749_v50  ;;  %v11412_v33 = vld [vmem:[#allocation46_spill] sm:$0xff]  ;;  %v11416_v22 = vld [vmem:[#allocation47_spill] sm:$0xff]  ;;  %v6535_v38 = vmul.f32 0.020408163, %v11418_v21 }
 0x1a8   :  { %v691_v14 = vpop.xlane.xlu1 %690  ;;  %v688_v52 = vpop.xlane.xlu0 %687  ;;  %11411 = vst [vmem:[#allocation45_spill] sm:$0xff] %v6522_v28  ;;  %v6525_v44 = vmul.f32 0.020408163, %v11412_v33  ;;  %v6532_v55 = vmul.f32 0.020408163, %v11416_v22  ;;  %v905_v22 = vsel %vm135_vm0, %v599_v24, 0.0 }
 0x1a9   :  { %v6527_v36 = vmul.f32 0.020408163, %v691_v14  ;;  %v6529_v58 = vmul.f32 0.020408163, %v688_v52  ;;  %11419 = vst [vmem:[#allocation48_spill] sm:$0xff] %v6535_v38  ;;  %v4750_v14 = vld [vmem:[%s10972_s0 + $0x2e8] sm:$0xff] }
 0x1aa   :  { %11413 = vst [vmem:[#allocation46_spill] sm:$0xff] %v6525_v44  ;;  %11417 = vst [vmem:[#allocation47_spill] sm:$0xff] %v6532_v55  ;;  %v601_v52 = vmul.f32 %v4750_v14, %v4750_v14  ;;  %v902_v21 = vsel %vm135_vm0, %v598_v43, 0.0  ;;  %v4751_v50 = vld [vmem:[%s10972_s0 + $0x2e0] sm:$0xff]  ;;  %v6560_v14 = vmul.f32 %v6532_v55, %v6532_v55  ;;  %v6566_v43 = vmul.f32 %v6535_v38, %v6535_v38 }
 0x1ab   :  { %11414 = vst [vmem:[#allocation120_spill] sm:$0xff] %v6527_v36  ;;  %11415 = vst [vmem:[#allocation121_spill] sm:$0xff] %v6529_v58  ;;  %900 = vadd.xlane.f32.xlu1 %v899_v46  ;;  %897 = vadd.xlane.f32.xlu0 %v896_v25  ;;  %v600_v11 = vmul.f32 %v4751_v50, %v4751_v50  ;;  %v6551_v46 = vmul.f32 %v6525_v44, %v6525_v44  ;;  %v11421_v25 = vld [vmem:[#allocation49_spill] sm:$0xff]  ;;  %v4753_v50 = vld [vmem:[%s10972_s0 + $0x2f0] sm:$0xff] }
 0x1ac   :  { %v697_v33 = vpop.xlane.xlu1 %696  ;;  %v694_v18 = vpop.xlane.xlu0 %693  ;;  %v6554_v45 = vmul.f32 0.020408163, %v11421_v25  ;;  %11424 = vst [vmem:[#allocation124_spill] sm:$0xff] %v6560_v14  ;;  %11426 = vst [vmem:[#allocation126_spill] sm:$0xff] %v6566_v43  ;;  %v911_v25 = vsel %vm135_vm0, %v601_v52, 0.0  ;;  %v11475_v58 = vld [vmem:[#allocation59_spill] sm:$0xff] }
 0x1ad   :  { %11420 = vst [vmem:[#allocation122_spill] sm:$0xff] %v6551_v46  ;;  %v6556_v36 = vmul.f32 0.020408163, %v697_v33  ;;  %v6562_v24 = vmul.f32 0.020408163, %v694_v18  ;;  %v908_v55 = vsel %vm135_vm0, %v600_v11, 0.0 }
 0x1ae   :  { %11422 = vst [vmem:[#allocation49_spill] sm:$0xff] %v6554_v45  ;;  %v4752_v18 = vld [vmem:[%s10972_s0 + $0x2f8] sm:$0xff]  ;;  %v6582_v52 = vmul.f32 %v6554_v45, %v6554_v45  ;;  %v6783_v20 = vmul.f32 0.020408163, %v11475_v58 }
 0x1af   :  { %11423 = vst [vmem:[#allocation123_spill] sm:$0xff] %v6556_v36  ;;  %11425 = vst [vmem:[#allocation125_spill] sm:$0xff] %v6562_v24  ;;  %906 = vadd.xlane.f32.xlu1 %v905_v22  ;;  %903 = vadd.xlane.f32.xlu0 %v902_v21  ;;  %v603_v38 = vmul.f32 %v4752_v18, %v4752_v18  ;;  %v602_v22 = vmul.f32 %v4753_v50, %v4753_v50  ;;  %v11428_v21 = vld [vmem:[#allocation50_spill] sm:$0xff]  ;;  %v11432_v36 = vld [vmem:[#allocation51_spill] sm:$0xff] }
 0x1b0   :  { %v703_v44 = vpop.xlane.xlu1 %702  ;;  %v700_v28 = vpop.xlane.xlu0 %699  ;;  %11427 = vst [vmem:[#allocation127_spill] sm:$0xff] %v6582_v52  ;;  %v6585_v33 = vmul.f32 0.020408163, %v11428_v21  ;;  %v6592_v14 = vmul.f32 0.020408163, %v11432_v36  ;;  %v4754_v21 = vld [vmem:[%s10972_s0 + $0x308] sm:$0xff] }
 0x1b1   :  { %v6587_v46 = vmul.f32 0.020408163, %v703_v44  ;;  %v6589_v11 = vmul.f32 0.020408163, %v700_v28  ;;  %v605_v45 = vmul.f32 %v4754_v21, %v4754_v21  ;;  %v917_v28 = vsel %vm135_vm0, %v603_v38, 0.0  ;;  %v4755_v18 = vld [vmem:[%s10972_s0 + $0x300] sm:$0xff] }
 0x1b2   :  { %11429 = vst [vmem:[#allocation50_spill] sm:$0xff] %v6585_v33  ;;  %11433 = vst [vmem:[#allocation51_spill] sm:$0xff] %v6592_v14  ;;  %v914_v36 = vsel %vm135_vm0, %v602_v22, 0.0  ;;  %v604_v43 = vmul.f32 %v4755_v18, %v4755_v18  ;;  %v6614_v21 = vmul.f32 %v6592_v14, %v6592_v14 }
 0x1b3   :  { %11430 = vst [vmem:[#allocation128_spill] sm:$0xff] %v6587_v46  ;;  %11431 = vst [vmem:[#allocation129_spill] sm:$0xff] %v6589_v11  ;;  %912 = vadd.xlane.f32.xlu1 %v911_v25  ;;  %909 = vadd.xlane.f32.xlu0 %v908_v55  ;;  %v6608_v25 = vmul.f32 %v6585_v33, %v6585_v33  ;;  %v923_v22 = vsel %vm135_vm0, %v605_v45, 0.0 }
 0x1b4   :  { %v709_v44 = vpop.xlane.xlu1 %708  ;;  %v706_v24 = vpop.xlane.xlu0 %705  ;;  %11436 = vst [vmem:[#allocation132_spill] sm:$0xff] %v6614_v21  ;;  %v920_v46 = vsel %vm135_vm0, %v604_v43, 0.0  ;;  %11476 = vst [vmem:[#allocation59_spill] sm:$0xff] %v6783_v20 }
 0x1b5   :  { %11434 = vst [vmem:[#allocation130_spill] sm:$0xff] %v6608_v25  ;;  %v6610_v55 = vmul.f32 0.020408163, %v709_v44  ;;  %v6616_v50 = vmul.f32 0.020408163, %v706_v24  ;;  %v4756_v24 = vld [vmem:[%s10972_s0 + $0x318] sm:$0xff] }
 0x1b6   :  { %v607_v14 = vmul.f32 %v4756_v24, %v4756_v24  ;;  %v4758_v25 = vld [vmem:[%s10972_s0 + $0x328] sm:$0xff] }
 0x1b7   :  { %11435 = vst [vmem:[#allocation131_spill] sm:$0xff] %v6610_v55  ;;  %11437 = vst [vmem:[#allocation133_spill] sm:$0xff] %v6616_v50  ;;  %918 = vadd.xlane.f32.xlu1 %v917_v28  ;;  %915 = vadd.xlane.f32.xlu0 %v914_v36  ;;  %v4757_v28 = vld [vmem:[%s10972_s0 + $0x310] sm:$0xff]  ;;  %v609_v24 = vmul.f32 %v4758_v25, %v4758_v25  ;;  %v4759_v55 = vld [vmem:[%s10972_s0 + $0x320] sm:$0xff] }
 0x1b8   :  { %v6623_v33 = vpop.xlane.xlu1 %714  ;;  %v6625_v44 = vpop.xlane.xlu0 %711  ;;  %v606_v36 = vmul.f32 %v4757_v28, %v4757_v28  ;;  %v929_v18 = vsel %vm135_vm0, %v607_v14, 0.0  ;;  %v608_v28 = vmul.f32 %v4759_v55, %v4759_v55 }
 0x1b9   :  { %11438 = vst [vmem:[#allocation134_spill] sm:$0xff] %v6623_v33  ;;  %11439 = vst [vmem:[#allocation135_spill] sm:$0xff] %v6625_v44  ;;  %v935_v14 = vsel %vm135_vm0, %v609_v24, 0.0 }
 0x1ba   :  { %v926_v43 = vsel %vm135_vm0, %v606_v36, 0.0  ;;  %v932_v36 = vsel %vm135_vm0, %v608_v28, 0.0 }
 0x1bb   :  { %924 = vadd.xlane.f32.xlu1 %v923_v22  ;;  %921 = vadd.xlane.f32.xlu0 %v920_v46 }
 0x1bc   :  { %v6634_v45 = vpop.xlane.xlu1 %720  ;;  %v6636_v38 = vpop.xlane.xlu0 %717 }
 0x1bd   :  { %11440 = vst [vmem:[#allocation136_spill] sm:$0xff] %v6634_v45  ;;  %11441 = vst [vmem:[#allocation137_spill] sm:$0xff] %v6636_v38  ;;  %v4760_v45 = vld [vmem:[%s10972_s0 + $0x338] sm:$0xff]  ;;  %v4761_v38 = vld [vmem:[%s10972_s0 + $0x330] sm:$0xff] }
 0x1be   :  { %v611_v25 = vmul.f32 %v4760_v45, %v4760_v45  ;;  %v610_v55 = vmul.f32 %v4761_v38, %v4761_v38 }
 0x1bf   :  { %930 = vadd.xlane.f32.xlu1 %v929_v18  ;;  %927 = vadd.xlane.f32.xlu0 %v926_v43 }
 0x1c0   :  { %v6646_v46 = vpop.xlane.xlu1 %726  ;;  %v6648_v22 = vpop.xlane.xlu0 %723  ;;  %v941_v24 = vsel %vm135_vm0, %v611_v25, 0.0  ;;  %v938_v28 = vsel %vm135_vm0, %v610_v55, 0.0 }
 0x1c1   :  { %11442 = vst [vmem:[#allocation138_spill] sm:$0xff] %v6646_v46  ;;  %11443 = vst [vmem:[#allocation139_spill] sm:$0xff] %v6648_v22  ;;  %v4762_v46 = vld [vmem:[%s10972_s0 + $0x348] sm:$0xff]  ;;  %v4763_v22 = vld [vmem:[%s10972_s0 + $0x340] sm:$0xff] }
 0x1c2   :  { %v613_v45 = vmul.f32 %v4762_v46, %v4762_v46  ;;  %v612_v38 = vmul.f32 %v4763_v22, %v4763_v22 }
 0x1c3   :  { %936 = vadd.xlane.f32.xlu1 %v935_v14  ;;  %933 = vadd.xlane.f32.xlu0 %v932_v36 }
 0x1c4   :  { %v6658_v18 = vpop.xlane.xlu1 %732  ;;  %v6660_v43 = vpop.xlane.xlu0 %729  ;;  %v947_v25 = vsel %vm135_vm0, %v613_v45, 0.0  ;;  %v944_v55 = vsel %vm135_vm0, %v612_v38, 0.0 }
 0x1c5   :  { %11444 = vst [vmem:[#allocation140_spill] sm:$0xff] %v6658_v18  ;;  %11445 = vst [vmem:[#allocation141_spill] sm:$0xff] %v6660_v43  ;;  %v4764_v18 = vld [vmem:[%s10972_s0 + $0x358] sm:$0xff]  ;;  %v4765_v43 = vld [vmem:[%s10972_s0 + $0x350] sm:$0xff] }
 0x1c6   :  { %v615_v46 = vmul.f32 %v4764_v18, %v4764_v18  ;;  %v614_v22 = vmul.f32 %v4765_v43, %v4765_v43 }
 0x1c7   :  { %942 = vadd.xlane.f32.xlu1 %v941_v24  ;;  %939 = vadd.xlane.f32.xlu0 %v938_v28 }
 0x1c8   :  { %v6670_v14 = vpop.xlane.xlu1 %738  ;;  %v6672_v36 = vpop.xlane.xlu0 %735  ;;  %v953_v45 = vsel %vm135_vm0, %v615_v46, 0.0  ;;  %v950_v38 = vsel %vm135_vm0, %v614_v22, 0.0 }
 0x1c9   :  { %11446 = vst [vmem:[#allocation142_spill] sm:$0xff] %v6670_v14  ;;  %11447 = vst [vmem:[#allocation143_spill] sm:$0xff] %v6672_v36  ;;  %v4766_v14 = vld [vmem:[%s10972_s0 + $0x368] sm:$0xff]  ;;  %v4767_v36 = vld [vmem:[%s10972_s0 + $0x360] sm:$0xff] }
 0x1ca   :  { %v617_v18 = vmul.f32 %v4766_v14, %v4766_v14  ;;  %v616_v43 = vmul.f32 %v4767_v36, %v4767_v36 }
 0x1cb   :  { %948 = vadd.xlane.f32.xlu1 %v947_v25  ;;  %945 = vadd.xlane.f32.xlu0 %v944_v55 }
 0x1cc   :  { %v6682_v24 = vpop.xlane.xlu1 %744  ;;  %v6684_v28 = vpop.xlane.xlu0 %741  ;;  %v959_v46 = vsel %vm135_vm0, %v617_v18, 0.0  ;;  %v956_v22 = vsel %vm135_vm0, %v616_v43, 0.0 }
 0x1cd   :  { %11448 = vst [vmem:[#allocation144_spill] sm:$0xff] %v6682_v24  ;;  %11449 = vst [vmem:[#allocation145_spill] sm:$0xff] %v6684_v28  ;;  %v4768_v24 = vld [vmem:[%s10972_s0 + $0x378] sm:$0xff]  ;;  %v4769_v28 = vld [vmem:[%s10972_s0 + $0x370] sm:$0xff] }
 0x1ce   :  { %v619_v14 = vmul.f32 %v4768_v24, %v4768_v24  ;;  %v618_v36 = vmul.f32 %v4769_v28, %v4769_v28 }
 0x1cf   :  { %954 = vadd.xlane.f32.xlu1 %v953_v45  ;;  %951 = vadd.xlane.f32.xlu0 %v950_v38 }
 0x1d0   :  { %v6694_v25 = vpop.xlane.xlu1 %750  ;;  %v6696_v55 = vpop.xlane.xlu0 %747  ;;  %v965_v18 = vsel %vm135_vm0, %v619_v14, 0.0  ;;  %v962_v43 = vsel %vm135_vm0, %v618_v36, 0.0 }
 0x1d1   :  { %11450 = vst [vmem:[#allocation146_spill] sm:$0xff] %v6694_v25  ;;  %11451 = vst [vmem:[#allocation147_spill] sm:$0xff] %v6696_v55  ;;  %v4770_v25 = vld [vmem:[%s10972_s0 + $0x388] sm:$0xff]  ;;  %v4771_v55 = vld [vmem:[%s10972_s0 + $0x380] sm:$0xff] }
 0x1d2   :  { %v621_v24 = vmul.f32 %v4770_v25, %v4770_v25  ;;  %v620_v28 = vmul.f32 %v4771_v55, %v4771_v55 }
 0x1d3   :  { %960 = vadd.xlane.f32.xlu1 %v959_v46  ;;  %957 = vadd.xlane.f32.xlu0 %v956_v22 }
 0x1d4   :  { %v6706_v45 = vpop.xlane.xlu1 %756  ;;  %v6708_v38 = vpop.xlane.xlu0 %753  ;;  %v971_v14 = vsel %vm135_vm0, %v621_v24, 0.0  ;;  %v968_v36 = vsel %vm135_vm0, %v620_v28, 0.0 }
 0x1d5   :  { %11452 = vst [vmem:[#allocation148_spill] sm:$0xff] %v6706_v45  ;;  %11453 = vst [vmem:[#allocation149_spill] sm:$0xff] %v6708_v38  ;;  %v4772_v45 = vld [vmem:[%s10972_s0 + $0x398] sm:$0xff]  ;;  %v4773_v38 = vld [vmem:[%s10972_s0 + $0x390] sm:$0xff] }
 0x1d6   :  { %v623_v25 = vmul.f32 %v4772_v45, %v4772_v45  ;;  %v622_v55 = vmul.f32 %v4773_v38, %v4773_v38 }
 0x1d7   :  { %966 = vadd.xlane.f32.xlu1 %v965_v18  ;;  %963 = vadd.xlane.f32.xlu0 %v962_v43 }
 0x1d8   :  { %v6718_v46 = vpop.xlane.xlu1 %762  ;;  %v6720_v22 = vpop.xlane.xlu0 %759  ;;  %v977_v24 = vsel %vm135_vm0, %v623_v25, 0.0  ;;  %v974_v28 = vsel %vm135_vm0, %v622_v55, 0.0  ;;  %v11464_v55 = vld [vmem:[#allocation55_spill] sm:$0xff] }
 0x1d9   :  { %11454 = vst [vmem:[#allocation150_spill] sm:$0xff] %v6718_v46  ;;  %11455 = vst [vmem:[#allocation151_spill] sm:$0xff] %v6720_v22  ;;  %v4774_v46 = vld [vmem:[%s10972_s0 + $0x3a8] sm:$0xff]  ;;  %v4775_v22 = vld [vmem:[%s10972_s0 + $0x3a0] sm:$0xff]  ;;  %v6752_v50 = vmul.f32 0.020408163, %v11464_v55 }
 0x1da   :  { %v625_v45 = vmul.f32 %v4774_v46, %v4774_v46  ;;  %v624_v38 = vmul.f32 %v4775_v22, %v4775_v22 }
 0x1db   :  { %972 = vadd.xlane.f32.xlu1 %v971_v14  ;;  %969 = vadd.xlane.f32.xlu0 %v968_v36  ;;  %v11458_v14 = vld [vmem:[#allocation52_spill] sm:$0xff]  ;;  %11465 = vst [vmem:[#allocation55_spill] sm:$0xff] %v6752_v50 }
 0x1dc   :  { %v6730_v18 = vpop.xlane.xlu1 %768  ;;  %v6732_v43 = vpop.xlane.xlu0 %765  ;;  %v6743_v36 = vmul.f32 0.020408163, %v11458_v14  ;;  %v983_v22 = vsel %vm135_vm0, %v625_v45, 0.0  ;;  %v980_v14 = vsel %vm135_vm0, %v624_v38, 0.0  ;;  %v11472_v45 = vsub.f32 %v6263_v23, %v6261_v42  ;;  %v11478_v42 = vld [vmem:[#allocation60_spill] sm:$0xff] }
 0x1dd   :  { %11456 = vst [vmem:[#allocation152_spill] sm:$0xff] %v6730_v18  ;;  %11457 = vst [vmem:[#allocation153_spill] sm:$0xff] %v6732_v43  ;;  %v11460_v18 = vld [vmem:[#allocation53_spill] sm:$0xff]  ;;  %v11462_v43 = vld [vmem:[#allocation54_spill] sm:$0xff]  ;;  %v6794_v23 = vmul.f32 0.020408163, %v11478_v42 }
 0x1de   :  { %11459 = vst [vmem:[#allocation52_spill] sm:$0xff] %v6743_v36  ;;  %v6746_v21 = vmul.f32 0.020408163, %v11460_v18  ;;  %v6749_v25 = vmul.f32 0.020408163, %v11462_v43  ;;  %v4776_v18 = vld [vmem:[%s10972_s0 + $0x3b8] sm:$0xff] }
 0x1df   :  { %978 = vadd.xlane.f32.xlu1 %v977_v24  ;;  %975 = vadd.xlane.f32.xlu0 %v974_v28  ;;  %v627_v44 = vmul.f32 %v4776_v18, %v4776_v18  ;;  %v4777_v43 = vld [vmem:[%s10972_s0 + $0x3b0] sm:$0xff]  ;;  %v1501_v38 = vmax.f32 %v11472_v45, 0.0  ;;  %v11473_v18 = vld [vmem:[#allocation58_spill] sm:$0xff]  ;;  %11479 = vst [vmem:[#allocation60_spill] sm:$0xff] %v6794_v23 }
 0x1e0   :  { %11461 = vst [vmem:[#allocation53_spill] sm:$0xff] %v6746_v21  ;;  %11463 = vst [vmem:[#allocation54_spill] sm:$0xff] %v6749_v25  ;;  %v6754_v46 = vpop.xlane.xlu1 %774  ;;  %v6756_v33 = vpop.xlane.xlu0 %771  ;;  %v626_v55 = vmul.f32 %v4777_v43, %v4777_v43  ;;  %v11468_v24 = vld [vmem:[#allocation56_spill] sm:$0xff]  ;;  %v6780_v11 = vmul.f32 0.020408163, %v11473_v18  ;;  %v6787_v43 = vmul.f32 %v6746_v21, %v6746_v21  ;;  %v4779_v42 = vld [vmem:[%s10972_s0 + $0x3c0] sm:$0xff] }
 0x1e1   :  { %11466 = vst [vmem:[#allocation154_spill] sm:$0xff] %v6754_v46  ;;  %11467 = vst [vmem:[#allocation155_spill] sm:$0xff] %v6756_v33  ;;  %v6767_v28 = vmul.f32 0.020408163, %v11468_v24  ;;  %v11470_v46 = vld [vmem:[#allocation57_spill] sm:$0xff]  ;;  %v6777_v33 = vmul.f32 %v6743_v36, %v6743_v36  ;;  %v989_v36 = vsel %vm135_vm0, %v627_v44, 0.0 }
 0x1e2   :  { %v6770_v52 = vmul.f32 0.020408163, %v11470_v46  ;;  %11474 = vst [vmem:[#allocation58_spill] sm:$0xff] %v6780_v11  ;;  %v6791_v46 = vmul.f32 %v6749_v25, %v6749_v25  ;;  %v11480_v24 = vld [vmem:[#allocation61_spill] sm:$0xff]  ;;  %v986_v21 = vsel %vm135_vm0, %v626_v55, 0.0  ;;  %v4778_v25 = vld [vmem:[%s10972_s0 + $0x3c8] sm:$0xff] }
 0x1e3   :  { %11469 = vst [vmem:[#allocation56_spill] sm:$0xff] %v6767_v28  ;;  %v6797_v45 = vmul.f32 0.020408163, %v11480_v24  ;;  %984 = vadd.xlane.f32.xlu1 %v983_v22  ;;  %981 = vadd.xlane.f32.xlu0 %v980_v14  ;;  %v628_v24 = vmul.f32 %v4779_v42, %v4779_v42  ;;  %v6813_v22 = vmul.f32 %v6752_v50, %v6752_v50  ;;  %v1625_v55 = vadd.f32 1e-05, %v1501_v38 }
 0x1e4   :  { %11471 = vst [vmem:[#allocation57_spill] sm:$0xff] %v6770_v52  ;;  %11477 = vst [vmem:[#allocation156_spill] sm:$0xff] %v6791_v46  ;;  %v6799_v18 = vpop.xlane.xlu1 %780  ;;  %v6801_v58 = vpop.xlane.xlu0 %777  ;;  %v629_v46 = vmul.f32 %v4778_v25, %v4778_v25  ;;  %v6817_v14 = vmul.f32 %v6767_v28, %v6767_v28  ;;  %v6821_v44 = vmul.f32 %v6770_v52, %v6770_v52 }
 0x1e5   :  { %11481 = vst [vmem:[#allocation61_spill] sm:$0xff] %v6797_v45  ;;  %11482 = vst [vmem:[#allocation157_spill] sm:$0xff] %v6799_v18  ;;  %v6825_v25 = vmul.f32 %v6780_v11, %v6780_v11  ;;  %v6829_v42 = vmul.f32 %v6783_v20, %v6783_v20  ;;  %v11487_v18 = vld [vmem:[#allocation62_spill] sm:$0xff]  ;;  %v11489_v28 = vsub.f32 %v6290_v62, %v6269_v63  ;;  %v11492_v11 = vld [vmem:[#allocation63_spill] sm:$0xff]  ;;  %4487 = vrsqrt.f32 %v1625_v55 }
 0x1e6   :  { %11483 = vst [vmem:[#allocation158_spill] sm:$0xff] %v6801_v58  ;;  %11484 = vst [vmem:[#allocation159_spill] sm:$0xff] %v6817_v14  ;;  %v6832_v58 = vmul.f32 0.020408163, %v11487_v18  ;;  %v6839_v52 = vmul.f32 %v6794_v23, %v6794_v23  ;;  %v6843_v38 = vmul.f32 %v6797_v45, %v6797_v45  ;;  %v11494_v20 = vsub.f32 %v6265_v54, %v6248_v7  ;;  %v4780_v23 = vld [vmem:[%s10972_s0 + $0x3d8] sm:$0xff]  ;;  %v4781_v7 = vld [vmem:[%s10972_s0 + $0x3d0] sm:$0xff] }
 0x1e7   :  { %11485 = vst [vmem:[#allocation160_spill] sm:$0xff] %v6825_v25  ;;  %11486 = vst [vmem:[#allocation161_spill] sm:$0xff] %v6829_v42  ;;  %v1502_v50 = vmax.f32 %v11489_v28, 0.0  ;;  %v6846_v25 = vmul.f32 0.020408163, %v11492_v11  ;;  %990 = vadd.xlane.f32.xlu1 %v989_v36  ;;  %987 = vadd.xlane.f32.xlu0 %v986_v21  ;;  %v995_v62 = vsel %vm135_vm0, %v629_v46, 0.0  ;;  %v631_v11 = vmul.f32 %v4780_v23, %v4780_v23 }
 0x1e8   :  { %11488 = vst [vmem:[#allocation62_spill] sm:$0xff] %v6832_v58  ;;  %11490 = vst [vmem:[#allocation162_spill] sm:$0xff] %v6839_v52  ;;  %v1500_v18 = vmax.f32 %v11494_v20, 0.0  ;;  %v6851_v42 = vpop.xlane.xlu1 %786  ;;  %v6853_v63 = vpop.xlane.xlu0 %783  ;;  %v992_v28 = vsel %vm135_vm0, %v628_v24, 0.0  ;;  %v630_v20 = vmul.f32 %v4781_v7, %v4781_v7  ;;  %v11497_v54 = vld [vmem:[#allocation64_spill] sm:$0xff]  ;;  %v11499_v36 = vld [vmem:[#allocation65_spill] sm:$0xff]  ;;  %v6874_v24 = vmul.f32 %v6832_v58, %v6832_v58 }
 0x1e9   :  { %11491 = vst [vmem:[#allocation163_spill] sm:$0xff] %v6843_v38  ;;  %11493 = vst [vmem:[#allocation63_spill] sm:$0xff] %v6846_v25  ;;  %v6864_v21 = vmul.f32 0.020408163, %v11497_v54  ;;  %v11501_v45 = vld [vmem:[#allocation66_spill] sm:$0xff]  ;;  %v11504_v23 = vld [vmem:[#allocation67_spill] sm:$0xff]  ;;  %v11506_v7 = vsub.f32 %v6288_v6, %v6283_v59  ;;  %v11509_v58 = vsub.f32 %v6322_v34, %v6320_v19 }
 0x1ea   :  { %11495 = vst [vmem:[#allocation164_spill] sm:$0xff] %v6851_v42  ;;  %11496 = vst [vmem:[#allocation165_spill] sm:$0xff] %v6853_v63  ;;  %v6867_v42 = vmul.f32 0.020408163, %v11499_v36  ;;  %v6870_v46 = vmul.f32 0.020408163, %v11501_v45  ;;  %v6884_v36 = vmul.f32 %v6846_v25, %v6846_v25 }
 0x1eb   :  { %11498 = vst [vmem:[#allocation64_spill] sm:$0xff] %v6864_v21  ;;  %11503 = vst [vmem:[#allocation166_spill] sm:$0xff] %v6874_v24  ;;  %v6877_v63 = vmul.f32 0.020408163, %v11504_v23  ;;  %v1503_v52 = vmax.f32 %v11506_v7, 0.0  ;;  %v11507_v38 = vld [vmem:[#allocation68_spill] sm:$0xff]  ;;  %996 = vadd.xlane.f32.xlu1 %v995_v62  ;;  %993 = vadd.xlane.f32.xlu0 %v992_v28  ;;  %v6906_v19 = vmul.f32 %v6864_v21, %v6864_v21 }
 0x1ec   :  { %11500 = vst [vmem:[#allocation65_spill] sm:$0xff] %v6867_v42  ;;  %11502 = vst [vmem:[#allocation66_spill] sm:$0xff] %v6870_v46  ;;  %v1626_v54 = vadd.f32 1e-05, %v1502_v50  ;;  %v6887_v45 = vmul.f32 0.020408163, %v11507_v38  ;;  %v6898_v50 = vpop.xlane.xlu1 %792  ;;  %v6900_v7 = vpop.xlane.xlu0 %789  ;;  %v6910_v34 = vmul.f32 %v6867_v42, %v6867_v42 }
 0x1ed   :  { %11505 = vst [vmem:[#allocation67_spill] sm:$0xff] %v6877_v63  ;;  %v1624_v55 = vadd.f32 1e-05, %v1500_v18  ;;  %v1504_v24 = vmax.f32 %v11509_v58, 0.0  ;;  %v11510_v23 = vld [vmem:[#allocation69_spill] sm:$0xff]  ;;  %v11512_v59 = vld [vmem:[#allocation70_spill] sm:$0xff]  ;;  %v6914_v58 = vmul.f32 %v6870_v46, %v6870_v46  ;;  %v6927_v42 = vmul.f32 %v6877_v63, %v6877_v63 }
 0x1ee   :  { %11508 = vst [vmem:[#allocation68_spill] sm:$0xff] %v6887_v45  ;;  %v6893_v14 = vmul.f32 0.020408163, %v11510_v23  ;;  %v6896_v6 = vmul.f32 0.020408163, %v11512_v59  ;;  %v1001_v38 = vsel %vm135_vm0, %v631_v11, 0.0  ;;  %4489 = vrsqrt.f32 %v1626_v54 }
 0x1ef   :  { %v998_v18 = vsel %vm135_vm0, %v630_v20, 0.0  ;;  %v11514_v62 = vld [vmem:[#allocation71_spill] sm:$0xff]  ;;  %v11516_v23 = vld [vmem:[#allocation72_spill] sm:$0xff]  ;;  %v1627_v11 = vadd.f32 1e-05, %v1503_v52  ;;  %v11518_v20 = vsub.f32 %v6316_v47, %v6311_v27  ;;  %4491 = vrsqrt.f32 %v1624_v55  ;;  %1002 = vadd.xlane.f32.xlu1 %v1001_v38  ;;  %v11520_v54 = vld [vmem:[#allocation73_spill] sm:$0xff] }
 0x1f0   :  { %11511 = vst [vmem:[#allocation69_spill] sm:$0xff] %v6893_v14  ;;  %11513 = vst [vmem:[#allocation70_spill] sm:$0xff] %v6896_v6  ;;  %v6917_v28 = vmul.f32 0.020408163, %v11514_v62  ;;  %v6920_v59 = vmul.f32 0.020408163, %v11516_v23  ;;  %v11519_v46 = vsub.f32 %v6349_v3, %v6342_v15  ;;  %999 = vadd.xlane.f32.xlu0 %v998_v18  ;;  %v6934_v52 = vmul.f32 %v6887_v45, %v6887_v45  ;;  %v6947_v55 = vpop.xlane.xlu1 %798  ;;  %v6949_v15 = vpop.xlane.xlu0 %795 }
 0x1f1   :  { %v1505_v21 = vmax.f32 %v11518_v20, 0.0  ;;  %v1628_v25 = vadd.f32 1e-05, %v1504_v24  ;;  %v6938_v27 = vmul.f32 %v6893_v14, %v6893_v14  ;;  %v6942_v47 = vmul.f32 %v6896_v6, %v6896_v6  ;;  %11522 = vst [vmem:[#allocation167_spill] sm:$0xff] %v6947_v55  ;;  %11523 = vst [vmem:[#allocation168_spill] sm:$0xff] %v6949_v15  ;;  %v11526_v18 = vld [vmem:[#allocation75_spill] sm:$0xff] }
 0x1f2   :  { %11515 = vst [vmem:[#allocation71_spill] sm:$0xff] %v6917_v28  ;;  %11517 = vst [vmem:[#allocation72_spill] sm:$0xff] %v6920_v59  ;;  %v1506_v62 = vmax.f32 %v11519_v46, 0.0  ;;  %v6945_v24 = vmul.f32 0.020408163, %v11520_v54  ;;  %v6953_v3 = vmul.f32 %v6917_v28, %v6917_v28  ;;  %v11524_v46 = vld [vmem:[#allocation74_spill] sm:$0xff]  ;;  %v6966_v54 = vmul.f32 %v6920_v59, %v6920_v59 }
 0x1f3   :  { %v6956_v38 = vmul.f32 0.020408163, %v11524_v46  ;;  %v6959_v23 = vmul.f32 0.020408163, %v11526_v18  ;;  %v11528_v20 = vld [vmem:[#allocation76_spill] sm:$0xff]  ;;  %4493 = vrsqrt.f32 %v1627_v11  ;;  %v11530_v14 = vsub.f32 %v6347_v53, %v6326_v26  ;;  %v11531_v63 = vld [vmem:[#allocation77_spill] sm:$0xff] }
 0x1f4   :  { %11521 = vst [vmem:[#allocation73_spill] sm:$0xff] %v6945_v24  ;;  %v6962_v6 = vmul.f32 0.020408163, %v11528_v20  ;;  %v1629_v45 = vadd.f32 1e-05, %v1505_v21  ;;  %4495 = vrsqrt.f32 %v1628_v25  ;;  %v11533_v18 = vsub.f32 %v6382_v56, %v6380_v61  ;;  %v11535_v21 = vld [vmem:[#allocation78_spill] sm:$0xff]  ;;  %v6992_v25 = vpop.xlane.xlu0 %801 }
 0x1f5   :  { %11525 = vst [vmem:[#allocation74_spill] sm:$0xff] %v6956_v38  ;;  %11527 = vst [vmem:[#allocation75_spill] sm:$0xff] %v6959_v23  ;;  %v1507_v28 = vmax.f32 %v11530_v14, 0.0  ;;  %v6972_v55 = vmul.f32 0.020408163, %v11531_v63  ;;  %v6979_v15 = vmul.f32 %v6945_v24, %v6945_v24  ;;  %v11537_v53 = vsub.f32 %v6376_v40, %v6371_v35  ;;  %v6990_v14 = vpop.xlane.xlu1 %804  ;;  %v4488_v40 = vpop.eup %4487 }
 0x1f6   :  { %11529 = vst [vmem:[#allocation76_spill] sm:$0xff] %v6962_v6  ;;  %v1630_v46 = vadd.f32 1e-05, %v1506_v62  ;;  %v1508_v20 = vmax.f32 %v11533_v18, 0.0  ;;  %v6982_v11 = vmul.f32 0.020408163, %v5877_v31  ;;  %v6996_v61 = vmul.f32 %v6956_v38, %v6956_v38 }
 0x1f7   :  { %11532 = vst [vmem:[#allocation77_spill] sm:$0xff] %v6972_v55  ;;  %v6985_v59 = vmul.f32 0.020408163, %v11535_v21  ;;  %v1509_v26 = vmax.f32 %v11537_v53, 0.0  ;;  %v7000_v56 = vmul.f32 %v6959_v23, %v6959_v23  ;;  %v7004_v31 = vmul.f32 %v6962_v6, %v6962_v6  ;;  %v1873_v53 = vld [vmem:[%s10973_s1 + $0x8] sm:$0xff] }
 0x1f8   :  { %11534 = vst [vmem:[#allocation169_spill] sm:$0xff] %v6982_v11  ;;  %v7007_v63 = vmul.f32 0.020408163, %v5887_v39  ;;  %v7010_v35 = vmul.f32 0.020408163, %v5889_v30  ;;  %4497 = vrsqrt.f32 %v1629_v45  ;;  %v11540_v18 = vsub.f32 %v6409_v41, %v6402_v60 }
 0x1f9   :  { %11536 = vst [vmem:[#allocation78_spill] sm:$0xff] %v6985_v59  ;;  %v1631_v62 = vadd.f32 1e-05, %v1507_v28  ;;  %v7020_v6 = vmul.f32 %v6972_v55, %v6972_v55  ;;  %v7023_v39 = vmul.f32 0.020408163, %v5897_v5  ;;  %4499 = vrsqrt.f32 %v1630_v46  ;;  %v7038_v55 = vpop.xlane.xlu0 %807 }
 0x1fa   :  { %11538 = vst [vmem:[#allocation170_spill] sm:$0xff] %v7007_v63  ;;  %11539 = vst [vmem:[#allocation171_spill] sm:$0xff] %v7010_v35  ;;  %v1510_v21 = vmax.f32 %v11540_v18, 0.0  ;;  %v1632_v30 = vadd.f32 1e-05, %v1508_v20  ;;  %v7027_v45 = vmul.f32 %v6982_v11, %v6982_v11  ;;  %v7031_v60 = vmul.f32 %v6985_v59, %v6985_v59  ;;  %v7036_v18 = vpop.xlane.xlu1 %810 }
 0x1fb   :  { %11541 = vst [vmem:[#allocation172_spill] sm:$0xff] %v7023_v39  ;;  %v7034_v41 = vmul.f32 0.020408163, %v5899_v1  ;;  %v1633_v28 = vadd.f32 1e-05, %v1509_v26  ;;  %v7042_v5 = vmul.f32 %v7007_v63, %v7007_v63  ;;  %v11544_v20 = vsub.f32 %v6407_v49, %v6386_v4  ;;  %v4490_v23 = vpop.eup %4489 }
 0x1fc   :  { %v7045_v46 = vmul.f32 0.020408163, %v5907_v2  ;;  %v7050_v59 = vmul.f32 %v4488_v40, %v1873_v53  ;;  %v7054_v1 = vmul.f32 %v7010_v35, %v7010_v35  ;;  %4501 = vrsqrt.f32 %v1631_v62  ;;  %v1874_v40 = vld [vmem:[%s10973_s1 + $0x10] sm:$0xff]  ;;  %v4492_v62 = vpop.eup %4491 }
 0x1fd   :  { %11542 = vst [vmem:[#allocation173_spill] sm:$0xff] %v7034_v41  ;;  %v1511_v11 = vmax.f32 %v11544_v20, 0.0  ;;  %v1634_v26 = vadd.f32 1e-05, %v1510_v21  ;;  %v11546_v38 = vsub.f32 %v6442_v48, %v6440_v10  ;;  %v7061_v2 = vmul.f32 %v7023_v39, %v7023_v39  ;;  %v1872_v21 = vld [vmem:[%s10973_s1] sm:$0xff] }
 0x1fe   :  { %11543 = vst [vmem:[#allocation174_spill] sm:$0xff] %v7045_v46  ;;  %11545 = vst [vmem:[#allocation175_spill] sm:$0xff] %v7050_v59  ;;  %v7064_v49 = vmul.f32 0.020408163, %v5909_v0  ;;  %v7067_v4 = vmul.f32 0.020408163, %v5917_v8  ;;  %4503 = vrsqrt.f32 %v1632_v30  ;;  %v7074_v10 = vmul.f32 %v7034_v41, %v7034_v41  ;;  %v7082_v0 = vpop.xlane.xlu1 %816  ;;  %v7084_v8 = vpop.xlane.xlu0 %813 }
 0x1ff   :  { %v1512_v63 = vmax.f32 %v11546_v38, 0.0  ;;  %v7077_v48 = vmul.f32 0.020408163, %v5919_v9  ;;  %v7080_v38 = vmul.f32 0.020408163, %v5927_v12  ;;  %4505 = vrsqrt.f32 %v1633_v28 }
 0x200   :  { %11547 = vst [vmem:[#allocation176_spill] sm:$0xff] %v7064_v49  ;;  %11548 = vst [vmem:[#allocation177_spill] sm:$0xff] %v7067_v4  ;;  %v7091_v53 = vmul.f32 %v7045_v46, %v7045_v46  ;;  %v1635_v30 = vadd.f32 1e-05, %v1511_v11  ;;  %v11552_v9 = vsub.f32 %v6436_v29, %v6431_v57  ;;  %v2121_v12 = vmul.f32 %v7050_v59, %v6241_v51  ;;  %v4494_v24 = vpop.eup %4493  ;;  %v11567_v59 = vld [vmem:[#allocation34_spill] sm:$0xff] }
 0x201   :  { %11549 = vst [vmem:[#allocation178_spill] sm:$0xff] %v7077_v48  ;;  %11550 = vst [vmem:[#allocation179_spill] sm:$0xff] %v7080_v38  ;;  %4507 = vrsqrt.f32 %v1634_v26  ;;  %v1636_v28 = vadd.f32 1e-05, %v1512_v63  ;;  %v11553_v39 = vsub.f32 %v6469_v32, %v6462_v37  ;;  %v7101_v35 = vmul.f32 %v4490_v23, %v1874_v40  ;;  %v1875_v37 = vld [vmem:[%s10973_s1 + $0x18] sm:$0xff]  ;;  %v4496_v32 = vpop.eup %4495  ;;  %v1876_v40 = vld [vmem:[%s10973_s1 + $0x20] sm:$0xff] }
 0x202   :  { %11551 = vst [vmem:[#allocation180_spill] sm:$0xff] %v7091_v53  ;;  %v1513_v20 = vmax.f32 %v11552_v9, 0.0  ;;  %v7105_v46 = vmul.f32 %v7064_v49, %v7064_v49  ;;  %v7109_v29 = vmul.f32 %v7067_v4, %v7067_v4  ;;  %v7112_v57 = vmul.f32 0.020408163, %v5929_v13  ;;  %2370 = vrot.lane.b32.xlu1 %v2121_v12, %s5030_s23  ;;  %v7136_v26 = vpop.xlane.xlu0 %819  ;;  %v11566_v9 = vld [vmem:[#allocation36_spill] sm:$0xff] }
 0x203   :  { %v1514_v41 = vmax.f32 %v11553_v39, 0.0  ;;  %11554 = vst [vmem:[#allocation181_spill] sm:$0xff] %v7101_v35  ;;  %v7114_v51 = vmul.f32 %v4492_v62, %v1872_v21  ;;  %v7121_v23 = vmul.f32 %v7077_v48, %v7077_v48  ;;  %v7125_v11 = vmul.f32 %v7080_v38, %v7080_v38  ;;  %v7133_v39 = vpop.xlane.xlu1 %822  ;;  %11563 = vst [vmem:[#allocation190_spill] sm:$0xff] %v7136_v26  ;;  %v11564_v62 = vld [vmem:[#allocation79_spill] sm:$0xff]  ;;  %v11575_v26 = vld [vmem:[#allocation17_spill] sm:$0xff] }
 0x204   :  { %11555 = vst [vmem:[#allocation182_spill] sm:$0xff] %v7109_v29  ;;  %11556 = vst [vmem:[#allocation183_spill] sm:$0xff] %v7112_v57  ;;  %v7128_v63 = vmul.f32 0.020408163, %v5937_v16  ;;  %v7131_v13 = vmul.f32 0.020408163, %v5939_v17  ;;  %4509 = vrsqrt.f32 %v1635_v30  ;;  %v11568_v17 = vsub.f32 %v11566_v9, %v11567_v59 }
 0x205   :  { %11557 = vst [vmem:[#allocation184_spill] sm:$0xff] %v7114_v51  ;;  %11558 = vst [vmem:[#allocation185_spill] sm:$0xff] %v7121_v23  ;;  %v7142_v21 = vmul.f32 0.020408163, %v11564_v62  ;;  %v1637_v16 = vadd.f32 1e-05, %v1513_v20  ;;  %4511 = vrsqrt.f32 %v1636_v28  ;;  %v7149_v49 = vmul.f32 %v4494_v24, %v1875_v37 }
 0x206   :  { %11559 = vst [vmem:[#allocation186_spill] sm:$0xff] %v7125_v11  ;;  %11560 = vst [vmem:[#allocation187_spill] sm:$0xff] %v7128_v63  ;;  %v1515_v38 = vmax.f32 %v11568_v17, 0.0  ;;  %v1638_v4 = vadd.f32 1e-05, %v1514_v41  ;;  %v11569_v48 = vld [vmem:[#allocation19_spill] sm:$0xff]  ;;  %v4498_v11 = vpop.eup %4497  ;;  %v2120_v59 = vmul.f32 %v7114_v51, %v11575_v26  ;;  %v7160_v9 = vmul.f32 %v4496_v32, %v1876_v40  ;;  %v7182_v40 = vpop.xlane.xlu0 %825 }
 0x207   :  { %11561 = vst [vmem:[#allocation188_spill] sm:$0xff] %v7131_v13  ;;  %11562 = vst [vmem:[#allocation189_spill] sm:$0xff] %v7133_v39  ;;  %v2122_v12 = vmul.f32 %v7101_v35, %v11569_v48  ;;  %v7153_v39 = vmul.f32 %v7112_v57, %v7112_v57  ;;  %v11572_v62 = vld [vmem:[#allocation43_spill] sm:$0xff]  ;;  %v11573_v29 = vld [vmem:[#allocation42_spill] sm:$0xff]  ;;  %v4500_v24 = vpop.eup %4499  ;;  %v7167_v48 = vmul.f32 %v7128_v63, %v7128_v63  ;;  %v7179_v32 = vpop.xlane.xlu1 %828  ;;  %4513 = vrsqrt.f32 %v1637_v16 }
 0x208   :  { %11565 = vst [vmem:[#allocation79_spill] sm:$0xff] %v7142_v21  ;;  %11570 = vst [vmem:[#allocation36_spill] sm:$0xff] %v7149_v49  ;;  %v11574_v30 = vsub.f32 %v11572_v62, %v11573_v29  ;;  %v1877_v41 = vld [vmem:[%s10973_s1 + $0x28] sm:$0xff]  ;;  %v7171_v28 = vmul.f32 %v7131_v13, %v7131_v13  ;;  %v11579_v29 = vld [vmem:[#allocation80_spill] sm:$0xff]  ;;  %2368 = vrot.lane.b32.xlu0 %v2120_v59, %s5030_s23  ;;  %4515 = vrsqrt.f32 %v1638_v4 }
 0x209   :  { %11571 = vst [vmem:[#allocation34_spill] sm:$0xff] %v7153_v39  ;;  %11576 = vst [vmem:[#allocation19_spill] sm:$0xff] %v7160_v9  ;;  %v7174_v37 = vmul.f32 0.020408163, %v11579_v29  ;;  %v11581_v17 = vld [vmem:[#allocation81_spill] sm:$0xff]  ;;  %2372 = vrot.lane.b32.xlu1 %v2122_v12, %s5030_s23  ;;  %v1878_v62 = vld [vmem:[%s10973_s1 + $0x30] sm:$0xff] }
 0x20a   :  { %v1516_v20 = vmax.f32 %v11574_v30, 0.0  ;;  %11577 = vst [vmem:[#allocation43_spill] sm:$0xff] %v7167_v48  ;;  %11578 = vst [vmem:[#allocation42_spill] sm:$0xff] %v7171_v28  ;;  %v7177_v26 = vmul.f32 0.020408163, %v11581_v17  ;;  %v7189_v30 = vmul.f32 %v7142_v21, %v7142_v21  ;;  %v11586_v35 = vld [vmem:[#allocation41_spill] sm:$0xff]  ;;  %v7200_v28 = vmul.f32 %v4498_v11, %v1877_v41 }
 0x20b   :  { %11580 = vst [vmem:[#allocation17_spill] sm:$0xff] %v7174_v37  ;;  %11583 = vst [vmem:[#allocation81_spill] sm:$0xff] %v7179_v32  ;;  %v1639_v29 = vadd.f32 1e-05, %v1515_v38  ;;  %v11587_v51 = vld [vmem:[#allocation39_spill] sm:$0xff]  ;;  %v11589_v13 = vld [vmem:[#allocation82_spill] sm:$0xff]  ;;  %v4502_v32 = vpop.eup %4501 }
 0x20c   :  { %11582 = vst [vmem:[#allocation80_spill] sm:$0xff] %v7177_v26  ;;  %11584 = vst [vmem:[#allocation191_spill] sm:$0xff] %v7182_v40  ;;  %v11588_v17 = vsub.f32 %v11586_v35, %v11587_v51  ;;  %v7196_v12 = vmul.f32 0.020408163, %v11589_v13  ;;  %v11591_v57 = vld [vmem:[#allocation20_spill] sm:$0xff]  ;;  %v11594_v16 = vld [vmem:[#allocation45_spill] sm:$0xff]  ;;  %v7207_v51 = vmul.f32 %v4500_v24, %v1878_v62  ;;  %v4504_v13 = vpop.eup %4503  ;;  %v7218_v11 = vmul.f32 %v7177_v26, %v7177_v26  ;;  %v7226_v24 = vpop.xlane.xlu1 %834 }
 0x20d   :  { %11585 = vst [vmem:[#allocation192_spill] sm:$0xff] %v7189_v30  ;;  %v2123_v48 = vmul.f32 %v7149_v49, %v11591_v57  ;;  %11592 = vst [vmem:[#allocation39_spill] sm:$0xff] %v7200_v28  ;;  %v1640_v21 = vadd.f32 1e-05, %v1516_v20  ;;  %v11593_v30 = vld [vmem:[#allocation121_spill] sm:$0xff]  ;;  %v7214_v57 = vmul.f32 %v7174_v37, %v7174_v37  ;;  %v11600_v20 = vld [vmem:[#allocation83_spill] sm:$0xff]  ;;  %v7229_v62 = vpop.xlane.xlu0 %831  ;;  %4517 = vrsqrt.f32 %v1639_v29 }
 0x20e   :  { %v1517_v63 = vmax.f32 %v11588_v17, 0.0  ;;  %11590 = vst [vmem:[#allocation41_spill] sm:$0xff] %v7196_v12  ;;  %v11595_v38 = vsub.f32 %v11593_v30, %v11594_v16  ;;  %v11596_v39 = vld [vmem:[#allocation21_spill] sm:$0xff]  ;;  %11597 = vst [vmem:[#allocation82_spill] sm:$0xff] %v7207_v51  ;;  %v7221_v59 = vmul.f32 0.020408163, %v11600_v20  ;;  %v4506_v17 = vpop.eup %4505 }
 0x20f   :  { %v2124_v35 = vmul.f32 %v7160_v9, %v11596_v39  ;;  %v1879_v4 = vld [vmem:[%s10973_s1 + $0x38] sm:$0xff]  ;;  %11598 = vst [vmem:[#allocation20_spill] sm:$0xff] %v7214_v57  ;;  %11599 = vst [vmem:[#allocation121_spill] sm:$0xff] %v7218_v11  ;;  %v11602_v41 = vld [vmem:[#allocation84_spill] sm:$0xff]  ;;  %2374 = vrot.lane.b32.xlu1 %v2123_v48, %s5030_s23  ;;  %4519 = vrsqrt.f32 %v1640_v21 }
 0x210   :  { %v1518_v40 = vmax.f32 %v11595_v38, 0.0  ;;  %11601 = vst [vmem:[#allocation45_spill] sm:$0xff] %v7221_v59  ;;  %v7224_v39 = vmul.f32 0.020408163, %v11602_v41  ;;  %11604 = vst [vmem:[#allocation83_spill] sm:$0xff] %v7226_v24  ;;  %v1880_v30 = vld [vmem:[%s10973_s1 + $0x40] sm:$0xff]  ;;  %v7252_v29 = vmul.f32 %v4502_v32, %v1879_v4  ;;  %v7273_v32 = vpop.xlane.xlu1 %840 }
 0x211   :  { %11605 = vst [vmem:[#allocation84_spill] sm:$0xff] %v7229_v62  ;;  %v11606_v16 = vld [vmem:[#allocation85_spill] sm:$0xff]  ;;  %v1641_v20 = vadd.f32 1e-05, %v1517_v63  ;;  %v11608_v9 = vld [vmem:[#allocation120_spill] sm:$0xff]  ;;  %2376 = vrot.lane.b32.xlu0 %v2124_v35, %s5030_s23  ;;  %v1881_v48 = vld [vmem:[%s10973_s1 + $0x48] sm:$0xff]  ;;  %v7256_v53 = vmul.f32 %v4504_v13, %v1880_v30 }
 0x212   :  { %11603 = vst [vmem:[#allocation21_spill] sm:$0xff] %v7224_v39  ;;  %v7235_v38 = vmul.f32 0.020408163, %v11606_v16  ;;  %v11609_v49 = vld [vmem:[#allocation44_spill] sm:$0xff]  ;;  %v11611_v37 = vld [vmem:[#allocation86_spill] sm:$0xff]  ;;  %v11613_v57 = vld [vmem:[#allocation125_spill] sm:$0xff]  ;;  %v7271_v21 = vmul.f32 %v7224_v39, %v7224_v39  ;;  %v7278_v4 = vmul.f32 %v4506_v17, %v1881_v48 }
 0x213   :  { %v11610_v41 = vsub.f32 %v11608_v9, %v11609_v49  ;;  %v7245_v11 = vmul.f32 0.020408163, %v11611_v37  ;;  %v11614_v24 = vld [vmem:[#allocation124_spill] sm:$0xff]  ;;  %v11616_v23 = vld [vmem:[#allocation26_spill] sm:$0xff]  ;;  %11617 = vst [vmem:[#allocation44_spill] sm:$0xff] %v7252_v29  ;;  %v4508_v49 = vpop.eup %4507  ;;  %11619 = vst [vmem:[#allocation86_spill] sm:$0xff] %v7256_v53  ;;  %4521 = vrsqrt.f32 %v1641_v20 }
 0x214   :  { %11607 = vst [vmem:[#allocation85_spill] sm:$0xff] %v7235_v38  ;;  %v11615_v62 = vsub.f32 %v11613_v57, %v11614_v24  ;;  %v2125_v63 = vmul.f32 %v7200_v28, %v11616_v23  ;;  %v1642_v9 = vadd.f32 1e-05, %v1518_v40  ;;  %v11618_v35 = vld [vmem:[#allocation24_spill] sm:$0xff]  ;;  %v7263_v57 = vmul.f32 %v7196_v12, %v7196_v12  ;;  %11622 = vst [vmem:[#allocation26_spill] sm:$0xff] %v7271_v21  ;;  %v7276_v40 = vpop.xlane.xlu0 %837  ;;  %v11628_v30 = vld [vmem:[#allocation122_spill] sm:$0xff]  ;;  %v4510_v28 = vpop.eup %4509 }
 0x215   :  { %v1519_v26 = vmax.f32 %v11610_v41, 0.0  ;;  %11612 = vst [vmem:[#allocation120_spill] sm:$0xff] %v7245_v11  ;;  %v2126_v41 = vmul.f32 %v7207_v51, %v11618_v35  ;;  %v1882_v37 = vld [vmem:[%s10973_s1 + $0x50] sm:$0xff]  ;;  %v7267_v23 = vmul.f32 %v7221_v59, %v7221_v59  ;;  %11623 = vst [vmem:[#allocation24_spill] sm:$0xff] %v7273_v32  ;;  %v7282_v13 = vmul.f32 %v7235_v38, %v7235_v38  ;;  %v11631_v17 = vld [vmem:[#allocation23_spill] sm:$0xff]  ;;  %v4512_v20 = vpop.eup %4511 }
 0x216   :  { %v1520_v16 = vmax.f32 %v11615_v62, 0.0  ;;  %11620 = vst [vmem:[#allocation125_spill] sm:$0xff] %v7263_v57  ;;  %2378 = vrot.lane.b32.xlu1 %v2125_v63, %s5030_s23  ;;  %11624 = vst [vmem:[#allocation193_spill] sm:$0xff] %v7276_v40  ;;  %v11627_v62 = vld [vmem:[#allocation123_spill] sm:$0xff]  ;;  %v7290_v63 = vmul.f32 %v7245_v11, %v7245_v11  ;;  %v2127_v48 = vmul.f32 %v7252_v29, %v11631_v17  ;;  %4523 = vrsqrt.f32 %v1642_v9  ;;  %v11640_v29 = vld [vmem:[#allocation88_spill] sm:$0xff] }
 0x217   :  { %11621 = vst [vmem:[#allocation124_spill] sm:$0xff] %v7267_v23  ;;  %11625 = vst [vmem:[#allocation194_spill] sm:$0xff] %v7278_v4  ;;  %v1643_v24 = vadd.f32 1e-05, %v1519_v26  ;;  %v11629_v35 = vsub.f32 %v11627_v62, %v11628_v30  ;;  %2380 = vrot.lane.b32.xlu0 %v2126_v41, %s5030_s23  ;;  %v7294_v39 = vmul.f32 %v4508_v49, %v1882_v37  ;;  %v1883_v26 = vld [vmem:[%s10973_s1 + $0x58] sm:$0xff]  ;;  %v11634_v30 = vld [vmem:[#allocation127_spill] sm:$0xff] }
 0x218   :  { %11626 = vst [vmem:[#allocation195_spill] sm:$0xff] %v7282_v13  ;;  %11630 = vst [vmem:[#allocation123_spill] sm:$0xff] %v7290_v63  ;;  %v1644_v59 = vadd.f32 1e-05, %v1520_v16  ;;  %v11633_v62 = vld [vmem:[#allocation129_spill] sm:$0xff]  ;;  %v11636_v38 = vld [vmem:[#allocation135_spill] sm:$0xff] }
 0x219   :  { %v1521_v51 = vmax.f32 %v11629_v35, 0.0  ;;  %11632 = vst [vmem:[#allocation122_spill] sm:$0xff] %v7294_v39  ;;  %v11635_v41 = vsub.f32 %v11633_v62, %v11634_v30  ;;  %v1154_v12 = vmul.f32 0.020408163, %v11636_v38  ;;  %v11637_v11 = vld [vmem:[#allocation27_spill] sm:$0xff]  ;;  %v1884_v49 = vld [vmem:[%s10973_s1 + $0x60] sm:$0xff]  ;;  %v7317_v62 = vpop.xlane.xlu1 %846  ;;  %v7320_v38 = vpop.xlane.xlu0 %843  ;;  %4525 = vrsqrt.f32 %v1643_v24 }
 0x21a   :  { %v2128_v16 = vmul.f32 %v7256_v53, %v11637_v11  ;;  %v11638_v37 = vld [vmem:[#allocation87_spill] sm:$0xff]  ;;  %v7312_v63 = vmul.f32 0.020408163, %v11640_v29  ;;  %v11642_v9 = vld [vmem:[#allocation89_spill] sm:$0xff]  ;;  %11644 = vst [vmem:[#allocation135_spill] sm:$0xff] %v7317_v62  ;;  %2382 = vrot.lane.b32.xlu1 %v2127_v48, %s5030_s23  ;;  %11645 = vst [vmem:[#allocation27_spill] sm:$0xff] %v7320_v38  ;;  %v7328_v29 = vmul.f32 %v4510_v28, %v1883_v26  ;;  %4527 = vrsqrt.f32 %v1644_v59 }
 0x21b   :  { %v1522_v35 = vmax.f32 %v11635_v41, 0.0  ;;  %v7309_v17 = vmul.f32 0.020408163, %v11638_v37  ;;  %v7315_v13 = vmul.f32 0.020408163, %v11642_v9  ;;  %v11646_v11 = vld [vmem:[#allocation25_spill] sm:$0xff]  ;;  %v4514_v9 = vpop.eup %4513  ;;  %v7333_v32 = vmul.f32 %v4512_v20, %v1884_v49 }
 0x21c   :  { %11641 = vst [vmem:[#allocation129_spill] sm:$0xff] %v7312_v63  ;;  %v2129_v30 = vmul.f32 %v7278_v4, %v11646_v11  ;;  %v1645_v41 = vadd.f32 1e-05, %v1521_v51  ;;  %v11647_v53 = vld [vmem:[#allocation128_spill] sm:$0xff]  ;;  %v11648_v37 = vld [vmem:[#allocation126_spill] sm:$0xff]  ;;  %2384 = vrot.lane.b32.xlu0 %v2128_v16, %s5030_s23  ;;  %11650 = vst [vmem:[#allocation87_spill] sm:$0xff] %v7328_v29  ;;  %v4516_v24 = vpop.eup %4515  ;;  %v1402_v26 = vsub.f32 %v1154_v12, %v6787_v43 }
 0x21d   :  { %11639 = vst [vmem:[#allocation23_spill] sm:$0xff] %v7309_v17  ;;  %11643 = vst [vmem:[#allocation127_spill] sm:$0xff] %v7315_v13  ;;  %v11649_v21 = vsub.f32 %v11647_v53, %v11648_v37  ;;  %v11651_v62 = vld [vmem:[#allocation134_spill] sm:$0xff]  ;;  %v11652_v48 = vld [vmem:[#allocation29_spill] sm:$0xff]  ;;  %v1646_v53 = vadd.f32 1e-05, %v1522_v35  ;;  %v7348_v20 = vmul.f32 %v7309_v17, %v7309_v17  ;;  %v7357_v43 = vpop.xlane.xlu1 %852  ;;  %v7360_v12 = vpop.xlane.xlu0 %849 }
 0x21e   :  { %v1155_v57 = vmul.f32 0.020408163, %v11651_v62  ;;  %v2130_v38 = vmul.f32 %v7294_v39, %v11652_v48  ;;  %11653 = vst [vmem:[#allocation88_spill] sm:$0xff] %v7333_v32  ;;  %v1885_v51 = vld [vmem:[%s10973_s1 + $0x68] sm:$0xff]  ;;  %v11655_v11 = vld [vmem:[#allocation132_spill] sm:$0xff]  ;;  %v11657_v59 = vld [vmem:[#allocation137_spill] sm:$0xff]  ;;  %2386 = vrot.lane.b32.xlu1 %v2129_v30, %s5030_s23  ;;  %4529 = vrsqrt.f32 %v1645_v41  ;;  %v4518_v40 = vpop.eup %4517 }
 0x21f   :  { %v1523_v23 = vmax.f32 %v11649_v21, 0.0  ;;  %v11654_v21 = vld [vmem:[#allocation133_spill] sm:$0xff]  ;;  %v1156_v37 = vmul.f32 0.020408163, %v11657_v59  ;;  %v1886_v62 = vld [vmem:[%s10973_s1 + $0x70] sm:$0xff]  ;;  %11658 = vst [vmem:[#allocation89_spill] sm:$0xff] %v7348_v20  ;;  %v7365_v20 = vmul.f32 %v4514_v9, %v1885_v51  ;;  %4531 = vrsqrt.f32 %v1646_v53  ;;  %v4520_v9 = vpop.eup %4519 }
 0x220   :  { %v11656_v16 = vsub.f32 %v11654_v21, %v11655_v11  ;;  %v11659_v49 = vld [vmem:[#allocation90_spill] sm:$0xff]  ;;  %v11661_v35 = vld [vmem:[#allocation131_spill] sm:$0xff]  ;;  %v11664_v11 = vld [vmem:[#allocation136_spill] sm:$0xff]  ;;  %11665 = vst [vmem:[#allocation128_spill] sm:$0xff] %v7357_v43  ;;  %2388 = vrot.lane.b32.xlu0 %v2130_v38, %s5030_s23  ;;  %v7371_v30 = vmul.f32 %v4516_v24, %v1886_v62  ;;  %v1526_v41 = vmax.f32 %v1402_v26, 0.0  ;;  %v7393_v53 = vmul.f32 %v7315_v13, %v7315_v13 }
 0x221   :  { %v7351_v48 = vmul.f32 0.020408163, %v11659_v49  ;;  %v11662_v39 = vld [vmem:[#allocation130_spill] sm:$0xff]  ;;  %v1647_v59 = vadd.f32 1e-05, %v1523_v23  ;;  %v11666_v17 = vld [vmem:[#allocation28_spill] sm:$0xff]  ;;  %v7383_v62 = vpop.xlane.xlu1 %858 }
 0x222   :  { %v1524_v28 = vmax.f32 %v11656_v16, 0.0  ;;  %v11663_v4 = vsub.f32 %v11661_v35, %v11662_v39  ;;  %v1157_v16 = vmul.f32 0.020408163, %v11664_v11  ;;  %v2131_v49 = vmul.f32 %v7328_v29, %v11666_v17  ;;  %11667 = vst [vmem:[#allocation126_spill] sm:$0xff] %v7365_v20  ;;  %v11669_v11 = vld [vmem:[#allocation32_spill] sm:$0xff]  ;;  %11670 = vst [vmem:[#allocation134_spill] sm:$0xff] %v7371_v30 }
 0x223   :  { %11660 = vst [vmem:[#allocation25_spill] sm:$0xff] %v7351_v48  ;;  %v1403_v39 = vsub.f32 %v1155_v57, %v6777_v33  ;;  %v2132_v43 = vmul.f32 %v7333_v32, %v11669_v11  ;;  %v1887_v23 = vld [vmem:[%s10973_s1 + $0x78] sm:$0xff]  ;;  %v1404_v17 = vsub.f32 %v1156_v37, %v6813_v22  ;;  %v7379_v33 = vmul.f32 %v7312_v63, %v7312_v63  ;;  %v11671_v51 = vld [vmem:[#allocation156_spill] sm:$0xff]  ;;  %v11672_v11 = vld [vmem:[#allocation138_spill] sm:$0xff]  ;;  %v7386_v32 = vpop.xlane.xlu0 %855 }
 0x224   :  { %v1525_v21 = vmax.f32 %v11663_v4, 0.0  ;;  %v11668_v4 = vld [vmem:[#allocation139_spill] sm:$0xff]  ;;  %v1648_v38 = vadd.f32 1e-05, %v1524_v28  ;;  %v1159_v24 = vmul.f32 0.020408163, %v11672_v11  ;;  %2390 = vrot.lane.b32.xlu1 %v2131_v49, %s5030_s23  ;;  %4533 = vrsqrt.f32 %v1647_v59 }
 0x225   :  { %v1158_v35 = vmul.f32 0.020408163, %v11668_v4  ;;  %v1405_v4 = vsub.f32 %v1157_v16, %v11671_v51  ;;  %v1888_v22 = vld [vmem:[%s10973_s1 + $0x80] sm:$0xff]  ;;  %11673 = vst [vmem:[#allocation29_spill] sm:$0xff] %v7393_v53  ;;  %2392 = vrot.lane.b32.xlu0 %v2132_v43, %s5030_s23  ;;  %v7398_v37 = vmul.f32 %v4518_v40, %v1887_v23  ;;  %v1527_v16 = vmax.f32 %v1403_v39, 0.0  ;;  %v11676_v51 = vld [vmem:[#allocation141_spill] sm:$0xff] }
 0x226   :  { %v1649_v57 = vadd.f32 1e-05, %v1525_v21  ;;  %v11674_v28 = vld [vmem:[#allocation30_spill] sm:$0xff]  ;;  %v4522_v21 = vpop.eup %4521  ;;  %v1160_v11 = vmul.f32 0.020408163, %v11676_v51  ;;  %v11677_v29 = vld [vmem:[#allocation33_spill] sm:$0xff]  ;;  %4535 = vrsqrt.f32 %v1648_v38  ;;  %v7407_v53 = vmul.f32 %v4520_v9, %v1888_v22  ;;  %v7411_v51 = vpop.xlane.xlu1 %864 }
 0x227   :  { %v2133_v26 = vmul.f32 %v7365_v20, %v11674_v28  ;;  %11675 = vst [vmem:[#allocation133_spill] sm:$0xff] %v7398_v37  ;;  %v1406_v49 = vsub.f32 %v1158_v35, %v6821_v44  ;;  %v2134_v63 = vmul.f32 %v7371_v30, %v11677_v29  ;;  %v1889_v59 = vld [vmem:[%s10973_s1 + $0x88] sm:$0xff]  ;;  %v1650_v43 = vadd.f32 1e-05, %v1526_v41  ;;  %v4524_v40 = vpop.eup %4523  ;;  %v11680_v44 = vld [vmem:[#allocation140_spill] sm:$0xff]  ;;  %11681 = vst [vmem:[#allocation137_spill] sm:$0xff] %v7411_v51  ;;  %v7414_v29 = vpop.xlane.xlu0 %861 }
 0x228   :  { %v1528_v13 = vmax.f32 %v1404_v17, 0.0  ;;  %11678 = vst [vmem:[#allocation132_spill] sm:$0xff] %v7407_v53  ;;  %4537 = vrsqrt.f32 %v1649_v57  ;;  %v1529_v23 = vmax.f32 %v1405_v4, 0.0  ;;  %v11679_v39 = vld [vmem:[#allocation159_spill] sm:$0xff]  ;;  %v1161_v35 = vmul.f32 0.020408163, %v11680_v44  ;;  %v4526_v22 = vpop.eup %4525 }
 0x229   :  { %v1407_v28 = vsub.f32 %v1159_v24, %v11679_v39  ;;  %2394 = vrot.lane.b32.xlu1 %v2133_v26, %s5030_s23  ;;  %11682 = vst [vmem:[#allocation90_spill] sm:$0xff] %v7414_v29  ;;  %v1890_v38 = vld [vmem:[%s10973_s1 + $0x90] sm:$0xff]  ;;  %v7421_v41 = vmul.f32 %v7351_v48, %v7351_v48  ;;  %v11684_v17 = vld [vmem:[#allocation91_spill] sm:$0xff]  ;;  %2396 = vrot.lane.b32.xlu0 %v2134_v63, %s5030_s23  ;;  %v1651_v26 = vadd.f32 1e-05, %v1527_v16  ;;  %v1530_v39 = vmax.f32 %v1406_v49, 0.0 }
 0x22a   :  { %v7424_v9 = vmul.f32 0.020408163, %v11684_v17  ;;  %v11686_v57 = vld [vmem:[#allocation143_spill] sm:$0xff]  ;;  %v7428_v24 = vmul.f32 %v4522_v21, %v1889_v59  ;;  %v11688_v44 = vld [vmem:[#allocation161_spill] sm:$0xff]  ;;  %v4528_v17 = vpop.eup %4527  ;;  %4539 = vrsqrt.f32 %v1650_v43  ;;  %v7438_v21 = vmul.f32 %v4524_v40, %v1890_v38  ;;  %v11692_v59 = vld [vmem:[#allocation92_spill] sm:$0xff] }
 0x22b   :  { %11683 = vst [vmem:[#allocation131_spill] sm:$0xff] %v7421_v41  ;;  %v1162_v4 = vmul.f32 0.020408163, %v11686_v57  ;;  %v1408_v30 = vsub.f32 %v1160_v11, %v11688_v44  ;;  %v11689_v20 = vld [vmem:[#allocation31_spill] sm:$0xff]  ;;  %v1891_v48 = vld [vmem:[%s10973_s1 + $0x98] sm:$0xff]  ;;  %v1531_v11 = vmax.f32 %v1407_v28, 0.0  ;;  %4541 = vrsqrt.f32 %v1651_v26 }
 0x22c   :  { %11685 = vst [vmem:[#allocation130_spill] sm:$0xff] %v7424_v9  ;;  %11687 = vst [vmem:[#allocation136_spill] sm:$0xff] %v7428_v24  ;;  %v2135_v51 = vmul.f32 %v7398_v37, %v11689_v20  ;;  %v1652_v41 = vadd.f32 1e-05, %v1528_v13  ;;  %v11690_v57 = vld [vmem:[#allocation37_spill] sm:$0xff]  ;;  %v11694_v44 = vld [vmem:[#allocation160_spill] sm:$0xff]  ;;  %v7444_v20 = vpop.xlane.xlu1 %870  ;;  %v7447_v37 = vpop.xlane.xlu0 %867 }
 0x22d   :  { %v2136_v63 = vmul.f32 %v7407_v53, %v11690_v57  ;;  %11691 = vst [vmem:[#allocation28_spill] sm:$0xff] %v7438_v21  ;;  %v7441_v16 = vmul.f32 0.020408163, %v11692_v59  ;;  %v1653_v49 = vadd.f32 1e-05, %v1529_v23  ;;  %v1409_v29 = vsub.f32 %v1161_v35, %v11694_v44  ;;  %11695 = vst [vmem:[#allocation32_spill] sm:$0xff] %v7444_v20  ;;  %v4530_v59 = vpop.eup %4529 }
 0x22e   :  { %2398 = vrot.lane.b32.xlu1 %v2135_v51, %s5030_s23  ;;  %11696 = vst [vmem:[#allocation156_spill] sm:$0xff] %v7447_v37  ;;  %v1892_v13 = vld [vmem:[%s10973_s1 + $0xa0] sm:$0xff]  ;;  %v11698_v38 = vld [vmem:[#allocation163_spill] sm:$0xff]  ;;  %v7457_v35 = vmul.f32 %v4526_v22, %v1891_v48  ;;  %v1654_v51 = vadd.f32 1e-05, %v1530_v39  ;;  %v1532_v44 = vmax.f32 %v1408_v30, 0.0  ;;  %4543 = vrsqrt.f32 %v1652_v41  ;;  %v4532_v22 = vpop.eup %4531 }
 0x22f   :  { %11693 = vst [vmem:[#allocation139_spill] sm:$0xff] %v7441_v16  ;;  %v11697_v43 = vld [vmem:[#allocation142_spill] sm:$0xff]  ;;  %v1410_v57 = vsub.f32 %v1162_v4, %v11698_v38  ;;  %2400 = vrot.lane.b32.xlu0 %v2136_v63, %s5030_s23  ;;  %v11699_v23 = vld [vmem:[#allocation35_spill] sm:$0xff]  ;;  %v11701_v53 = vld [vmem:[#allocation145_spill] sm:$0xff]  ;;  %v7465_v4 = vmul.f32 %v7424_v9, %v7424_v9  ;;  %v7469_v48 = vmul.f32 %v4528_v17, %v1892_v13  ;;  %4545 = vrsqrt.f32 %v1653_v49 }
 0x230   :  { %v1163_v40 = vmul.f32 0.020408163, %v11697_v43  ;;  %v2137_v28 = vmul.f32 %v7428_v24, %v11699_v23  ;;  %11700 = vst [vmem:[#allocation138_spill] sm:$0xff] %v7457_v35  ;;  %v1164_v20 = vmul.f32 0.020408163, %v11701_v53  ;;  %v1893_v37 = vld [vmem:[%s10973_s1 + $0xa8] sm:$0xff]  ;;  %v7472_v38 = vpop.xlane.xlu1 %876  ;;  %v7475_v23 = vpop.xlane.xlu0 %873  ;;  %4547 = vrsqrt.f32 %v1654_v51 }
 0x231   :  { %11702 = vst [vmem:[#allocation30_spill] sm:$0xff] %v7465_v4  ;;  %v11703_v63 = vld [vmem:[#allocation40_spill] sm:$0xff]  ;;  %11704 = vst [vmem:[#allocation141_spill] sm:$0xff] %v7469_v48  ;;  %v1655_v26 = vadd.f32 1e-05, %v1531_v11  ;;  %v1533_v30 = vmax.f32 %v1409_v29, 0.0  ;;  %v7484_v11 = vmul.f32 %v4530_v59, %v1893_v37  ;;  %v4534_v13 = vpop.eup %4533 }
 0x232   :  { %v2138_v43 = vmul.f32 %v7438_v21, %v11703_v63  ;;  %v11705_v39 = vld [vmem:[#allocation144_spill] sm:$0xff]  ;;  %11706 = vst [vmem:[#allocation33_spill] sm:$0xff] %v7472_v38  ;;  %2402 = vrot.lane.b32.xlu1 %v2137_v28, %s5030_s23  ;;  %11707 = vst [vmem:[#allocation159_spill] sm:$0xff] %v7475_v23  ;;  %v11708_v24 = vld [vmem:[#allocation162_spill] sm:$0xff]  ;;  %v1534_v17 = vmax.f32 %v1410_v57, 0.0  ;;  %v1412_v28 = vsub.f32 %v1164_v20, %v6884_v36 }
 0x233   :  { %v1165_v53 = vmul.f32 0.020408163, %v11705_v39  ;;  %v1894_v41 = vld [vmem:[%s10973_s1 + $0xb0] sm:$0xff]  ;;  %v1411_v63 = vsub.f32 %v1163_v40, %v11708_v24  ;;  %v11709_v49 = vld [vmem:[#allocation38_spill] sm:$0xff]  ;;  %11710 = vst [vmem:[#allocation140_spill] sm:$0xff] %v7484_v11  ;;  %v11711_v21 = vld [vmem:[#allocation147_spill] sm:$0xff]  ;;  %v7490_v38 = vmul.f32 %v7441_v16, %v7441_v16  ;;  %v4536_v59 = vpop.eup %4535  ;;  %4549 = vrsqrt.f32 %v1655_v26 }
 0x234   :  { %2404 = vrot.lane.b32.xlu0 %v2138_v43, %s5030_s23  ;;  %v2139_v29 = vmul.f32 %v7457_v35, %v11709_v49  ;;  %v1656_v39 = vadd.f32 1e-05, %v1532_v44  ;;  %v1166_v9 = vmul.f32 0.020408163, %v11711_v21  ;;  %v11712_v24 = vld [vmem:[#allocation93_spill] sm:$0xff]  ;;  %v11714_v57 = vld [vmem:[#allocation47_spill] sm:$0xff]  ;;  %v7497_v49 = vmul.f32 %v4532_v22, %v1894_v41  ;;  %v7506_v35 = vpop.xlane.xlu1 %882 }
 0x235   :  { %v7493_v40 = vmul.f32 0.020408163, %v11712_v24  ;;  %v2140_v43 = vmul.f32 %v7469_v48, %v11714_v57  ;;  %v1895_v37 = vld [vmem:[%s10973_s1 + $0xb8] sm:$0xff]  ;;  %v11716_v36 = vld [vmem:[#allocation94_spill] sm:$0xff]  ;;  %v1657_v21 = vadd.f32 1e-05, %v1533_v30  ;;  %v7509_v24 = vpop.xlane.xlu0 %879  ;;  %v4538_v41 = vpop.eup %4537 }
 0x236   :  { %11715 = vst [vmem:[#allocation143_spill] sm:$0xff] %v7497_v49  ;;  %v7503_v20 = vmul.f32 0.020408163, %v11716_v36  ;;  %v11718_v51 = vld [vmem:[#allocation166_spill] sm:$0xff]  ;;  %11719 = vst [vmem:[#allocation31_spill] sm:$0xff] %v7506_v35  ;;  %2406 = vrot.lane.b32.xlu1 %v2139_v29, %s5030_s23  ;;  %v1535_v57 = vmax.f32 %v1411_v63, 0.0  ;;  %4551 = vrsqrt.f32 %v1656_v39  ;;  %v7522_v35 = vmul.f32 %v4534_v13, %v1895_v37 }
 0x237   :  { %11713 = vst [vmem:[#allocation91_spill] sm:$0xff] %v7493_v40  ;;  %v1413_v44 = vsub.f32 %v1165_v53, %v11718_v51  ;;  %11720 = vst [vmem:[#allocation37_spill] sm:$0xff] %v7509_v24  ;;  %v1896_v22 = vld [vmem:[%s10973_s1 + $0xc0] sm:$0xff]  ;;  %v1658_v48 = vadd.f32 1e-05, %v1534_v17  ;;  %v1897_v53 = vld [vmem:[%s10973_s1 + $0xc8] sm:$0xff]  ;;  %v1414_v51 = vsub.f32 %v1166_v9, %v6910_v34  ;;  %v7526_v63 = vmul.f32 %v7493_v40, %v7493_v40 }
 0x238   :  { %11717 = vst [vmem:[#allocation161_spill] sm:$0xff] %v7503_v20  ;;  %v11721_v16 = vld [vmem:[#allocation146_spill] sm:$0xff]  ;;  %2408 = vrot.lane.b32.xlu0 %v2140_v43, %s5030_s23  ;;  %v1536_v29 = vmax.f32 %v1412_v28, 0.0  ;;  %11723 = vst [vmem:[#allocation92_spill] sm:$0xff] %v7522_v35  ;;  %v11725_v43 = vld [vmem:[#allocation49_spill] sm:$0xff]  ;;  %4553 = vrsqrt.f32 %v1657_v21  ;;  %v7536_v34 = vpop.xlane.xlu1 %888  ;;  %v7541_v13 = vmul.f32 %v4538_v41, %v1897_v53  ;;  %v7551_v21 = vmul.f32 %v7503_v20, %v7503_v20 }
 0x239   :  { %v1167_v36 = vmul.f32 0.020408163, %v11721_v16  ;;  %v11722_v26 = vld [vmem:[#allocation46_spill] sm:$0xff]  ;;  %v11724_v16 = vld [vmem:[#allocation149_spill] sm:$0xff]  ;;  %v2142_v24 = vmul.f32 %v7497_v49, %v11725_v43  ;;  %v11727_v4 = vld [vmem:[#allocation95_spill] sm:$0xff]  ;;  %v1537_v39 = vmax.f32 %v1413_v44, 0.0  ;;  %v7539_v9 = vpop.xlane.xlu0 %885  ;;  %4555 = vrsqrt.f32 %v1658_v48 }
 0x23a   :  { %v2141_v30 = vmul.f32 %v7484_v11, %v11722_v26  ;;  %v1168_v17 = vmul.f32 0.020408163, %v11724_v16  ;;  %v7531_v26 = vmul.f32 %v4536_v59, %v1896_v22  ;;  %v4540_v11 = vpop.eup %4539  ;;  %v7534_v23 = vmul.f32 0.020408163, %v11727_v4  ;;  %11729 = vst [vmem:[#allocation163_spill] sm:$0xff] %v7541_v13  ;;  %v1898_v28 = vld [vmem:[%s10973_s1 + $0xd0] sm:$0xff] }
 0x23b   :  { %v1659_v37 = vadd.f32 1e-05, %v1535_v57  ;;  %v1415_v59 = vsub.f32 %v1167_v36, %v6906_v19  ;;  %v11730_v4 = vld [vmem:[#allocation148_spill] sm:$0xff]  ;;  %v1660_v44 = vadd.f32 1e-05, %v1536_v29  ;;  %v4542_v16 = vpop.eup %4541  ;;  %v11732_v57 = vld [vmem:[#allocation151_spill] sm:$0xff]  ;;  %v7559_v36 = vmul.f32 %v4540_v11, %v1898_v28 }
 0x23c   :  { %11726 = vst [vmem:[#allocation160_spill] sm:$0xff] %v7531_v26  ;;  %11728 = vst [vmem:[#allocation142_spill] sm:$0xff] %v7534_v23  ;;  %2410 = vrot.lane.b32.xlu1 %v2141_v30, %s5030_s23  ;;  %v1169_v22 = vmul.f32 0.020408163, %v11730_v4  ;;  %2412 = vrot.lane.b32.xlu0 %v2142_v24, %s5030_s23  ;;  %v1538_v30 = vmax.f32 %v1414_v51, 0.0  ;;  %v11731_v41 = vld [vmem:[#allocation48_spill] sm:$0xff]  ;;  %v1416_v43 = vsub.f32 %v1168_v17, %v6927_v42  ;;  %v4544_v4 = vpop.eup %4543  ;;  %v7571_v17 = vpop.xlane.xlu1 %894 }
 0x23d   :  { %v2143_v53 = vmul.f32 %v7522_v35, %v11731_v41  ;;  %v1170_v48 = vmul.f32 0.020408163, %v11732_v57  ;;  %v11733_v49 = vld [vmem:[#allocation51_spill] sm:$0xff]  ;;  %11734 = vst [vmem:[#allocation35_spill] sm:$0xff] %v7559_v36  ;;  %v1899_v24 = vld [vmem:[%s10973_s1 + $0xd8] sm:$0xff]  ;;  %v7566_v29 = vmul.f32 %v7534_v23, %v7534_v23  ;;  %v11735_v51 = vld [vmem:[#allocation96_spill] sm:$0xff]  ;;  %4557 = vrsqrt.f32 %v1659_v37 }
 0x23e   :  { %v2144_v19 = vmul.f32 %v7531_v26, %v11733_v49  ;;  %v7569_v41 = vmul.f32 0.020408163, %v11735_v51  ;;  %v1661_v42 = vadd.f32 1e-05, %v1537_v39  ;;  %11737 = vst [vmem:[#allocation40_spill] sm:$0xff] %v7571_v17  ;;  %v7574_v49 = vpop.xlane.xlu0 %891  ;;  %v11739_v11 = vld [vmem:[#allocation50_spill] sm:$0xff]  ;;  %v4546_v26 = vpop.eup %4545  ;;  %v1417_v51 = vsub.f32 %v1169_v22, %v6914_v58 }
 0x23f   :  { %11738 = vst [vmem:[#allocation144_spill] sm:$0xff] %v7574_v49  ;;  %v2145_v28 = vmul.f32 %v7541_v13, %v11739_v11  ;;  %v1900_v57 = vld [vmem:[%s10973_s1 + $0xe0] sm:$0xff]  ;;  %v1539_v35 = vmax.f32 %v1415_v59, 0.0  ;;  %4559 = vrsqrt.f32 %v1660_v44  ;;  %v1662_v40 = vadd.f32 1e-05, %v1538_v30  ;;  %v11741_v11 = vld [vmem:[#allocation153_spill] sm:$0xff]  ;;  %v4548_v17 = vpop.eup %4547 }
 0x240   :  { %11736 = vst [vmem:[#allocation145_spill] sm:$0xff] %v7569_v41  ;;  %2414 = vrot.lane.b32.xlu1 %v2143_v53, %s5030_s23  ;;  %v11740_v23 = vld [vmem:[#allocation150_spill] sm:$0xff]  ;;  %2416 = vrot.lane.b32.xlu0 %v2144_v19, %s5030_s23  ;;  %v1901_v53 = vld [vmem:[%s10973_s1 + $0xe8] sm:$0xff]  ;;  %v1172_v13 = vmul.f32 0.020408163, %v11741_v11  ;;  %v7588_v20 = vmul.f32 %v4542_v16, %v1899_v24  ;;  %v1540_v49 = vmax.f32 %v1416_v43, 0.0  ;;  %v1418_v37 = vsub.f32 %v1170_v48, %v6938_v27  ;;  %v7605_v43 = vpop.xlane.xlu1 %900  ;;  %v4550_v19 = vpop.eup %4549 }
 0x241   :  { %v1171_v39 = vmul.f32 0.020408163, %v11740_v23  ;;  %v11743_v59 = vld [vmem:[#allocation53_spill] sm:$0xff]  ;;  %v7593_v23 = vmul.f32 %v4544_v4, %v1900_v57  ;;  %v1902_v22 = vld [vmem:[%s10973_s1 + $0xf0] sm:$0xff]  ;;  %v7600_v44 = vmul.f32 %v7569_v41, %v7569_v41  ;;  %4561 = vrsqrt.f32 %v1661_v42  ;;  %v1904_v41 = vld [vmem:[%s10973_s1 + $0x100] sm:$0xff] }
 0x242   :  { %11742 = vst [vmem:[#allocation162_spill] sm:$0xff] %v7588_v20  ;;  %v2146_v58 = vmul.f32 %v7559_v36, %v11743_v59  ;;  %v11745_v30 = vld [vmem:[#allocation97_spill] sm:$0xff]  ;;  %v7608_v27 = vpop.xlane.xlu0 %897  ;;  %v7610_v48 = vmul.f32 %v4546_v26, %v1901_v53  ;;  %v1663_v24 = vadd.f32 1e-05, %v1539_v35  ;;  %v1541_v4 = vmax.f32 %v1417_v51, 0.0  ;;  %v11749_v11 = vld [vmem:[#allocation152_spill] sm:$0xff] }
 0x243   :  { %11744 = vst [vmem:[#allocation38_spill] sm:$0xff] %v7593_v23  ;;  %v7603_v16 = vmul.f32 0.020408163, %v11745_v30  ;;  %11747 = vst [vmem:[#allocation93_spill] sm:$0xff] %v7608_v27  ;;  %v1419_v57 = vsub.f32 %v1171_v39, %v6934_v52  ;;  %v1173_v59 = vmul.f32 0.020408163, %v11749_v11  ;;  %4563 = vrsqrt.f32 %v1662_v40  ;;  %v4552_v35 = vpop.eup %4551 }
 0x244   :  { %2418 = vrot.lane.b32.xlu1 %v2145_v28, %s5030_s23  ;;  %11748 = vst [vmem:[#allocation47_spill] sm:$0xff] %v7610_v48  ;;  %2420 = vrot.lane.b32.xlu0 %v2146_v58, %s5030_s23  ;;  %v1903_v42 = vld [vmem:[%s10973_s1 + $0xf8] sm:$0xff]  ;;  %v1420_v28 = vsub.f32 %v1172_v13, %v6953_v3  ;;  %v11750_v30 = vld [vmem:[#allocation52_spill] sm:$0xff]  ;;  %v7621_v53 = vmul.f32 %v4548_v17, %v1902_v22  ;;  %v1664_v51 = vadd.f32 1e-05, %v1540_v49  ;;  %v1542_v36 = vmax.f32 %v1418_v37, 0.0  ;;  %v7636_v17 = vpop.xlane.xlu1 %906 }
 0x245   :  { %11746 = vst [vmem:[#allocation147_spill] sm:$0xff] %v7603_v16  ;;  %v2147_v26 = vmul.f32 %v7588_v20, %v11750_v30  ;;  %v11752_v52 = vld [vmem:[#allocation155_spill] sm:$0xff]  ;;  %v7631_v3 = vmul.f32 %v7603_v16, %v7603_v16  ;;  %v11754_v40 = vld [vmem:[#allocation98_spill] sm:$0xff]  ;;  %11756 = vst [vmem:[#allocation146_spill] sm:$0xff] %v7636_v17  ;;  %v7643_v30 = vmul.f32 %v4550_v19, %v1903_v42  ;;  %4565 = vrsqrt.f32 %v1663_v24 }
 0x246   :  { %11751 = vst [vmem:[#allocation94_spill] sm:$0xff] %v7621_v53  ;;  %v1174_v39 = vmul.f32 0.020408163, %v11752_v52  ;;  %v11753_v11 = vld [vmem:[#allocation55_spill] sm:$0xff]  ;;  %v7634_v13 = vmul.f32 0.020408163, %v11754_v40  ;;  %v7639_v49 = vpop.xlane.xlu0 %903  ;;  %v4554_v52 = vpop.eup %4553  ;;  %v1421_v20 = vsub.f32 %v1173_v59, %v6942_v47  ;;  %v7653_v42 = vmul.f32 %v4552_v35, %v1904_v41 }
 0x247   :  { %v2148_v58 = vmul.f32 %v7593_v23, %v11753_v11  ;;  %11757 = vst [vmem:[#allocation46_spill] sm:$0xff] %v7639_v49  ;;  %v11758_v37 = vld [vmem:[#allocation54_spill] sm:$0xff]  ;;  %11759 = vst [vmem:[#allocation149_spill] sm:$0xff] %v7643_v30  ;;  %v1665_v11 = vadd.f32 1e-05, %v1541_v4  ;;  %v1543_v23 = vmax.f32 %v1419_v57, 0.0  ;;  %4567 = vrsqrt.f32 %v1664_v51 }
 0x248   :  { %11755 = vst [vmem:[#allocation166_spill] sm:$0xff] %v7634_v13  ;;  %2422 = vrot.lane.b32.xlu1 %v2147_v26, %s5030_s23  ;;  %v2149_v22 = vmul.f32 %v7610_v48, %v11758_v37  ;;  %v1905_v40 = vld [vmem:[%s10973_s1 + $0x108] sm:$0xff]  ;;  %v4556_v26 = vpop.eup %4555  ;;  %v1544_v16 = vmax.f32 %v1420_v28, 0.0  ;;  %v11760_v17 = vld [vmem:[#allocation154_spill] sm:$0xff]  ;;  %v11761_v27 = vld [vmem:[#allocation57_spill] sm:$0xff]  ;;  %v1422_v4 = vsub.f32 %v1174_v39, %v6979_v15  ;;  %v7662_v28 = vmul.f32 %v7634_v13, %v7634_v13  ;;  %v7668_v35 = vpop.xlane.xlu1 %912 }
 0x249   :  { %2424 = vrot.lane.b32.xlu0 %v2148_v58, %s5030_s23  ;;  %v1175_v49 = vmul.f32 0.020408163, %v11760_v17  ;;  %v2150_v19 = vmul.f32 %v7621_v53, %v11761_v27  ;;  %11762 = vst [vmem:[#allocation49_spill] sm:$0xff] %v7653_v42  ;;  %v1906_v24 = vld [vmem:[%s10973_s1 + $0x110] sm:$0xff]  ;;  %v1666_v47 = vadd.f32 1e-05, %v1542_v36  ;;  %v7673_v36 = vmul.f32 %v4554_v52, %v1905_v40 }
 0x24a   :  { %v11763_v57 = vld [vmem:[#allocation158_spill] sm:$0xff]  ;;  %v11764_v58 = vld [vmem:[#allocation99_spill] sm:$0xff]  ;;  %v11766_v27 = vld [vmem:[#allocation157_spill] sm:$0xff]  ;;  %v7671_v37 = vpop.xlane.xlu0 %909  ;;  %4569 = vrsqrt.f32 %v1665_v11  ;;  %v1667_v15 = vadd.f32 1e-05, %v1543_v23  ;;  %v1545_v51 = vmax.f32 %v1421_v20, 0.0  ;;  %v7676_v39 = vmul.f32 %v4556_v26, %v1906_v24 }
 0x24b   :  { %v1176_v59 = vmul.f32 0.020408163, %v11763_v57  ;;  %v7665_v17 = vmul.f32 0.020408163, %v11764_v58  ;;  %v1177_v41 = vmul.f32 0.020408163, %v11766_v27  ;;  %v4558_v57 = vpop.eup %4557  ;;  %v1423_v53 = vsub.f32 %v1175_v49, %v6966_v54 }
 0x24c   :  { %2426 = vrot.lane.b32.xlu1 %v2149_v22, %s5030_s23  ;;  %11767 = vst [vmem:[#allocation148_spill] sm:$0xff] %v7673_v36  ;;  %11768 = vst [vmem:[#allocation48_spill] sm:$0xff] %v7676_v39  ;;  %v1668_v58 = vadd.f32 1e-05, %v1544_v16  ;;  %v11769_v27 = vld [vmem:[#allocation56_spill] sm:$0xff]  ;;  %v11770_v13 = vld [vmem:[#allocation59_spill] sm:$0xff]  ;;  %v4560_v23 = vpop.eup %4559  ;;  %4571 = vrsqrt.f32 %v1666_v47 }
 0x24d   :  { %11765 = vst [vmem:[#allocation95_spill] sm:$0xff] %v7665_v17  ;;  %2428 = vrot.lane.b32.xlu0 %v2150_v19, %s5030_s23  ;;  %v2151_v48 = vmul.f32 %v7643_v30, %v11769_v27  ;;  %v2152_v22 = vmul.f32 %v7653_v42, %v11770_v13  ;;  %v1907_v52 = vld [vmem:[%s10973_s1 + $0x118] sm:$0xff]  ;;  %v1546_v20 = vmax.f32 %v1422_v4, 0.0  ;;  %v1424_v11 = vsub.f32 %v1176_v59, %v7000_v56  ;;  %v1908_v54 = vld [vmem:[%s10973_s1 + $0x120] sm:$0xff]  ;;  %v11772_v16 = vld [vmem:[#allocation100_spill] sm:$0xff]  ;;  %v7698_v27 = vpop.xlane.xlu1 %918 }
 0x24e   :  { %v11771_v40 = vld [vmem:[#allocation165_spill] sm:$0xff]  ;;  %v7692_v49 = vmul.f32 0.020408163, %v11772_v16  ;;  %v1425_v24 = vsub.f32 %v1177_v41, %v6996_v61  ;;  %11776 = vst [vmem:[#allocation96_spill] sm:$0xff] %v7698_v27  ;;  %v7701_v47 = vpop.xlane.xlu0 %915  ;;  %v11777_v56 = vld [vmem:[#allocation58_spill] sm:$0xff]  ;;  %v4562_v59 = vpop.eup %4561  ;;  %4573 = vrsqrt.f32 %v1667_v15  ;;  %v7708_v42 = vmul.f32 %v4558_v57, %v1907_v52  ;;  %v11780_v41 = vld [vmem:[#allocation164_spill] sm:$0xff] }
 0x24f   :  { %v1178_v26 = vmul.f32 0.020408163, %v11771_v40  ;;  %v11774_v19 = vld [vmem:[#allocation101_spill] sm:$0xff]  ;;  %v2153_v4 = vmul.f32 %v7673_v36, %v11777_v56  ;;  %v1669_v40 = vadd.f32 1e-05, %v1545_v51  ;;  %4575 = vrsqrt.f32 %v1668_v58  ;;  %v1909_v56 = vld [vmem:[%s10973_s1 + $0x128] sm:$0xff] }
 0x250   :  { %11773 = vst [vmem:[#allocation151_spill] sm:$0xff] %v7692_v49  ;;  %v7695_v13 = vmul.f32 0.020408163, %v11774_v19  ;;  %2430 = vrot.lane.b32.xlu1 %v2151_v48, %s5030_s23  ;;  %v11778_v16 = vld [vmem:[#allocation61_spill] sm:$0xff]  ;;  %11779 = vst [vmem:[#allocation50_spill] sm:$0xff] %v7708_v42  ;;  %v1547_v61 = vmax.f32 %v1423_v53, 0.0  ;;  %v7711_v48 = vmul.f32 %v4560_v23, %v1908_v54  ;;  %v4564_v36 = vpop.eup %4563  ;;  %v7723_v53 = vmul.f32 %v7665_v17, %v7665_v17 }
 0x251   :  { %2432 = vrot.lane.b32.xlu0 %v2152_v22, %s5030_s23  ;;  %v2154_v19 = vmul.f32 %v7676_v39, %v11778_v16  ;;  %v1179_v30 = vmul.f32 0.020408163, %v11780_v41  ;;  %v1670_v15 = vadd.f32 1e-05, %v1546_v20  ;;  %v1548_v51 = vmax.f32 %v1424_v11, 0.0  ;;  %v1910_v57 = vld [vmem:[%s10973_s1 + $0x130] sm:$0xff]  ;;  %v7729_v20 = vpop.xlane.xlu1 %924 }
 0x252   :  { %11775 = vst [vmem:[#allocation51_spill] sm:$0xff] %v7695_v13  ;;  %11781 = vst [vmem:[#allocation150_spill] sm:$0xff] %v7711_v48  ;;  %v1426_v22 = vsub.f32 %v1178_v26, %v7020_v6  ;;  %v1180_v27 = vmul.f32 0.020408163, %v6900_v7  ;;  %v11782_v58 = vld [vmem:[#allocation102_spill] sm:$0xff]  ;;  %v1549_v23 = vmax.f32 %v1425_v24, 0.0  ;;  %v7732_v6 = vpop.xlane.xlu0 %921  ;;  %4577 = vrsqrt.f32 %v1669_v40 }
 0x253   :  { %v7726_v52 = vmul.f32 0.020408163, %v11782_v58  ;;  %v1181_v54 = vmul.f32 0.020408163, %v6898_v50  ;;  %v11784_v7 = vld [vmem:[#allocation168_spill] sm:$0xff]  ;;  %v7738_v41 = vmul.f32 %v4562_v59, %v1909_v56  ;;  %v4566_v58 = vpop.eup %4565  ;;  %v1427_v50 = vsub.f32 %v1179_v30, %v7004_v31  ;;  %v11787_v39 = vld [vmem:[#allocation63_spill] sm:$0xff] }
 0x254   :  { %2434 = vrot.lane.b32.xlu1 %v2153_v4, %s5030_s23  ;;  %v1182_v11 = vmul.f32 0.020408163, %v11784_v7  ;;  %v11785_v26 = vld [vmem:[#allocation60_spill] sm:$0xff]  ;;  %v1671_v24 = vadd.f32 1e-05, %v1547_v61  ;;  %v2156_v17 = vmul.f32 %v7711_v48, %v11787_v39  ;;  %v7743_v4 = vmul.f32 %v4564_v36, %v1910_v57  ;;  %v1911_v40 = vld [vmem:[%s10973_s1 + $0x138] sm:$0xff]  ;;  %v4568_v59 = vpop.eup %4567 }
 0x255   :  { %11783 = vst [vmem:[#allocation153_spill] sm:$0xff] %v7726_v52  ;;  %2436 = vrot.lane.b32.xlu0 %v2154_v19, %s5030_s23  ;;  %v2155_v16 = vmul.f32 %v7708_v42, %v11785_v26  ;;  %11786 = vst [vmem:[#allocation53_spill] sm:$0xff] %v7738_v41  ;;  %4579 = vrsqrt.f32 %v1670_v15  ;;  %v1672_v19 = vadd.f32 1e-05, %v1548_v51  ;;  %v1550_v7 = vmax.f32 %v1426_v22, 0.0  ;;  %v11789_v39 = vld [vmem:[#allocation167_spill] sm:$0xff]  ;;  %v7755_v56 = vpop.xlane.xlu1 %930 }
 0x256   :  { %11788 = vst [vmem:[#allocation97_spill] sm:$0xff] %v7743_v4  ;;  %v1428_v26 = vsub.f32 %v1180_v27, %v7031_v60  ;;  %v7751_v61 = vmul.f32 %v7692_v49, %v7692_v49  ;;  %v1673_v31 = vadd.f32 1e-05, %v1549_v23  ;;  %v1429_v30 = vsub.f32 %v1181_v54, %v7027_v45  ;;  %v7758_v57 = vpop.xlane.xlu0 %927  ;;  %v1912_v60 = vld [vmem:[%s10973_s1 + $0x140] sm:$0xff]  ;;  %v1913_v42 = vld [vmem:[%s10973_s1 + $0x148] sm:$0xff] }
 0x257   :  { %v1183_v36 = vmul.f32 0.020408163, %v11789_v39  ;;  %v7765_v27 = vmul.f32 %v7695_v13, %v7695_v13  ;;  %v1430_v15 = vsub.f32 %v1182_v11, %v7054_v1  ;;  %v11790_v45 = vld [vmem:[#allocation62_spill] sm:$0xff]  ;;  %v7771_v22 = vmul.f32 %v4566_v58, %v1911_v40  ;;  %v4570_v23 = vpop.eup %4569  ;;  %v11792_v39 = vld [vmem:[#allocation65_spill] sm:$0xff] }
 0x258   :  { %2438 = vrot.lane.b32.xlu1 %v2155_v16, %s5030_s23  ;;  %v2157_v51 = vmul.f32 %v7738_v41, %v11790_v45  ;;  %4581 = vrsqrt.f32 %v1671_v24  ;;  %v1551_v54 = vmax.f32 %v1427_v50, 0.0  ;;  %v1184_v16 = vmul.f32 0.020408163, %v6992_v25 }
 0x259   :  { %2440 = vrot.lane.b32.xlu0 %v2156_v17, %s5030_s23  ;;  %11791 = vst [vmem:[#allocation152_spill] sm:$0xff] %v7771_v22  ;;  %v2158_v48 = vmul.f32 %v7743_v4, %v11792_v39  ;;  %4583 = vrsqrt.f32 %v1672_v19  ;;  %v1674_v1 = vadd.f32 1e-05, %v1550_v7  ;;  %v1552_v17 = vmax.f32 %v1428_v26, 0.0  ;;  %v4572_v45 = vpop.eup %4571  ;;  %v7783_v25 = vpop.xlane.xlu1 %936  ;;  %v1914_v19 = vld [vmem:[%s10973_s1 + $0x150] sm:$0xff] }
 0x25a   :  { %v7779_v11 = vmul.f32 %v4568_v59, %v1912_v60  ;;  %4585 = vrsqrt.f32 %v1673_v31  ;;  %v1553_v58 = vmax.f32 %v1429_v30, 0.0  ;;  %v1431_v24 = vsub.f32 %v1183_v36, %v7042_v5  ;;  %11794 = vst [vmem:[#allocation155_spill] sm:$0xff] %v7783_v25  ;;  %v7786_v40 = vpop.xlane.xlu0 %933  ;;  %v11796_v31 = vld [vmem:[#allocation103_spill] sm:$0xff] }
 0x25b   :  { %v1185_v50 = vmul.f32 0.020408163, %v6990_v14  ;;  %v7793_v7 = vmul.f32 %v7726_v52, %v7726_v52  ;;  %v1554_v26 = vmax.f32 %v1430_v15, 0.0  ;;  %v1186_v59 = vmul.f32 0.020408163, %v7038_v55  ;;  %v4574_v5 = vpop.eup %4573  ;;  %v11799_v15 = vld [vmem:[#allocation67_spill] sm:$0xff] }
 0x25c   :  { %11793 = vst [vmem:[#allocation52_spill] sm:$0xff] %v7779_v11  ;;  %2442 = vrot.lane.b32.xlu1 %v2157_v51, %s5030_s23  ;;  %v7797_v14 = vmul.f32 %v4570_v23, %v1913_v42  ;;  %v7800_v30 = vmul.f32 0.020408163, %v11796_v31  ;;  %v1675_v36 = vadd.f32 1e-05, %v1551_v54  ;;  %v1432_v60 = vsub.f32 %v1184_v16, %v7074_v10  ;;  %v11798_v51 = vld [vmem:[#allocation64_spill] sm:$0xff]  ;;  %v4576_v4 = vpop.eup %4575 }
 0x25d   :  { %2444 = vrot.lane.b32.xlu0 %v2158_v48, %s5030_s23  ;;  %v2159_v39 = vmul.f32 %v7771_v22, %v11798_v51  ;;  %4587 = vrsqrt.f32 %v1674_v1  ;;  %v1676_v41 = vadd.f32 1e-05, %v1552_v17  ;;  %v2160_v55 = vmul.f32 %v7779_v11, %v11799_v15  ;;  %v1915_v42 = vld [vmem:[%s10973_s1 + $0x158] sm:$0xff]  ;;  %v11801_v48 = vld [vmem:[#allocation104_spill] sm:$0xff]  ;;  %v7816_v31 = vpop.xlane.xlu1 %942  ;;  %v1916_v17 = vld [vmem:[%s10973_s1 + $0x160] sm:$0xff] }
 0x25e   :  { %11795 = vst [vmem:[#allocation55_spill] sm:$0xff] %v7797_v14  ;;  %11797 = vst [vmem:[#allocation98_spill] sm:$0xff] %v7800_v30  ;;  %v7807_v13 = vmul.f32 %v4572_v45, %v1914_v19  ;;  %v7813_v23 = vmul.f32 0.020408163, %v11801_v48  ;;  %v1677_v54 = vadd.f32 1e-05, %v1553_v58  ;;  %v1433_v16 = vsub.f32 %v1185_v50, %v7061_v2  ;;  %v7819_v1 = vpop.xlane.xlu0 %939 }
 0x25f   :  { %v1555_v10 = vmax.f32 %v1431_v24, 0.0  ;;  %11803 = vst [vmem:[#allocation57_spill] sm:$0xff] %v7816_v31  ;;  %11804 = vst [vmem:[#allocation158_spill] sm:$0xff] %v7819_v1  ;;  %v1678_v45 = vadd.f32 1e-05, %v1554_v26  ;;  %v1434_v51 = vsub.f32 %v1186_v59, %v7105_v46  ;;  %v11805_v58 = vld [vmem:[#allocation66_spill] sm:$0xff]  ;;  %v4578_v24 = vpop.eup %4577  ;;  %4589 = vrsqrt.f32 %v1675_v36 }
 0x260   :  { %11800 = vst [vmem:[#allocation54_spill] sm:$0xff] %v7807_v13  ;;  %11802 = vst [vmem:[#allocation154_spill] sm:$0xff] %v7813_v23  ;;  %2446 = vrot.lane.b32.xlu1 %v2159_v39, %s5030_s23  ;;  %v1187_v19 = vmul.f32 0.020408163, %v7036_v18  ;;  %v2161_v2 = vmul.f32 %v7797_v14, %v11805_v58  ;;  %v1556_v50 = vmax.f32 %v1432_v60, 0.0  ;;  %v7830_v15 = vmul.f32 %v4574_v5, %v1915_v42  ;;  %v1917_v26 = vld [vmem:[%s10973_s1 + $0x168] sm:$0xff] }
 0x261   :  { %2448 = vrot.lane.b32.xlu0 %v2160_v55, %s5030_s23  ;;  %v1188_v39 = vmul.f32 0.020408163, %v7084_v8  ;;  %v7837_v18 = vmul.f32 %v7800_v30, %v7800_v30  ;;  %4591 = vrsqrt.f32 %v1676_v41  ;;  %v11807_v46 = vld [vmem:[#allocation69_spill] sm:$0xff]  ;;  %v7841_v55 = vmul.f32 %v4576_v4, %v1916_v17  ;;  %v7844_v42 = vpop.xlane.xlu1 %948  ;;  %v1918_v41 = vld [vmem:[%s10973_s1 + $0x170] sm:$0xff] }
 0x262   :  { %11806 = vst [vmem:[#allocation99_spill] sm:$0xff] %v7830_v15  ;;  %v2162_v59 = vmul.f32 %v7807_v13, %v11807_v46  ;;  %v4580_v36 = vpop.eup %4579  ;;  %4593 = vrsqrt.f32 %v1677_v54  ;;  %v1679_v60 = vadd.f32 1e-05, %v1555_v10  ;;  %v1557_v8 = vmax.f32 %v1433_v16, 0.0  ;;  %11809 = vst [vmem:[#allocation56_spill] sm:$0xff] %v7844_v42  ;;  %v7847_v48 = vpop.xlane.xlu0 %945  ;;  %v11811_v58 = vld [vmem:[#allocation180_spill] sm:$0xff] }
 0x263   :  { %11808 = vst [vmem:[#allocation157_spill] sm:$0xff] %v7841_v55  ;;  %v1189_v5 = vmul.f32 0.020408163, %v7082_v0  ;;  %11810 = vst [vmem:[#allocation59_spill] sm:$0xff] %v7847_v48  ;;  %4595 = vrsqrt.f32 %v1678_v45  ;;  %v1435_v4 = vsub.f32 %v1187_v19, %v11811_v58  ;;  %v1558_v17 = vmax.f32 %v1434_v51, 0.0  ;;  %v11813_v0 = vld [vmem:[#allocation185_spill] sm:$0xff] }
 0x264   :  { %2450 = vrot.lane.b32.xlu1 %v2161_v2, %s5030_s23  ;;  %v7854_v54 = vmul.f32 %v4578_v24, %v1917_v26  ;;  %v1680_v10 = vadd.f32 1e-05, %v1556_v50  ;;  %v1436_v16 = vsub.f32 %v1188_v39, %v11813_v0  ;;  %v11814_v46 = vld [vmem:[#allocation190_spill] sm:$0xff]  ;;  %v11815_v2 = vld [vmem:[#allocation68_spill] sm:$0xff]  ;;  %v7862_v22 = vmul.f32 %v7813_v23, %v7813_v23  ;;  %v11816_v45 = vld [vmem:[#allocation105_spill] sm:$0xff] }
 0x265   :  { %2452 = vrot.lane.b32.xlu0 %v2162_v59, %s5030_s23  ;;  %v1190_v13 = vmul.f32 0.020408163, %v11814_v46  ;;  %v2163_v11 = vmul.f32 %v7830_v15, %v11815_v2  ;;  %v4582_v14 = vpop.eup %4581  ;;  %v7865_v19 = vmul.f32 0.020408163, %v11816_v45  ;;  %v11818_v51 = vld [vmem:[#allocation71_spill] sm:$0xff]  ;;  %v7869_v26 = vmul.f32 %v4580_v36, %v1918_v41  ;;  %v1919_v50 = vld [vmem:[%s10973_s1 + $0x178] sm:$0xff]  ;;  %v7878_v15 = vpop.xlane.xlu1 %954 }
 0x266   :  { %11812 = vst [vmem:[#allocation165_spill] sm:$0xff] %v7854_v54  ;;  %v2164_v24 = vmul.f32 %v7841_v55, %v11818_v51  ;;  %v4584_v39 = vpop.eup %4583  ;;  %v11820_v59 = vld [vmem:[#allocation106_spill] sm:$0xff]  ;;  %4597 = vrsqrt.f32 %v1679_v60  ;;  %v1681_v0 = vadd.f32 1e-05, %v1557_v8  ;;  %11823 = vst [vmem:[#allocation61_spill] sm:$0xff] %v7878_v15  ;;  %v7881_v45 = vpop.xlane.xlu0 %951  ;;  %v1559_v51 = vmax.f32 %v1435_v4, 0.0 }
 0x267   :  { %11817 = vst [vmem:[#allocation100_spill] sm:$0xff] %v7865_v19  ;;  %11819 = vst [vmem:[#allocation101_spill] sm:$0xff] %v7869_v26  ;;  %v7875_v58 = vmul.f32 0.020408163, %v11820_v59  ;;  %v11822_v46 = vld [vmem:[#allocation182_spill] sm:$0xff]  ;;  %v4586_v41 = vpop.eup %4585  ;;  %v11825_v30 = vld [vmem:[#allocation189_spill] sm:$0xff]  ;;  %4599 = vrsqrt.f32 %v1680_v10  ;;  %v7894_v15 = vmul.f32 %v4582_v14, %v1919_v50  ;;  %v7898_v4 = vmul.f32 %v7865_v19, %v7865_v19 }
 0x268   :  { %v1437_v2 = vsub.f32 %v1189_v5, %v11822_v46  ;;  %2454 = vrot.lane.b32.xlu1 %v2163_v11, %s5030_s23  ;;  %11824 = vst [vmem:[#allocation164_spill] sm:$0xff] %v7881_v45  ;;  %v1920_v36 = vld [vmem:[%s10973_s1 + $0x180] sm:$0xff]  ;;  %v1682_v55 = vadd.f32 1e-05, %v1558_v17  ;;  %v1191_v59 = vmul.f32 0.020408163, %v11825_v30  ;;  %4601 = vrsqrt.f32 %v1681_v0 }
 0x269   :  { %11821 = vst [vmem:[#allocation58_spill] sm:$0xff] %v7875_v58  ;;  %2456 = vrot.lane.b32.xlu0 %v2164_v24, %s5030_s23  ;;  %v11826_v60 = vld [vmem:[#allocation70_spill] sm:$0xff]  ;;  %v1921_v11 = vld [vmem:[%s10973_s1 + $0x188] sm:$0xff]  ;;  %v1560_v5 = vmax.f32 %v1436_v16, 0.0  ;;  %11828 = vst [vmem:[#allocation102_spill] sm:$0xff] %v7894_v15  ;;  %v7923_v0 = vmul.f32 %v7875_v58, %v7875_v58 }
 0x26a   :  { %v2165_v8 = vmul.f32 %v7854_v54, %v11826_v60  ;;  %v11827_v46 = vld [vmem:[#allocation34_spill] sm:$0xff]  ;;  %v11829_v30 = vld [vmem:[#allocation191_spill] sm:$0xff]  ;;  %v11830_v24 = vld [vmem:[#allocation73_spill] sm:$0xff]  ;;  %v7903_v60 = vmul.f32 %v4584_v39, %v1920_v36  ;;  %v4588_v54 = vpop.eup %4587  ;;  %v1561_v10 = vmax.f32 %v1437_v2, 0.0  ;;  %v7911_v14 = vpop.xlane.xlu0 %957  ;;  %v7913_v16 = vmul.f32 %v4586_v41, %v1921_v11 }
 0x26b   :  { %v1438_v23 = vsub.f32 %v1190_v13, %v11827_v46  ;;  %v1192_v17 = vmul.f32 0.020408163, %v11829_v30  ;;  %v2166_v52 = vmul.f32 %v7869_v26, %v11830_v24  ;;  %v11832_v45 = vld [vmem:[#allocation107_spill] sm:$0xff]  ;;  %v7908_v13 = vpop.xlane.xlu1 %960  ;;  %11835 = vst [vmem:[#allocation167_spill] sm:$0xff] %v7911_v14  ;;  %v1922_v50 = vld [vmem:[%s10973_s1 + $0x190] sm:$0xff]  ;;  %4603 = vrsqrt.f32 %v1682_v55  ;;  %v11837_v36 = vld [vmem:[#allocation186_spill] sm:$0xff] }
 0x26c   :  { %11831 = vst [vmem:[#allocation168_spill] sm:$0xff] %v7903_v60  ;;  %v7906_v42 = vmul.f32 0.020408163, %v11832_v45  ;;  %11834 = vst [vmem:[#allocation63_spill] sm:$0xff] %v7908_v13  ;;  %2458 = vrot.lane.b32.xlu1 %v2165_v8, %s5030_s23  ;;  %v1683_v39 = vadd.f32 1e-05, %v1559_v51  ;;  %v1439_v46 = vsub.f32 %v1191_v59, %v11837_v36  ;;  %v4590_v24 = vpop.eup %4589  ;;  %v7931_v36 = vmul.f32 %v4588_v54, %v1922_v50 }
 0x26d   :  { %11836 = vst [vmem:[#allocation62_spill] sm:$0xff] %v7913_v16  ;;  %v11838_v45 = vld [vmem:[#allocation81_spill] sm:$0xff]  ;;  %2460 = vrot.lane.b32.xlu0 %v2166_v52, %s5030_s23  ;;  %v1684_v2 = vadd.f32 1e-05, %v1560_v5  ;;  %v1562_v8 = vmax.f32 %v1438_v23, 0.0  ;;  %v11839_v41 = vld [vmem:[#allocation72_spill] sm:$0xff] }
 0x26e   :  { %11833 = vst [vmem:[#allocation60_spill] sm:$0xff] %v7906_v42  ;;  %v1193_v30 = vmul.f32 0.020408163, %v11838_v45  ;;  %v2167_v11 = vmul.f32 %v7894_v15, %v11839_v41  ;;  %v11840_v26 = vld [vmem:[#allocation42_spill] sm:$0xff]  ;;  %v11841_v51 = vld [vmem:[#allocation84_spill] sm:$0xff]  ;;  %v11842_v13 = vld [vmem:[#allocation75_spill] sm:$0xff]  ;;  %v4592_v45 = vpop.eup %4591  ;;  %v7938_v23 = vmul.f32 %v7906_v42, %v7906_v42  ;;  %4605 = vrsqrt.f32 %v1683_v39 }
 0x26f   :  { %v1440_v19 = vsub.f32 %v1192_v17, %v11840_v26  ;;  %v1194_v55 = vmul.f32 0.020408163, %v11841_v51  ;;  %v2168_v59 = vmul.f32 %v7903_v60, %v11842_v13  ;;  %11843 = vst [vmem:[#allocation65_spill] sm:$0xff] %v7931_v36  ;;  %v1923_v52 = vld [vmem:[%s10973_s1 + $0x198] sm:$0xff]  ;;  %v11844_v5 = vld [vmem:[#allocation108_spill] sm:$0xff]  ;;  %v7943_v17 = vpop.xlane.xlu1 %966  ;;  %v7946_v13 = vpop.xlane.xlu0 %963  ;;  %v11848_v54 = vld [vmem:[#allocation74_spill] sm:$0xff]  ;;  %4607 = vrsqrt.f32 %v1684_v2 }
 0x270   :  { %v7941_v41 = vmul.f32 0.020408163, %v11844_v5  ;;  %v1685_v26 = vadd.f32 1e-05, %v1561_v10  ;;  %11846 = vst [vmem:[#allocation64_spill] sm:$0xff] %v7943_v17  ;;  %2462 = vrot.lane.b32.xlu1 %v2167_v11, %s5030_s23  ;;  %11847 = vst [vmem:[#allocation67_spill] sm:$0xff] %v7946_v13  ;;  %v2169_v50 = vmul.f32 %v7913_v16, %v11848_v54  ;;  %v4594_v60 = vpop.eup %4593  ;;  %v7960_v14 = vmul.f32 %v4590_v24, %v1923_v52 }
 0x271   :  { %v1924_v51 = vld [vmem:[%s10973_s1 + $0x1a0] sm:$0xff]  ;;  %v1563_v15 = vmax.f32 %v1439_v46, 0.0  ;;  %v11849_v42 = vld [vmem:[#allocation43_spill] sm:$0xff]  ;;  %2464 = vrot.lane.b32.xlu0 %v2168_v59, %s5030_s23  ;;  %v4596_v17 = vpop.eup %4595  ;;  %v1686_v54 = vadd.f32 1e-05, %v1562_v8  ;;  %v11851_v16 = vld [vmem:[#allocation193_spill] sm:$0xff] }
 0x272   :  { %11845 = vst [vmem:[#allocation103_spill] sm:$0xff] %v7941_v41  ;;  %v1441_v5 = vsub.f32 %v1193_v30, %v11849_v42  ;;  %v11850_v58 = vld [vmem:[#allocation83_spill] sm:$0xff]  ;;  %v1196_v13 = vmul.f32 0.020408163, %v11851_v16  ;;  %11852 = vst [vmem:[#allocation104_spill] sm:$0xff] %v7960_v14  ;;  %v1926_v39 = vld [vmem:[%s10973_s1 + $0x1b0] sm:$0xff]  ;;  %v7968_v49 = vmul.f32 %v4592_v45, %v1924_v51  ;;  %v7972_v2 = vmul.f32 %v7941_v41, %v7941_v41 }
 0x273   :  { %v1195_v10 = vmul.f32 0.020408163, %v11850_v58  ;;  %v1925_v11 = vld [vmem:[%s10973_s1 + $0x1a8] sm:$0xff]  ;;  %v1564_v42 = vmax.f32 %v1440_v19, 0.0  ;;  %v11853_v46 = vld [vmem:[#allocation20_spill] sm:$0xff]  ;;  %v11854_v30 = vld [vmem:[#allocation77_spill] sm:$0xff]  ;;  %4609 = vrsqrt.f32 %v1685_v26  ;;  %v7975_v24 = vpop.xlane.xlu1 %972  ;;  %v7978_v52 = vpop.xlane.xlu0 %969 }
 0x274   :  { %v1442_v58 = vsub.f32 %v1194_v55, %v11853_v46  ;;  %v2170_v59 = vmul.f32 %v7931_v36, %v11854_v30  ;;  %11855 = vst [vmem:[#allocation66_spill] sm:$0xff] %v7968_v49  ;;  %v11856_v16 = vld [vmem:[#allocation24_spill] sm:$0xff]  ;;  %11857 = vst [vmem:[#allocation69_spill] sm:$0xff] %v7975_v24  ;;  %2466 = vrot.lane.b32.xlu1 %v2169_v50, %s5030_s23  ;;  %v7980_v19 = vmul.f32 %v4594_v60, %v1925_v11  ;;  %v4598_v55 = vpop.eup %4597  ;;  %v1927_v26 = vld [vmem:[%s10973_s1 + $0x1b8] sm:$0xff] }
 0x275   :  { %v1197_v8 = vmul.f32 0.020408163, %v11856_v16  ;;  %11858 = vst [vmem:[#allocation180_spill] sm:$0xff] %v7978_v52  ;;  %v1687_v46 = vadd.f32 1e-05, %v1563_v15  ;;  %v1565_v30 = vmax.f32 %v1441_v5, 0.0  ;;  %v7984_v36 = vmul.f32 %v4596_v17, %v1926_v39  ;;  %v4600_v15 = vpop.eup %4599 }
 0x276   :  { %11859 = vst [vmem:[#allocation185_spill] sm:$0xff] %v7980_v19  ;;  %v11860_v45 = vld [vmem:[#allocation192_spill] sm:$0xff]  ;;  %2468 = vrot.lane.b32.xlu0 %v2170_v59, %s5030_s23  ;;  %4611 = vrsqrt.f32 %v1686_v54  ;;  %v11862_v16 = vld [vmem:[#allocation125_spill] sm:$0xff]  ;;  %v11863_v24 = vld [vmem:[#allocation135_spill] sm:$0xff]  ;;  %v1688_v5 = vadd.f32 1e-05, %v1564_v42 }
 0x277   :  { %v1443_v51 = vsub.f32 %v1195_v10, %v11860_v45  ;;  %11861 = vst [vmem:[#allocation190_spill] sm:$0xff] %v7984_v36  ;;  %v1444_v50 = vsub.f32 %v1196_v13, %v11862_v16  ;;  %v1199_v41 = vmul.f32 0.020408163, %v11863_v24  ;;  %v11864_v60 = vld [vmem:[#allocation76_spill] sm:$0xff]  ;;  %v1566_v52 = vmax.f32 %v1442_v58, 0.0  ;;  %v11865_v10 = vld [vmem:[#allocation27_spill] sm:$0xff]  ;;  %v8003_v16 = vpop.xlane.xlu1 %978  ;;  %v8006_v42 = vpop.xlane.xlu0 %975 }
 0x278   :  { %v2171_v11 = vmul.f32 %v7960_v14, %v11864_v60  ;;  %v1198_v45 = vmul.f32 0.020408163, %v11865_v10  ;;  %v11866_v59 = vld [vmem:[#allocation78_spill] sm:$0xff]  ;;  %v11867_v54 = vld [vmem:[#allocation109_spill] sm:$0xff]  ;;  %11869 = vst [vmem:[#allocation68_spill] sm:$0xff] %v8003_v16  ;;  %11870 = vst [vmem:[#allocation105_spill] sm:$0xff] %v8006_v42  ;;  %v8010_v10 = vmul.f32 %v4598_v55, %v1927_v26  ;;  %4613 = vrsqrt.f32 %v1687_v46 }
 0x279   :  { %v2172_v17 = vmul.f32 %v7968_v49, %v11866_v59  ;;  %v1928_v39 = vld [vmem:[%s10973_s1 + $0x1c0] sm:$0xff]  ;;  %v8000_v48 = vmul.f32 0.020408163, %v11867_v54  ;;  %v11868_v13 = vld [vmem:[#allocation121_spill] sm:$0xff]  ;;  %v4602_v59 = vpop.eup %4601  ;;  %v1689_v49 = vadd.f32 1e-05, %v1565_v30  ;;  %4615 = vrsqrt.f32 %v1688_v5 }
 0x27a   :  { %v1445_v24 = vsub.f32 %v1197_v8, %v11868_v13  ;;  %2470 = vrot.lane.b32.xlu1 %v2171_v11, %s5030_s23  ;;  %v11871_v58 = vld [vmem:[#allocation169_spill] sm:$0xff]  ;;  %11872 = vst [vmem:[#allocation71_spill] sm:$0xff] %v8010_v10  ;;  %v1567_v14 = vmax.f32 %v1443_v51, 0.0  ;;  %v11873_v54 = vld [vmem:[#allocation171_spill] sm:$0xff]  ;;  %v4604_v13 = vpop.eup %4603  ;;  %v1568_v16 = vmax.f32 %v1444_v50, 0.0  ;;  %v11874_v31 = vld [vmem:[#allocation124_spill] sm:$0xff]  ;;  %v8017_v25 = vmul.f32 %v4600_v15, %v1928_v39 }
 0x27b   :  { %v2173_v60 = vmul.f32 %v7980_v19, %v11871_v58  ;;  %2472 = vrot.lane.b32.xlu0 %v2172_v17, %s5030_s23  ;;  %v2174_v8 = vmul.f32 %v7984_v36, %v11873_v54  ;;  %v1447_v11 = vsub.f32 %v1199_v41, %v11874_v31  ;;  %v11875_v1 = vld [vmem:[#allocation128_spill] sm:$0xff]  ;;  %v1929_v55 = vld [vmem:[%s10973_s1 + $0x1c8] sm:$0xff]  ;;  %v1690_v30 = vadd.f32 1e-05, %v1566_v52  ;;  %v11877_v51 = vld [vmem:[#allocation26_spill] sm:$0xff]  ;;  %v8034_v17 = vpop.xlane.xlu1 %984  ;;  %v8037_v39 = vpop.xlane.xlu0 %981 }
 0x27c   :  { %v1201_v42 = vmul.f32 0.020408163, %v11875_v1  ;;  %11876 = vst [vmem:[#allocation106_spill] sm:$0xff] %v8017_v25  ;;  %v1930_v46 = vld [vmem:[%s10973_s1 + $0x1d0] sm:$0xff]  ;;  %v1446_v26 = vsub.f32 %v1198_v45, %v11877_v51  ;;  %v1200_v50 = vmul.f32 0.020408163, %v7360_v12  ;;  %v8029_v31 = vmul.f32 %v8000_v48, %v8000_v48  ;;  %v4606_v54 = vpop.eup %4605 }
 0x27d   :  { %v11878_v1 = vld [vmem:[#allocation110_spill] sm:$0xff]  ;;  %v1569_v15 = vmax.f32 %v1445_v24, 0.0  ;;  %11879 = vst [vmem:[#allocation182_spill] sm:$0xff] %v8034_v17  ;;  %11880 = vst [vmem:[#allocation189_spill] sm:$0xff] %v8037_v39  ;;  %4617 = vrsqrt.f32 %v1689_v49  ;;  %v1691_v45 = vadd.f32 1e-05, %v1567_v14  ;;  %v8042_v12 = vmul.f32 %v4602_v59, %v1929_v55  ;;  %v4608_v49 = vpop.eup %4607 }
 0x27e   :  { %v8032_v41 = vmul.f32 0.020408163, %v11878_v1  ;;  %2474 = vrot.lane.b32.xlu1 %v2173_v60, %s5030_s23  ;;  %v11881_v5 = vld [vmem:[#allocation170_spill] sm:$0xff]  ;;  %v8044_v58 = vmul.f32 %v4604_v13, %v1930_v46  ;;  %v1692_v51 = vadd.f32 1e-05, %v1568_v16  ;;  %v1571_v24 = vmax.f32 %v1447_v11, 0.0 }
 0x27f   :  { %v2175_v52 = vmul.f32 %v8010_v10, %v11881_v5  ;;  %2476 = vrot.lane.b32.xlu0 %v2174_v8, %s5030_s23  ;;  %11882 = vst [vmem:[#allocation70_spill] sm:$0xff] %v8042_v12  ;;  %v11884_v1 = vld [vmem:[#allocation195_spill] sm:$0xff]  ;;  %v11885_v19 = vld [vmem:[#allocation173_spill] sm:$0xff]  ;;  %4619 = vrsqrt.f32 %v1690_v30  ;;  %v1570_v14 = vmax.f32 %v1446_v26, 0.0  ;;  %v1202_v13 = vmul.f32 0.020408163, %v7386_v32  ;;  %v8065_v30 = vpop.xlane.xlu1 %990  ;;  %v8068_v26 = vpop.xlane.xlu0 %987 }
 0x280   :  { %11883 = vst [vmem:[#allocation34_spill] sm:$0xff] %v8044_v58  ;;  %v1449_v36 = vsub.f32 %v1201_v42, %v11884_v1  ;;  %v2176_v60 = vmul.f32 %v8017_v25, %v11885_v19  ;;  %v1931_v5 = vld [vmem:[%s10973_s1 + $0x1d8] sm:$0xff]  ;;  %v11886_v8 = vld [vmem:[#allocation123_spill] sm:$0xff]  ;;  %v1932_v16 = vld [vmem:[%s10973_s1 + $0x1e0] sm:$0xff]  ;;  %v8059_v42 = vmul.f32 %v8032_v41, %v8032_v41  ;;  %v1693_v55 = vadd.f32 1e-05, %v1569_v15  ;;  %v4610_v32 = vpop.eup %4609 }
 0x281   :  { %v1448_v59 = vsub.f32 %v1200_v50, %v11886_v8  ;;  %v11887_v19 = vld [vmem:[#allocation111_spill] sm:$0xff]  ;;  %v1203_v46 = vmul.f32 0.020408163, %v7383_v62  ;;  %11889 = vst [vmem:[#allocation73_spill] sm:$0xff] %v8065_v30  ;;  %11890 = vst [vmem:[#allocation107_spill] sm:$0xff] %v8068_v26  ;;  %4621 = vrsqrt.f32 %v1691_v45  ;;  %v11891_v50 = vld [vmem:[#allocation172_spill] sm:$0xff]  ;;  %v8075_v25 = vmul.f32 %v4606_v54, %v1931_v5 }
 0x282   :  { %v8062_v11 = vmul.f32 0.020408163, %v11887_v19  ;;  %2478 = vrot.lane.b32.xlu1 %v2175_v52, %s5030_s23  ;;  %v2177_v1 = vmul.f32 %v8042_v12, %v11891_v50  ;;  %v11892_v8 = vld [vmem:[#allocation176_spill] sm:$0xff]  ;;  %4623 = vrsqrt.f32 %v1692_v51  ;;  %v1695_v62 = vadd.f32 1e-05, %v1571_v24  ;;  %v1933_v52 = vld [vmem:[%s10973_s1 + $0x1e8] sm:$0xff] }
 0x283   :  { %2480 = vrot.lane.b32.xlu0 %v2176_v60, %s5030_s23  ;;  %v2178_v19 = vmul.f32 %v8044_v58, %v11892_v8  ;;  %11893 = vst [vmem:[#allocation186_spill] sm:$0xff] %v8075_v25  ;;  %v1573_v15 = vmax.f32 %v1449_v36, 0.0  ;;  %v8077_v10 = vmul.f32 %v4608_v49, %v1932_v16  ;;  %v4612_v45 = vpop.eup %4611  ;;  %v1694_v30 = vadd.f32 1e-05, %v1570_v14  ;;  %v11895_v50 = vld [vmem:[#allocation90_spill] sm:$0xff]  ;;  %v1934_v54 = vld [vmem:[%s10973_s1 + $0x1f0] sm:$0xff]  ;;  %v8092_v8 = vpop.xlane.xlu1 %996 }
 0x284   :  { %11888 = vst [vmem:[#allocation191_spill] sm:$0xff] %v8062_v11  ;;  %v1572_v60 = vmax.f32 %v1448_v59, 0.0  ;;  %v1450_v26 = vsub.f32 %v1202_v13, %v7379_v33  ;;  %v1204_v12 = vmul.f32 0.020408163, %v11895_v50  ;;  %v11896_v51 = vld [vmem:[#allocation112_spill] sm:$0xff]  ;;  %4625 = vrsqrt.f32 %v1693_v55  ;;  %v11898_v36 = vld [vmem:[#allocation89_spill] sm:$0xff]  ;;  %v8095_v14 = vpop.xlane.xlu0 %993 }
 0x285   :  { %11894 = vst [vmem:[#allocation81_spill] sm:$0xff] %v8077_v10  ;;  %v8088_v24 = vmul.f32 0.020408163, %v11896_v51  ;;  %v1451_v5 = vsub.f32 %v1203_v46, %v11898_v36  ;;  %v11899_v49 = vld [vmem:[#allocation137_spill] sm:$0xff]  ;;  %11900 = vst [vmem:[#allocation42_spill] sm:$0xff] %v8092_v8  ;;  %v8099_v33 = vmul.f32 %v8062_v11, %v8062_v11  ;;  %v11902_v59 = vld [vmem:[#allocation156_spill] sm:$0xff]  ;;  %v8105_v46 = vmul.f32 %v4610_v32, %v1933_v52  ;;  %v4614_v51 = vpop.eup %4613 }
 0x286   :  { %v1205_v16 = vmul.f32 0.020408163, %v11899_v49  ;;  %2482 = vrot.lane.b32.xlu1 %v2177_v1, %s5030_s23  ;;  %11901 = vst [vmem:[#allocation84_spill] sm:$0xff] %v8095_v14  ;;  %v1206_v13 = vmul.f32 0.020408163, %v11902_v59  ;;  %v11903_v50 = vld [vmem:[#allocation174_spill] sm:$0xff]  ;;  %4627 = vrsqrt.f32 %v1695_v62  ;;  %v8109_v58 = vmul.f32 %v4612_v45, %v1934_v54 }
 0x287   :  { %11897 = vst [vmem:[#allocation72_spill] sm:$0xff] %v8088_v24  ;;  %2484 = vrot.lane.b32.xlu0 %v2178_v19, %s5030_s23  ;;  %v2179_v55 = vmul.f32 %v8075_v25, %v11903_v50  ;;  %11904 = vst [vmem:[#allocation75_spill] sm:$0xff] %v8105_v46  ;;  %v1697_v36 = vadd.f32 1e-05, %v1573_v15  ;;  %v11905_v49 = vld [vmem:[#allocation178_spill] sm:$0xff]  ;;  %4629 = vrsqrt.f32 %v1694_v30  ;;  %v1574_v14 = vmax.f32 %v1450_v26, 0.0  ;;  %v4616_v50 = vpop.eup %4615  ;;  %v8117_v17 = vpop.xlane.xlu1 %1002 }
 0x288   :  { %v2180_v1 = vmul.f32 %v8077_v10, %v11905_v49  ;;  %11906 = vst [vmem:[#allocation108_spill] sm:$0xff] %v8109_v58  ;;  %v1696_v8 = vadd.f32 1e-05, %v1572_v60  ;;  %v11907_v11 = vld [vmem:[#allocation131_spill] sm:$0xff]  ;;  %v1935_v19 = vld [vmem:[%s10973_s1 + $0x1f8] sm:$0xff]  ;;  %v1575_v32 = vmax.f32 %v1451_v5, 0.0  ;;  %v8120_v45 = vpop.xlane.xlu0 %999  ;;  %v1454_v60 = vsub.f32 %v1206_v13, %v7490_v38 }
 0x289   :  { %v1452_v59 = vsub.f32 %v1204_v12, %v11907_v11  ;;  %v11908_v52 = vld [vmem:[#allocation29_spill] sm:$0xff]  ;;  %v11909_v62 = vld [vmem:[#allocation32_spill] sm:$0xff]  ;;  %11910 = vst [vmem:[#allocation74_spill] sm:$0xff] %v8117_v17  ;;  %11911 = vst [vmem:[#allocation43_spill] sm:$0xff] %v8120_v45  ;;  %v8127_v11 = vmul.f32 %v8088_v24, %v8088_v24  ;;  %4631 = vrsqrt.f32 %v1697_v36  ;;  %v8139_v17 = vmul.f32 %v4614_v51, %v1935_v19 }
 0x28a   :  { %v1453_v25 = vsub.f32 %v1205_v16, %v11908_v52  ;;  %v1207_v15 = vmul.f32 0.020408163, %v11909_v62  ;;  %2486 = vrot.lane.b32.xlu1 %v2179_v55, %s5030_s23  ;;  %v1936_v12 = vld [vmem:[%s10973_s1 + $0x200] sm:$0xff]  ;;  %v11912_v30 = vld [vmem:[#allocation113_spill] sm:$0xff]  ;;  %v5031_v16 = vmov 0   ;;  %v4618_v55 = vpop.eup %4617  ;;  %v11914_v49 = vld [vmem:[#allocation159_spill] sm:$0xff]  ;;  %4633 = vrsqrt.f32 %v1696_v8 }
 0x28b   :  { %v8130_v26 = vmul.f32 0.020408163, %v11912_v30  ;;  %2488 = vrot.lane.b32.xlu0 %v2180_v1, %s5030_s23  ;;  %v11913_v54 = vld [vmem:[#allocation177_spill] sm:$0xff]  ;;  %4484 = vset.pattern.permute.xlu1 %v5031_v16  ;;  %v1208_v52 = vmul.f32 0.020408163, %v11914_v49  ;;  %v11915_v62 = vld [vmem:[#allocation183_spill] sm:$0xff]  ;;  %v8141_v13 = vmul.f32 %v4616_v50, %v1936_v12 }
 0x28c   :  { %v2181_v5 = vmul.f32 %v8105_v46, %v11913_v54  ;;  %v2182_v10 = vmul.f32 %v8109_v58, %v11915_v62  ;;  %11916 = vst [vmem:[#allocation83_spill] sm:$0xff] %v8139_v17  ;;  %4483 = vset.pattern.permute.xlu0 %v5031_v16  ;;  %v1698_v30 = vadd.f32 1e-05, %v1574_v14  ;;  %v1576_v38 = vmax.f32 %v1452_v59, 0.0  ;;  %v1937_v1 = vld [vmem:[%s10973_s1 + $0x208] sm:$0xff]  ;;  %v4620_v54 = vpop.eup %4619  ;;  %v11918_v45 = vld [vmem:[#allocation30_spill] sm:$0xff]  ;;  %v8148_v62 = vpop.permute.xlu1 %2370 }
 0x28d   :  { %11917 = vst [vmem:[#allocation193_spill] sm:$0xff] %v8141_v13  ;;  %v1699_v46 = vadd.f32 1e-05, %v1575_v32  ;;  %v1577_v36 = vmax.f32 %v1453_v25, 0.0  ;;  %v1455_v49 = vsub.f32 %v1207_v15, %v11918_v45  ;;  %v11919_v24 = vld [vmem:[#allocation33_spill] sm:$0xff]  ;;  %11920 = vst [vmem:[#allocation20_spill] sm:$0xff] %v8148_v62  ;;  %v8151_v8 = vpop.permute.xlu0 %2368  ;;  %v8158_v51 = vmul.f32 %v8130_v26, %v8130_v26 }
 0x28e   :  { %v1209_v39 = vmul.f32 0.020408163, %v11919_v24  ;;  %2490 = vrot.lane.b32.xlu1 %v2181_v5, %s5030_s23  ;;  %11921 = vst [vmem:[#allocation77_spill] sm:$0xff] %v8151_v8  ;;  %v1938_v14 = vld [vmem:[%s10973_s1 + $0x210] sm:$0xff]  ;;  %v11922_v59 = vld [vmem:[#allocation114_spill] sm:$0xff]  ;;  %v1578_v19 = vmax.f32 %v1454_v60, 0.0  ;;  %v4622_v32 = vpop.eup %4621  ;;  %v1456_v12 = vsub.f32 %v1208_v52, %v7551_v21  ;;  %v8171_v8 = vmul.f32 %v4618_v55, %v1937_v1 }
 0x28f   :  { %v8161_v25 = vmul.f32 0.020408163, %v11922_v59  ;;  %v11923_v50 = vld [vmem:[#allocation37_spill] sm:$0xff]  ;;  %2492 = vrot.lane.b32.xlu0 %v2182_v10, %s5030_s23  ;;  %v11924_v15 = vld [vmem:[#allocation115_spill] sm:$0xff]  ;;  %v4624_v62 = vpop.eup %4623  ;;  %4635 = vrsqrt.f32 %v1698_v30  ;;  %v1700_v59 = vadd.f32 1e-05, %v1576_v38 }
 0x290   :  { %v1210_v24 = vmul.f32 0.020408163, %v11923_v50  ;;  %v8166_v45 = vmul.f32 0.020408163, %v11924_v15  ;;  %v11925_v5 = vld [vmem:[#allocation179_spill] sm:$0xff]  ;;  %v11926_v58 = vld [vmem:[#allocation188_spill] sm:$0xff]  ;;  %v8175_v50 = vmul.f32 %v4620_v54, %v1938_v14  ;;  %4637 = vrsqrt.f32 %v1699_v46  ;;  %v8182_v55 = vpop.permute.xlu1 %2372 }
 0x291   :  { %v2183_v16 = vmul.f32 %v8139_v17, %v11925_v5  ;;  %v2184_v60 = vmul.f32 %v8141_v13, %v11926_v58  ;;  %v1939_v10 = vld [vmem:[%s10973_s1 + $0x218] sm:$0xff]  ;;  %v1701_v15 = vadd.f32 1e-05, %v1577_v36  ;;  %v1579_v21 = vmax.f32 %v1455_v49, 0.0  ;;  %11927 = vst [vmem:[#allocation24_spill] sm:$0xff] %v8182_v55  ;;  %v8184_v30 = vpop.permute.xlu0 %2376  ;;  %v1940_v58 = vld [vmem:[%s10973_s1 + $0x220] sm:$0xff]  ;;  %v4626_v38 = vpop.eup %4625 }
 0x292   :  { %v1457_v52 = vsub.f32 %v1209_v39, %v7526_v63  ;;  %11928 = vst [vmem:[#allocation192_spill] sm:$0xff] %v8184_v30  ;;  %v8191_v1 = vmul.f32 %v8161_v25, %v8161_v25  ;;  %v1702_v46 = vadd.f32 1e-05, %v1578_v19  ;;  %v11929_v54 = vld [vmem:[#allocation31_spill] sm:$0xff]  ;;  %v1458_v63 = vsub.f32 %v1210_v24, %v7600_v44  ;;  %v11931_v19 = vld [vmem:[#allocation116_spill] sm:$0xff]  ;;  %v11932_v44 = vld [vmem:[#allocation17_spill] sm:$0xff] }
 0x293   :  { %2494 = vrot.lane.b32.xlu1 %v2183_v16, %s5030_s23  ;;  %v1211_v36 = vmul.f32 0.020408163, %v11929_v54  ;;  %2496 = vrot.lane.b32.xlu0 %v2184_v60, %s5030_s23  ;;  %v1941_v39 = vld [vmem:[%s10973_s1 + $0x228] sm:$0xff]  ;;  %v1580_v49 = vmax.f32 %v1456_v12, 0.0  ;;  %v1212_v14 = vmul.f32 0.020408163, %v7539_v9  ;;  %v8202_v55 = vmul.f32 %v4622_v32, %v1939_v10  ;;  %v4628_v30 = vpop.eup %4627 }
 0x294   :  { %v11930_v5 = vld [vmem:[#allocation187_spill] sm:$0xff]  ;;  %v8205_v13 = vmul.f32 0.020408163, %v11931_v19  ;;  %4639 = vrsqrt.f32 %v1700_v59  ;;  %v2186_v24 = vmul.f32 %v8175_v50, %v11932_v44  ;;  %v8209_v60 = vmul.f32 %v4624_v62, %v1940_v58  ;;  %v4630_v54 = vpop.eup %4629  ;;  %v8212_v9 = vpop.permute.xlu1 %2374  ;;  %v1942_v59 = vld [vmem:[%s10973_s1 + $0x230] sm:$0xff] }
 0x295   :  { %v2185_v16 = vmul.f32 %v8171_v8, %v11930_v5  ;;  %4641 = vrsqrt.f32 %v1701_v15  ;;  %v1703_v12 = vadd.f32 1e-05, %v1579_v21  ;;  %v1581_v17 = vmax.f32 %v1457_v52, 0.0  ;;  %11934 = vst [vmem:[#allocation135_spill] sm:$0xff] %v8212_v9  ;;  %v8214_v32 = vpop.permute.xlu0 %2380  ;;  %v1943_v21 = vld [vmem:[%s10973_s1 + $0x238] sm:$0xff] }
 0x296   :  { %11933 = vst [vmem:[#allocation125_spill] sm:$0xff] %v8209_v60  ;;  %11935 = vst [vmem:[#allocation76_spill] sm:$0xff] %v8214_v32  ;;  %v8216_v10 = vmul.f32 %v4626_v38, %v1941_v39  ;;  %4643 = vrsqrt.f32 %v1702_v46  ;;  %v1459_v62 = vsub.f32 %v1211_v36, %v7566_v29  ;;  %v1582_v58 = vmax.f32 %v1458_v63, 0.0  ;;  %v11937_v39 = vld [vmem:[#allocation144_spill] sm:$0xff]  ;;  %v4632_v46 = vpop.eup %4631  ;;  %v11939_v36 = vld [vmem:[#allocation41_spill] sm:$0xff] }
 0x297   :  { %2498 = vrot.lane.b32.xlu1 %v2185_v16, %s5030_s23  ;;  %v1213_v15 = vmul.f32 0.020408163, %v7536_v34  ;;  %2500 = vrot.lane.b32.xlu0 %v2186_v24, %s5030_s23  ;;  %v1704_v52 = vadd.f32 1e-05, %v1580_v49  ;;  %v1460_v38 = vsub.f32 %v1212_v14, %v7662_v28  ;;  %v1214_v5 = vmul.f32 0.020408163, %v11937_v39  ;;  %v4634_v28 = vpop.eup %4633 }
 0x298   :  { %11936 = vst [vmem:[#allocation27_spill] sm:$0xff] %v8216_v10  ;;  %v11938_v16 = vld [vmem:[#allocation79_spill] sm:$0xff]  ;;  %v8233_v29 = vmul.f32 %v8166_v45, %v8166_v45  ;;  %v8237_v34 = vmul.f32 %v8205_v13, %v8205_v13  ;;  %v2188_v63 = vmul.f32 %v8209_v60, %v11939_v36  ;;  %v8241_v49 = vmul.f32 %v4630_v54, %v1942_v59  ;;  %v8244_v44 = vpop.permute.xlu1 %2378  ;;  %v11942_v39 = vld [vmem:[#allocation80_spill] sm:$0xff]  ;;  %v1944_v36 = vld [vmem:[%s10973_s1 + $0x240] sm:$0xff] }
 0x299   :  { %v2187_v19 = vmul.f32 %v8202_v55, %v11938_v16  ;;  %4645 = vrsqrt.f32 %v1703_v12  ;;  %v1705_v14 = vadd.f32 1e-05, %v1581_v17  ;;  %11940 = vst [vmem:[#allocation78_spill] sm:$0xff] %v8244_v44  ;;  %v8246_v24 = vpop.permute.xlu0 %2384  ;;  %v2189_v16 = vmul.f32 %v8216_v10, %v11942_v39  ;;  %v11943_v17 = vld [vmem:[#allocation40_spill] sm:$0xff]  ;;  %v11944_v44 = vld [vmem:[#allocation117_spill] sm:$0xff]  ;;  %v11948_v60 = vld [vmem:[#allocation118_spill] sm:$0xff] }
 0x29a   :  { %11941 = vst [vmem:[#allocation109_spill] sm:$0xff] %v8246_v24  ;;  %v8250_v9 = vmul.f32 %v4628_v30, %v1943_v21  ;;  %v1583_v54 = vmax.f32 %v1459_v62, 0.0  ;;  %v1706_v59 = vadd.f32 1e-05, %v1582_v58  ;;  %v1461_v12 = vsub.f32 %v1213_v15, %v7631_v3  ;;  %v11945_v62 = vld [vmem:[#allocation93_spill] sm:$0xff] }
 0x29b   :  { %2502 = vrot.lane.b32.xlu1 %v2187_v19, %s5030_s23  ;;  %v1215_v32 = vmul.f32 0.020408163, %v11943_v17  ;;  %2504 = vrot.lane.b32.xlu0 %v2188_v63, %s5030_s23  ;;  %v1945_v19 = vld [vmem:[%s10973_s1 + $0x248] sm:$0xff]  ;;  %4647 = vrsqrt.f32 %v1704_v52  ;;  %v1584_v39 = vmax.f32 %v1460_v38, 0.0  ;;  %v1462_v30 = vsub.f32 %v1214_v5, %v7751_v61  ;;  %v11946_v3 = vld [vmem:[#allocation21_spill] sm:$0xff] }
 0x29c   :  { %v1217_v21 = vmul.f32 0.020408163, %v7605_v43  ;;  %v8264_v24 = vmul.f32 0.020408163, %v11944_v44  ;;  %v1216_v58 = vmul.f32 0.020408163, %v11945_v62  ;;  %v2190_v15 = vmul.f32 %v8241_v49, %v11946_v3  ;;  %v4636_v63 = vpop.eup %4635  ;;  %v8275_v61 = vpop.permute.xlu1 %2382 }
 0x29d   :  { %v8269_v17 = vmul.f32 %v4634_v28, %v1944_v36  ;;  %v8272_v10 = vmul.f32 0.020408163, %v11948_v60  ;;  %4649 = vrsqrt.f32 %v1705_v14  ;;  %11949 = vst [vmem:[#allocation169_spill] sm:$0xff] %v8275_v61  ;;  %v8277_v43 = vpop.permute.xlu0 %2388  ;;  %v11951_v52 = vld [vmem:[#allocation45_spill] sm:$0xff]  ;;  %v8281_v5 = vmul.f32 %v4632_v46, %v1945_v19  ;;  %v1946_v28 = vld [vmem:[%s10973_s1 + $0x250] sm:$0xff]  ;;  %v4638_v44 = vpop.eup %4637  ;;  %v11953_v19 = vld [vmem:[#allocation46_spill] sm:$0xff] }
 0x29e   :  { %11950 = vst [vmem:[#allocation171_spill] sm:$0xff] %v8277_v43  ;;  %v2191_v38 = vmul.f32 %v8250_v9, %v11951_v52  ;;  %v1707_v36 = vadd.f32 1e-05, %v1583_v54  ;;  %4651 = vrsqrt.f32 %v1706_v59  ;;  %v1585_v60 = vmax.f32 %v1461_v12, 0.0  ;;  %v11954_v59 = vld [vmem:[#allocation120_spill] sm:$0xff]  ;;  %v11960_v43 = vld [vmem:[#allocation146_spill] sm:$0xff] }
 0x29f   :  { %11947 = vst [vmem:[#allocation121_spill] sm:$0xff] %v8269_v17  ;;  %2506 = vrot.lane.b32.xlu1 %v2189_v16, %s5030_s23  ;;  %11952 = vst [vmem:[#allocation124_spill] sm:$0xff] %v8281_v5  ;;  %v1463_v14 = vsub.f32 %v1215_v32, %v7723_v53  ;;  %2508 = vrot.lane.b32.xlu0 %v2190_v15, %s5030_s23  ;;  %v1947_v16 = vld [vmem:[%s10973_s1 + $0x258] sm:$0xff]  ;;  %v1708_v62 = vadd.f32 1e-05, %v1584_v39  ;;  %v1586_v3 = vmax.f32 %v1462_v30, 0.0 }
 0x2a0   :  { %v1465_v46 = vsub.f32 %v1217_v21, %v7765_v27  ;;  %v1218_v52 = vmul.f32 0.020408163, %v11953_v19  ;;  %v8295_v61 = vmul.f32 %v8264_v24, %v8264_v24  ;;  %v1464_v54 = vsub.f32 %v1216_v58, %v7793_v7  ;;  %v11956_v30 = vld [vmem:[#allocation2_spill] sm:$0xff]  ;;  %v8310_v21 = vpop.permute.xlu1 %2386  ;;  %v11959_v7 = vld [vmem:[#allocation85_spill] sm:$0xff] }
 0x2a1   :  { %v2192_v53 = vmul.f32 %v8269_v17, %v11954_v59  ;;  %v8300_v32 = vmul.f32 %v4636_v63, %v1946_v28  ;;  %v4640_v12 = vpop.eup %4639  ;;  %v8304_v39 = vmul.f32 %v8272_v10, %v8272_v10  ;;  %v8307_v27 = vmul.f32 0.020408163, %v11956_v30  ;;  %11957 = vst [vmem:[#allocation26_spill] sm:$0xff] %v8310_v21  ;;  %v8312_v15 = vpop.permute.xlu0 %2392  ;;  %v1948_v63 = vld [vmem:[%s10973_s1 + $0x260] sm:$0xff] }
 0x2a2   :  { %11958 = vst [vmem:[#allocation110_spill] sm:$0xff] %v8312_v15  ;;  %v2193_v58 = vmul.f32 %v8281_v5, %v11959_v7  ;;  %v8316_v19 = vmul.f32 %v4638_v44, %v1947_v16  ;;  %v4642_v28 = vpop.eup %4641  ;;  %4653 = vrsqrt.f32 %v1707_v36  ;;  %v1709_v59 = vadd.f32 1e-05, %v1585_v60  ;;  %v1950_v36 = vld [vmem:[%s10973_s1 + $0x270] sm:$0xff] }
 0x2a3   :  { %11955 = vst [vmem:[#allocation128_spill] sm:$0xff] %v8300_v32  ;;  %2510 = vrot.lane.b32.xlu1 %v2191_v38, %s5030_s23  ;;  %v1587_v30 = vmax.f32 %v1463_v14, 0.0  ;;  %v1219_v17 = vmul.f32 0.020408163, %v11960_v43  ;;  %2512 = vrot.lane.b32.xlu0 %v2192_v53, %s5030_s23  ;;  %v1949_v38 = vld [vmem:[%s10973_s1 + $0x268] sm:$0xff]  ;;  %v4644_v21 = vpop.eup %4643  ;;  %4655 = vrsqrt.f32 %v1708_v62  ;;  %v1589_v16 = vmax.f32 %v1465_v46, 0.0 }
 0x2a4   :  { %v1710_v44 = vadd.f32 1e-05, %v1586_v3  ;;  %v1466_v7 = vsub.f32 %v1218_v52, %v7862_v22  ;;  %v1588_v60 = vmax.f32 %v1464_v54, 0.0  ;;  %v1220_v14 = vmul.f32 0.020408163, %v7671_v37  ;;  %v11961_v43 = vld [vmem:[#allocation129_spill] sm:$0xff]  ;;  %v8343_v22 = vpop.permute.xlu1 %2390 }
 0x2a5   :  { %v2194_v53 = vmul.f32 %v8300_v32, %v11961_v43  ;;  %v8333_v15 = vmul.f32 %v4640_v12, %v1948_v63  ;;  %v8337_v5 = vmul.f32 %v8307_v27, %v8307_v27  ;;  %v11963_v62 = vld [vmem:[#allocation119_spill] sm:$0xff]  ;;  %11964 = vst [vmem:[#allocation195_spill] sm:$0xff] %v8343_v22  ;;  %v8345_v46 = vpop.permute.xlu0 %2396  ;;  %v8349_v54 = vmul.f32 %v4642_v28, %v1949_v38 }
 0x2a6   :  { %v8340_v3 = vmul.f32 0.020408163, %v11963_v62  ;;  %11965 = vst [vmem:[#allocation173_spill] sm:$0xff] %v8345_v46  ;;  %v11966_v52 = vld [vmem:[#allocation23_spill] sm:$0xff]  ;;  %v4646_v12 = vpop.eup %4645  ;;  %4657 = vrsqrt.f32 %v1709_v59  ;;  %v1711_v63 = vadd.f32 1e-05, %v1587_v30  ;;  %v1467_v43 = vsub.f32 %v1219_v17, %v7837_v18 }
 0x2a7   :  { %11962 = vst [vmem:[#allocation170_spill] sm:$0xff] %v8333_v15  ;;  %2514 = vrot.lane.b32.xlu1 %v2193_v58, %s5030_s23  ;;  %v2195_v37 = vmul.f32 %v8316_v19, %v11966_v52  ;;  %2516 = vrot.lane.b32.xlu0 %v2194_v53, %s5030_s23  ;;  %v8353_v62 = vmul.f32 %v4644_v21, %v1950_v36  ;;  %v1951_v58 = vld [vmem:[%s10973_s1 + $0x278] sm:$0xff]  ;;  %4659 = vrsqrt.f32 %v1710_v44  ;;  %v1713_v22 = vadd.f32 1e-05, %v1589_v16  ;;  %v1952_v21 = vld [vmem:[%s10973_s1 + $0x280] sm:$0xff]  ;;  %v11968_v36 = vld [vmem:[#allocation3_spill] sm:$0xff] }
 0x2a8   :  { %v1590_v46 = vmax.f32 %v1466_v7, 0.0  ;;  %v1221_v52 = vmul.f32 0.020408163, %v7668_v35  ;;  %v4648_v28 = vpop.eup %4647  ;;  %v1712_v38 = vadd.f32 1e-05, %v1588_v60  ;;  %v1468_v59 = vsub.f32 %v1220_v14, %v7923_v0  ;;  %v11967_v18 = vld [vmem:[#allocation25_spill] sm:$0xff]  ;;  %v8373_v35 = vpop.permute.xlu1 %2394 }
 0x2a9   :  { %v1222_v30 = vmul.f32 0.020408163, %v7701_v47  ;;  %v2196_v17 = vmul.f32 %v8333_v15, %v11967_v18  ;;  %v8367_v53 = vmul.f32 0.020408163, %v11968_v36  ;;  %v11969_v44 = vld [vmem:[#allocation4_spill] sm:$0xff]  ;;  %11970 = vst [vmem:[#allocation123_spill] sm:$0xff] %v8373_v35  ;;  %v8375_v0 = vpop.permute.xlu0 %2400  ;;  %v8379_v60 = vmul.f32 %v4646_v12, %v1951_v58 }
 0x2aa   :  { %v8370_v16 = vmul.f32 0.020408163, %v11969_v44  ;;  %11971 = vst [vmem:[#allocation111_spill] sm:$0xff] %v8375_v0  ;;  %v11972_v47 = vld [vmem:[#allocation127_spill] sm:$0xff]  ;;  %v4650_v14 = vpop.eup %4649  ;;  %4661 = vrsqrt.f32 %v1711_v63  ;;  %v1591_v18 = vmax.f32 %v1467_v43, 0.0  ;;  %v11973_v15 = vld [vmem:[#allocation96_spill] sm:$0xff]  ;;  %v1469_v12 = vsub.f32 %v1221_v52, %v7898_v4 }
 0x2ab   :  { %2518 = vrot.lane.b32.xlu1 %v2195_v37, %s5030_s23  ;;  %v2197_v7 = vmul.f32 %v8349_v54, %v11972_v47  ;;  %v1223_v36 = vmul.f32 0.020408163, %v11973_v15  ;;  %2520 = vrot.lane.b32.xlu0 %v2196_v17, %s5030_s23  ;;  %v11974_v44 = vld [vmem:[#allocation139_spill] sm:$0xff]  ;;  %v4652_v35 = vpop.eup %4651  ;;  %4663 = vrsqrt.f32 %v1713_v22  ;;  %v1714_v0 = vadd.f32 1e-05, %v1590_v46  ;;  %v1954_v17 = vld [vmem:[%s10973_s1 + $0x290] sm:$0xff] }
 0x2ac   :  { %v2198_v32 = vmul.f32 %v8353_v62, %v11974_v44  ;;  %v1953_v37 = vld [vmem:[%s10973_s1 + $0x288] sm:$0xff]  ;;  %v8389_v58 = vmul.f32 %v4648_v28, %v1952_v21  ;;  %4665 = vrsqrt.f32 %v1712_v38  ;;  %v1592_v63 = vmax.f32 %v1468_v59, 0.0  ;;  %v8406_v46 = vpop.permute.xlu1 %2398  ;;  %v11979_v59 = vld [vmem:[#allocation130_spill] sm:$0xff] }
 0x2ad   :  { %v1470_v15 = vsub.f32 %v1222_v30, %v7972_v2  ;;  %v1224_v43 = vmul.f32 0.020408163, %v7732_v6  ;;  %v8398_v47 = vmul.f32 %v8340_v3, %v8340_v3  ;;  %v8402_v22 = vmul.f32 %v8367_v53, %v8367_v53  ;;  %11976 = vst [vmem:[#allocation176_spill] sm:$0xff] %v8406_v46  ;;  %v8408_v2 = vpop.permute.xlu0 %2404 }
 0x2ae   :  { %11975 = vst [vmem:[#allocation172_spill] sm:$0xff] %v8389_v58  ;;  %v1225_v4 = vmul.f32 0.020408163, %v7729_v20  ;;  %11977 = vst [vmem:[#allocation90_spill] sm:$0xff] %v8408_v2  ;;  %v8410_v6 = vmul.f32 %v4650_v14, %v1953_v37  ;;  %v8414_v52 = vmul.f32 %v8370_v16, %v8370_v16  ;;  %v1715_v28 = vadd.f32 1e-05, %v1591_v18 }
 0x2af   :  { %2522 = vrot.lane.b32.xlu1 %v2197_v7, %s5030_s23  ;;  %v1471_v38 = vsub.f32 %v1223_v36, %v7938_v23  ;;  %2524 = vrot.lane.b32.xlu0 %v2198_v32, %s5030_s23  ;;  %v2199_v20 = vmul.f32 %v8379_v60, %v11979_v59  ;;  %v4654_v30 = vpop.eup %4653  ;;  %4667 = vrsqrt.f32 %v1714_v0  ;;  %v1593_v21 = vmax.f32 %v1469_v12, 0.0  ;;  %v11980_v7 = vld [vmem:[#allocation161_spill] sm:$0xff]  ;;  %v1956_v0 = vld [vmem:[%s10973_s1 + $0x2a0] sm:$0xff] }
 0x2b0   :  { %11978 = vst [vmem:[#allocation112_spill] sm:$0xff] %v8410_v6  ;;  %v2200_v44 = vmul.f32 %v8389_v58, %v11980_v7  ;;  %v8422_v14 = vmul.f32 %v4652_v35, %v1954_v17  ;;  %v1955_v37 = vld [vmem:[%s10973_s1 + $0x298] sm:$0xff]  ;;  %v4656_v18 = vpop.eup %4655  ;;  %v1716_v46 = vadd.f32 1e-05, %v1592_v63  ;;  %v1594_v23 = vmax.f32 %v1470_v15, 0.0  ;;  %v11983_v35 = vld [vmem:[#allocation6_spill] sm:$0xff]  ;;  %v8440_v63 = vpop.permute.xlu1 %2402 }
 0x2b1   :  { %v1472_v32 = vsub.f32 %v1224_v43, %v8059_v42  ;;  %v1226_v36 = vmul.f32 0.020408163, %v7758_v57  ;;  %v11982_v12 = vld [vmem:[#allocation5_spill] sm:$0xff]  ;;  %v8436_v17 = vmul.f32 0.020408163, %v11983_v35  ;;  %v1473_v7 = vsub.f32 %v1225_v4, %v8029_v31  ;;  %11984 = vst [vmem:[#allocation137_spill] sm:$0xff] %v8440_v63  ;;  %v8442_v15 = vpop.permute.xlu0 %2408 }
 0x2b2   :  { %11981 = vst [vmem:[#allocation89_spill] sm:$0xff] %v8422_v14  ;;  %v8433_v59 = vmul.f32 0.020408163, %v11982_v12  ;;  %11985 = vst [vmem:[#allocation156_spill] sm:$0xff] %v8442_v15  ;;  %v11986_v42 = vld [vmem:[#allocation91_spill] sm:$0xff]  ;;  %4669 = vrsqrt.f32 %v1715_v28  ;;  %v1595_v43 = vmax.f32 %v1471_v38, 0.0  ;;  %v8448_v12 = vmul.f32 %v4654_v30, %v1955_v37 }
 0x2b3   :  { %2526 = vrot.lane.b32.xlu1 %v2199_v20, %s5030_s23  ;;  %v2201_v57 = vmul.f32 %v8410_v6, %v11986_v42  ;;  %v1227_v2 = vmul.f32 0.020408163, %v7755_v56  ;;  %2528 = vrot.lane.b32.xlu0 %v2200_v44, %s5030_s23  ;;  %v4658_v35 = vpop.eup %4657  ;;  %v1717_v58 = vadd.f32 1e-05, %v1593_v21  ;;  %v1228_v31 = vmul.f32 0.020408163, %v7786_v40 }
 0x2b4   :  { %11987 = vst [vmem:[#allocation174_spill] sm:$0xff] %v8448_v12  ;;  %v11988_v4 = vld [vmem:[#allocation145_spill] sm:$0xff]  ;;  %v8453_v63 = vmul.f32 %v4656_v18, %v1956_v0  ;;  %v1957_v28 = vld [vmem:[%s10973_s1 + $0x2a8] sm:$0xff]  ;;  %v4660_v38 = vpop.eup %4659  ;;  %4671 = vrsqrt.f32 %v1716_v46  ;;  %v1718_v56 = vadd.f32 1e-05, %v1594_v23  ;;  %v1596_v42 = vmax.f32 %v1472_v32, 0.0  ;;  %v8471_v46 = vpop.permute.xlu1 %2406 }
 0x2b5   :  { %v2202_v20 = vmul.f32 %v8422_v14, %v11988_v4  ;;  %v1474_v30 = vsub.f32 %v1226_v36, %v8127_v11  ;;  %v1958_v21 = vld [vmem:[%s10973_s1 + $0x2b0] sm:$0xff]  ;;  %v8464_v40 = vmul.f32 %v8433_v59, %v8433_v59  ;;  %v11990_v44 = vld [vmem:[#allocation7_spill] sm:$0xff]  ;;  %v1597_v18 = vmax.f32 %v1473_v7, 0.0  ;;  %11992 = vst [vmem:[#allocation131_spill] sm:$0xff] %v8471_v46  ;;  %v8473_v23 = vpop.permute.xlu0 %2412  ;;  %v11994_v36 = vld [vmem:[#allocation142_spill] sm:$0xff] }
 0x2b6   :  { %11989 = vst [vmem:[#allocation178_spill] sm:$0xff] %v8453_v63  ;;  %v8467_v37 = vmul.f32 0.020408163, %v11990_v44  ;;  %v11991_v0 = vld [vmem:[#allocation155_spill] sm:$0xff]  ;;  %11993 = vst [vmem:[#allocation29_spill] sm:$0xff] %v8473_v23  ;;  %v1475_v32 = vsub.f32 %v1227_v2, %v8099_v33  ;;  %v2203_v15 = vmul.f32 %v8448_v12, %v11994_v36  ;;  %v8479_v14 = vmul.f32 %v4658_v35, %v1957_v28  ;;  %v11997_v46 = vld [vmem:[#allocation166_spill] sm:$0xff] }
 0x2b7   :  { %v1229_v4 = vmul.f32 0.020408163, %v11991_v0  ;;  %2530 = vrot.lane.b32.xlu1 %v2201_v57, %s5030_s23  ;;  %v1719_v11 = vadd.f32 1e-05, %v1595_v43  ;;  %2532 = vrot.lane.b32.xlu0 %v2202_v20, %s5030_s23  ;;  %v4662_v44 = vpop.eup %4661  ;;  %4673 = vrsqrt.f32 %v1717_v58  ;;  %v1476_v7 = vsub.f32 %v1228_v31, %v8191_v1  ;;  %v11995_v0 = vld [vmem:[#allocation158_spill] sm:$0xff]  ;;  %v1959_v43 = vld [vmem:[%s10973_s1 + $0x2b8] sm:$0xff] }
 0x2b8   :  { %v1230_v57 = vmul.f32 0.020408163, %v11995_v0  ;;  %v8483_v6 = vmul.f32 %v4660_v38, %v1958_v21  ;;  %v4664_v33 = vpop.eup %4663  ;;  %4675 = vrsqrt.f32 %v1718_v56  ;;  %v1720_v2 = vadd.f32 1e-05, %v1596_v42  ;;  %v11998_v38 = vld [vmem:[#allocation57_spill] sm:$0xff]  ;;  %v8497_v36 = vpop.permute.xlu1 %2410  ;;  %v1960_v42 = vld [vmem:[%s10973_s1 + $0x2c0] sm:$0xff] }
 0x2b9   :  { %v1598_v20 = vmax.f32 %v1474_v30, 0.0  ;;  %v2204_v35 = vmul.f32 %v8453_v63, %v11997_v46  ;;  %v4666_v28 = vpop.eup %4665  ;;  %v8492_v58 = vmul.f32 %v8436_v17, %v8436_v17  ;;  %v1721_v1 = vadd.f32 1e-05, %v1597_v18  ;;  %11999 = vst [vmem:[#allocation113_spill] sm:$0xff] %v8497_v36  ;;  %v8499_v56 = vpop.permute.xlu0 %2416  ;;  %v1961_v30 = vld [vmem:[%s10973_s1 + $0x2c8] sm:$0xff] }
 0x2ba   :  { %11996 = vst [vmem:[#allocation32_spill] sm:$0xff] %v8483_v6  ;;  %v1477_v31 = vsub.f32 %v1229_v4, %v8158_v51  ;;  %v1231_v21 = vmul.f32 0.020408163, %v11998_v38  ;;  %12000 = vst [vmem:[#allocation177_spill] sm:$0xff] %v8499_v56  ;;  %4677 = vrsqrt.f32 %v1719_v11  ;;  %v1599_v18 = vmax.f32 %v1475_v32, 0.0  ;;  %v12001_v51 = vld [vmem:[#allocation147_spill] sm:$0xff] }
 0x2bb   :  { %2534 = vrot.lane.b32.xlu1 %v2203_v15, %s5030_s23  ;;  %2536 = vrot.lane.b32.xlu0 %v2204_v35, %s5030_s23  ;;  %v2205_v4 = vmul.f32 %v8479_v14, %v12001_v51  ;;  %v8510_v15 = vmul.f32 %v4662_v44, %v1959_v43  ;;  %v1600_v46 = vmax.f32 %v1476_v7, 0.0  ;;  %v1478_v0 = vsub.f32 %v1230_v57, %v8237_v34  ;;  %v12003_v38 = vld [vmem:[#allocation59_spill] sm:$0xff]  ;;  %v12007_v43 = vld [vmem:[#allocation56_spill] sm:$0xff] }
 0x2bc   :  { %v1232_v36 = vmul.f32 0.020408163, %v12003_v38  ;;  %v12004_v56 = vld [vmem:[#allocation151_spill] sm:$0xff]  ;;  %v4668_v63 = vpop.eup %4667  ;;  %4679 = vrsqrt.f32 %v1720_v2  ;;  %v1722_v12 = vadd.f32 1e-05, %v1598_v20  ;;  %v8516_v11 = vmul.f32 %v4666_v28, %v1960_v42  ;;  %v8523_v34 = vpop.permute.xlu1 %2414  ;;  %v1962_v2 = vld [vmem:[%s10973_s1 + $0x2d0] sm:$0xff] }
 0x2bd   :  { %12002 = vst [vmem:[#allocation159_spill] sm:$0xff] %v8510_v15  ;;  %v2206_v23 = vmul.f32 %v8483_v6, %v12004_v56  ;;  %v8518_v32 = vmul.f32 %v4664_v33, %v1961_v30  ;;  %4681 = vrsqrt.f32 %v1721_v1  ;;  %v1601_v35 = vmax.f32 %v1477_v31, 0.0  ;;  %12008 = vst [vmem:[#allocation33_spill] sm:$0xff] %v8523_v34  ;;  %v8525_v57 = vpop.permute.xlu0 %2420  ;;  %v12010_v20 = vld [vmem:[#allocation8_spill] sm:$0xff]  ;;  %v12012_v51 = vld [vmem:[#allocation95_spill] sm:$0xff] }
 0x2be   :  { %12005 = vst [vmem:[#allocation183_spill] sm:$0xff] %v8516_v11  ;;  %v1479_v44 = vsub.f32 %v1231_v21, %v8233_v29  ;;  %v1233_v7 = vmul.f32 0.020408163, %v12007_v43  ;;  %12009 = vst [vmem:[#allocation114_spill] sm:$0xff] %v8525_v57  ;;  %v8532_v33 = vmul.f32 %v8467_v37, %v8467_v37  ;;  %v8535_v28 = vmul.f32 0.020408163, %v12010_v20 }
 0x2bf   :  { %12006 = vst [vmem:[#allocation30_spill] sm:$0xff] %v8518_v32  ;;  %2538 = vrot.lane.b32.xlu1 %v2205_v4, %s5030_s23  ;;  %v1723_v29 = vadd.f32 1e-05, %v1599_v18  ;;  %v12011_v1 = vld [vmem:[#allocation164_spill] sm:$0xff]  ;;  %2540 = vrot.lane.b32.xlu0 %v2206_v23, %s5030_s23  ;;  %v4670_v21 = vpop.eup %4669  ;;  %v1724_v56 = vadd.f32 1e-05, %v1600_v46  ;;  %v1480_v30 = vsub.f32 %v1232_v36, %v8304_v39  ;;  %v2207_v4 = vmul.f32 %v8510_v15, %v12012_v51 }
 0x2c0   :  { %v1234_v31 = vmul.f32 0.020408163, %v12011_v1  ;;  %v1602_v42 = vmax.f32 %v1478_v0, 0.0  ;;  %v1963_v38 = vld [vmem:[%s10973_s1 + $0x2d8] sm:$0xff]  ;;  %4683 = vrsqrt.f32 %v1722_v12  ;;  %v8550_v23 = vmul.f32 %v4668_v63, %v1962_v2  ;;  %v8554_v36 = vpop.permute.xlu1 %2418  ;;  %v12018_v57 = vld [vmem:[#allocation51_spill] sm:$0xff]  ;;  %v1964_v12 = vld [vmem:[%s10973_s1 + $0x2e0] sm:$0xff] }
 0x2c1   :  { %v12013_v43 = vld [vmem:[#allocation9_spill] sm:$0xff]  ;;  %v4672_v46 = vpop.eup %4671  ;;  %v1725_v0 = vadd.f32 1e-05, %v1601_v35  ;;  %v1603_v34 = vmax.f32 %v1479_v44, 0.0  ;;  %v1481_v39 = vsub.f32 %v1233_v7, %v8295_v61  ;;  %12016 = vst [vmem:[#allocation115_spill] sm:$0xff] %v8554_v36  ;;  %v8556_v51 = vpop.permute.xlu0 %2424  ;;  %4685 = vrsqrt.f32 %v1723_v29  ;;  %v12031_v15 = vld [vmem:[#allocation58_spill] sm:$0xff] }
 0x2c2   :  { %v8546_v20 = vmul.f32 0.020408163, %v12013_v43  ;;  %v12014_v18 = vld [vmem:[#allocation153_spill] sm:$0xff]  ;;  %12015 = vst [vmem:[#allocation37_spill] sm:$0xff] %v8550_v23  ;;  %12017 = vst [vmem:[#allocation179_spill] sm:$0xff] %v8556_v51  ;;  %v2209_v43 = vmul.f32 %v8518_v32, %v12018_v57  ;;  %v1482_v35 = vsub.f32 %v1234_v31, %v8398_v47  ;;  %v8566_v61 = vmul.f32 %v4670_v21, %v1963_v38  ;;  %v12022_v51 = vld [vmem:[#allocation10_spill] sm:$0xff] }
 0x2c3   :  { %v2208_v1 = vmul.f32 %v8516_v11, %v12014_v18  ;;  %2542 = vrot.lane.b32.xlu1 %v2207_v4, %s5030_s23  ;;  %v12019_v63 = vld [vmem:[#allocation61_spill] sm:$0xff]  ;;  %4687 = vrsqrt.f32 %v1724_v56  ;;  %v1726_v44 = vadd.f32 1e-05, %v1602_v42  ;;  %v1604_v7 = vmax.f32 %v1480_v30, 0.0  ;;  %v12021_v4 = vld [vmem:[#allocation167_spill] sm:$0xff] }
 0x2c4   :  { %v1235_v2 = vmul.f32 0.020408163, %v12019_v63  ;;  %12020 = vst [vmem:[#allocation188_spill] sm:$0xff] %v8566_v61  ;;  %v1236_v18 = vmul.f32 0.020408163, %v12021_v4  ;;  %v4674_v36 = vpop.eup %4673  ;;  %v8571_v57 = vmul.f32 %v8535_v28, %v8535_v28  ;;  %v12023_v63 = vld [vmem:[#allocation154_spill] sm:$0xff]  ;;  %v8578_v31 = vmul.f32 %v4672_v46, %v1964_v12  ;;  %v8585_v4 = vpop.permute.xlu1 %2422 }
 0x2c5   :  { %2544 = vrot.lane.b32.xlu0 %v2208_v1, %s5030_s23  ;;  %v8574_v29 = vmul.f32 0.020408163, %v12022_v51  ;;  %v2210_v47 = vmul.f32 %v8550_v23, %v12023_v63  ;;  %v1965_v21 = vld [vmem:[%s10973_s1 + $0x2e8] sm:$0xff]  ;;  %v4676_v56 = vpop.eup %4675  ;;  %4689 = vrsqrt.f32 %v1725_v0  ;;  %v1727_v42 = vadd.f32 1e-05, %v1603_v34  ;;  %12026 = vst [vmem:[#allocation187_spill] sm:$0xff] %v8585_v4  ;;  %v8587_v51 = vpop.permute.xlu0 %2428 }
 0x2c6   :  { %12024 = vst [vmem:[#allocation31_spill] sm:$0xff] %v8578_v31  ;;  %v1605_v30 = vmax.f32 %v1481_v39, 0.0  ;;  %v12025_v38 = vld [vmem:[#allocation63_spill] sm:$0xff]  ;;  %12027 = vst [vmem:[#allocation116_spill] sm:$0xff] %v8587_v51  ;;  %v1966_v46 = vld [vmem:[%s10973_s1 + $0x2f0] sm:$0xff]  ;;  %v8594_v12 = vmul.f32 %v8546_v20, %v8546_v20  ;;  %v1483_v0 = vsub.f32 %v1235_v2, %v8337_v5  ;;  %v1606_v34 = vmax.f32 %v1482_v35, 0.0 }
 0x2c7   :  { %v1237_v1 = vmul.f32 0.020408163, %v12025_v38  ;;  %2546 = vrot.lane.b32.xlu1 %v2209_v43, %s5030_s23  ;;  %v12028_v39 = vld [vmem:[#allocation98_spill] sm:$0xff]  ;;  %v4678_v63 = vpop.eup %4677  ;;  %4691 = vrsqrt.f32 %v1726_v44  ;;  %v1728_v38 = vadd.f32 1e-05, %v1604_v7  ;;  %v1484_v4 = vsub.f32 %v1236_v18, %v8414_v52  ;;  %v12029_v23 = vld [vmem:[#allocation11_spill] sm:$0xff] }
 0x2c8   :  { %v2211_v43 = vmul.f32 %v8566_v61, %v12028_v39  ;;  %v8601_v51 = vmul.f32 %v4674_v36, %v1965_v21  ;;  %v8604_v11 = vmul.f32 0.020408163, %v12029_v23  ;;  %v12030_v32 = vld [vmem:[#allocation67_spill] sm:$0xff]  ;;  %v2212_v5 = vmul.f32 %v8578_v31, %v12031_v15  ;;  %v1967_v35 = vld [vmem:[%s10973_s1 + $0x2f8] sm:$0xff]  ;;  %v12033_v7 = vld [vmem:[#allocation12_spill] sm:$0xff] }
 0x2c9   :  { %2548 = vrot.lane.b32.xlu0 %v2210_v47, %s5030_s23  ;;  %v1238_v6 = vmul.f32 0.020408163, %v12030_v32  ;;  %v8609_v2 = vmul.f32 %v4676_v56, %v1966_v46  ;;  %v4680_v44 = vpop.eup %4679  ;;  %v8615_v47 = vmul.f32 0.020408163, %v12033_v7  ;;  %4693 = vrsqrt.f32 %v1727_v42  ;;  %v8619_v32 = vpop.permute.xlu1 %2426  ;;  %v1968_v15 = vld [vmem:[%s10973_s1 + $0x300] sm:$0xff]  ;;  %v12037_v39 = vld [vmem:[#allocation100_spill] sm:$0xff] }
 0x2ca   :  { %v1729_v52 = vadd.f32 1e-05, %v1605_v30  ;;  %v1485_v23 = vsub.f32 %v1237_v1, %v8402_v22  ;;  %12034 = vst [vmem:[#allocation144_spill] sm:$0xff] %v8619_v32  ;;  %v8621_v36 = vpop.permute.xlu0 %2432  ;;  %v4682_v18 = vpop.eup %4681  ;;  %v8628_v21 = vmul.f32 %v8574_v29, %v8574_v29  ;;  %v1607_v56 = vmax.f32 %v1483_v0, 0.0  ;;  %v12036_v30 = vld [vmem:[#allocation64_spill] sm:$0xff]  ;;  %v1969_v22 = vld [vmem:[%s10973_s1 + $0x308] sm:$0xff] }
 0x2cb   :  { %12032 = vst [vmem:[#allocation17_spill] sm:$0xff] %v8609_v2  ;;  %2550 = vrot.lane.b32.xlu1 %v2211_v43, %s5030_s23  ;;  %12035 = vst [vmem:[#allocation79_spill] sm:$0xff] %v8621_v36  ;;  %v1730_v42 = vadd.f32 1e-05, %v1606_v34  ;;  %v1239_v46 = vmul.f32 0.020408163, %v12036_v30  ;;  %4695 = vrsqrt.f32 %v1728_v38  ;;  %v2213_v43 = vmul.f32 %v8601_v51, %v12037_v39 }
 0x2cc   :  { %v1608_v1 = vmax.f32 %v1484_v4, 0.0  ;;  %v8637_v7 = vmul.f32 %v4678_v63, %v1967_v35  ;;  %v1486_v32 = vsub.f32 %v1238_v6, %v8492_v58  ;;  %v12038_v36 = vld [vmem:[#allocation180_spill] sm:$0xff]  ;;  %v12039_v34 = vld [vmem:[#allocation103_spill] sm:$0xff]  ;;  %v8643_v31 = vmul.f32 %v4680_v44, %v1968_v15 }
 0x2cd   :  { %2552 = vrot.lane.b32.xlu0 %v2212_v5, %s5030_s23  ;;  %v1240_v0 = vmul.f32 0.020408163, %v12038_v36  ;;  %v2214_v30 = vmul.f32 %v8609_v2, %v12039_v34  ;;  %v4684_v5 = vpop.eup %4683  ;;  %v8647_v61 = vmul.f32 %v8604_v11, %v8604_v11  ;;  %4697 = vrsqrt.f32 %v1729_v52  ;;  %v8650_v63 = vpop.permute.xlu1 %2430  ;;  %v1970_v58 = vld [vmem:[%s10973_s1 + $0x310] sm:$0xff]  ;;  %v12043_v36 = vld [vmem:[#allocation69_spill] sm:$0xff] }
 0x2ce   :  { %12040 = vst [vmem:[#allocation41_spill] sm:$0xff] %v8643_v31  ;;  %v1609_v4 = vmax.f32 %v1485_v23, 0.0  ;;  %12041 = vst [vmem:[#allocation80_spill] sm:$0xff] %v8650_v63  ;;  %v8652_v38 = vpop.permute.xlu0 %2436  ;;  %v8654_v6 = vmul.f32 %v4682_v18, %v1969_v22  ;;  %v1731_v35 = vadd.f32 1e-05, %v1607_v56  ;;  %4699 = vrsqrt.f32 %v1730_v42  ;;  %v4686_v52 = vpop.eup %4685  ;;  %v12044_v18 = vld [vmem:[#allocation105_spill] sm:$0xff] }
 0x2cf   :  { %2554 = vrot.lane.b32.xlu1 %v2213_v43, %s5030_s23  ;;  %12042 = vst [vmem:[#allocation40_spill] sm:$0xff] %v8652_v38  ;;  %v1487_v44 = vsub.f32 %v1239_v46, %v8464_v40  ;;  %v1241_v15 = vmul.f32 0.020408163, %v12043_v36  ;;  %v8664_v23 = vmul.f32 %v8615_v47, %v8615_v47  ;;  %v1732_v39 = vadd.f32 1e-05, %v1608_v1  ;;  %v12045_v43 = vld [vmem:[#allocation60_spill] sm:$0xff] }
 0x2d0   :  { %v1242_v22 = vmul.f32 0.020408163, %v12044_v18  ;;  %v2215_v34 = vmul.f32 %v8637_v7, %v12045_v43  ;;  %v4688_v63 = vpop.eup %4687  ;;  %v1610_v56 = vmax.f32 %v1486_v32, 0.0  ;;  %v1488_v42 = vsub.f32 %v1240_v0, %v8571_v57  ;;  %v1972_v1 = vld [vmem:[%s10973_s1 + $0x320] sm:$0xff]  ;;  %v12047_v36 = vld [vmem:[#allocation13_spill] sm:$0xff] }
 0x2d1   :  { %2556 = vrot.lane.b32.xlu0 %v2214_v30, %s5030_s23  ;;  %v2216_v40 = vmul.f32 %v8643_v31, %v8032_v41  ;;  %v8672_v46 = vmul.f32 %v4684_v5, %v1970_v58  ;;  %v1971_v30 = vld [vmem:[%s10973_s1 + $0x318] sm:$0xff]  ;;  %v8681_v18 = vmul.f32 0.020408163, %v12047_v36  ;;  %v12048_v43 = vld [vmem:[#allocation14_spill] sm:$0xff]  ;;  %v1733_v57 = vadd.f32 1e-05, %v1609_v4  ;;  %v8687_v41 = vpop.permute.xlu1 %2434 }
 0x2d2   :  { %v8684_v32 = vmul.f32 0.020408163, %v12048_v43  ;;  %12049 = vst [vmem:[#allocation93_spill] sm:$0xff] %v8687_v41  ;;  %v8689_v0 = vpop.permute.xlu0 %2440  ;;  %v2217_v5 = vmul.f32 %v8654_v6, %v8000_v48  ;;  %v4690_v58 = vpop.eup %4689  ;;  %4701 = vrsqrt.f32 %v1731_v35  ;;  %v1611_v38 = vmax.f32 %v1487_v44, 0.0  ;;  %v12051_v36 = vld [vmem:[#allocation68_spill] sm:$0xff]  ;;  %v1973_v4 = vld [vmem:[%s10973_s1 + $0x328] sm:$0xff] }
 0x2d3   :  { %12046 = vst [vmem:[#allocation117_spill] sm:$0xff] %v8672_v46  ;;  %2558 = vrot.lane.b32.xlu1 %v2215_v34, %s5030_s23  ;;  %12050 = vst [vmem:[#allocation21_spill] sm:$0xff] %v8689_v0  ;;  %v1489_v31 = vsub.f32 %v1241_v15, %v8532_v33  ;;  %v1243_v2 = vmul.f32 0.020408163, %v12051_v36  ;;  %4703 = vrsqrt.f32 %v1732_v39  ;;  %v1490_v34 = vsub.f32 %v1242_v22, %v8628_v21  ;;  %v12053_v0 = vld [vmem:[#allocation189_spill] sm:$0xff]  ;;  %v12054_v15 = vld [vmem:[#allocation72_spill] sm:$0xff] }
 0x2d4   :  { %v8700_v43 = vmul.f32 %v4686_v52, %v1971_v30  ;;  %v8702_v41 = vmul.f32 %v4688_v63, %v1972_v1  ;;  %v4692_v48 = vpop.eup %4691  ;;  %v1734_v35 = vadd.f32 1e-05, %v1610_v56  ;;  %v1612_v44 = vmax.f32 %v1488_v42, 0.0 }
 0x2d5   :  { %2560 = vrot.lane.b32.xlu0 %v2216_v40, %s5030_s23  ;;  %v1244_v33 = vmul.f32 0.020408163, %v12053_v0  ;;  %v2218_v36 = vmul.f32 %v8672_v46, %v12054_v15  ;;  %v1974_v40 = vld [vmem:[%s10973_s1 + $0x330] sm:$0xff]  ;;  %v8712_v39 = vmul.f32 %v8681_v18, %v8681_v18  ;;  %v8716_v21 = vmul.f32 %v8684_v32, %v8684_v32  ;;  %v8719_v63 = vpop.permute.xlu1 %2438  ;;  %v12057_v0 = vld [vmem:[#allocation182_spill] sm:$0xff]  ;;  %v12058_v46 = vld [vmem:[#allocation191_spill] sm:$0xff] }
 0x2d6   :  { %12052 = vst [vmem:[#allocation118_spill] sm:$0xff] %v8700_v43  ;;  %4705 = vrsqrt.f32 %v1733_v57  ;;  %12055 = vst [vmem:[#allocation45_spill] sm:$0xff] %v8719_v63  ;;  %v8721_v52 = vpop.permute.xlu0 %2444  ;;  %v8723_v22 = vmul.f32 %v4690_v58, %v1973_v4  ;;  %v4694_v56 = vpop.eup %4693  ;;  %v1735_v42 = vadd.f32 1e-05, %v1611_v38  ;;  %v1613_v30 = vmax.f32 %v1489_v31, 0.0  ;;  %v1975_v57 = vld [vmem:[%s10973_s1 + $0x338] sm:$0xff] }
 0x2d7   :  { %2562 = vrot.lane.b32.xlu1 %v2217_v5, %s5030_s23  ;;  %12056 = vst [vmem:[#allocation46_spill] sm:$0xff] %v8721_v52  ;;  %v1491_v1 = vsub.f32 %v1243_v2, %v8594_v12  ;;  %v1245_v15 = vmul.f32 0.020408163, %v12057_v0  ;;  %v1614_v5 = vmax.f32 %v1490_v34, 0.0  ;;  %v2219_v63 = vmul.f32 %v8700_v43, %v12058_v46  ;;  %v12059_v38 = vld [vmem:[#allocation107_spill] sm:$0xff]  ;;  %v1976_v0 = vld [vmem:[%s10973_s1 + $0x340] sm:$0xff] }
 0x2d8   :  { %v2220_v58 = vmul.f32 %v8702_v41, %v8161_v25  ;;  %v8735_v4 = vmul.f32 %v4692_v48, %v1974_v40  ;;  %v4696_v31 = vpop.eup %4695  ;;  %4707 = vrsqrt.f32 %v1734_v35  ;;  %v1736_v12 = vadd.f32 1e-05, %v1612_v44  ;;  %v12060_v34 = vld [vmem:[#allocation15_spill] sm:$0xff]  ;;  %v12061_v46 = vld [vmem:[#allocation16_spill] sm:$0xff] }
 0x2d9   :  { %2564 = vrot.lane.b32.xlu0 %v2218_v36, %s5030_s23  ;;  %v1492_v2 = vsub.f32 %v1244_v33, %v8664_v23  ;;  %v1246_v36 = vmul.f32 0.020408163, %v12059_v38  ;;  %v8743_v52 = vmul.f32 0.020408163, %v12060_v34  ;;  %v8746_v43 = vmul.f32 0.020408163, %v12061_v46  ;;  %v8749_v25 = vpop.permute.xlu1 %2442 }
 0x2da   :  { %12062 = vst [vmem:[#allocation120_spill] sm:$0xff] %v8749_v25  ;;  %v8751_v48 = vpop.permute.xlu0 %2448  ;;  %v2221_v23 = vmul.f32 %v8723_v22, %v8130_v26  ;;  %v8755_v35 = vmul.f32 %v4694_v56, %v1975_v57  ;;  %v4698_v44 = vpop.eup %4697  ;;  %4709 = vrsqrt.f32 %v1735_v42  ;;  %v1737_v33 = vadd.f32 1e-05, %v1613_v30  ;;  %v12064_v25 = vld [vmem:[#allocation73_spill] sm:$0xff]  ;;  %v1978_v42 = vld [vmem:[%s10973_s1 + $0x350] sm:$0xff] }
 0x2db   :  { %2566 = vrot.lane.b32.xlu1 %v2219_v63, %s5030_s23  ;;  %12063 = vst [vmem:[#allocation2_spill] sm:$0xff] %v8751_v48  ;;  %v1615_v40 = vmax.f32 %v1491_v1, 0.0  ;;  %v1493_v38 = vsub.f32 %v1245_v15, %v8647_v61  ;;  %v1977_v63 = vld [vmem:[%s10973_s1 + $0x348] sm:$0xff]  ;;  %v4700_v34 = vpop.eup %4699  ;;  %v1738_v46 = vadd.f32 1e-05, %v1614_v5  ;;  %v2222_v26 = vmul.f32 %v8735_v4, %v8205_v13  ;;  %v12066_v1 = vld [vmem:[#allocation84_spill] sm:$0xff] }
 0x2dc   :  { %v1247_v48 = vmul.f32 0.020408163, %v12064_v25  ;;  %v8765_v56 = vmul.f32 %v4696_v31, %v1976_v0  ;;  %4711 = vrsqrt.f32 %v1736_v12  ;;  %v1616_v61 = vmax.f32 %v1492_v2, 0.0  ;;  %v12067_v5 = vld [vmem:[#allocation22_spill] sm:$0xff] }
 0x2dd   :  { %2568 = vrot.lane.b32.xlu0 %v2220_v58, %s5030_s23  ;;  %v1494_v30 = vsub.f32 %v1246_v36, %v8716_v21  ;;  %v1248_v15 = vmul.f32 0.020408163, %v12066_v1  ;;  %v1372_v57 = vmul.f32 %v8746_v43, %v8746_v43  ;;  %v8775_v58 = vmul.f32 0.020408163, %v12067_v5  ;;  %v8778_v13 = vpop.permute.xlu1 %2446  ;;  %v12070_v1 = vld [vmem:[#allocation42_spill] sm:$0xff] }
 0x2de   :  { %12065 = vst [vmem:[#allocation85_spill] sm:$0xff] %v8765_v56  ;;  %12068 = vst [vmem:[#allocation146_spill] sm:$0xff] %v8778_v13  ;;  %v8780_v31 = vpop.permute.xlu0 %2452  ;;  %v2223_v12 = vmul.f32 %v8755_v35, %v8166_v45  ;;  %v8784_v2 = vmul.f32 %v4698_v44, %v1977_v63  ;;  %4713 = vrsqrt.f32 %v1737_v33  ;;  %v1739_v21 = vadd.f32 1e-05, %v1615_v40  ;;  %v1979_v45 = vld [vmem:[%s10973_s1 + $0x358] sm:$0xff]  ;;  %v12071_v63 = vld [vmem:[#allocation43_spill] sm:$0xff] }
 0x2df   :  { %2570 = vrot.lane.b32.xlu1 %v2221_v23, %s5030_s23  ;;  %12069 = vst [vmem:[#allocation129_spill] sm:$0xff] %v8780_v31  ;;  %v1617_v36 = vmax.f32 %v1493_v38, 0.0  ;;  %v8787_v0 = vmul.f32 %v4700_v34, %v1978_v42  ;;  %v4702_v25 = vpop.eup %4701  ;;  %4715 = vrsqrt.f32 %v1738_v46  ;;  %v1495_v23 = vsub.f32 %v1247_v48, %v8712_v39  ;;  %v1980_v46 = vld [vmem:[%s10973_s1 + $0x360] sm:$0xff] }
 0x2e0   :  { %v1249_v5 = vmul.f32 0.020408163, %v12070_v1  ;;  %v2224_v13 = vmul.f32 %v8765_v56, %v8272_v10  ;;  %v4704_v44 = vpop.eup %4703  ;;  %v1740_v33 = vadd.f32 1e-05, %v1616_v61  ;;  %v1618_v40 = vmax.f32 %v1494_v30, 0.0  ;;  %v12072_v48 = vld [vmem:[#allocation18_spill] sm:$0xff] }
 0x2e1   :  { %2572 = vrot.lane.b32.xlu0 %v2222_v26, %s5030_s23  ;;  %v1496_v38 = vsub.f32 %v1248_v15, %v1372_v57  ;;  %v1250_v34 = vmul.f32 0.020408163, %v12071_v63  ;;  %v1373_v39 = vmul.f32 %v8743_v52, %v8743_v52  ;;  %v8803_v26 = vmul.f32 0.020408163, %v12072_v48  ;;  %v8808_v42 = vpop.permute.xlu1 %2450 }
 0x2e2   :  { %v1374_v10 = vmul.f32 %v8775_v58, %v8775_v58  ;;  %12073 = vst [vmem:[#allocation119_spill] sm:$0xff] %v8808_v42  ;;  %v8810_v61 = vpop.permute.xlu0 %2456  ;;  %v2225_v30 = vmul.f32 %v8784_v2, %v8264_v24  ;;  %4717 = vrsqrt.f32 %v1739_v21  ;;  %v1741_v57 = vadd.f32 1e-05, %v1617_v36  ;;  %v1981_v24 = vld [vmem:[%s10973_s1 + $0x368] sm:$0xff] }
 0x2e3   :  { %2574 = vrot.lane.b32.xlu1 %v2223_v12, %s5030_s23  ;;  %12074 = vst [vmem:[#allocation23_spill] sm:$0xff] %v8810_v61  ;;  %v4706_v15 = vpop.eup %4705  ;;  %v2226_v1 = vmul.f32 %v8787_v0, %v8340_v3  ;;  %v8817_v63 = vmul.f32 %v4702_v25, %v1979_v45  ;;  %v1619_v48 = vmax.f32 %v1495_v23, 0.0  ;;  %v1497_v31 = vsub.f32 %v1249_v5, %v1373_v39  ;;  %v12075_v12 = vld [vmem:[#allocation74_spill] sm:$0xff]  ;;  %v1982_v5 = vld [vmem:[%s10973_s1 + $0x370] sm:$0xff] }
 0x2e4   :  { %v1251_v56 = vmul.f32 0.020408163, %v12075_v12  ;;  %v8820_v42 = vmul.f32 %v4704_v44, %v1980_v46  ;;  %4719 = vrsqrt.f32 %v1740_v33  ;;  %v1742_v21 = vadd.f32 1e-05, %v1618_v40 }
 0x2e5   :  { %2576 = vrot.lane.b32.xlu0 %v2224_v13, %s5030_s23  ;;  %v1620_v36 = vmax.f32 %v1496_v38, 0.0  ;;  %v1498_v61 = vsub.f32 %v1250_v34, %v1374_v10  ;;  %v4708_v13 = vpop.eup %4707  ;;  %v1375_v3 = vmul.f32 %v8803_v26, %v8803_v26  ;;  %v8828_v25 = vpop.permute.xlu1 %2454  ;;  %4721 = vrsqrt.f32 %v1741_v57  ;;  %v1983_v57 = vld [vmem:[%s10973_s1 + $0x378] sm:$0xff] }
 0x2e6   :  { %v8830_v23 = vpop.permute.xlu0 %2460  ;;  %v2227_v45 = vmul.f32 %v8817_v63, %v8307_v27  ;;  %v8838_v44 = vmul.f32 %v4706_v15, %v1981_v24  ;;  %v1743_v40 = vadd.f32 1e-05, %v1619_v48  ;;  %v1621_v38 = vmax.f32 %v1497_v31, 0.0 }
 0x2e7   :  { %2578 = vrot.lane.b32.xlu1 %v2225_v30, %s5030_s23  ;;  %v4710_v33 = vpop.eup %4709  ;;  %v1499_v34 = vsub.f32 %v1251_v56, %v1375_v3  ;;  %v2228_v46 = vmul.f32 %v8820_v42, %v8370_v16  ;;  %4723 = vrsqrt.f32 %v1742_v21  ;;  %v1744_v39 = vadd.f32 1e-05, %v1620_v36  ;;  %v1984_v16 = vld [vmem:[%s10973_s1 + $0x380] sm:$0xff]  ;;  %v1985_v3 = vld [vmem:[%s10973_s1 + $0x388] sm:$0xff] }
 0x2e8   :  { %v1622_v10 = vmax.f32 %v1498_v61, 0.0  ;;  %v8842_v30 = vmul.f32 %v4708_v13, %v1982_v5  ;;  %v2229_v56 = vmul.f32 %v8838_v44, %v8367_v53  ;;  %4725 = vrsqrt.f32 %v1743_v40 }
 0x2e9   :  { %2580 = vrot.lane.b32.xlu0 %v2226_v1, %s5030_s23  ;;  %v4712_v1 = vpop.eup %4711  ;;  %v8848_v27 = vpop.permute.xlu1 %2458  ;;  %v1745_v61 = vadd.f32 1e-05, %v1621_v38  ;;  %v1623_v48 = vmax.f32 %v1499_v34, 0.0  ;;  %v8858_v12 = vmul.f32 %v4710_v33, %v1983_v57  ;;  %4727 = vrsqrt.f32 %v1744_v39  ;;  %v1987_v39 = vld [vmem:[%s10973_s1 + $0x398] sm:$0xff] }
 0x2ea   :  { %v8850_v15 = vpop.permute.xlu0 %2464  ;;  %v1746_v21 = vadd.f32 1e-05, %v1622_v10  ;;  %v2230_v36 = vmul.f32 %v8842_v30, %v8436_v17  ;;  %v8862_v13 = vmul.f32 %v4712_v1, %v1984_v16 }
 0x2eb   :  { %2582 = vrot.lane.b32.xlu1 %v2227_v45, %s5030_s23  ;;  %v4714_v31 = vpop.eup %4713  ;;  %v1986_v45 = vld [vmem:[%s10973_s1 + $0x390] sm:$0xff]  ;;  %4729 = vrsqrt.f32 %v1745_v61  ;;  %v1747_v17 = vadd.f32 1e-05, %v1623_v48  ;;  %v2231_v40 = vmul.f32 %v8858_v12, %v8433_v59  ;;  %v1988_v59 = vld [vmem:[%s10973_s1 + $0x3a0] sm:$0xff]  ;;  %v1989_v48 = vld [vmem:[%s10973_s1 + $0x3a8] sm:$0xff] }
 0x2ec   :  { %v4716_v24 = vpop.eup %4715  ;;  %v8878_v38 = vmul.f32 %v4714_v31, %v1985_v3  ;;  %4731 = vrsqrt.f32 %v1746_v21  ;;  %v2232_v34 = vmul.f32 %v8862_v13, %v8535_v28 }
 0x2ed   :  { %2584 = vrot.lane.b32.xlu0 %v2228_v46, %s5030_s23  ;;  %v8868_v53 = vpop.permute.xlu1 %2462  ;;  %v8882_v46 = vmul.f32 %v4716_v24, %v1986_v45  ;;  %4733 = vrsqrt.f32 %v1747_v17 }
 0x2ee   :  { %v8870_v5 = vpop.permute.xlu0 %2468  ;;  %v2233_v16 = vmul.f32 %v8878_v38, %v8467_v37  ;;  %v1990_v37 = vld [vmem:[%s10973_s1 + $0x3b0] sm:$0xff] }
 0x2ef   :  { %2586 = vrot.lane.b32.xlu1 %v2229_v56, %s5030_s23  ;;  %v4718_v33 = vpop.eup %4717  ;;  %v2234_v31 = vmul.f32 %v8882_v46, %v8574_v29 }
 0x2f0   :  { %v8898_v56 = vmul.f32 %v4718_v33, %v1987_v39 }
 0x2f1   :  { %2588 = vrot.lane.b32.xlu0 %v2230_v36, %s5030_s23  ;;  %v4720_v10 = vpop.eup %4719  ;;  %v8888_v57 = vpop.permute.xlu1 %2466 }
 0x2f2   :  { %v8890_v1 = vpop.permute.xlu0 %2472  ;;  %v4722_v28 = vpop.eup %4721  ;;  %v8902_v61 = vmul.f32 %v4720_v10, %v1988_v59  ;;  %v2235_v29 = vmul.f32 %v8898_v56, %v8546_v20  ;;  %v1992_v20 = vld [vmem:[%s10973_s1 + $0x3c0] sm:$0xff] }
 0x2f3   :  { %2590 = vrot.lane.b32.xlu1 %v2231_v40, %s5030_s23  ;;  %v8918_v3 = vmul.f32 %v4722_v28, %v1989_v48  ;;  %v1991_v40 = vld [vmem:[%s10973_s1 + $0x3b8] sm:$0xff]  ;;  %v1993_v48 = vld [vmem:[%s10973_s1 + $0x3c8] sm:$0xff] }
 0x2f4   :  { %v4724_v24 = vpop.eup %4723  ;;  %v2236_v33 = vmul.f32 %v8902_v61, %v8615_v47 }
 0x2f5   :  { %2592 = vrot.lane.b32.xlu0 %v2232_v34, %s5030_s23  ;;  %v8908_v21 = vpop.permute.xlu1 %2470  ;;  %v4726_v45 = vpop.eup %4725  ;;  %v8922_v17 = vmul.f32 %v4724_v24, %v1990_v37  ;;  %v2237_v47 = vmul.f32 %v8918_v3, %v8604_v11  ;;  %v1994_v11 = vld [vmem:[%s10973_s1 + $0x3d0] sm:$0xff] }
 0x2f6   :  { %v8910_v36 = vpop.permute.xlu0 %2476  ;;  %v4728_v34 = vpop.eup %4727  ;;  %v8938_v59 = vmul.f32 %v4726_v45, %v1991_v40 }
 0x2f7   :  { %2594 = vrot.lane.b32.xlu1 %v2233_v16, %s5030_s23  ;;  %v2238_v16 = vmul.f32 %v8922_v17, %v8684_v32 }
 0x2f8   :  { %v4730_v28 = vpop.eup %4729  ;;  %v2239_v32 = vmul.f32 %v8938_v59, %v8681_v18 }
 0x2f9   :  { %2596 = vrot.lane.b32.xlu0 %v2234_v31, %s5030_s23  ;;  %v8928_v39 = vpop.permute.xlu1 %2474  ;;  %v8942_v31 = vmul.f32 %v4728_v34, %v1992_v20  ;;  %v4732_v24 = vpop.eup %4731  ;;  %v8958_v45 = vmul.f32 %v4730_v28, %v1993_v48  ;;  %v1995_v20 = vld [vmem:[%s10973_s1 + $0x3d8] sm:$0xff] }
 0x2fa   :  { %v8930_v10 = vpop.permute.xlu0 %2480  ;;  %v8962_v34 = vmul.f32 %v4732_v24, %v1994_v11 }
 0x2fb   :  { %2598 = vrot.lane.b32.xlu1 %v2235_v29, %s5030_s23  ;;  %v2240_v40 = vmul.f32 %v8942_v31, %v8746_v43  ;;  %v2241_v18 = vmul.f32 %v8958_v45, %v8743_v52 }
 0x2fc   :  { %v2242_v43 = vmul.f32 %v8962_v34, %v8775_v58  ;;  %v12080_v58 = vld [vmem:[#allocation175_spill] sm:$0xff] }
 0x2fd   :  { %2600 = vrot.lane.b32.xlu0 %v2236_v33, %s5030_s23  ;;  %v8948_v37 = vpop.permute.xlu1 %2478  ;;  %v4734_v33 = vpop.eup %4733 }
 0x2fe   :  { %v8950_v29 = vpop.permute.xlu0 %2484  ;;  %v8975_v28 = vmul.f32 %v4734_v33, %v1995_v20  ;;  %v12079_v33 = vld [vmem:[#allocation184_spill] sm:$0xff] }
 0x2ff   :  { %2602 = vrot.lane.b32.xlu1 %v2237_v47, %s5030_s23 }
 0x300   :  { %v2243_v11 = vmul.f32 %v8975_v28, %v8803_v26 }
 0x301   :  { %2604 = vrot.lane.b32.xlu0 %v2238_v16, %s5030_s23  ;;  %v8968_v47 = vpop.permute.xlu1 %2482 }
 0x302   :  { %v8970_v16 = vpop.permute.xlu0 %2488 }
 0x303   :  { %2606 = vrot.lane.b32.xlu1 %v2239_v32, %s5030_s23 }
 0x305   :  { %2608 = vrot.lane.b32.xlu0 %v2240_v40, %s5030_s23  ;;  %v8980_v48 = vpop.permute.xlu1 %2486 }
 0x306   :  { %12076 = vst [vmem:[#allocation25_spill] sm:$0xff] %v8980_v48  ;;  %v8982_v24 = vpop.permute.xlu0 %2492 }
 0x307   :  { %2610 = vrot.lane.b32.xlu1 %v2241_v18, %s5030_s23  ;;  %v12083_v18 = vld [vmem:[#allocation36_spill] sm:$0xff] }
 0x309   :  { %2612 = vrot.lane.b32.xlu0 %v2242_v43, %s5030_s23  ;;  %v8988_v32 = vpop.permute.xlu1 %2490  ;;  %v12084_v43 = vld [vmem:[#allocation181_spill] sm:$0xff] }
 0x30a   :  { %12077 = vst [vmem:[#allocation3_spill] sm:$0xff] %v8988_v32  ;;  %v8990_v52 = vpop.permute.xlu0 %2496 }
 0x30b   :  { %2614 = vrot.lane.b32.xlu1 %v2243_v11, %s5030_s23  ;;  %12078 = vst [vmem:[#allocation4_spill] sm:$0xff] %v8990_v52  ;;  %v12087_v11 = vld [vmem:[#allocation39_spill] sm:$0xff] }
 0x30c   :  { %v12089_v52 = vld [vmem:[#allocation19_spill] sm:$0xff] }
 0x30d   :  { %2866 = vperm.xlu0 %4483, %v12079_v33   ;;  %v8994_v40 = vpop.permute.xlu1 %2494 }
 0x30e   :  { %12081 = vst [vmem:[#allocation127_spill] sm:$0xff] %v8994_v40  ;;  %v8996_v20 = vpop.permute.xlu0 %2500 }
 0x30f   :  { %2871 = vperm.xlu1 %4484, %v12080_v58   ;;  %12082 = vst [vmem:[#allocation96_spill] sm:$0xff] %v8996_v20  ;;  %v12091_v58 = vld [vmem:[#allocation44_spill] sm:$0xff]  ;;  %v12093_v20 = vld [vmem:[#allocation82_spill] sm:$0xff] }
 0x311   :  { %2881 = vperm.xlu0 %4483, %v12083_v18   ;;  %v9000_v48 = vpop.permute.xlu1 %2498 }
 0x312   :  { %12085 = vst [vmem:[#allocation139_spill] sm:$0xff] %v9000_v48  ;;  %v9002_v26 = vpop.permute.xlu0 %2504 }
 0x313   :  { %2876 = vperm.xlu1 %4484, %v12084_v43   ;;  %12086 = vst [vmem:[#allocation130_spill] sm:$0xff] %v9002_v26  ;;  %v12095_v43 = vld [vmem:[#allocation194_spill] sm:$0xff] }
 0x314   :  { %v12097_v26 = vld [vmem:[#allocation86_spill] sm:$0xff] }
 0x315   :  { %2891 = vperm.xlu0 %4483, %v12087_v11   ;;  %v9005_v32 = vpop.permute.xlu1 %2502 }
 0x316   :  { %12088 = vst [vmem:[#allocation161_spill] sm:$0xff] %v9005_v32  ;;  %v9008_v33 = vpop.permute.xlu0 %2508  ;;  %v12099_v32 = vld [vmem:[#allocation87_spill] sm:$0xff] }
 0x317   :  { %2886 = vperm.xlu1 %4484, %v12089_v52   ;;  %12090 = vst [vmem:[#allocation5_spill] sm:$0xff] %v9008_v33  ;;  %v12101_v33 = vld [vmem:[#allocation122_spill] sm:$0xff] }
 0x319   :  { %2901 = vperm.xlu0 %4483, %v12091_v58   ;;  %v9011_v40 = vpop.permute.xlu1 %2506 }
 0x31a   :  { %12092 = vst [vmem:[#allocation6_spill] sm:$0xff] %v9011_v40  ;;  %v9014_v18 = vpop.permute.xlu0 %2512  ;;  %v12103_v40 = vld [vmem:[#allocation126_spill] sm:$0xff] }
 0x31b   :  { %2896 = vperm.xlu1 %4484, %v12093_v20   ;;  %12094 = vst [vmem:[#allocation91_spill] sm:$0xff] %v9014_v18  ;;  %v12105_v18 = vld [vmem:[#allocation88_spill] sm:$0xff] }
 0x31d   :  { %2911 = vperm.xlu0 %4483, %v12095_v43   ;;  %v9017_v48 = vpop.permute.xlu1 %2510 }
 0x31e   :  { %12096 = vst [vmem:[#allocation145_spill] sm:$0xff] %v9017_v48  ;;  %v9020_v11 = vpop.permute.xlu0 %2516  ;;  %v12107_v48 = vld [vmem:[#allocation133_spill] sm:$0xff] }
 0x31f   :  { %2906 = vperm.xlu1 %4484, %v12097_v26   ;;  %12098 = vst [vmem:[#allocation7_spill] sm:$0xff] %v9020_v11  ;;  %v12109_v11 = vld [vmem:[#allocation134_spill] sm:$0xff] }
 0x321   :  { %2921 = vperm.xlu0 %4483, %v12099_v32   ;;  %v9023_v52 = vpop.permute.xlu1 %2514 }
 0x322   :  { %12100 = vst [vmem:[#allocation155_spill] sm:$0xff] %v9023_v52  ;;  %v9026_v58 = vpop.permute.xlu0 %2520  ;;  %v12111_v52 = vld [vmem:[#allocation136_spill] sm:$0xff] }
 0x323   :  { %2916 = vperm.xlu1 %4484, %v12101_v33   ;;  %12102 = vst [vmem:[#allocation142_spill] sm:$0xff] %v9026_v58  ;;  %v12113_v58 = vld [vmem:[#allocation132_spill] sm:$0xff] }
 0x325   :  { %2931 = vperm.xlu0 %4483, %v12103_v40   ;;  %v9029_v20 = vpop.permute.xlu1 %2518 }
 0x326   :  { %12104 = vst [vmem:[#allocation158_spill] sm:$0xff] %v9029_v20  ;;  %v9032_v43 = vpop.permute.xlu0 %2524  ;;  %v12115_v20 = vld [vmem:[#allocation138_spill] sm:$0xff] }
 0x327   :  { %2926 = vperm.xlu1 %4484, %v12105_v18   ;;  %12106 = vst [vmem:[#allocation166_spill] sm:$0xff] %v9032_v43  ;;  %v12117_v43 = vld [vmem:[#allocation28_spill] sm:$0xff] }
 0x329   :  { %2941 = vperm.xlu0 %4483, %v12107_v48   ;;  %v9035_v26 = vpop.permute.xlu1 %2522 }
 0x32a   :  { %12108 = vst [vmem:[#allocation57_spill] sm:$0xff] %v9035_v26  ;;  %v9038_v32 = vpop.permute.xlu0 %2528  ;;  %v12119_v26 = vld [vmem:[#allocation140_spill] sm:$0xff] }
 0x32b   :  { %2936 = vperm.xlu1 %4484, %v12109_v11   ;;  %12110 = vst [vmem:[#allocation147_spill] sm:$0xff] %v9038_v32  ;;  %v12121_v32 = vld [vmem:[#allocation141_spill] sm:$0xff] }
 0x32d   :  { %2951 = vperm.xlu0 %4483, %v12111_v52   ;;  %v9041_v33 = vpop.permute.xlu1 %2526 }
 0x32e   :  { %12112 = vst [vmem:[#allocation59_spill] sm:$0xff] %v9041_v33  ;;  %v9044_v40 = vpop.permute.xlu0 %2532  ;;  %v12123_v33 = vld [vmem:[#allocation92_spill] sm:$0xff] }
 0x32f   :  { %2946 = vperm.xlu1 %4484, %v12113_v58   ;;  %12114 = vst [vmem:[#allocation151_spill] sm:$0xff] %v9044_v40  ;;  %v12125_v40 = vld [vmem:[#allocation143_spill] sm:$0xff] }
 0x331   :  { %2961 = vperm.xlu0 %4483, %v12115_v20   ;;  %v9047_v18 = vpop.permute.xlu1 %2530 }
 0x332   :  { %12116 = vst [vmem:[#allocation56_spill] sm:$0xff] %v9047_v18  ;;  %v9050_v48 = vpop.permute.xlu0 %2536  ;;  %v12127_v18 = vld [vmem:[#allocation163_spill] sm:$0xff] }
 0x333   :  { %2956 = vperm.xlu1 %4484, %v12117_v43   ;;  %12118 = vst [vmem:[#allocation8_spill] sm:$0xff] %v9050_v48  ;;  %v12129_v48 = vld [vmem:[#allocation160_spill] sm:$0xff] }
 0x335   :  { %2971 = vperm.xlu0 %4483, %v12119_v26   ;;  %v9053_v11 = vpop.permute.xlu1 %2534 }
 0x336   :  { %12120 = vst [vmem:[#allocation164_spill] sm:$0xff] %v9053_v11  ;;  %v9056_v52 = vpop.permute.xlu0 %2540  ;;  %v12131_v11 = vld [vmem:[#allocation162_spill] sm:$0xff] }
 0x337   :  { %2966 = vperm.xlu1 %4484, %v12121_v32   ;;  %12122 = vst [vmem:[#allocation95_spill] sm:$0xff] %v9056_v52  ;;  %v12133_v52 = vld [vmem:[#allocation35_spill] sm:$0xff] }
 0x339   :  { %2981 = vperm.xlu0 %4483, %v12123_v33   ;;  %v9059_v58 = vpop.permute.xlu1 %2538 }
 0x33a   :  { %12124 = vst [vmem:[#allocation9_spill] sm:$0xff] %v9059_v58  ;;  %v9062_v20 = vpop.permute.xlu0 %2544  ;;  %v12135_v58 = vld [vmem:[#allocation47_spill] sm:$0xff] }
 0x33b   :  { %2976 = vperm.xlu1 %4484, %v12125_v40   ;;  %12126 = vst [vmem:[#allocation153_spill] sm:$0xff] %v9062_v20  ;;  %v12137_v20 = vld [vmem:[#allocation38_spill] sm:$0xff] }
 0x33d   :  { %2991 = vperm.xlu0 %4483, %v12127_v18   ;;  %v9065_v43 = vpop.permute.xlu1 %2542 }
 0x33e   :  { %12128 = vst [vmem:[#allocation51_spill] sm:$0xff] %v9065_v43  ;;  %v9068_v26 = vpop.permute.xlu0 %2548  ;;  %v12139_v43 = vld [vmem:[#allocation149_spill] sm:$0xff] }
 0x33f   :  { %2986 = vperm.xlu1 %4484, %v12129_v48   ;;  %12130 = vst [vmem:[#allocation61_spill] sm:$0xff] %v9068_v26  ;;  %v12141_v26 = vld [vmem:[#allocation94_spill] sm:$0xff] }
 0x341   :  { %3001 = vperm.xlu0 %4483, %v12131_v11   ;;  %v9071_v32 = vpop.permute.xlu1 %2546 }
 0x342   :  { %12132 = vst [vmem:[#allocation167_spill] sm:$0xff] %v9071_v32  ;;  %v9074_v33 = vpop.permute.xlu0 %2552  ;;  %v12143_v32 = vld [vmem:[#allocation148_spill] sm:$0xff] }
 0x343   :  { %2996 = vperm.xlu1 %4484, %v12133_v52   ;;  %12134 = vst [vmem:[#allocation10_spill] sm:$0xff] %v9074_v33  ;;  %v12145_v33 = vld [vmem:[#allocation49_spill] sm:$0xff] }
 0x345   :  { %3011 = vperm.xlu0 %4483, %v12135_v58   ;;  %v9077_v40 = vpop.permute.xlu1 %2550 }
 0x346   :  { %12136 = vst [vmem:[#allocation154_spill] sm:$0xff] %v9077_v40  ;;  %v9080_v18 = vpop.permute.xlu0 %2556  ;;  %v12147_v40 = vld [vmem:[#allocation50_spill] sm:$0xff] }
 0x347   :  { %3006 = vperm.xlu1 %4484, %v12137_v20   ;;  %12138 = vst [vmem:[#allocation63_spill] sm:$0xff] %v9080_v18  ;;  %v12149_v18 = vld [vmem:[#allocation48_spill] sm:$0xff] }
 0x349   :  { %3021 = vperm.xlu0 %4483, %v12139_v43   ;;  %v9083_v48 = vpop.permute.xlu1 %2554 }
 0x34a   :  { %12140 = vst [vmem:[#allocation98_spill] sm:$0xff] %v9083_v48  ;;  %v9086_v11 = vpop.permute.xlu0 %2560  ;;  %v12151_v48 = vld [vmem:[#allocation53_spill] sm:$0xff] }
 0x34b   :  { %3016 = vperm.xlu1 %4484, %v12141_v26   ;;  %12142 = vst [vmem:[#allocation11_spill] sm:$0xff] %v9086_v11  ;;  %v12153_v11 = vld [vmem:[#allocation150_spill] sm:$0xff] }
 0x34d   :  { %3031 = vperm.xlu0 %4483, %v12143_v32   ;;  %v9089_v52 = vpop.permute.xlu1 %2558 }
 0x34e   :  { %12144 = vst [vmem:[#allocation67_spill] sm:$0xff] %v9089_v52  ;;  %v9092_v58 = vpop.permute.xlu0 %2564  ;;  %v12155_v52 = vld [vmem:[#allocation152_spill] sm:$0xff] }
 0x34f   :  { %3026 = vperm.xlu1 %4484, %v12145_v33   ;;  %12146 = vst [vmem:[#allocation58_spill] sm:$0xff] %v9092_v58  ;;  %v12157_v58 = vld [vmem:[#allocation97_spill] sm:$0xff] }
 0x351   :  { %3041 = vperm.xlu0 %4483, %v12147_v40   ;;  %v9095_v20 = vpop.permute.xlu1 %2562 }
 0x352   :  { %12148 = vst [vmem:[#allocation12_spill] sm:$0xff] %v9095_v20  ;;  %v9098_v43 = vpop.permute.xlu0 %2568  ;;  %v12159_v20 = vld [vmem:[#allocation55_spill] sm:$0xff] }
 0x353   :  { %3036 = vperm.xlu1 %4484, %v12149_v18   ;;  %12150 = vst [vmem:[#allocation64_spill] sm:$0xff] %v9098_v43  ;;  %v12161_v43 = vld [vmem:[#allocation52_spill] sm:$0xff] }
 0x355   :  { %3051 = vperm.xlu0 %4483, %v12151_v48   ;;  %v9101_v26 = vpop.permute.xlu1 %2566 }
 0x356   :  { %12152 = vst [vmem:[#allocation100_spill] sm:$0xff] %v9101_v26  ;;  %v9104_v32 = vpop.permute.xlu0 %2572  ;;  %v12163_v26 = vld [vmem:[#allocation99_spill] sm:$0xff] }
 0x357   :  { %3046 = vperm.xlu1 %4484, %v12153_v11   ;;  %12154 = vst [vmem:[#allocation180_spill] sm:$0xff] %v9104_v32  ;;  %v12165_v32 = vld [vmem:[#allocation54_spill] sm:$0xff] }
 0x359   :  { %3061 = vperm.xlu0 %4483, %v12155_v52   ;;  %v9107_v33 = vpop.permute.xlu1 %2570 }
 0x35a   :  { %12156 = vst [vmem:[#allocation103_spill] sm:$0xff] %v9107_v33  ;;  %v9110_v40 = vpop.permute.xlu0 %2576  ;;  %v12167_v33 = vld [vmem:[#allocation165_spill] sm:$0xff] }
 0x35b   :  { %3056 = vperm.xlu1 %4484, %v12157_v58   ;;  %12158 = vst [vmem:[#allocation69_spill] sm:$0xff] %v9110_v40  ;;  %v12169_v40 = vld [vmem:[#allocation157_spill] sm:$0xff] }
 0x35d   :  { %3071 = vperm.xlu0 %4483, %v12159_v20   ;;  %v9113_v18 = vpop.permute.xlu1 %2574 }
 0x35e   :  { %12160 = vst [vmem:[#allocation105_spill] sm:$0xff] %v9113_v18  ;;  %v9116_v48 = vpop.permute.xlu0 %2580  ;;  %v12171_v18 = vld [vmem:[#allocation102_spill] sm:$0xff] }
 0x35f   :  { %3066 = vperm.xlu1 %4484, %v12161_v43   ;;  %12162 = vst [vmem:[#allocation60_spill] sm:$0xff] %v9116_v48  ;;  %v12173_v48 = vld [vmem:[#allocation101_spill] sm:$0xff] }
 0x361   :  { %3081 = vperm.xlu0 %4483, %v12163_v26   ;;  %v9119_v11 = vpop.permute.xlu1 %2578 }
 0x362   :  { %12164 = vst [vmem:[#allocation13_spill] sm:$0xff] %v9119_v11  ;;  %v9122_v52 = vpop.permute.xlu0 %2584  ;;  %v12175_v11 = vld [vmem:[#allocation62_spill] sm:$0xff] }
 0x363   :  { %3076 = vperm.xlu1 %4484, %v12165_v32   ;;  %12166 = vst [vmem:[#allocation14_spill] sm:$0xff] %v9122_v52  ;;  %v12177_v52 = vld [vmem:[#allocation168_spill] sm:$0xff] }
 0x365   :  { %3091 = vperm.xlu0 %4483, %v12167_v33   ;;  %v9125_v58 = vpop.permute.xlu1 %2582 }
 0x366   :  { %12168 = vst [vmem:[#allocation68_spill] sm:$0xff] %v9125_v58  ;;  %v9128_v20 = vpop.permute.xlu0 %2588  ;;  %v12179_v58 = vld [vmem:[#allocation104_spill] sm:$0xff] }
 0x367   :  { %3086 = vperm.xlu1 %4484, %v12169_v40   ;;  %12170 = vst [vmem:[#allocation189_spill] sm:$0xff] %v9128_v20  ;;  %v12181_v20 = vld [vmem:[#allocation65_spill] sm:$0xff] }
 0x369   :  { %3101 = vperm.xlu0 %4483, %v12171_v18   ;;  %v9131_v43 = vpop.permute.xlu1 %2586 }
 0x36a   :  { %12172 = vst [vmem:[#allocation72_spill] sm:$0xff] %v9131_v43  ;;  %v9134_v26 = vpop.permute.xlu0 %2592  ;;  %v12183_v43 = vld [vmem:[#allocation185_spill] sm:$0xff] }
 0x36b   :  { %3096 = vperm.xlu1 %4484, %v12173_v48   ;;  %12174 = vst [vmem:[#allocation182_spill] sm:$0xff] %v9134_v26  ;;  %v12185_v26 = vld [vmem:[#allocation66_spill] sm:$0xff] }
 0x36d   :  { %3111 = vperm.xlu0 %4483, %v12175_v11   ;;  %v9137_v32 = vpop.permute.xlu1 %2590 }
 0x36e   :  { %12176 = vst [vmem:[#allocation191_spill] sm:$0xff] %v9137_v32  ;;  %v9140_v33 = vpop.permute.xlu0 %2596  ;;  %v12187_v32 = vld [vmem:[#allocation71_spill] sm:$0xff] }
 0x36f   :  { %3106 = vperm.xlu1 %4484, %v12177_v52   ;;  %12178 = vst [vmem:[#allocation107_spill] sm:$0xff] %v9140_v33  ;;  %v12189_v33 = vld [vmem:[#allocation190_spill] sm:$0xff] }
 0x371   :  { %3121 = vperm.xlu0 %4483, %v12179_v58   ;;  %v9143_v40 = vpop.permute.xlu1 %2594  ;;  %v12190_v58 = vld [vmem:[#allocation70_spill] sm:$0xff] }
 0x372   :  { %12180 = vst [vmem:[#allocation15_spill] sm:$0xff] %v9143_v40  ;;  %v9146_v18 = vpop.permute.xlu0 %2600 }
 0x373   :  { %3116 = vperm.xlu1 %4484, %v12181_v20   ;;  %12182 = vst [vmem:[#allocation16_spill] sm:$0xff] %v9146_v18  ;;  %v12193_v18 = vld [vmem:[#allocation106_spill] sm:$0xff] }
 0x375   :  { %3131 = vperm.xlu0 %4483, %v12183_v43   ;;  %v9149_v48 = vpop.permute.xlu1 %2598  ;;  %v12194_v43 = vld [vmem:[#allocation186_spill] sm:$0xff] }
 0x376   :  { %12184 = vst [vmem:[#allocation73_spill] sm:$0xff] %v9149_v48  ;;  %v9152_v11 = vpop.permute.xlu0 %2604 }
 0x377   :  { %3126 = vperm.xlu1 %4484, %v12185_v26   ;;  %12186 = vst [vmem:[#allocation84_spill] sm:$0xff] %v9152_v11  ;;  %v12197_v11 = vld [vmem:[#allocation34_spill] sm:$0xff] }
 0x379   :  { %3141 = vperm.xlu0 %4483, %v12187_v32   ;;  %v9155_v52 = vpop.permute.xlu1 %2602  ;;  %v12198_v32 = vld [vmem:[#allocation75_spill] sm:$0xff] }
 0x37a   :  { %12188 = vst [vmem:[#allocation22_spill] sm:$0xff] %v9155_v52  ;;  %v9159_v40 = vpop.permute.xlu0 %2608 }
 0x37b   :  { %3136 = vperm.xlu1 %4484, %v12189_v33   ;;  %12191 = vst [vmem:[#allocation42_spill] sm:$0xff] %v9159_v40  ;;  %v12200_v33 = vld [vmem:[#allocation81_spill] sm:$0xff]  ;;  %v12201_v40 = vld [vmem:[#allocation83_spill] sm:$0xff] }
 0x37d   :  { %3151 = vperm.xlu0 %4483, %v12190_v58   ;;  %v9161_v20 = vpop.permute.xlu1 %2606 }
 0x37e   :  { %12192 = vst [vmem:[#allocation43_spill] sm:$0xff] %v9161_v20  ;;  %v9165_v48 = vpop.permute.xlu0 %2612 }
 0x37f   :  { %3146 = vperm.xlu1 %4484, %v12193_v18   ;;  %12195 = vst [vmem:[#allocation18_spill] sm:$0xff] %v9165_v48  ;;  %v12202_v18 = vld [vmem:[#allocation108_spill] sm:$0xff]  ;;  %v12207_v48 = vld [vmem:[#allocation125_spill] sm:$0xff] }
 0x381   :  { %3161 = vperm.xlu0 %4483, %v12194_v43   ;;  %v9167_v26 = vpop.permute.xlu1 %2610 }
 0x382   :  { %12196 = vst [vmem:[#allocation74_spill] sm:$0xff] %v9167_v26 }
 0x383   :  { %3156 = vperm.xlu1 %4484, %v12197_v11   ;;  %v12203_v11 = vld [vmem:[#allocation193_spill] sm:$0xff] }
 0x385   :  { %3171 = vperm.xlu0 %4483, %v12198_v32   ;;  %v9171_v52 = vpop.permute.xlu1 %2614 }
 0x386   :  { %12199 = vst [vmem:[#allocation184_spill] sm:$0xff] %v9171_v52  ;;  %v12206_v52 = vld [vmem:[#allocation27_spill] sm:$0xff] }
 0x387   :  { %3166 = vperm.xlu1 %4484, %v12200_v33  }
 0x388   :  { %v9174_v58 = vpop.permute.xlu0 %2866 }
 0x389   :  { %3181 = vperm.xlu0 %4483, %v12201_v40  }
 0x38a   :  { %v9177_v20 = vpop.permute.xlu1 %2871 }
 0x38b   :  { %3176 = vperm.xlu1 %4484, %v12202_v18  }
 0x38c   :  { %v9180_v43 = vpop.permute.xlu0 %2881 }
 0x38d   :  { %3191 = vperm.xlu0 %4483, %v8171_v8  }
 0x38e   :  { %v9183_v26 = vpop.permute.xlu1 %2876 }
 0x38f   :  { %3186 = vperm.xlu1 %4484, %v12203_v11  }
 0x390   :  { %v9186_v32 = vpop.permute.xlu0 %2891 }
 0x391   :  { %12204 = vst [vmem:[#allocation175_spill] sm:$0xff] %v9186_v32  ;;  %3201 = vperm.xlu0 %4483, %v8202_v55   ;;  %v12210_v32 = vld [vmem:[#allocation124_spill] sm:$0xff] }
 0x392   :  { %v9189_v33 = vpop.permute.xlu1 %2886 }
 0x393   :  { %3196 = vperm.xlu1 %4484, %v8175_v50  }
 0x394   :  { %v9192_v40 = vpop.permute.xlu0 %2901 }
 0x395   :  { %12205 = vst [vmem:[#allocation36_spill] sm:$0xff] %v9192_v40  ;;  %3211 = vperm.xlu0 %4483, %v12206_v52   ;;  %v12211_v40 = vld [vmem:[#allocation121_spill] sm:$0xff] }
 0x396   :  { %v9195_v18 = vpop.permute.xlu1 %2896 }
 0x397   :  { %3206 = vperm.xlu1 %4484, %v12207_v48  }
 0x398   :  { %v9198_v8 = vpop.permute.xlu0 %2911 }
 0x399   :  { %12208 = vst [vmem:[#allocation181_spill] sm:$0xff] %v9198_v8  ;;  %3221 = vperm.xlu0 %4483, %v8250_v9   ;;  %v12213_v8 = vld [vmem:[#allocation128_spill] sm:$0xff] }
 0x39a   :  { %v9201_v11 = vpop.permute.xlu1 %2906 }
 0x39b   :  { %3216 = vperm.xlu1 %4484, %v8241_v49  }
 0x39c   :  { %v9204_v55 = vpop.permute.xlu0 %2921 }
 0x39d   :  { %12209 = vst [vmem:[#allocation39_spill] sm:$0xff] %v9204_v55  ;;  %3231 = vperm.xlu0 %4483, %v12210_v32   ;;  %v12216_v55 = vld [vmem:[#allocation170_spill] sm:$0xff] }
 0x39e   :  { %v9207_v50 = vpop.permute.xlu1 %2916 }
 0x39f   :  { %3226 = vperm.xlu1 %4484, %v12211_v40  }
 0x3a0   :  { %v9210_v52 = vpop.permute.xlu0 %2931 }
 0x3a1   :  { %12212 = vst [vmem:[#allocation19_spill] sm:$0xff] %v9210_v52  ;;  %3241 = vperm.xlu0 %4483, %v8316_v19   ;;  %v12219_v52 = vld [vmem:[#allocation112_spill] sm:$0xff] }
 0x3a2   :  { %v9213_v48 = vpop.permute.xlu1 %2926 }
 0x3a3   :  { %3236 = vperm.xlu1 %4484, %v12213_v8  }
 0x3a4   :  { %v9216_v9 = vpop.permute.xlu0 %2941 }
 0x3a5   :  { %12214 = vst [vmem:[#allocation44_spill] sm:$0xff] %v9216_v9  ;;  %3251 = vperm.xlu0 %4483, %v8349_v54   ;;  %v12221_v9 = vld [vmem:[#allocation172_spill] sm:$0xff] }
 0x3a6   :  { %v9219_v49 = vpop.permute.xlu1 %2936 }
 0x3a7   :  { %12215 = vst [vmem:[#allocation82_spill] sm:$0xff] %v9219_v49  ;;  %3246 = vperm.xlu1 %4484, %v12216_v55   ;;  %v12223_v49 = vld [vmem:[#allocation174_spill] sm:$0xff] }
 0x3a8   :  { %v9222_v32 = vpop.permute.xlu0 %2951 }
 0x3a9   :  { %12217 = vst [vmem:[#allocation194_spill] sm:$0xff] %v9222_v32  ;;  %3261 = vperm.xlu0 %4483, %v8379_v60   ;;  %v12225_v32 = vld [vmem:[#allocation89_spill] sm:$0xff] }
 0x3aa   :  { %v9225_v40 = vpop.permute.xlu1 %2946 }
 0x3ab   :  { %3256 = vperm.xlu1 %4484, %v8353_v62  }
 0x3ac   :  { %v9228_v19 = vpop.permute.xlu0 %2961 }
 0x3ad   :  { %12218 = vst [vmem:[#allocation86_spill] sm:$0xff] %v9228_v19  ;;  %3271 = vperm.xlu0 %4483, %v12219_v52   ;;  %v12228_v19 = vld [vmem:[#allocation178_spill] sm:$0xff] }
 0x3ae   :  { %v9231_v8 = vpop.permute.xlu1 %2956 }
 0x3af   :  { %12220 = vst [vmem:[#allocation87_spill] sm:$0xff] %v9231_v8  ;;  %3266 = vperm.xlu1 %4484, %v12221_v9   ;;  %v12230_v8 = vld [vmem:[#allocation159_spill] sm:$0xff] }
 0x3b0   :  { %v9234_v54 = vpop.permute.xlu0 %2971 }
 0x3b1   :  { %12222 = vst [vmem:[#allocation122_spill] sm:$0xff] %v9234_v54  ;;  %3281 = vperm.xlu0 %4483, %v12223_v49   ;;  %v12231_v54 = vld [vmem:[#allocation32_spill] sm:$0xff] }
 0x3b2   :  { %v9237_v55 = vpop.permute.xlu1 %2966 }
 0x3b3   :  { %12224 = vst [vmem:[#allocation126_spill] sm:$0xff] %v9237_v55  ;;  %3276 = vperm.xlu1 %4484, %v12225_v32   ;;  %v12233_v55 = vld [vmem:[#allocation30_spill] sm:$0xff] }
 0x3b4   :  { %v9240_v60 = vpop.permute.xlu0 %2981 }
 0x3b5   :  { %12226 = vst [vmem:[#allocation88_spill] sm:$0xff] %v9240_v60  ;;  %3291 = vperm.xlu0 %4483, %v8479_v14   ;;  %v12234_v60 = vld [vmem:[#allocation183_spill] sm:$0xff] }
 0x3b6   :  { %v9243_v62 = vpop.permute.xlu1 %2976 }
 0x3b7   :  { %12227 = vst [vmem:[#allocation133_spill] sm:$0xff] %v9243_v62  ;;  %3286 = vperm.xlu1 %4484, %v12228_v19   ;;  %v12236_v62 = vld [vmem:[#allocation188_spill] sm:$0xff] }
 0x3b8   :  { %v9246_v52 = vpop.permute.xlu0 %2991 }
 0x3b9   :  { %12229 = vst [vmem:[#allocation134_spill] sm:$0xff] %v9246_v52  ;;  %3301 = vperm.xlu0 %4483, %v12230_v8   ;;  %v12237_v52 = vld [vmem:[#allocation37_spill] sm:$0xff] }
 0x3ba   :  { %v9249_v9 = vpop.permute.xlu1 %2986 }
 0x3bb   :  { %3296 = vperm.xlu1 %4484, %v12231_v54  }
 0x3bc   :  { %v9252_v49 = vpop.permute.xlu0 %3001 }
 0x3bd   :  { %12232 = vst [vmem:[#allocation136_spill] sm:$0xff] %v9252_v49  ;;  %3311 = vperm.xlu0 %4483, %v12233_v55   ;;  %v12240_v49 = vld [vmem:[#allocation31_spill] sm:$0xff] }
 0x3be   :  { %v9255_v32 = vpop.permute.xlu1 %2996 }
 0x3bf   :  { %3306 = vperm.xlu1 %4484, %v12234_v60  }
 0x3c0   :  { %v9258_v14 = vpop.permute.xlu0 %3011 }
 0x3c1   :  { %12235 = vst [vmem:[#allocation132_spill] sm:$0xff] %v9258_v14  ;;  %3321 = vperm.xlu0 %4483, %v12236_v62   ;;  %v12242_v14 = vld [vmem:[#allocation17_spill] sm:$0xff] }
 0x3c2   :  { %v9261_v19 = vpop.permute.xlu1 %3006 }
 0x3c3   :  { %3316 = vperm.xlu1 %4484, %v12237_v52  }
 0x3c4   :  { %v9264_v8 = vpop.permute.xlu0 %3021 }
 0x3c5   :  { %12238 = vst [vmem:[#allocation138_spill] sm:$0xff] %v9264_v8  ;;  %3331 = vperm.xlu0 %4483, %v8601_v51   ;;  %v12243_v8 = vld [vmem:[#allocation41_spill] sm:$0xff] }
 0x3c6   :  { %v9267_v54 = vpop.permute.xlu1 %3016 }
 0x3c7   :  { %12239 = vst [vmem:[#allocation28_spill] sm:$0xff] %v9267_v54  ;;  %3326 = vperm.xlu1 %4484, %v12240_v49   ;;  %v12244_v54 = vld [vmem:[#allocation118_spill] sm:$0xff] }
 0x3c8   :  { %v9270_v55 = vpop.permute.xlu0 %3031 }
 0x3c9   :  { %12241 = vst [vmem:[#allocation140_spill] sm:$0xff] %v9270_v55  ;;  %3341 = vperm.xlu0 %4483, %v8637_v7   ;;  %v12245_v55 = vld [vmem:[#allocation117_spill] sm:$0xff] }
 0x3ca   :  { %v9273_v60 = vpop.permute.xlu1 %3026 }
 0x3cb   :  { %3336 = vperm.xlu1 %4484, %v12242_v14  }
 0x3cc   :  { %v9276_v62 = vpop.permute.xlu0 %3041 }
 0x3cd   :  { %3351 = vperm.xlu0 %4483, %v8654_v6  }
 0x3ce   :  { %v9279_v52 = vpop.permute.xlu1 %3036 }
 0x3cf   :  { %3346 = vperm.xlu1 %4484, %v12243_v8  }
 0x3d0   :  { %v9282_v51 = vpop.permute.xlu0 %3051 }
 0x3d1   :  { %3361 = vperm.xlu0 %4483, %v12244_v54  }
 0x3d2   :  { %v9285_v49 = vpop.permute.xlu1 %3046 }
 0x3d3   :  { %3356 = vperm.xlu1 %4484, %v12245_v55  }
 0x3d4   :  { %v9288_v7 = vpop.permute.xlu0 %3061 }
 0x3d5   :  { %12246 = vst [vmem:[#allocation141_spill] sm:$0xff] %v9288_v7  ;;  %3371 = vperm.xlu0 %4483, %v8723_v22   ;;  %v12247_v7 = vld [vmem:[#allocation85_spill] sm:$0xff] }
 0x3d6   :  { %v9291_v14 = vpop.permute.xlu1 %3056 }
 0x3d7   :  { %3366 = vperm.xlu1 %4484, %v8702_v41  }
 0x3d8   :  { %v9294_v6 = vpop.permute.xlu0 %3071 }
 0x3d9   :  { %3381 = vperm.xlu0 %4483, %v8755_v35  }
 0x3da   :  { %v9297_v8 = vpop.permute.xlu1 %3066 }
 0x3db   :  { %3376 = vperm.xlu1 %4484, %v8735_v4  }
 0x3dc   :  { %v9300_v54 = vpop.permute.xlu0 %3081 }
 0x3dd   :  { %3391 = vperm.xlu0 %4483, %v8784_v2  }
 0x3de   :  { %v9303_v55 = vpop.permute.xlu1 %3076 }
 0x3df   :  { %3386 = vperm.xlu1 %4484, %v12247_v7  }
 0x3e0   :  { %v9306_v22 = vpop.permute.xlu0 %3091 }
 0x3e1   :  { %3401 = vperm.xlu0 %4483, %v8817_v63  }
 0x3e2   :  { %v9309_v41 = vpop.permute.xlu1 %3086 }
 0x3e3   :  { %3396 = vperm.xlu1 %4484, %v8787_v0  }
 0x3e4   :  { %v9312_v35 = vpop.permute.xlu0 %3101 }
 0x3e5   :  { %3411 = vperm.xlu0 %4483, %v8838_v44  }
 0x3e6   :  { %v9315_v4 = vpop.permute.xlu1 %3096 }
 0x3e7   :  { %3406 = vperm.xlu1 %4484, %v8820_v42  }
 0x3e8   :  { %v9318_v2 = vpop.permute.xlu0 %3111 }
 0x3e9   :  { %3421 = vperm.xlu0 %4483, %v8858_v12  }
 0x3ea   :  { %v9321_v7 = vpop.permute.xlu1 %3106 }
 0x3eb   :  { %3416 = vperm.xlu1 %4484, %v8842_v30  }
 0x3ec   :  { %v9324_v63 = vpop.permute.xlu0 %3121 }
 0x3ed   :  { %3431 = vperm.xlu0 %4483, %v8878_v38  }
 0x3ee   :  { %v9327_v0 = vpop.permute.xlu1 %3116 }
 0x3ef   :  { %3426 = vperm.xlu1 %4484, %v8862_v13  }
 0x3f0   :  { %v9330_v44 = vpop.permute.xlu0 %3131 }
 0x3f1   :  { %12248 = vst [vmem:[#allocation92_spill] sm:$0xff] %v9330_v44  ;;  %3441 = vperm.xlu0 %4483, %v8898_v56  }
 0x3f2   :  { %v9333_v42 = vpop.permute.xlu1 %3126 }
 0x3f3   :  { %3436 = vperm.xlu1 %4484, %v8882_v46  }
 0x3f4   :  { %v9336_v12 = vpop.permute.xlu0 %3141 }
 0x3f5   :  { %12249 = vst [vmem:[#allocation143_spill] sm:$0xff] %v9336_v12  ;;  %3451 = vperm.xlu0 %4483, %v8918_v3  }
 0x3f6   :  { %v9339_v30 = vpop.permute.xlu1 %3136 }
 0x3f7   :  { %3446 = vperm.xlu1 %4484, %v8902_v61   ;;  %v4782_v61 = vld [vmem:[%s10973_s1 + $0x8] sm:$0xff] }
 0x3f8   :  { %v9342_v38 = vpop.permute.xlu0 %3151 }
 0x3f9   :  { %12250 = vst [vmem:[#allocation163_spill] sm:$0xff] %v9342_v38  ;;  %3461 = vperm.xlu0 %4483, %v8938_v59   ;;  %v12254_v59 = vld [vmem:[#allocation20_spill] sm:$0xff] }
 0x3fa   :  { %v9345_v13 = vpop.permute.xlu1 %3146  ;;  %v2741_v38 = vsub.f32 %v4782_v61, %v12254_v59  ;;  %v12258_v61 = vld [vmem:[#allocation192_spill] sm:$0xff] }
 0x3fb   :  { %3456 = vperm.xlu1 %4484, %v8922_v17  }
 0x3fc   :  { %v9348_v56 = vpop.permute.xlu0 %3161 }
 0x3fd   :  { %12251 = vst [vmem:[#allocation160_spill] sm:$0xff] %v9348_v56  ;;  %3471 = vperm.xlu0 %4483, %v8958_v45   ;;  %v5032_v45 = vmov 1   ;;  %v4784_v56 = vld [vmem:[%s10973_s1 + $0x20] sm:$0xff] }
 0x3fe   :  { %v9351_v46 = vpop.permute.xlu1 %3156  ;;  %v2744_v59 = vsub.f32 %v4784_v56, %v12258_v61 }
 0x3ff   :  { %12252 = vst [vmem:[#allocation162_spill] sm:$0xff] %v9351_v46  ;;  %3466 = vperm.xlu1 %4484, %v8942_v31   ;;  %v4783_v31 = vld [vmem:[%s10973_s1] sm:$0xff] }
 0x400   :  { %v9354_v3 = vpop.permute.xlu0 %3171 }
 0x401   :  { %12253 = vst [vmem:[#allocation35_spill] sm:$0xff] %v9354_v3  ;;  %3481 = vperm.xlu0 %4483, %v8975_v28   ;;  %v12257_v28 = vld [vmem:[#allocation77_spill] sm:$0xff] }
 0x402   :  { %v9361_v12 = vpop.permute.xlu1 %3166  ;;  %v2740_v3 = vsub.f32 %v4783_v31, %v12257_v28  ;;  %v4786_v31 = vld [vmem:[%s10973_s1 + $0x30] sm:$0xff] }
 0x403   :  { %12255 = vst [vmem:[#allocation47_spill] sm:$0xff] %v9361_v12  ;;  %3476 = vperm.xlu1 %4484, %v8962_v34   ;;  %v12262_v28 = vld [vmem:[#allocation76_spill] sm:$0xff] }
 0x404   :  { %v9364_v17 = vpop.permute.xlu0 %3181  ;;  %v2746_v44 = vsub.f32 %v4786_v31, %v12262_v28 }
 0x405   :  { %12256 = vst [vmem:[#allocation38_spill] sm:$0xff] %v9364_v17  ;;  %4486 = vset.pattern.permute.xlu0 %v5032_v45  ;;  %v12261_v17 = vld [vmem:[#allocation24_spill] sm:$0xff] }
 0x406   :  { %3615 = vperm.xlu0 %4486, %v2741_v38   ;;  %v9374_v12 = vpop.permute.xlu1 %3176  ;;  %v4785_v38 = vld [vmem:[%s10973_s1 + $0x10] sm:$0xff] }
 0x407   :  { %12259 = vst [vmem:[#allocation149_spill] sm:$0xff] %v9374_v12  ;;  %4485 = vset.pattern.permute.xlu1 %v5032_v45  ;;  %v2742_v46 = vsub.f32 %v4785_v38, %v12261_v17  ;;  %v12265_v45 = vld [vmem:[#allocation135_spill] sm:$0xff]  ;;  %v4788_v17 = vld [vmem:[%s10973_s1 + $0x40] sm:$0xff]  ;;  %v12266_v38 = vld [vmem:[#allocation109_spill] sm:$0xff] }
 0x408   :  { %v9376_v34 = vpop.permute.xlu0 %3191  ;;  %3610 = vperm.xlu1 %4485, %v2740_v3   ;;  %v4787_v3 = vld [vmem:[%s10973_s1 + $0x18] sm:$0xff] }
 0x409   :  { %12260 = vst [vmem:[#allocation94_spill] sm:$0xff] %v9376_v34  ;;  %v2748_v34 = vsub.f32 %v4788_v17, %v12266_v38 }
 0x40a   :  { %3630 = vperm.xlu0 %4486, %v2744_v59   ;;  %v9386_v56 = vpop.permute.xlu1 %3186  ;;  %v2743_v59 = vsub.f32 %v4787_v3, %v12265_v45  ;;  %v4790_v3 = vld [vmem:[%s10973_s1 + $0x50] sm:$0xff]  ;;  %v12270_v45 = vld [vmem:[#allocation171_spill] sm:$0xff] }
 0x40b   :  { %12263 = vst [vmem:[#allocation148_spill] sm:$0xff] %v9386_v56 }
 0x40c   :  { %v9388_v61 = vpop.permute.xlu0 %3201  ;;  %3620 = vperm.xlu1 %4485, %v2742_v46   ;;  %v12269_v46 = vld [vmem:[#allocation78_spill] sm:$0xff] }
 0x40d   :  { %12264 = vst [vmem:[#allocation49_spill] sm:$0xff] %v9388_v61  ;;  %v2750_v61 = vsub.f32 %v4790_v3, %v12270_v45 }
 0x40e   :  { %3640 = vperm.xlu0 %4486, %v2746_v44   ;;  %v9398_v12 = vpop.permute.xlu1 %3196  ;;  %v4789_v44 = vld [vmem:[%s10973_s1 + $0x28] sm:$0xff] }
 0x40f   :  { %12267 = vst [vmem:[#allocation50_spill] sm:$0xff] %v9398_v12  ;;  %v2745_v28 = vsub.f32 %v4789_v44, %v12269_v46  ;;  %v4792_v44 = vld [vmem:[%s10973_s1 + $0x60] sm:$0xff] }
 0x410   :  { %v9400_v31 = vpop.permute.xlu0 %3211  ;;  %3625 = vperm.xlu1 %4485, %v2743_v59   ;;  %v12273_v59 = vld [vmem:[#allocation169_spill] sm:$0xff]  ;;  %v12274_v46 = vld [vmem:[#allocation110_spill] sm:$0xff] }
 0x411   :  { %12268 = vst [vmem:[#allocation48_spill] sm:$0xff] %v9400_v31  ;;  %v2752_v31 = vsub.f32 %v4792_v44, %v12274_v46 }
 0x412   :  { %3650 = vperm.xlu0 %4486, %v2748_v34   ;;  %v9410_v56 = vpop.permute.xlu1 %3206  ;;  %v4791_v34 = vld [vmem:[%s10973_s1 + $0x38] sm:$0xff] }
 0x413   :  { %12271 = vst [vmem:[#allocation53_spill] sm:$0xff] %v9410_v56  ;;  %v2747_v38 = vsub.f32 %v4791_v34, %v12273_v59  ;;  %v4794_v34 = vld [vmem:[%s10973_s1 + $0x70] sm:$0xff]  ;;  %v12278_v59 = vld [vmem:[#allocation173_spill] sm:$0xff] }
 0x414   :  { %v9412_v17 = vpop.permute.xlu0 %3221  ;;  %3635 = vperm.xlu1 %4485, %v2745_v28   ;;  %v12277_v28 = vld [vmem:[#allocation26_spill] sm:$0xff] }
 0x415   :  { %12272 = vst [vmem:[#allocation150_spill] sm:$0xff] %v9412_v17  ;;  %v2754_v17 = vsub.f32 %v4794_v34, %v12278_v59 }
 0x416   :  { %3660 = vperm.xlu0 %4486, %v2750_v61   ;;  %v9422_v12 = vpop.permute.xlu1 %3216  ;;  %v4793_v61 = vld [vmem:[%s10973_s1 + $0x48] sm:$0xff] }
 0x417   :  { %12275 = vst [vmem:[#allocation152_spill] sm:$0xff] %v9422_v12  ;;  %v2749_v45 = vsub.f32 %v4793_v61, %v12277_v28  ;;  %v4796_v61 = vld [vmem:[%s10973_s1 + $0x80] sm:$0xff]  ;;  %v12282_v28 = vld [vmem:[#allocation111_spill] sm:$0xff] }
 0x418   :  { %v9424_v3 = vpop.permute.xlu0 %3231  ;;  %3645 = vperm.xlu1 %4485, %v2747_v38   ;;  %v12281_v38 = vld [vmem:[#allocation195_spill] sm:$0xff] }
 0x419   :  { %12276 = vst [vmem:[#allocation97_spill] sm:$0xff] %v9424_v3  ;;  %v2756_v3 = vsub.f32 %v4796_v61, %v12282_v28 }
 0x41a   :  { %3670 = vperm.xlu0 %4486, %v2752_v31   ;;  %v9434_v56 = vpop.permute.xlu1 %3226  ;;  %v4795_v31 = vld [vmem:[%s10973_s1 + $0x58] sm:$0xff] }
 0x41b   :  { %12279 = vst [vmem:[#allocation55_spill] sm:$0xff] %v9434_v56  ;;  %v2751_v46 = vsub.f32 %v4795_v31, %v12281_v38  ;;  %v4798_v31 = vld [vmem:[%s10973_s1 + $0x90] sm:$0xff]  ;;  %v12286_v38 = vld [vmem:[#allocation90_spill] sm:$0xff] }
 0x41c   :  { %v9436_v44 = vpop.permute.xlu0 %3241  ;;  %3655 = vperm.xlu1 %4485, %v2749_v45   ;;  %v12285_v45 = vld [vmem:[#allocation123_spill] sm:$0xff] }
 0x41d   :  { %12280 = vst [vmem:[#allocation52_spill] sm:$0xff] %v9436_v44  ;;  %v2758_v44 = vsub.f32 %v4798_v31, %v12286_v38 }
 0x41e   :  { %3680 = vperm.xlu0 %4486, %v2754_v17   ;;  %v9446_v12 = vpop.permute.xlu1 %3236  ;;  %v4797_v17 = vld [vmem:[%s10973_s1 + $0x68] sm:$0xff] }
 0x41f   :  { %12283 = vst [vmem:[#allocation99_spill] sm:$0xff] %v9446_v12  ;;  %v2753_v59 = vsub.f32 %v4797_v17, %v12285_v45  ;;  %v4800_v17 = vld [vmem:[%s10973_s1 + $0xa0] sm:$0xff]  ;;  %v12290_v45 = vld [vmem:[#allocation156_spill] sm:$0xff] }
 0x420   :  { %v9448_v34 = vpop.permute.xlu0 %3251  ;;  %3665 = vperm.xlu1 %4485, %v2751_v46   ;;  %v12289_v46 = vld [vmem:[#allocation176_spill] sm:$0xff] }
 0x421   :  { %12284 = vst [vmem:[#allocation54_spill] sm:$0xff] %v9448_v34  ;;  %v2760_v34 = vsub.f32 %v4800_v17, %v12290_v45 }
 0x422   :  { %3690 = vperm.xlu0 %4486, %v2756_v3   ;;  %v9458_v56 = vpop.permute.xlu1 %3246  ;;  %v4799_v3 = vld [vmem:[%s10973_s1 + $0x78] sm:$0xff] }
 0x423   :  { %12287 = vst [vmem:[#allocation165_spill] sm:$0xff] %v9458_v56  ;;  %v2755_v28 = vsub.f32 %v4799_v3, %v12289_v46  ;;  %v4802_v3 = vld [vmem:[%s10973_s1 + $0xb0] sm:$0xff]  ;;  %v12294_v46 = vld [vmem:[#allocation29_spill] sm:$0xff] }
 0x424   :  { %v9460_v61 = vpop.permute.xlu0 %3261  ;;  %3675 = vperm.xlu1 %4485, %v2753_v59   ;;  %v12293_v59 = vld [vmem:[#allocation137_spill] sm:$0xff] }
 0x425   :  { %12288 = vst [vmem:[#allocation157_spill] sm:$0xff] %v9460_v61  ;;  %v2762_v61 = vsub.f32 %v4802_v3, %v12294_v46 }
 0x426   :  { %3700 = vperm.xlu0 %4486, %v2758_v44   ;;  %v9470_v12 = vpop.permute.xlu1 %3256  ;;  %v4801_v44 = vld [vmem:[%s10973_s1 + $0x88] sm:$0xff] }
 0x427   :  { %12291 = vst [vmem:[#allocation102_spill] sm:$0xff] %v9470_v12  ;;  %v2757_v38 = vsub.f32 %v4801_v44, %v12293_v59  ;;  %v4804_v44 = vld [vmem:[%s10973_s1 + $0xc0] sm:$0xff]  ;;  %v12298_v59 = vld [vmem:[#allocation177_spill] sm:$0xff] }
 0x428   :  { %v9472_v31 = vpop.permute.xlu0 %3271  ;;  %3685 = vperm.xlu1 %4485, %v2755_v28   ;;  %v12297_v28 = vld [vmem:[#allocation131_spill] sm:$0xff] }
 0x429   :  { %12292 = vst [vmem:[#allocation101_spill] sm:$0xff] %v9472_v31  ;;  %v2764_v31 = vsub.f32 %v4804_v44, %v12298_v59 }
 0x42a   :  { %3710 = vperm.xlu0 %4486, %v2760_v34   ;;  %v9482_v56 = vpop.permute.xlu1 %3266  ;;  %v4803_v34 = vld [vmem:[%s10973_s1 + $0x98] sm:$0xff] }
 0x42b   :  { %12295 = vst [vmem:[#allocation62_spill] sm:$0xff] %v9482_v56  ;;  %v2759_v45 = vsub.f32 %v4803_v34, %v12297_v28  ;;  %v4806_v34 = vld [vmem:[%s10973_s1 + $0xd0] sm:$0xff]  ;;  %v12302_v28 = vld [vmem:[#allocation114_spill] sm:$0xff] }
 0x42c   :  { %v9484_v17 = vpop.permute.xlu0 %3281  ;;  %3695 = vperm.xlu1 %4485, %v2757_v38   ;;  %v12301_v38 = vld [vmem:[#allocation113_spill] sm:$0xff] }
 0x42d   :  { %12296 = vst [vmem:[#allocation168_spill] sm:$0xff] %v9484_v17  ;;  %v2766_v17 = vsub.f32 %v4806_v34, %v12302_v28 }
 0x42e   :  { %3720 = vperm.xlu0 %4486, %v2762_v61   ;;  %v9494_v12 = vpop.permute.xlu1 %3276  ;;  %v4805_v61 = vld [vmem:[%s10973_s1 + $0xa8] sm:$0xff] }
 0x42f   :  { %12299 = vst [vmem:[#allocation104_spill] sm:$0xff] %v9494_v12  ;;  %v2761_v46 = vsub.f32 %v4805_v61, %v12301_v38  ;;  %v4808_v61 = vld [vmem:[%s10973_s1 + $0xe0] sm:$0xff]  ;;  %v12306_v38 = vld [vmem:[#allocation179_spill] sm:$0xff] }
 0x430   :  { %v9496_v3 = vpop.permute.xlu0 %3291  ;;  %3705 = vperm.xlu1 %4485, %v2759_v45   ;;  %v12305_v45 = vld [vmem:[#allocation33_spill] sm:$0xff] }
 0x431   :  { %12300 = vst [vmem:[#allocation65_spill] sm:$0xff] %v9496_v3  ;;  %v2768_v3 = vsub.f32 %v4808_v61, %v12306_v38 }
 0x432   :  { %3730 = vperm.xlu0 %4486, %v2764_v31   ;;  %v9506_v56 = vpop.permute.xlu1 %3286  ;;  %v4807_v31 = vld [vmem:[%s10973_s1 + $0xb8] sm:$0xff] }
 0x433   :  { %12303 = vst [vmem:[#allocation185_spill] sm:$0xff] %v9506_v56  ;;  %v2763_v59 = vsub.f32 %v4807_v31, %v12305_v45  ;;  %v4810_v31 = vld [vmem:[%s10973_s1 + $0xf0] sm:$0xff] }
 0x434   :  { %v9508_v44 = vpop.permute.xlu0 %3301  ;;  %3715 = vperm.xlu1 %4485, %v2761_v46   ;;  %v12309_v46 = vld [vmem:[#allocation115_spill] sm:$0xff]  ;;  %v12310_v45 = vld [vmem:[#allocation116_spill] sm:$0xff] }
 0x435   :  { %12304 = vst [vmem:[#allocation66_spill] sm:$0xff] %v9508_v44  ;;  %v2770_v44 = vsub.f32 %v4810_v31, %v12310_v45 }
 0x436   :  { %3740 = vperm.xlu0 %4486, %v2766_v17   ;;  %v9518_v12 = vpop.permute.xlu1 %3296  ;;  %v4809_v17 = vld [vmem:[%s10973_s1 + $0xc8] sm:$0xff] }
 0x437   :  { %12307 = vst [vmem:[#allocation71_spill] sm:$0xff] %v9518_v12  ;;  %v2765_v28 = vsub.f32 %v4809_v17, %v12309_v46  ;;  %v4812_v17 = vld [vmem:[%s10973_s1 + $0x100] sm:$0xff]  ;;  %v12314_v46 = vld [vmem:[#allocation79_spill] sm:$0xff] }
 0x438   :  { %v9520_v34 = vpop.permute.xlu0 %3311  ;;  %3725 = vperm.xlu1 %4485, %v2763_v59   ;;  %v12313_v59 = vld [vmem:[#allocation187_spill] sm:$0xff] }
 0x439   :  { %12308 = vst [vmem:[#allocation190_spill] sm:$0xff] %v9520_v34  ;;  %v2772_v34 = vsub.f32 %v4812_v17, %v12314_v46 }
 0x43a   :  { %3750 = vperm.xlu0 %4486, %v2768_v3   ;;  %v9530_v56 = vpop.permute.xlu1 %3306  ;;  %v4811_v3 = vld [vmem:[%s10973_s1 + $0xd8] sm:$0xff] }
 0x43b   :  { %12311 = vst [vmem:[#allocation70_spill] sm:$0xff] %v9530_v56  ;;  %v2767_v38 = vsub.f32 %v4811_v3, %v12313_v59  ;;  %v4814_v3 = vld [vmem:[%s10973_s1 + $0x110] sm:$0xff] }
 0x43c   :  { %v9532_v61 = vpop.permute.xlu0 %3321  ;;  %3735 = vperm.xlu1 %4485, %v2765_v28   ;;  %v12317_v28 = vld [vmem:[#allocation144_spill] sm:$0xff] }
 0x43d   :  { %12312 = vst [vmem:[#allocation106_spill] sm:$0xff] %v9532_v61  ;;  %v12318_v59 = vld [vmem:[#allocation40_spill] sm:$0xff] }
 0x43e   :  { %3760 = vperm.xlu0 %4486, %v2770_v44   ;;  %v9542_v12 = vpop.permute.xlu1 %3316  ;;  %v4813_v44 = vld [vmem:[%s10973_s1 + $0xe8] sm:$0xff]  ;;  %v2774_v61 = vsub.f32 %v4814_v3, %v12318_v59 }
 0x43f   :  { %12315 = vst [vmem:[#allocation186_spill] sm:$0xff] %v9542_v12  ;;  %v2769_v45 = vsub.f32 %v4813_v44, %v12317_v28  ;;  %v4816_v44 = vld [vmem:[%s10973_s1 + $0x120] sm:$0xff]  ;;  %v12322_v28 = vld [vmem:[#allocation21_spill] sm:$0xff] }
 0x440   :  { %v9544_v31 = vpop.permute.xlu0 %3331  ;;  %3745 = vperm.xlu1 %4485, %v2767_v38   ;;  %v12321_v38 = vld [vmem:[#allocation80_spill] sm:$0xff] }
 0x441   :  { %12316 = vst [vmem:[#allocation34_spill] sm:$0xff] %v9544_v31  ;;  %v2776_v31 = vsub.f32 %v4816_v44, %v12322_v28 }
 0x442   :  { %3770 = vperm.xlu0 %4486, %v2772_v34   ;;  %v9554_v56 = vpop.permute.xlu1 %3326  ;;  %v4815_v34 = vld [vmem:[%s10973_s1 + $0xf8] sm:$0xff] }
 0x443   :  { %12319 = vst [vmem:[#allocation75_spill] sm:$0xff] %v9554_v56  ;;  %v2771_v46 = vsub.f32 %v4815_v34, %v12321_v38  ;;  %v4818_v34 = vld [vmem:[%s10973_s1 + $0x130] sm:$0xff]  ;;  %v12326_v38 = vld [vmem:[#allocation46_spill] sm:$0xff] }
 0x444   :  { %v9556_v17 = vpop.permute.xlu0 %3341  ;;  %3755 = vperm.xlu1 %4485, %v2769_v45   ;;  %v12325_v45 = vld [vmem:[#allocation93_spill] sm:$0xff] }
 0x445   :  { %12320 = vst [vmem:[#allocation81_spill] sm:$0xff] %v9556_v17  ;;  %v2778_v17 = vsub.f32 %v4818_v34, %v12326_v38 }
 0x446   :  { %3780 = vperm.xlu0 %4486, %v2774_v61   ;;  %v9566_v12 = vpop.permute.xlu1 %3336  ;;  %v4817_v61 = vld [vmem:[%s10973_s1 + $0x108] sm:$0xff] }
 0x447   :  { %12323 = vst [vmem:[#allocation83_spill] sm:$0xff] %v9566_v12  ;;  %v2773_v59 = vsub.f32 %v4817_v61, %v12325_v45  ;;  %v4820_v61 = vld [vmem:[%s10973_s1 + $0x140] sm:$0xff] }
 0x448   :  { %v9568_v3 = vpop.permute.xlu0 %3351  ;;  %3765 = vperm.xlu1 %4485, %v2771_v46   ;;  %v12329_v46 = vld [vmem:[#allocation45_spill] sm:$0xff]  ;;  %v12330_v45 = vld [vmem:[#allocation2_spill] sm:$0xff] }
 0x449   :  { %12324 = vst [vmem:[#allocation108_spill] sm:$0xff] %v9568_v3  ;;  %v2780_v3 = vsub.f32 %v4820_v61, %v12330_v45 }
 0x44a   :  { %3790 = vperm.xlu0 %4486, %v2776_v31   ;;  %v9578_v56 = vpop.permute.xlu1 %3346  ;;  %v4819_v31 = vld [vmem:[%s10973_s1 + $0x118] sm:$0xff] }
 0x44b   :  { %12327 = vst [vmem:[#allocation193_spill] sm:$0xff] %v9578_v56  ;;  %v2775_v28 = vsub.f32 %v4819_v31, %v12329_v46  ;;  %v4822_v31 = vld [vmem:[%s10973_s1 + $0x150] sm:$0xff]  ;;  %v12334_v46 = vld [vmem:[#allocation129_spill] sm:$0xff] }
 0x44c   :  { %v9580_v44 = vpop.permute.xlu0 %3361  ;;  %3775 = vperm.xlu1 %4485, %v2773_v59   ;;  %v12333_v59 = vld [vmem:[#allocation120_spill] sm:$0xff] }
 0x44d   :  { %12328 = vst [vmem:[#allocation27_spill] sm:$0xff] %v9580_v44  ;;  %v2782_v44 = vsub.f32 %v4822_v31, %v12334_v46 }
 0x44e   :  { %3800 = vperm.xlu0 %4486, %v2778_v17   ;;  %v9590_v12 = vpop.permute.xlu1 %3356  ;;  %v4821_v17 = vld [vmem:[%s10973_s1 + $0x128] sm:$0xff] }
 0x44f   :  { %12331 = vst [vmem:[#allocation125_spill] sm:$0xff] %v9590_v12  ;;  %v2777_v38 = vsub.f32 %v4821_v17, %v12333_v59  ;;  %v4824_v17 = vld [vmem:[%s10973_s1 + $0x160] sm:$0xff]  ;;  %v12337_v59 = vld [vmem:[#allocation23_spill] sm:$0xff] }
 0x450   :  { %v9592_v34 = vpop.permute.xlu0 %3371  ;;  %3785 = vperm.xlu1 %4485, %v2775_v28   ;;  %v12336_v28 = vld [vmem:[#allocation146_spill] sm:$0xff] }
 0x451   :  { %12332 = vst [vmem:[#allocation124_spill] sm:$0xff] %v9592_v34  ;;  %v2784_v34 = vsub.f32 %v4824_v17, %v12337_v59  ;;  %v4828_v59 = vld [vmem:[%s10973_s1 + $0x180] sm:$0xff] }
 0x452   :  { %3810 = vperm.xlu0 %4486, %v2780_v3   ;;  %v9602_v56 = vpop.permute.xlu1 %3366  ;;  %v4823_v3 = vld [vmem:[%s10973_s1 + $0x138] sm:$0xff] }
 0x453   :  { %v2779_v45 = vsub.f32 %v4823_v3, %v12336_v28  ;;  %v4826_v3 = vld [vmem:[%s10973_s1 + $0x170] sm:$0xff] }
 0x454   :  { %v9604_v61 = vpop.permute.xlu0 %3381  ;;  %3795 = vperm.xlu1 %4485, %v2777_v38   ;;  %v12338_v38 = vld [vmem:[#allocation119_spill] sm:$0xff]  ;;  %v2786_v28 = vsub.f32 %v4826_v3, %v8830_v23 }
 0x455   :  { %12335 = vst [vmem:[#allocation121_spill] sm:$0xff] %v9604_v61 }
 0x456   :  { %3820 = vperm.xlu0 %4486, %v2782_v44   ;;  %v9614_v12 = vpop.permute.xlu1 %3376  ;;  %v4825_v44 = vld [vmem:[%s10973_s1 + $0x148] sm:$0xff] }
 0x457   :  { %v2781_v46 = vsub.f32 %v4825_v44, %v12338_v38  ;;  %v2788_v44 = vsub.f32 %v4828_v59, %v8850_v15 }
 0x458   :  { %v9616_v31 = vpop.permute.xlu0 %3391  ;;  %3805 = vperm.xlu1 %4485, %v2779_v45  }
 0x45a   :  { %3830 = vperm.xlu0 %4486, %v2784_v34   ;;  %v9626_v61 = vpop.permute.xlu1 %3386  ;;  %v4827_v34 = vld [vmem:[%s10973_s1 + $0x158] sm:$0xff] }
 0x45b   :  { %v2783_v45 = vsub.f32 %v4827_v34, %v8828_v25  ;;  %v4830_v25 = vld [vmem:[%s10973_s1 + $0x190] sm:$0xff] }
 0x45c   :  { %v9628_v17 = vpop.permute.xlu0 %3401  ;;  %3815 = vperm.xlu1 %4485, %v2781_v46   ;;  %v4829_v46 = vld [vmem:[%s10973_s1 + $0x168] sm:$0xff] }
 0x45d   :  { %v2785_v3 = vsub.f32 %v4829_v46, %v8848_v27  ;;  %v4832_v27 = vld [vmem:[%s10973_s1 + $0x1a0] sm:$0xff] }
 0x45e   :  { %3840 = vperm.xlu0 %4486, %v2786_v28   ;;  %v9638_v38 = vpop.permute.xlu1 %3396  ;;  %v2790_v28 = vsub.f32 %v4830_v25, %v8870_v5 }
 0x460   :  { %v9640_v23 = vpop.permute.xlu0 %3411  ;;  %3825 = vperm.xlu1 %4485, %v2783_v45   ;;  %v4831_v45 = vld [vmem:[%s10973_s1 + $0x178] sm:$0xff] }
 0x461   :  { %v2787_v59 = vsub.f32 %v4831_v45, %v8868_v53  ;;  %v4834_v53 = vld [vmem:[%s10973_s1 + $0x1b0] sm:$0xff] }
 0x462   :  { %3850 = vperm.xlu0 %4486, %v2788_v44   ;;  %v9650_v34 = vpop.permute.xlu1 %3406  ;;  %v2792_v44 = vsub.f32 %v4832_v27, %v8890_v1 }
 0x464   :  { %v9652_v15 = vpop.permute.xlu0 %3421  ;;  %3835 = vperm.xlu1 %4485, %v2785_v3   ;;  %v4833_v3 = vld [vmem:[%s10973_s1 + $0x188] sm:$0xff] }
 0x465   :  { %v2789_v25 = vsub.f32 %v4833_v3, %v8888_v57  ;;  %v4836_v57 = vld [vmem:[%s10973_s1 + $0x1c0] sm:$0xff] }
 0x466   :  { %3860 = vperm.xlu0 %4486, %v2790_v28   ;;  %v9662_v46 = vpop.permute.xlu1 %3416  ;;  %v2794_v28 = vsub.f32 %v4834_v53, %v8910_v36 }
 0x468   :  { %v9664_v5 = vpop.permute.xlu0 %3431  ;;  %3845 = vperm.xlu1 %4485, %v2787_v59   ;;  %v4835_v59 = vld [vmem:[%s10973_s1 + $0x198] sm:$0xff] }
 0x469   :  { %v2791_v27 = vsub.f32 %v4835_v59, %v8908_v21  ;;  %v4838_v21 = vld [vmem:[%s10973_s1 + $0x1d0] sm:$0xff] }
 0x46a   :  { %3870 = vperm.xlu0 %4486, %v2792_v44   ;;  %v9674_v45 = vpop.permute.xlu1 %3426  ;;  %v2796_v44 = vsub.f32 %v4836_v57, %v8930_v10 }
 0x46c   :  { %v9676_v1 = vpop.permute.xlu0 %3441  ;;  %3855 = vperm.xlu1 %4485, %v2789_v25   ;;  %v4837_v25 = vld [vmem:[%s10973_s1 + $0x1a8] sm:$0xff] }
 0x46d   :  { %v2793_v53 = vsub.f32 %v4837_v25, %v8928_v39  ;;  %v4840_v39 = vld [vmem:[%s10973_s1 + $0x1e0] sm:$0xff] }
 0x46e   :  { %3880 = vperm.xlu0 %4486, %v2794_v28   ;;  %v9686_v3 = vpop.permute.xlu1 %3436  ;;  %v2798_v28 = vsub.f32 %v4838_v21, %v8950_v29 }
 0x470   :  { %v9688_v36 = vpop.permute.xlu0 %3451  ;;  %3865 = vperm.xlu1 %4485, %v2791_v27   ;;  %v4839_v27 = vld [vmem:[%s10973_s1 + $0x1b8] sm:$0xff] }
 0x471   :  { %v2795_v57 = vsub.f32 %v4839_v27, %v8948_v37  ;;  %v4842_v37 = vld [vmem:[%s10973_s1 + $0x1f0] sm:$0xff] }
 0x472   :  { %3890 = vperm.xlu0 %4486, %v2796_v44   ;;  %v9698_v59 = vpop.permute.xlu1 %3446  ;;  %v2800_v44 = vsub.f32 %v4840_v39, %v8970_v16  ;;  %v12342_v39 = vld [vmem:[#allocation25_spill] sm:$0xff] }
 0x474   :  { %v9700_v10 = vpop.permute.xlu0 %3461  ;;  %3875 = vperm.xlu1 %4485, %v2793_v53   ;;  %v4841_v53 = vld [vmem:[%s10973_s1 + $0x1c8] sm:$0xff] }
 0x475   :  { %12339 = vst [vmem:[#allocation128_spill] sm:$0xff] %v9700_v10  ;;  %v2797_v21 = vsub.f32 %v4841_v53, %v8968_v47  ;;  %v4844_v47 = vld [vmem:[%s10973_s1 + $0x200] sm:$0xff]  ;;  %v12343_v53 = vld [vmem:[#allocation4_spill] sm:$0xff] }
 0x476   :  { %3900 = vperm.xlu0 %4486, %v2798_v28   ;;  %v9710_v25 = vpop.permute.xlu1 %3456  ;;  %v2802_v28 = vsub.f32 %v4842_v37, %v8982_v24  ;;  %v4845_v24 = vld [vmem:[%s10972_s0 + $0x8] sm:$0xff] }
 0x477   :  { %v3485_v37 = vmul.f32 %v4845_v24, %v9177_v20  ;;  %v4848_v20 = vld [vmem:[%s10973_s1 + $0x210] sm:$0xff] }
 0x478   :  { %v9712_v29 = vpop.permute.xlu0 %3471  ;;  %3885 = vperm.xlu1 %4485, %v2795_v57   ;;  %v4843_v57 = vld [vmem:[%s10973_s1 + $0x1d8] sm:$0xff] }
 0x479   :  { %12340 = vst [vmem:[#allocation170_spill] sm:$0xff] %v9712_v29  ;;  %v2804_v29 = vsub.f32 %v4844_v47, %v12343_v53  ;;  %v4847_v47 = vld [vmem:[%s10972_s0] sm:$0xff] }
 0x47a   :  { %3910 = vperm.xlu0 %4486, %v2800_v44   ;;  %v9722_v27 = vpop.permute.xlu1 %3466  ;;  %v2799_v44 = vsub.f32 %v4843_v57, %v12342_v39  ;;  %v4846_v57 = vld [vmem:[%s10973_s1 + $0x1e8] sm:$0xff]  ;;  %v3484_v53 = vmul.f32 %v4847_v47, %v9174_v58  ;;  %v4850_v47 = vld [vmem:[%s10973_s1 + $0x1f8] sm:$0xff] }
 0x47b   :  { %v12344_v39 = vld [vmem:[#allocation3_spill] sm:$0xff] }
 0x47c   :  { %v9724_v16 = vpop.permute.xlu0 %3481  ;;  %3895 = vperm.xlu1 %4485, %v2797_v21   ;;  %v2801_v10 = vsub.f32 %v4846_v57, %v12344_v39 }
 0x47d   :  { %12341 = vst [vmem:[#allocation112_spill] sm:$0xff] %v9724_v16 }
 0x47e   :  { %3920 = vperm.xlu0 %4486, %v2802_v28   ;;  %v9738_v21 = vpop.permute.xlu1 %3476 }
 0x480   :  { %3905 = vperm.xlu1 %4485, %v2799_v44   ;;  %v12345_v44 = vld [vmem:[#allocation96_spill] sm:$0xff] }
 0x481   :  { %v3616_v28 = vpop.permute.xlu0 %3615  ;;  %v2806_v24 = vsub.f32 %v4848_v20, %v12345_v44  ;;  %v12346_v20 = vld [vmem:[#allocation127_spill] sm:$0xff] }
 0x482   :  { %v4229_v16 = vadd.f32 %v3616_v28, %v3485_v37  ;;  %3930 = vperm.xlu0 %4486, %v2804_v29   ;;  %v4849_v29 = vld [vmem:[%s10972_s0 + $0x20] sm:$0xff]  ;;  %v2803_v44 = vsub.f32 %v4850_v47, %v12346_v20  ;;  %v4854_v47 = vld [vmem:[%s10973_s1 + $0x208] sm:$0xff] }
 0x483   :  { %v3488_v37 = vmul.f32 %v4849_v29, %v9189_v33  ;;  %v3611_v28 = vpop.permute.xlu1 %3610  ;;  %v4851_v33 = vld [vmem:[%s10972_s0 + $0x10] sm:$0xff]  ;;  %v12348_v20 = vld [vmem:[#allocation139_spill] sm:$0xff] }
 0x484   :  { %4353 = vst.msk [vmem:[%s10974_s2 + $0x8] sm:$0xff] %vm135_vm0, %v4229_v16  ;;  %v4228_v57 = vadd.f32 %v3611_v28, %v3484_v53  ;;  %3915 = vperm.xlu1 %4485, %v2801_v10   ;;  %v3486_v29 = vmul.f32 %v4851_v33, %v9183_v26  ;;  %v4852_v10 = vld [vmem:[%s10973_s1 + $0x220] sm:$0xff]  ;;  %v2805_v33 = vsub.f32 %v4854_v47, %v12348_v20  ;;  %v12351_v20 = vld [vmem:[#allocation175_spill] sm:$0xff] }
 0x485   :  { %v3631_v58 = vpop.permute.xlu0 %3630  ;;  %v12347_v16 = vld [vmem:[#allocation130_spill] sm:$0xff] }
 0x486   :  { %v4232_v39 = vadd.f32 %v3631_v58, %v3488_v37  ;;  %3940 = vperm.xlu0 %4486, %v2806_v24   ;;  %4352 = vst.msk [vmem:[%s10974_s2] sm:$0xff] %vm135_vm0, %v4228_v57  ;;  %v2808_v53 = vsub.f32 %v4852_v10, %v12347_v16  ;;  %v4853_v24 = vld [vmem:[%s10972_s0 + $0x30] sm:$0xff]  ;;  %v4857_v16 = vld [vmem:[%s10972_s0 + $0x40] sm:$0xff] }
 0x487   :  { %v3490_v37 = vmul.f32 %v4853_v24, %v9195_v18  ;;  %v3621_v26 = vpop.permute.xlu1 %3620  ;;  %v4855_v18 = vld [vmem:[%s10972_s0 + $0x18] sm:$0xff] }
 0x488   :  { %4356 = vst.msk [vmem:[%s10974_s2 + $0x20] sm:$0xff] %vm135_vm0, %v4232_v39  ;;  %v4230_v28 = vadd.f32 %v3621_v26, %v3486_v29  ;;  %3925 = vperm.xlu1 %4485, %v2803_v44   ;;  %v3487_v10 = vmul.f32 %v4855_v18, %v9180_v43  ;;  %v4856_v39 = vld [vmem:[%s10973_s1 + $0x230] sm:$0xff]  ;;  %v12349_v44 = vld [vmem:[#allocation5_spill] sm:$0xff] }
 0x489   :  { %v3641_v57 = vpop.permute.xlu0 %3640  ;;  %v2810_v29 = vsub.f32 %v4856_v39, %v12349_v44  ;;  %v4861_v39 = vld [vmem:[%s10972_s0 + $0x50] sm:$0xff] }
 0x48a   :  { %v4234_v58 = vadd.f32 %v3641_v57, %v3490_v37  ;;  %3950 = vperm.xlu0 %4486, %v2808_v53   ;;  %4354 = vst.msk [vmem:[%s10974_s2 + $0x10] sm:$0xff] %vm135_vm0, %v4230_v28  ;;  %v3492_v53 = vmul.f32 %v4857_v16, %v9201_v11  ;;  %v4858_v28 = vld [vmem:[%s10973_s1 + $0x218] sm:$0xff]  ;;  %v4859_v11 = vld [vmem:[%s10972_s0 + $0x28] sm:$0xff]  ;;  %v3494_v44 = vmul.f32 %v4861_v39, %v9207_v50 }
 0x48b   :  { %v3626_v43 = vpop.permute.xlu1 %3625  ;;  %v12350_v57 = vld [vmem:[#allocation161_spill] sm:$0xff]  ;;  %v3489_v18 = vmul.f32 %v4859_v11, %v12351_v20 }
 0x48c   :  { %4358 = vst.msk [vmem:[%s10974_s2 + $0x30] sm:$0xff] %vm135_vm0, %v4234_v58  ;;  %v4231_v24 = vadd.f32 %v3626_v43, %v3487_v10  ;;  %3935 = vperm.xlu1 %4485, %v2805_v33   ;;  %v2807_v47 = vsub.f32 %v4858_v28, %v12350_v57  ;;  %v4860_v58 = vld [vmem:[%s10973_s1 + $0x240] sm:$0xff]  ;;  %v12352_v33 = vld [vmem:[#allocation91_spill] sm:$0xff]  ;;  %v4863_v50 = vld [vmem:[%s10972_s0 + $0x38] sm:$0xff] }
 0x48d   :  { %v3651_v37 = vpop.permute.xlu0 %3650  ;;  %v2812_v10 = vsub.f32 %v4860_v58, %v12352_v33  ;;  %v12354_v57 = vld [vmem:[#allocation36_spill] sm:$0xff] }
 0x48e   :  { %v4236_v26 = vadd.f32 %v3651_v37, %v3492_v53  ;;  %3960 = vperm.xlu0 %4486, %v2810_v29   ;;  %4355 = vst.msk [vmem:[%s10974_s2 + $0x18] sm:$0xff] %vm135_vm0, %v4231_v24  ;;  %v4862_v24 = vld [vmem:[%s10973_s1 + $0x228] sm:$0xff]  ;;  %v12353_v37 = vld [vmem:[#allocation6_spill] sm:$0xff]  ;;  %v3491_v11 = vmul.f32 %v4863_v50, %v12354_v57  ;;  %v4869_v57 = vld [vmem:[%s10972_s0 + $0x70] sm:$0xff] }
 0x48f   :  { %v3636_v29 = vpop.permute.xlu1 %3635  ;;  %v2809_v28 = vsub.f32 %v4862_v24, %v12353_v37  ;;  %v12357_v24 = vld [vmem:[#allocation181_spill] sm:$0xff] }
 0x490   :  { %4360 = vst.msk [vmem:[%s10974_s2 + $0x40] sm:$0xff] %vm135_vm0, %v4236_v26  ;;  %v4233_v16 = vadd.f32 %v3636_v29, %v3489_v18  ;;  %3945 = vperm.xlu1 %4485, %v2807_v47   ;;  %v4864_v26 = vld [vmem:[%s10973_s1 + $0x250] sm:$0xff]  ;;  %v12355_v47 = vld [vmem:[#allocation7_spill] sm:$0xff]  ;;  %v4865_v18 = vld [vmem:[%s10972_s0 + $0x60] sm:$0xff] }
 0x491   :  { %v3661_v53 = vpop.permute.xlu0 %3660  ;;  %v2814_v20 = vsub.f32 %v4864_v26, %v12355_v47  ;;  %v3496_v58 = vmul.f32 %v4865_v18, %v9213_v48  ;;  %v4866_v29 = vld [vmem:[%s10973_s1 + $0x238] sm:$0xff]  ;;  %v4867_v48 = vld [vmem:[%s10972_s0 + $0x48] sm:$0xff] }
 0x492   :  { %v4238_v43 = vadd.f32 %v3661_v53, %v3494_v44  ;;  %3970 = vperm.xlu0 %4486, %v2812_v10   ;;  %4357 = vst.msk [vmem:[%s10974_s2 + $0x28] sm:$0xff] %vm135_vm0, %v4233_v16  ;;  %v12356_v16 = vld [vmem:[#allocation145_spill] sm:$0xff]  ;;  %v3493_v37 = vmul.f32 %v4867_v48, %v12357_v24 }
 0x493   :  { %v3646_v33 = vpop.permute.xlu1 %3645  ;;  %v2811_v53 = vsub.f32 %v4866_v29, %v12356_v16  ;;  %v4871_v29 = vld [vmem:[%s10972_s0 + $0x58] sm:$0xff]  ;;  %v12361_v16 = vld [vmem:[#allocation39_spill] sm:$0xff] }
 0x494   :  { %4362 = vst.msk [vmem:[%s10974_s2 + $0x50] sm:$0xff] %vm135_vm0, %v4238_v43  ;;  %v4235_v10 = vadd.f32 %v3646_v33, %v3491_v11  ;;  %3955 = vperm.xlu1 %4485, %v2809_v28   ;;  %v4868_v43 = vld [vmem:[%s10973_s1 + $0x260] sm:$0xff]  ;;  %v4870_v33 = vld [vmem:[%s10973_s1 + $0x248] sm:$0xff]  ;;  %v3495_v48 = vmul.f32 %v4871_v29, %v12361_v16  ;;  %v4877_v29 = vld [vmem:[%s10972_s0 + $0x90] sm:$0xff] }
 0x495   :  { %v3671_v39 = vpop.permute.xlu0 %3670  ;;  %v12358_v28 = vld [vmem:[#allocation142_spill] sm:$0xff]  ;;  %v12366_v16 = vld [vmem:[#allocation87_spill] sm:$0xff] }
 0x496   :  { %v4240_v44 = vadd.f32 %v3671_v39, %v3496_v58  ;;  %3980 = vperm.xlu0 %4486, %v2814_v20   ;;  %4359 = vst.msk [vmem:[%s10974_s2 + $0x38] sm:$0xff] %vm135_vm0, %v4235_v10  ;;  %v2816_v50 = vsub.f32 %v4868_v43, %v12358_v28  ;;  %v12359_v11 = vld [vmem:[#allocation82_spill] sm:$0xff]  ;;  %v12360_v10 = vld [vmem:[#allocation155_spill] sm:$0xff] }
 0x497   :  { %v3498_v26 = vmul.f32 %v4869_v57, %v12359_v11  ;;  %v3656_v47 = vpop.permute.xlu1 %3655  ;;  %v2813_v39 = vsub.f32 %v4870_v33, %v12360_v10  ;;  %v12365_v10 = vld [vmem:[#allocation147_spill] sm:$0xff] }
 0x498   :  { %4364 = vst.msk [vmem:[%s10974_s2 + $0x60] sm:$0xff] %vm135_vm0, %v4240_v44  ;;  %v4237_v20 = vadd.f32 %v3656_v47, %v3493_v37  ;;  %3965 = vperm.xlu1 %4485, %v2811_v53   ;;  %v4872_v44 = vld [vmem:[%s10973_s1 + $0x270] sm:$0xff]  ;;  %v12362_v53 = vld [vmem:[#allocation166_spill] sm:$0xff] }
 0x499   :  { %v3681_v18 = vpop.permute.xlu0 %3680  ;;  %v2818_v24 = vsub.f32 %v4872_v44, %v12362_v53  ;;  %v4873_v37 = vld [vmem:[%s10972_s0 + $0x80] sm:$0xff] }
 0x49a   :  { %v4242_v58 = vadd.f32 %v3681_v18, %v3498_v26  ;;  %3990 = vperm.xlu0 %4486, %v2816_v50   ;;  %4361 = vst.msk [vmem:[%s10974_s2 + $0x48] sm:$0xff] %vm135_vm0, %v4237_v20  ;;  %v3500_v43 = vmul.f32 %v4873_v37, %v9225_v40  ;;  %v4874_v26 = vld [vmem:[%s10973_s1 + $0x258] sm:$0xff]  ;;  %v12363_v47 = vld [vmem:[#allocation158_spill] sm:$0xff]  ;;  %v4875_v40 = vld [vmem:[%s10972_s0 + $0x68] sm:$0xff] }
 0x49b   :  { %v3666_v28 = vpop.permute.xlu1 %3665  ;;  %v2815_v20 = vsub.f32 %v4874_v26, %v12363_v47  ;;  %v12364_v18 = vld [vmem:[#allocation19_spill] sm:$0xff]  ;;  %v12368_v26 = vld [vmem:[#allocation44_spill] sm:$0xff] }
 0x49c   :  { %4366 = vst.msk [vmem:[%s10974_s2 + $0x70] sm:$0xff] %vm135_vm0, %v4242_v58  ;;  %v4239_v50 = vadd.f32 %v3666_v28, %v3495_v48  ;;  %3975 = vperm.xlu1 %4485, %v2813_v39   ;;  %v3497_v33 = vmul.f32 %v4875_v40, %v12364_v18  ;;  %v4876_v58 = vld [vmem:[%s10973_s1 + $0x280] sm:$0xff]  ;;  %v3502_v48 = vmul.f32 %v4877_v29, %v12366_v16  ;;  %v12367_v28 = vld [vmem:[#allocation57_spill] sm:$0xff] }
 0x49d   :  { %v3691_v57 = vpop.permute.xlu0 %3690  ;;  %v2820_v39 = vsub.f32 %v4876_v58, %v12365_v10  ;;  %v4881_v18 = vld [vmem:[%s10972_s0 + $0xa0] sm:$0xff] }
 0x49e   :  { %v4244_v11 = vadd.f32 %v3691_v57, %v3500_v43  ;;  %4000 = vperm.xlu0 %4486, %v2818_v24   ;;  %4363 = vst.msk [vmem:[%s10974_s2 + $0x58] sm:$0xff] %vm135_vm0, %v4239_v50  ;;  %v4878_v43 = vld [vmem:[%s10973_s1 + $0x268] sm:$0xff]  ;;  %v4879_v57 = vld [vmem:[%s10972_s0 + $0x78] sm:$0xff] }
 0x49f   :  { %v3676_v44 = vpop.permute.xlu1 %3675  ;;  %v2817_v50 = vsub.f32 %v4878_v43, %v12367_v28  ;;  %v3499_v47 = vmul.f32 %v4879_v57, %v12368_v26  ;;  %v12372_v43 = vld [vmem:[#allocation194_spill] sm:$0xff]  ;;  %v4885_v26 = vld [vmem:[%s10972_s0 + $0xb0] sm:$0xff] }
 0x4a0   :  { %4368 = vst.msk [vmem:[%s10974_s2 + $0x80] sm:$0xff] %vm135_vm0, %v4244_v11  ;;  %v4241_v53 = vadd.f32 %v3676_v44, %v3497_v33  ;;  %3985 = vperm.xlu1 %4485, %v2815_v20   ;;  %v4880_v11 = vld [vmem:[%s10973_s1 + $0x290] sm:$0xff]  ;;  %v12369_v20 = vld [vmem:[#allocation151_spill] sm:$0xff]  ;;  %v12370_v33 = vld [vmem:[#allocation126_spill] sm:$0xff] }
 0x4a1   :  { %v3701_v24 = vpop.permute.xlu0 %3700  ;;  %v2822_v40 = vsub.f32 %v4880_v11, %v12369_v20  ;;  %v3504_v58 = vmul.f32 %v4881_v18, %v12370_v33  ;;  %v12371_v44 = vld [vmem:[#allocation59_spill] sm:$0xff] }
 0x4a2   :  { %v4246_v37 = vadd.f32 %v3701_v24, %v3502_v48  ;;  %4010 = vperm.xlu0 %4486, %v2820_v39   ;;  %4365 = vst.msk [vmem:[%s10974_s2 + $0x68] sm:$0xff] %vm135_vm0, %v4241_v53  ;;  %v4882_v48 = vld [vmem:[%s10973_s1 + $0x278] sm:$0xff]  ;;  %v4883_v24 = vld [vmem:[%s10972_s0 + $0x88] sm:$0xff] }
 0x4a3   :  { %v3686_v10 = vpop.permute.xlu1 %3685  ;;  %v2819_v53 = vsub.f32 %v4882_v48, %v12371_v44  ;;  %v3501_v28 = vmul.f32 %v4883_v24, %v12372_v43  ;;  %v12376_v48 = vld [vmem:[#allocation86_spill] sm:$0xff] }
 0x4a4   :  { %4370 = vst.msk [vmem:[%s10974_s2 + $0x90] sm:$0xff] %vm135_vm0, %v4246_v37  ;;  %v4243_v39 = vadd.f32 %v3686_v10, %v3499_v47  ;;  %3995 = vperm.xlu1 %4485, %v2817_v50   ;;  %v4884_v37 = vld [vmem:[%s10973_s1 + $0x2a0] sm:$0xff]  ;;  %v12373_v50 = vld [vmem:[#allocation8_spill] sm:$0xff]  ;;  %v12374_v47 = vld [vmem:[#allocation133_spill] sm:$0xff] }
 0x4a5   :  { %v3711_v29 = vpop.permute.xlu0 %3710  ;;  %v2824_v57 = vsub.f32 %v4884_v37, %v12373_v50  ;;  %v3506_v11 = vmul.f32 %v4885_v26, %v12374_v47  ;;  %v12375_v10 = vld [vmem:[#allocation56_spill] sm:$0xff]  ;;  %v4889_v43 = vld [vmem:[%s10972_s0 + $0xc0] sm:$0xff]  ;;  %v4890_v47 = vld [vmem:[%s10973_s1 + $0x298] sm:$0xff] }
 0x4a6   :  { %v4248_v16 = vadd.f32 %v3711_v29, %v3504_v58  ;;  %4020 = vperm.xlu0 %4486, %v2822_v40   ;;  %4367 = vst.msk [vmem:[%s10974_s2 + $0x78] sm:$0xff] %vm135_vm0, %v4243_v39  ;;  %v4886_v58 = vld [vmem:[%s10973_s1 + $0x288] sm:$0xff]  ;;  %v4887_v29 = vld [vmem:[%s10972_s0 + $0x98] sm:$0xff] }
 0x4a7   :  { %v3696_v20 = vpop.permute.xlu1 %3695  ;;  %v2821_v39 = vsub.f32 %v4886_v58, %v12375_v10  ;;  %v3503_v44 = vmul.f32 %v4887_v29, %v12376_v48  ;;  %v12380_v58 = vld [vmem:[#allocation153_spill] sm:$0xff] }
 0x4a8   :  { %4372 = vst.msk [vmem:[%s10974_s2 + $0xa0] sm:$0xff] %vm135_vm0, %v4248_v16  ;;  %v4245_v40 = vadd.f32 %v3696_v20, %v3501_v28  ;;  %4005 = vperm.xlu1 %4485, %v2819_v53   ;;  %v4888_v16 = vld [vmem:[%s10973_s1 + $0x2b0] sm:$0xff]  ;;  %v12377_v53 = vld [vmem:[#allocation95_spill] sm:$0xff]  ;;  %v3508_v28 = vmul.f32 %v4889_v43, %v9249_v9  ;;  %v12381_v43 = vld [vmem:[#allocation9_spill] sm:$0xff] }
 0x4a9   :  { %v3721_v18 = vpop.permute.xlu0 %3720  ;;  %v2826_v24 = vsub.f32 %v4888_v16, %v12377_v53  ;;  %v4891_v9 = vld [vmem:[%s10972_s0 + $0xa8] sm:$0xff] }
 0x4aa   :  { %v4250_v33 = vadd.f32 %v3721_v18, %v3506_v11  ;;  %4030 = vperm.xlu0 %4486, %v2824_v57   ;;  %4369 = vst.msk [vmem:[%s10974_s2 + $0x88] sm:$0xff] %vm135_vm0, %v4245_v40  ;;  %v12378_v11 = vld [vmem:[#allocation164_spill] sm:$0xff]  ;;  %v12379_v40 = vld [vmem:[#allocation122_spill] sm:$0xff] }
 0x4ab   :  { %v3706_v37 = vpop.permute.xlu1 %3705  ;;  %v2823_v20 = vsub.f32 %v4890_v47, %v12378_v11  ;;  %v3505_v18 = vmul.f32 %v4891_v9, %v12379_v40  ;;  %v4897_v11 = vld [vmem:[%s10972_s0 + $0xe0] sm:$0xff] }
 0x4ac   :  { %4374 = vst.msk [vmem:[%s10974_s2 + $0xb0] sm:$0xff] %vm135_vm0, %v4250_v33  ;;  %v4247_v50 = vadd.f32 %v3706_v37, %v3503_v44  ;;  %4015 = vperm.xlu1 %4485, %v2821_v39   ;;  %v4892_v33 = vld [vmem:[%s10973_s1 + $0x2c0] sm:$0xff]  ;;  %v4893_v39 = vld [vmem:[%s10972_s0 + $0xd0] sm:$0xff] }
 0x4ad   :  { %v3731_v57 = vpop.permute.xlu0 %3730  ;;  %v2828_v10 = vsub.f32 %v4892_v33, %v12380_v58  ;;  %v3510_v29 = vmul.f32 %v4893_v39, %v9255_v32  ;;  %v4895_v32 = vld [vmem:[%s10972_s0 + $0xb8] sm:$0xff]  ;;  %v12382_v37 = vld [vmem:[#allocation88_spill] sm:$0xff] }
 0x4ae   :  { %v4252_v26 = vadd.f32 %v3731_v57, %v3508_v28  ;;  %4040 = vperm.xlu0 %4486, %v2826_v24   ;;  %4371 = vst.msk [vmem:[%s10974_s2 + $0x98] sm:$0xff] %vm135_vm0, %v4247_v50  ;;  %v4894_v24 = vld [vmem:[%s10973_s1 + $0x2a8] sm:$0xff]  ;;  %v3507_v50 = vmul.f32 %v4895_v32, %v12382_v37  ;;  %v4896_v57 = vld [vmem:[%s10973_s1 + $0x2d0] sm:$0xff]  ;;  %v4898_v58 = vld [vmem:[%s10973_s1 + $0x2b8] sm:$0xff] }
 0x4af   :  { %v3716_v48 = vpop.permute.xlu1 %3715  ;;  %v2825_v28 = vsub.f32 %v4894_v24, %v12381_v43  ;;  %v4901_v24 = vld [vmem:[%s10972_s0 + $0xf0] sm:$0xff] }
 0x4b0   :  { %4376 = vst.msk [vmem:[%s10974_s2 + $0xc0] sm:$0xff] %vm135_vm0, %v4252_v26  ;;  %v4249_v44 = vadd.f32 %v3716_v48, %v3505_v18  ;;  %4025 = vperm.xlu1 %4485, %v2823_v20   ;;  %v12383_v26 = vld [vmem:[#allocation61_spill] sm:$0xff]  ;;  %v3512_v20 = vmul.f32 %v4897_v11, %v9261_v19  ;;  %v4899_v19 = vld [vmem:[%s10972_s0 + $0xc8] sm:$0xff]  ;;  %v12387_v43 = vld [vmem:[#allocation28_spill] sm:$0xff] }
 0x4b1   :  { %v3741_v16 = vpop.permute.xlu0 %3740  ;;  %v2830_v47 = vsub.f32 %v4896_v57, %v12383_v26  ;;  %v4902_v26 = vld [vmem:[%s10973_s1 + $0x2c8] sm:$0xff] }
 0x4b2   :  { %v4254_v53 = vadd.f32 %v3741_v16, %v3510_v29  ;;  %4050 = vperm.xlu0 %4486, %v2828_v10   ;;  %4373 = vst.msk [vmem:[%s10974_s2 + $0xa8] sm:$0xff] %vm135_vm0, %v4249_v44  ;;  %v12384_v10 = vld [vmem:[#allocation51_spill] sm:$0xff]  ;;  %v12385_v29 = vld [vmem:[#allocation134_spill] sm:$0xff] }
 0x4b3   :  { %v3726_v9 = vpop.permute.xlu1 %3725  ;;  %v2827_v39 = vsub.f32 %v4898_v58, %v12384_v10  ;;  %v3509_v48 = vmul.f32 %v4899_v19, %v12385_v29  ;;  %v4900_v44 = vld [vmem:[%s10973_s1 + $0x2e0] sm:$0xff] }
 0x4b4   :  { %4378 = vst.msk [vmem:[%s10974_s2 + $0xd0] sm:$0xff] %vm135_vm0, %v4254_v53  ;;  %v4251_v40 = vadd.f32 %v3726_v9, %v3507_v50  ;;  %4035 = vperm.xlu1 %4485, %v2825_v28   ;;  %v12386_v16 = vld [vmem:[#allocation10_spill] sm:$0xff]  ;;  %v3514_v28 = vmul.f32 %v4901_v24, %v12387_v43  ;;  %v12389_v9 = vld [vmem:[#allocation136_spill] sm:$0xff] }
 0x4b5   :  { %v3751_v18 = vpop.permute.xlu0 %3750  ;;  %v2832_v53 = vsub.f32 %v4900_v44, %v12386_v16  ;;  %v4905_v10 = vld [vmem:[%s10972_s0 + $0x100] sm:$0xff]  ;;  %v4906_v16 = vld [vmem:[%s10973_s1 + $0x2d8] sm:$0xff]  ;;  %v12392_v43 = vld [vmem:[#allocation132_spill] sm:$0xff] }
 0x4b6   :  { %v4256_v33 = vadd.f32 %v3751_v18, %v3512_v20  ;;  %4060 = vperm.xlu0 %4486, %v2830_v47   ;;  %4375 = vst.msk [vmem:[%s10974_s2 + $0xb8] sm:$0xff] %vm135_vm0, %v4251_v40  ;;  %v12388_v47 = vld [vmem:[#allocation167_spill] sm:$0xff]  ;;  %v4903_v20 = vld [vmem:[%s10972_s0 + $0xd8] sm:$0xff]  ;;  %v4904_v18 = vld [vmem:[%s10973_s1 + $0x2f0] sm:$0xff] }
 0x4b7   :  { %v3736_v32 = vpop.permute.xlu1 %3735  ;;  %v2829_v11 = vsub.f32 %v4902_v26, %v12388_v47  ;;  %v3511_v40 = vmul.f32 %v4903_v20, %v12389_v9 }
 0x4b8   :  { %4380 = vst.msk [vmem:[%s10974_s2 + $0xe0] sm:$0xff] %vm135_vm0, %v4256_v33  ;;  %v4253_v37 = vadd.f32 %v3736_v32, %v3509_v48  ;;  %4045 = vperm.xlu1 %4485, %v2827_v39   ;;  %v12390_v33 = vld [vmem:[#allocation63_spill] sm:$0xff]  ;;  %v3516_v39 = vmul.f32 %v4905_v10, %v9273_v60  ;;  %v4908_v32 = vld [vmem:[%s10973_s1 + $0x300] sm:$0xff] }
 0x4b9   :  { %v3761_v50 = vpop.permute.xlu0 %3760  ;;  %v2834_v58 = vsub.f32 %v4904_v18, %v12390_v33  ;;  %v4907_v60 = vld [vmem:[%s10972_s0 + $0xe8] sm:$0xff]  ;;  %v12394_v18 = vld [vmem:[#allocation98_spill] sm:$0xff] }
 0x4ba   :  { %v4258_v57 = vadd.f32 %v3761_v50, %v3514_v28  ;;  %4070 = vperm.xlu0 %4486, %v2832_v53   ;;  %4377 = vst.msk [vmem:[%s10974_s2 + $0xc8] sm:$0xff] %vm135_vm0, %v4253_v37  ;;  %v12391_v53 = vld [vmem:[#allocation154_spill] sm:$0xff]  ;;  %v3513_v28 = vmul.f32 %v4907_v60, %v12392_v43  ;;  %v12393_v37 = vld [vmem:[#allocation11_spill] sm:$0xff]  ;;  %v4914_v43 = vld [vmem:[%s10973_s1 + $0x2f8] sm:$0xff] }
 0x4bb   :  { %v3746_v19 = vpop.permute.xlu1 %3745  ;;  %v2831_v24 = vsub.f32 %v4906_v16, %v12391_v53  ;;  %v2836_v50 = vsub.f32 %v4908_v32, %v12393_v37  ;;  %v12398_v37 = vld [vmem:[#allocation140_spill] sm:$0xff] }
 0x4bc   :  { %4382 = vst.msk [vmem:[%s10974_s2 + $0xf0] sm:$0xff] %vm135_vm0, %v4258_v57  ;;  %v4255_v29 = vadd.f32 %v3746_v19, %v3511_v40  ;;  %4055 = vperm.xlu1 %4485, %v2829_v11   ;;  %v4909_v57 = vld [vmem:[%s10972_s0 + $0x110] sm:$0xff]  ;;  %v4910_v40 = vld [vmem:[%s10973_s1 + $0x2e8] sm:$0xff]  ;;  %v12396_v19 = vld [vmem:[#allocation58_spill] sm:$0xff] }
 0x4bd   :  { %v3771_v48 = vpop.permute.xlu0 %3770  ;;  %v3518_v26 = vmul.f32 %v4909_v57, %v9279_v52  ;;  %v2833_v33 = vsub.f32 %v4910_v40, %v12394_v18  ;;  %v4911_v52 = vld [vmem:[%s10972_s0 + $0xf8] sm:$0xff]  ;;  %v4916_v57 = vld [vmem:[%s10973_s1 + $0x320] sm:$0xff] }
 0x4be   :  { %v4260_v44 = vadd.f32 %v3771_v48, %v3516_v39  ;;  %4080 = vperm.xlu0 %4486, %v2834_v58   ;;  %4379 = vst.msk [vmem:[%s10974_s2 + $0xd8] sm:$0xff] %vm135_vm0, %v4255_v29  ;;  %v12395_v58 = vld [vmem:[#allocation138_spill] sm:$0xff]  ;;  %v4912_v39 = vld [vmem:[%s10973_s1 + $0x310] sm:$0xff] }
 0x4bf   :  { %v3756_v47 = vpop.permute.xlu1 %3755  ;;  %v3515_v10 = vmul.f32 %v4911_v52, %v12395_v58  ;;  %v2838_v29 = vsub.f32 %v4912_v39, %v12396_v19  ;;  %v4913_v48 = vld [vmem:[%s10972_s0 + $0x120] sm:$0xff]  ;;  %v4918_v52 = vld [vmem:[%s10973_s1 + $0x308] sm:$0xff]  ;;  %v12400_v58 = vld [vmem:[#allocation12_spill] sm:$0xff] }
 0x4c0   :  { %4384 = vst.msk [vmem:[%s10974_s2 + $0x100] sm:$0xff] %vm135_vm0, %v4260_v44  ;;  %v4257_v11 = vadd.f32 %v3756_v47, %v3513_v28  ;;  %4065 = vperm.xlu1 %4485, %v2831_v24   ;;  %v3520_v44 = vmul.f32 %v4913_v48, %v9285_v49  ;;  %v12397_v28 = vld [vmem:[#allocation67_spill] sm:$0xff]  ;;  %v4920_v19 = vld [vmem:[%s10973_s1 + $0x330] sm:$0xff] }
 0x4c1   :  { %v3781_v20 = vpop.permute.xlu0 %3780  ;;  %v2835_v32 = vsub.f32 %v4914_v43, %v12397_v28  ;;  %v4915_v49 = vld [vmem:[%s10972_s0 + $0x108] sm:$0xff]  ;;  %v4922_v43 = vld [vmem:[%s10973_s1 + $0x318] sm:$0xff]  ;;  %v12402_v28 = vld [vmem:[#allocation100_spill] sm:$0xff] }
 0x4c2   :  { %v4262_v9 = vadd.f32 %v3781_v20, %v3518_v26  ;;  %4090 = vperm.xlu0 %4486, %v2836_v50   ;;  %4381 = vst.msk [vmem:[%s10974_s2 + $0xe8] sm:$0xff] %vm135_vm0, %v4257_v11  ;;  %v3517_v50 = vmul.f32 %v4915_v49, %v12398_v37  ;;  %v12399_v26 = vld [vmem:[#allocation64_spill] sm:$0xff]  ;;  %v4924_v37 = vld [vmem:[%s10973_s1 + $0x340] sm:$0xff] }
 0x4c3   :  { %v3766_v16 = vpop.permute.xlu1 %3765  ;;  %v2840_v47 = vsub.f32 %v4916_v57, %v12399_v26  ;;  %v4917_v11 = vld [vmem:[%s10972_s0 + $0x130] sm:$0xff] }
 0x4c4   :  { %4386 = vst.msk [vmem:[%s10974_s2 + $0x110] sm:$0xff] %vm135_vm0, %v4262_v9  ;;  %v4259_v53 = vadd.f32 %v3766_v16, %v3515_v10  ;;  %4075 = vperm.xlu1 %4485, %v2833_v33   ;;  %v3522_v20 = vmul.f32 %v4917_v11, %v9291_v14  ;;  %v2837_v10 = vsub.f32 %v4918_v52, %v12400_v58  ;;  %v4919_v14 = vld [vmem:[%s10972_s0 + $0x118] sm:$0xff]  ;;  %v4925_v26 = vld [vmem:[%s10972_s0 + $0x150] sm:$0xff] }
 0x4c5   :  { %v3791_v24 = vpop.permute.xlu0 %3790  ;;  %v3519_v39 = vmul.f32 %v4919_v14, %v9276_v62  ;;  %v12405_v52 = vld [vmem:[#allocation141_spill] sm:$0xff]  ;;  %v12406_v14 = vld [vmem:[#allocation60_spill] sm:$0xff] }
 0x4c6   :  { %v4264_v60 = vadd.f32 %v3791_v24, %v3520_v44  ;;  %4100 = vperm.xlu0 %4486, %v2838_v29   ;;  %4383 = vst.msk [vmem:[%s10974_s2 + $0xf8] sm:$0xff] %vm135_vm0, %v4259_v53  ;;  %v12401_v29 = vld [vmem:[#allocation180_spill] sm:$0xff]  ;;  %v4921_v44 = vld [vmem:[%s10972_s0 + $0x140] sm:$0xff] }
 0x4c7   :  { %v3776_v9 = vpop.permute.xlu1 %3775  ;;  %v2842_v48 = vsub.f32 %v4920_v19, %v12401_v29  ;;  %v3524_v16 = vmul.f32 %v4921_v44, %v9297_v8  ;;  %v4923_v8 = vld [vmem:[%s10972_s0 + $0x128] sm:$0xff]  ;;  %v4929_v19 = vld [vmem:[%s10972_s0 + $0x160] sm:$0xff] }
 0x4c8   :  { %4388 = vst.msk [vmem:[%s10974_s2 + $0x120] sm:$0xff] %vm135_vm0, %v4264_v60  ;;  %v4261_v40 = vadd.f32 %v3776_v9, %v3517_v50  ;;  %4085 = vperm.xlu1 %4485, %v2835_v32   ;;  %v2839_v32 = vsub.f32 %v4922_v43, %v12402_v28  ;;  %v3521_v49 = vmul.f32 %v4923_v8, %v9282_v51  ;;  %v12403_v50 = vld [vmem:[#allocation69_spill] sm:$0xff]  ;;  %v4932_v28 = vld [vmem:[%s10973_s1 + $0x360] sm:$0xff] }
 0x4c9   :  { %v3801_v18 = vpop.permute.xlu0 %3800  ;;  %v2844_v57 = vsub.f32 %v4924_v37, %v12403_v50  ;;  %v3528_v29 = vmul.f32 %v4929_v19, %v9309_v41  ;;  %v4931_v41 = vld [vmem:[%s10972_s0 + $0x148] sm:$0xff] }
 0x4ca   :  { %v4266_v33 = vadd.f32 %v3801_v18, %v3522_v20  ;;  %4110 = vperm.xlu0 %4486, %v2840_v47   ;;  %4385 = vst.msk [vmem:[%s10974_s2 + $0x108] sm:$0xff] %vm135_vm0, %v4261_v40  ;;  %v3526_v47 = vmul.f32 %v4925_v26, %v9303_v55  ;;  %v4926_v40 = vld [vmem:[%s10973_s1 + $0x328] sm:$0xff]  ;;  %v4927_v55 = vld [vmem:[%s10972_s0 + $0x138] sm:$0xff]  ;;  %v3525_v43 = vmul.f32 %v4931_v41, %v9294_v6 }
 0x4cb   :  { %v3786_v62 = vpop.permute.xlu1 %3785  ;;  %v12404_v18 = vld [vmem:[#allocation103_spill] sm:$0xff]  ;;  %v3523_v58 = vmul.f32 %v4927_v55, %v12405_v52 }
 0x4cc   :  { %4390 = vst.msk [vmem:[%s10974_s2 + $0x130] sm:$0xff] %vm135_vm0, %v4266_v33  ;;  %v4263_v53 = vadd.f32 %v3786_v62, %v3519_v39  ;;  %4095 = vperm.xlu1 %4485, %v2837_v10   ;;  %v2841_v33 = vsub.f32 %v4926_v40, %v12404_v18  ;;  %v4928_v10 = vld [vmem:[%s10973_s1 + $0x350] sm:$0xff]  ;;  %v12410_v40 = vld [vmem:[#allocation189_spill] sm:$0xff] }
 0x4cd   :  { %v3811_v24 = vpop.permute.xlu0 %3810  ;;  %v2846_v39 = vsub.f32 %v4928_v10, %v12406_v14  ;;  %v4938_v14 = vld [vmem:[%s10973_s1 + $0x358] sm:$0xff] }
 0x4ce   :  { %v4268_v60 = vadd.f32 %v3811_v24, %v3524_v16  ;;  %4120 = vperm.xlu0 %4486, %v2842_v48   ;;  %4387 = vst.msk [vmem:[%s10974_s2 + $0x118] sm:$0xff] %vm135_vm0, %v4263_v53  ;;  %v4930_v53 = vld [vmem:[%s10973_s1 + $0x338] sm:$0xff] }
 0x4cf   :  { %v3796_v51 = vpop.permute.xlu1 %3795  ;;  %v12407_v24 = vld [vmem:[#allocation105_spill] sm:$0xff] }
 0x4d0   :  { %4392 = vst.msk [vmem:[%s10974_s2 + $0x140] sm:$0xff] %vm135_vm0, %v4268_v60  ;;  %v4265_v11 = vadd.f32 %v3796_v51, %v3521_v49  ;;  %4105 = vperm.xlu1 %4485, %v2839_v32   ;;  %v2843_v60 = vsub.f32 %v4930_v53, %v12407_v24  ;;  %v12408_v32 = vld [vmem:[#allocation14_spill] sm:$0xff]  ;;  %v4933_v49 = vld [vmem:[%s10972_s0 + $0x170] sm:$0xff]  ;;  %v12409_v51 = vld [vmem:[#allocation13_spill] sm:$0xff] }
 0x4d1   :  { %v3821_v20 = vpop.permute.xlu0 %3820  ;;  %v2848_v8 = vsub.f32 %v4932_v28, %v12408_v32  ;;  %v3530_v37 = vmul.f32 %v4933_v49, %v9315_v4  ;;  %v4935_v4 = vld [vmem:[%s10972_s0 + $0x158] sm:$0xff]  ;;  %v12413_v28 = vld [vmem:[#allocation72_spill] sm:$0xff] }
 0x4d2   :  { %v4270_v9 = vadd.f32 %v3821_v20, %v3526_v47  ;;  %4130 = vperm.xlu0 %4486, %v2844_v57   ;;  %4389 = vst.msk [vmem:[%s10974_s2 + $0x128] sm:$0xff] %vm135_vm0, %v4265_v11  ;;  %v4934_v47 = vld [vmem:[%s10973_s1 + $0x348] sm:$0xff]  ;;  %v3527_v20 = vmul.f32 %v4935_v4, %v9300_v54  ;;  %v4944_v49 = vld [vmem:[%s10973_s1 + $0x390] sm:$0xff] }
 0x4d3   :  { %v3806_v48 = vpop.permute.xlu1 %3805  ;;  %v2845_v11 = vsub.f32 %v4934_v47, %v12409_v51  ;;  %v12415_v4 = vld [vmem:[#allocation191_spill] sm:$0xff] }
 0x4d4   :  { %4394 = vst.msk [vmem:[%s10974_s2 + $0x150] sm:$0xff] %vm135_vm0, %v4270_v9  ;;  %v4267_v44 = vadd.f32 %v3806_v48, %v3523_v58  ;;  %4115 = vperm.xlu1 %4485, %v2841_v33   ;;  %v4936_v9 = vld [vmem:[%s10973_s1 + $0x370] sm:$0xff]  ;;  %v4937_v33 = vld [vmem:[%s10972_s0 + $0x180] sm:$0xff] }
 0x4d5   :  { %v3831_v16 = vpop.permute.xlu0 %3830  ;;  %v2850_v18 = vsub.f32 %v4936_v9, %v12410_v40  ;;  %v3532_v55 = vmul.f32 %v4937_v33, %v9321_v7  ;;  %v4939_v7 = vld [vmem:[%s10972_s0 + $0x168] sm:$0xff]  ;;  %v4940_v48 = vld [vmem:[%s10973_s1 + $0x380] sm:$0xff] }
 0x4d6   :  { %v4272_v62 = vadd.f32 %v3831_v16, %v3528_v29  ;;  %4140 = vperm.xlu0 %4486, %v2846_v39   ;;  %4391 = vst.msk [vmem:[%s10974_s2 + $0x138] sm:$0xff] %vm135_vm0, %v4267_v44  ;;  %v12411_v39 = vld [vmem:[#allocation68_spill] sm:$0xff]  ;;  %v3529_v29 = vmul.f32 %v4939_v7, %v9306_v22  ;;  %v12412_v44 = vld [vmem:[#allocation182_spill] sm:$0xff] }
 0x4d7   :  { %v3816_v6 = vpop.permute.xlu1 %3815  ;;  %v2847_v19 = vsub.f32 %v4938_v14, %v12411_v39  ;;  %v2852_v16 = vsub.f32 %v4940_v48, %v12412_v44  ;;  %v4948_v40 = vld [vmem:[%s10973_s1 + $0x3a0] sm:$0xff]  ;;  %v4950_v14 = vld [vmem:[%s10973_s1 + $0x388] sm:$0xff]  ;;  %v12418_v48 = vld [vmem:[#allocation84_spill] sm:$0xff] }
 0x4d8   :  { %4396 = vst.msk [vmem:[%s10974_s2 + $0x160] sm:$0xff] %vm135_vm0, %v4272_v62  ;;  %v4269_v50 = vadd.f32 %v3816_v6, %v3525_v43  ;;  %4125 = vperm.xlu1 %4485, %v2843_v60   ;;  %v4941_v62 = vld [vmem:[%s10972_s0 + $0x190] sm:$0xff]  ;;  %v4942_v43 = vld [vmem:[%s10973_s1 + $0x368] sm:$0xff] }
 0x4d9   :  { %v3841_v57 = vpop.permute.xlu0 %3840  ;;  %v3534_v53 = vmul.f32 %v4941_v62, %v9327_v0  ;;  %v2849_v32 = vsub.f32 %v4942_v43, %v12413_v28  ;;  %v4943_v0 = vld [vmem:[%s10972_s0 + $0x178] sm:$0xff]  ;;  %v12417_v39 = vld [vmem:[#allocation15_spill] sm:$0xff]  ;;  %v12420_v28 = vld [vmem:[#allocation92_spill] sm:$0xff] }
 0x4da   :  { %v4274_v26 = vadd.f32 %v3841_v57, %v3530_v37  ;;  %4150 = vperm.xlu0 %4486, %v2848_v8   ;;  %4393 = vst.msk [vmem:[%s10974_s2 + $0x148] sm:$0xff] %vm135_vm0, %v4269_v50  ;;  %v3531_v8 = vmul.f32 %v4943_v0, %v9312_v35  ;;  %v12414_v37 = vld [vmem:[#allocation107_spill] sm:$0xff]  ;;  %v4945_v50 = vld [vmem:[%s10972_s0 + $0x1a0] sm:$0xff] }
 0x4db   :  { %v3826_v54 = vpop.permute.xlu1 %3825  ;;  %v2854_v6 = vsub.f32 %v4944_v49, %v12414_v37  ;;  %v3536_v57 = vmul.f32 %v4945_v50, %v9333_v42  ;;  %v4947_v42 = vld [vmem:[%s10972_s0 + $0x188] sm:$0xff]  ;;  %v4956_v0 = vld [vmem:[%s10973_s1 + $0x3c0] sm:$0xff]  ;;  %v4957_v37 = vld [vmem:[%s10972_s0 + $0x1d0] sm:$0xff] }
 0x4dc   :  { %4398 = vst.msk [vmem:[%s10974_s2 + $0x170] sm:$0xff] %vm135_vm0, %v4274_v26  ;;  %v4271_v52 = vadd.f32 %v3826_v54, %v3527_v20  ;;  %4135 = vperm.xlu1 %4485, %v2845_v11   ;;  %v4946_v11 = vld [vmem:[%s10973_s1 + $0x378] sm:$0xff]  ;;  %v3533_v9 = vmul.f32 %v4947_v42, %v9318_v2  ;;  %v12424_v42 = vld [vmem:[#allocation143_spill] sm:$0xff] }
 0x4dd   :  { %v3851_v58 = vpop.permute.xlu0 %3850  ;;  %v2851_v20 = vsub.f32 %v4946_v11, %v12415_v4  ;;  %v12423_v11 = vld [vmem:[#allocation22_spill] sm:$0xff] }
 0x4de   :  { %v4276_v10 = vadd.f32 %v3851_v58, %v3532_v55  ;;  %4160 = vperm.xlu0 %4486, %v2850_v18   ;;  %4395 = vst.msk [vmem:[%s10974_s2 + $0x158] sm:$0xff] %vm135_vm0, %v4271_v52  ;;  %v12416_v18 = vld [vmem:[#allocation16_spill] sm:$0xff] }
 0x4df   :  { %v3836_v22 = vpop.permute.xlu1 %3835  ;;  %v2856_v33 = vsub.f32 %v4948_v40, %v12416_v18  ;;  %v4949_v55 = vld [vmem:[%s10972_s0 + $0x1b0] sm:$0xff]  ;;  %v12425_v18 = vld [vmem:[#allocation18_spill] sm:$0xff] }
 0x4e0   :  { %4400 = vst.msk [vmem:[%s10974_s2 + $0x180] sm:$0xff] %vm135_vm0, %v4276_v10  ;;  %v4273_v24 = vadd.f32 %v3836_v22, %v3529_v29  ;;  %4145 = vperm.xlu1 %4485, %v2847_v19   ;;  %v3538_v54 = vmul.f32 %v4949_v55, %v9339_v30  ;;  %v2853_v19 = vsub.f32 %v4950_v14, %v12417_v39  ;;  %v4951_v30 = vld [vmem:[%s10972_s0 + $0x198] sm:$0xff]  ;;  %v4952_v29 = vld [vmem:[%s10973_s1 + $0x3b0] sm:$0xff]  ;;  %v4961_v55 = vld [vmem:[%s10972_s0 + $0x1e0] sm:$0xff] }
 0x4e1   :  { %v3861_v60 = vpop.permute.xlu0 %3860  ;;  %v3535_v7 = vmul.f32 %v4951_v30, %v9324_v63  ;;  %v2858_v44 = vsub.f32 %v4952_v29, %v12418_v48  ;;  %v4960_v40 = vld [vmem:[%s10973_s1 + $0x3d0] sm:$0xff]  ;;  %v4962_v39 = vld [vmem:[%s10973_s1 + $0x3b8] sm:$0xff]  ;;  %v12428_v29 = vld [vmem:[#allocation163_spill] sm:$0xff] }
 0x4e2   :  { %v4278_v41 = vadd.f32 %v3861_v60, %v3534_v53  ;;  %4170 = vperm.xlu0 %4486, %v2852_v16   ;;  %4397 = vst.msk [vmem:[%s10974_s2 + $0x168] sm:$0xff] %vm135_vm0, %v4273_v24  ;;  %v4953_v16 = vld [vmem:[%s10972_s0 + $0x1c0] sm:$0xff]  ;;  %v4954_v60 = vld [vmem:[%s10973_s1 + $0x398] sm:$0xff] }
 0x4e3   :  { %v3846_v35 = vpop.permute.xlu1 %3845  ;;  %v3540_v62 = vmul.f32 %v4953_v16, %v9345_v13  ;;  %v4955_v13 = vld [vmem:[%s10972_s0 + $0x1a8] sm:$0xff]  ;;  %v12429_v16 = vld [vmem:[#allocation149_spill] sm:$0xff] }
 0x4e4   :  { %4402 = vst.msk [vmem:[%s10974_s2 + $0x190] sm:$0xff] %vm135_vm0, %v4278_v41  ;;  %v4275_v26 = vadd.f32 %v3846_v35, %v3531_v8  ;;  %4155 = vperm.xlu1 %4485, %v2849_v32   ;;  %v12419_v41 = vld [vmem:[#allocation73_spill] sm:$0xff]  ;;  %v3537_v32 = vmul.f32 %v4955_v13, %v12420_v28  ;;  %v12421_v8 = vld [vmem:[#allocation42_spill] sm:$0xff]  ;;  %v12431_v28 = vld [vmem:[#allocation160_spill] sm:$0xff] }
 0x4e5   :  { %v3871_v47 = vpop.permute.xlu0 %3870  ;;  %v2855_v43 = vsub.f32 %v4954_v60, %v12419_v41  ;;  %v2860_v49 = vsub.f32 %v4956_v0, %v12421_v8  ;;  %v4965_v60 = vld [vmem:[%s10973_s1 + $0x3c8] sm:$0xff]  ;;  %v12430_v41 = vld [vmem:[#allocation74_spill] sm:$0xff]  ;;  %v4966_v13 = vld [vmem:[%s10972_s0 + $0x1d8] sm:$0xff] }
 0x4e6   :  { %v4280_v51 = vadd.f32 %v3871_v47, %v3536_v57  ;;  %4180 = vperm.xlu0 %4486, %v2854_v6   ;;  %4399 = vst.msk [vmem:[%s10974_s2 + $0x178] sm:$0xff] %vm135_vm0, %v4275_v26  ;;  %v12422_v6 = vld [vmem:[#allocation162_spill] sm:$0xff]  ;;  %v12432_v8 = vld [vmem:[#allocation148_spill] sm:$0xff] }
 0x4e7   :  { %v3856_v2 = vpop.permute.xlu1 %3855  ;;  %v3542_v50 = vmul.f32 %v4957_v37, %v12422_v6  ;;  %v4967_v0 = vld [vmem:[%s10972_s0 + $0x200] sm:$0xff] }
 0x4e8   :  { %4404 = vst.msk [vmem:[%s10974_s2 + $0x1a0] sm:$0xff] %vm135_vm0, %v4280_v51  ;;  %v4277_v52 = vadd.f32 %v3856_v2, %v3533_v9  ;;  %4165 = vperm.xlu1 %4485, %v2851_v20   ;;  %v4958_v51 = vld [vmem:[%s10973_s1 + $0x3a8] sm:$0xff]  ;;  %v4959_v20 = vld [vmem:[%s10972_s0 + $0x1b8] sm:$0xff] }
 0x4e9   :  { %v3881_v58 = vpop.permute.xlu0 %3880  ;;  %v2857_v4 = vsub.f32 %v4958_v51, %v12423_v11  ;;  %v3539_v9 = vmul.f32 %v4959_v20, %v12424_v42  ;;  %v4969_v51 = vld [vmem:[%s10972_s0 + $0x1e8] sm:$0xff]  ;;  %v4970_v20 = vld [vmem:[%s10972_s0 + $0x210] sm:$0xff]  ;;  %v12435_v42 = vld [vmem:[#allocation50_spill] sm:$0xff] }
 0x4ea   :  { %v4282_v10 = vadd.f32 %v3881_v58, %v3538_v54  ;;  %4190 = vperm.xlu0 %4486, %v2856_v33   ;;  %4401 = vst.msk [vmem:[%s10974_s2 + $0x188] sm:$0xff] %vm135_vm0, %v4277_v52  ;;  %v2862_v33 = vsub.f32 %v4960_v40, %v12425_v18  ;;  %v12426_v54 = vld [vmem:[#allocation47_spill] sm:$0xff] }
 0x4eb   :  { %v3866_v63 = vpop.permute.xlu1 %3865  ;;  %v3544_v2 = vmul.f32 %v4961_v55, %v12426_v54  ;;  %v12434_v11 = vld [vmem:[#allocation35_spill] sm:$0xff]  ;;  %v4971_v54 = vld [vmem:[%s10972_s0 + $0x1f8] sm:$0xff] }
 0x4ec   :  { %4406 = vst.msk [vmem:[%s10974_s2 + $0x1b0] sm:$0xff] %vm135_vm0, %v4282_v10  ;;  %v4279_v53 = vadd.f32 %v3866_v63, %v3535_v7  ;;  %4175 = vperm.xlu1 %4485, %v2853_v19   ;;  %v12427_v19 = vld [vmem:[#allocation43_spill] sm:$0xff] }
 0x4ed   :  { %v3891_v22 = vpop.permute.xlu0 %3890  ;;  %v2859_v30 = vsub.f32 %v4962_v39, %v12427_v19  ;;  %v4963_v7 = vld [vmem:[%s10972_s0 + $0x1c8] sm:$0xff] }
 0x4ee   :  { %v4284_v24 = vadd.f32 %v3891_v22, %v3540_v62  ;;  %4200 = vperm.xlu0 %4486, %v2858_v44   ;;  %4403 = vst.msk [vmem:[%s10974_s2 + $0x198] sm:$0xff] %vm135_vm0, %v4279_v53  ;;  %v3541_v48 = vmul.f32 %v4963_v7, %v12428_v29  ;;  %v4964_v44 = vld [vmem:[%s10972_s0 + $0x1f0] sm:$0xff]  ;;  %v4973_v29 = vld [vmem:[%s10972_s0 + $0x208] sm:$0xff] }
 0x4ef   :  { %v3876_v57 = vpop.permute.xlu1 %3875  ;;  %v3546_v62 = vmul.f32 %v4964_v44, %v12429_v16  ;;  %v4974_v16 = vld [vmem:[%s10972_s0 + $0x230] sm:$0xff] }
 0x4f0   :  { %4408 = vst.msk [vmem:[%s10974_s2 + $0x1c0] sm:$0xff] %vm135_vm0, %v4284_v24  ;;  %v4281_v35 = vadd.f32 %v3876_v57, %v3537_v32  ;;  %4185 = vperm.xlu1 %4485, %v2855_v43   ;;  %v2861_v43 = vsub.f32 %v4965_v60, %v12430_v41  ;;  %v3543_v32 = vmul.f32 %v4966_v13, %v12431_v28  ;;  %v4975_v41 = vld [vmem:[%s10972_s0 + $0x218] sm:$0xff]  ;;  %v4976_v28 = vld [vmem:[%s10972_s0 + $0x240] sm:$0xff] }
 0x4f1   :  { %v3901_v26 = vpop.permute.xlu0 %3900 }
 0x4f2   :  { %v4286_v47 = vadd.f32 %v3901_v26, %v3542_v50  ;;  %4210 = vperm.xlu0 %4486, %v2860_v49   ;;  %4405 = vst.msk [vmem:[%s10974_s2 + $0x1a8] sm:$0xff] %vm135_vm0, %v4281_v35  ;;  %v3548_v49 = vmul.f32 %v4967_v0, %v12432_v8  ;;  %v4968_v35 = vld [vmem:[%s10973_s1 + $0x3d8] sm:$0xff]  ;;  %v12433_v26 = vld [vmem:[#allocation184_spill] sm:$0xff] }
 0x4f3   :  { %v3886_v52 = vpop.permute.xlu1 %3885 }
 0x4f4   :  { %4410 = vst.msk [vmem:[%s10974_s2 + $0x1d0] sm:$0xff] %vm135_vm0, %v4286_v47  ;;  %v4283_v58 = vadd.f32 %v3886_v52, %v3539_v9  ;;  %4195 = vperm.xlu1 %4485, %v2857_v4   ;;  %v2863_v47 = vsub.f32 %v4968_v35, %v12433_v26  ;;  %v3545_v4 = vmul.f32 %v4969_v51, %v12434_v11  ;;  %v4978_v26 = vld [vmem:[%s10972_s0 + $0x250] sm:$0xff] }
 0x4f5   :  { %v3911_v10 = vpop.permute.xlu0 %3910  ;;  %v3550_v9 = vmul.f32 %v4970_v20, %v12435_v42 }
 0x4f6   :  { %v4288_v14 = vadd.f32 %v3911_v10, %v3544_v2  ;;  %4220 = vperm.xlu0 %4486, %v2862_v33   ;;  %4407 = vst.msk [vmem:[%s10974_s2 + $0x1b8] sm:$0xff] %vm135_vm0, %v4283_v58  ;;  %v12436_v2 = vld [vmem:[#allocation38_spill] sm:$0xff]  ;;  %v12437_v10 = vld [vmem:[#allocation53_spill] sm:$0xff] }
 0x4f7   :  { %v3896_v63 = vpop.permute.xlu1 %3895  ;;  %v3547_v52 = vmul.f32 %v4971_v54, %v12436_v2  ;;  %v4972_v58 = vld [vmem:[%s10972_s0 + $0x220] sm:$0xff] }
 0x4f8   :  { %4412 = vst.msk [vmem:[%s10974_s2 + $0x1e0] sm:$0xff] %vm135_vm0, %v4288_v14  ;;  %v4285_v53 = vadd.f32 %v3896_v63, %v3541_v48  ;;  %4205 = vperm.xlu1 %4485, %v2859_v30   ;;  %v3552_v14 = vmul.f32 %v4972_v58, %v12437_v10  ;;  %v12438_v48 = vld [vmem:[#allocation94_spill] sm:$0xff] }
 0x4f9   :  { %v3921_v22 = vpop.permute.xlu0 %3920  ;;  %v3549_v44 = vmul.f32 %v4973_v29, %v12438_v48 }
 0x4fa   :  { %v4290_v24 = vadd.f32 %v3921_v22, %v3546_v62  ;;  %4409 = vst.msk [vmem:[%s10974_s2 + $0x1c8] sm:$0xff] %vm135_vm0, %v4285_v53  ;;  %v12439_v62 = vld [vmem:[#allocation152_spill] sm:$0xff] }
 0x4fb   :  { %v3906_v37 = vpop.permute.xlu1 %3905  ;;  %v3554_v63 = vmul.f32 %v4974_v16, %v12439_v62 }
 0x4fc   :  { %4414 = vst.msk [vmem:[%s10974_s2 + $0x1f0] sm:$0xff] %vm135_vm0, %v4290_v24  ;;  %v4287_v6 = vadd.f32 %v3906_v37, %v3543_v32  ;;  %4215 = vperm.xlu1 %4485, %v2861_v43   ;;  %v12440_v43 = vld [vmem:[#allocation49_spill] sm:$0xff]  ;;  %v12441_v32 = vld [vmem:[#allocation55_spill] sm:$0xff] }
 0x4fd   :  { %v3931_v50 = vpop.permute.xlu0 %3930  ;;  %v3551_v13 = vmul.f32 %v4975_v41, %v12440_v43  ;;  %v3556_v0 = vmul.f32 %v4976_v28, %v12441_v32 }
 0x4fe   :  { %v4292_v57 = vadd.f32 %v3931_v50, %v3548_v49  ;;  %4411 = vst.msk [vmem:[%s10974_s2 + $0x1d8] sm:$0xff] %vm135_vm0, %v4287_v6  ;;  %v4977_v50 = vld [vmem:[%s10972_s0 + $0x228] sm:$0xff] }
 0x4ff   :  { %v3916_v40 = vpop.permute.xlu1 %3915 }
 0x500   :  { %4416 = vst.msk [vmem:[%s10974_s2 + $0x200] sm:$0xff] %vm135_vm0, %v4292_v57  ;;  %v4289_v18 = vadd.f32 %v3916_v40, %v3545_v4  ;;  %4225 = vperm.xlu1 %4485, %v2863_v47   ;;  %v12442_v57 = vld [vmem:[#allocation48_spill] sm:$0xff]  ;;  %v12443_v47 = vld [vmem:[#allocation99_spill] sm:$0xff]  ;;  %v12444_v40 = vld [vmem:[#allocation150_spill] sm:$0xff] }
 0x501   :  { %v3941_v33 = vpop.permute.xlu0 %3940  ;;  %v3553_v35 = vmul.f32 %v4977_v50, %v12442_v57  ;;  %v3558_v51 = vmul.f32 %v4978_v26, %v12443_v47 }
 0x502   :  { %v4294_v55 = vadd.f32 %v3941_v33, %v3550_v9  ;;  %4413 = vst.msk [vmem:[%s10974_s2 + $0x1e8] sm:$0xff] %vm135_vm0, %v4289_v18  ;;  %v4979_v9 = vld [vmem:[%s10972_s0 + $0x238] sm:$0xff]  ;;  %v4980_v33 = vld [vmem:[%s10972_s0 + $0x260] sm:$0xff] }
 0x503   :  { %v3926_v39 = vpop.permute.xlu1 %3925  ;;  %v3555_v18 = vmul.f32 %v4979_v9, %v12444_v40 }
 0x504   :  { %4418 = vst.msk [vmem:[%s10974_s2 + $0x210] sm:$0xff] %vm135_vm0, %v4294_v55  ;;  %v4291_v19 = vadd.f32 %v3926_v39, %v3547_v52  ;;  %v12445_v55 = vld [vmem:[#allocation165_spill] sm:$0xff] }
 0x505   :  { %v3951_v30 = vpop.permute.xlu0 %3950  ;;  %v3560_v54 = vmul.f32 %v4980_v33, %v12445_v55  ;;  %v12446_v39 = vld [vmem:[#allocation97_spill] sm:$0xff] }
 0x506   :  { %v4296_v7 = vadd.f32 %v3951_v30, %v3552_v14  ;;  %4415 = vst.msk [vmem:[%s10974_s2 + $0x1f8] sm:$0xff] %vm135_vm0, %v4291_v19  ;;  %v4981_v14 = vld [vmem:[%s10972_s0 + $0x248] sm:$0xff]  ;;  %v4982_v30 = vld [vmem:[%s10972_s0 + $0x270] sm:$0xff] }
 0x507   :  { %v3936_v53 = vpop.permute.xlu1 %3935  ;;  %v3557_v19 = vmul.f32 %v4981_v14, %v12446_v39 }
 0x508   :  { %4420 = vst.msk [vmem:[%s10974_s2 + $0x220] sm:$0xff] %vm135_vm0, %v4296_v7  ;;  %v4293_v22 = vadd.f32 %v3936_v53, %v3549_v44  ;;  %v12447_v7 = vld [vmem:[#allocation102_spill] sm:$0xff]  ;;  %v12448_v53 = vld [vmem:[#allocation52_spill] sm:$0xff] }
 0x509   :  { %v3961_v24 = vpop.permute.xlu0 %3960  ;;  %v3562_v29 = vmul.f32 %v4982_v30, %v12447_v7 }
 0x50a   :  { %v4298_v60 = vadd.f32 %v3961_v24, %v3554_v63  ;;  %4417 = vst.msk [vmem:[%s10974_s2 + $0x208] sm:$0xff] %vm135_vm0, %v4293_v22  ;;  %v4983_v63 = vld [vmem:[%s10972_s0 + $0x258] sm:$0xff]  ;;  %v4984_v24 = vld [vmem:[%s10972_s0 + $0x280] sm:$0xff] }
 0x50b   :  { %v3946_v8 = vpop.permute.xlu1 %3945  ;;  %v3559_v22 = vmul.f32 %v4983_v63, %v12448_v53 }
 0x50c   :  { %4422 = vst.msk [vmem:[%s10974_s2 + $0x230] sm:$0xff] %vm135_vm0, %v4298_v60  ;;  %v4295_v49 = vadd.f32 %v3946_v8, %v3551_v13  ;;  %v12449_v60 = vld [vmem:[#allocation62_spill] sm:$0xff] }
 0x50d   :  { %v3971_v37 = vpop.permute.xlu0 %3970  ;;  %v3564_v41 = vmul.f32 %v4984_v24, %v12449_v60  ;;  %v12450_v8 = vld [vmem:[#allocation54_spill] sm:$0xff] }
 0x50e   :  { %v4300_v6 = vadd.f32 %v3971_v37, %v3556_v0  ;;  %4419 = vst.msk [vmem:[%s10974_s2 + $0x218] sm:$0xff] %vm135_vm0, %v4295_v49  ;;  %v4985_v0 = vld [vmem:[%s10972_s0 + $0x268] sm:$0xff]  ;;  %v4986_v37 = vld [vmem:[%s10972_s0 + $0x290] sm:$0xff] }
 0x50f   :  { %v3956_v11 = vpop.permute.xlu1 %3955  ;;  %v3561_v49 = vmul.f32 %v4985_v0, %v12450_v8 }
 0x510   :  { %4424 = vst.msk [vmem:[%s10974_s2 + $0x240] sm:$0xff] %vm135_vm0, %v4300_v6  ;;  %v4297_v4 = vadd.f32 %v3956_v11, %v3553_v35  ;;  %v12451_v6 = vld [vmem:[#allocation104_spill] sm:$0xff]  ;;  %v12452_v11 = vld [vmem:[#allocation157_spill] sm:$0xff] }
 0x511   :  { %v3981_v20 = vpop.permute.xlu0 %3980  ;;  %v3566_v50 = vmul.f32 %v4986_v37, %v12451_v6 }
 0x512   :  { %v4302_v42 = vadd.f32 %v3981_v20, %v3558_v51  ;;  %4421 = vst.msk [vmem:[%s10974_s2 + $0x228] sm:$0xff] %vm135_vm0, %v4297_v4  ;;  %v4987_v51 = vld [vmem:[%s10972_s0 + $0x278] sm:$0xff]  ;;  %v4988_v20 = vld [vmem:[%s10972_s0 + $0x2a0] sm:$0xff] }
 0x513   :  { %v3966_v2 = vpop.permute.xlu1 %3965  ;;  %v3563_v4 = vmul.f32 %v4987_v51, %v12452_v11 }
 0x514   :  { %4426 = vst.msk [vmem:[%s10974_s2 + $0x250] sm:$0xff] %vm135_vm0, %v4302_v42  ;;  %v4299_v52 = vadd.f32 %v3966_v2, %v3555_v18  ;;  %v12453_v42 = vld [vmem:[#allocation185_spill] sm:$0xff] }
 0x515   :  { %v3991_v58 = vpop.permute.xlu0 %3990  ;;  %v3568_v9 = vmul.f32 %v4988_v20, %v12453_v42  ;;  %v12454_v2 = vld [vmem:[#allocation101_spill] sm:$0xff] }
 0x516   :  { %v4304_v10 = vadd.f32 %v3991_v58, %v3560_v54  ;;  %4423 = vst.msk [vmem:[%s10974_s2 + $0x238] sm:$0xff] %vm135_vm0, %v4299_v52  ;;  %v4989_v54 = vld [vmem:[%s10972_s0 + $0x288] sm:$0xff]  ;;  %v4990_v58 = vld [vmem:[%s10972_s0 + $0x2b0] sm:$0xff] }
 0x517   :  { %v3976_v48 = vpop.permute.xlu1 %3975  ;;  %v3565_v52 = vmul.f32 %v4989_v54, %v12454_v2 }
 0x518   :  { %4428 = vst.msk [vmem:[%s10974_s2 + $0x260] sm:$0xff] %vm135_vm0, %v4304_v10  ;;  %v4301_v44 = vadd.f32 %v3976_v48, %v3557_v19  ;;  %v12455_v10 = vld [vmem:[#allocation71_spill] sm:$0xff]  ;;  %v12456_v48 = vld [vmem:[#allocation168_spill] sm:$0xff] }
 0x519   :  { %v4001_v16 = vpop.permute.xlu0 %4000  ;;  %v3570_v14 = vmul.f32 %v4990_v58, %v12455_v10 }
 0x51a   :  { %v4306_v62 = vadd.f32 %v4001_v16, %v3562_v29  ;;  %4425 = vst.msk [vmem:[%s10974_s2 + $0x248] sm:$0xff] %vm135_vm0, %v4301_v44  ;;  %v4991_v29 = vld [vmem:[%s10972_s0 + $0x298] sm:$0xff]  ;;  %v4992_v16 = vld [vmem:[%s10972_s0 + $0x2c0] sm:$0xff] }
 0x51b   :  { %v3986_v43 = vpop.permute.xlu1 %3985  ;;  %v3567_v44 = vmul.f32 %v4991_v29, %v12456_v48 }
 0x51c   :  { %4430 = vst.msk [vmem:[%s10974_s2 + $0x270] sm:$0xff] %vm135_vm0, %v4306_v62  ;;  %v4303_v13 = vadd.f32 %v3986_v43, %v3559_v22  ;;  %v12457_v62 = vld [vmem:[#allocation70_spill] sm:$0xff]  ;;  %v12458_v43 = vld [vmem:[#allocation65_spill] sm:$0xff] }
 0x51d   :  { %v4011_v28 = vpop.permute.xlu0 %4010  ;;  %v3572_v63 = vmul.f32 %v4992_v16, %v12457_v62 }
 0x51e   :  { %v4308_v32 = vadd.f32 %v4011_v28, %v3564_v41  ;;  %4427 = vst.msk [vmem:[%s10974_s2 + $0x258] sm:$0xff] %vm135_vm0, %v4303_v13  ;;  %v4993_v41 = vld [vmem:[%s10972_s0 + $0x2a8] sm:$0xff]  ;;  %v4994_v28 = vld [vmem:[%s10972_s0 + $0x2d0] sm:$0xff] }
 0x51f   :  { %v3996_v57 = vpop.permute.xlu1 %3995  ;;  %v3569_v13 = vmul.f32 %v4993_v41, %v12458_v43 }
 0x520   :  { %4432 = vst.msk [vmem:[%s10974_s2 + $0x280] sm:$0xff] %vm135_vm0, %v4308_v32  ;;  %v4305_v35 = vadd.f32 %v3996_v57, %v3561_v49  ;;  %v12459_v32 = vld [vmem:[#allocation186_spill] sm:$0xff] }
 0x521   :  { %v4021_v26 = vpop.permute.xlu0 %4020  ;;  %v3574_v0 = vmul.f32 %v4994_v28, %v12459_v32  ;;  %v12460_v57 = vld [vmem:[#allocation66_spill] sm:$0xff] }
 0x522   :  { %v4310_v47 = vadd.f32 %v4021_v26, %v3566_v50  ;;  %4429 = vst.msk [vmem:[%s10974_s2 + $0x268] sm:$0xff] %vm135_vm0, %v4305_v35  ;;  %v4995_v50 = vld [vmem:[%s10972_s0 + $0x2b8] sm:$0xff]  ;;  %v4996_v26 = vld [vmem:[%s10972_s0 + $0x2e0] sm:$0xff] }
 0x523   :  { %v4006_v40 = vpop.permute.xlu1 %4005  ;;  %v3571_v35 = vmul.f32 %v4995_v50, %v12460_v57 }
 0x524   :  { %4434 = vst.msk [vmem:[%s10974_s2 + $0x290] sm:$0xff] %vm135_vm0, %v4310_v47  ;;  %v4307_v18 = vadd.f32 %v4006_v40, %v3563_v4  ;;  %v12461_v47 = vld [vmem:[#allocation75_spill] sm:$0xff]  ;;  %v12462_v40 = vld [vmem:[#allocation190_spill] sm:$0xff] }
 0x525   :  { %v4031_v33 = vpop.permute.xlu0 %4030  ;;  %v3576_v51 = vmul.f32 %v4996_v26, %v12461_v47  ;;  %v5005_v47 = vld [vmem:[%s10972_s0 + $0x308] sm:$0xff] }
 0x526   :  { %v4312_v55 = vadd.f32 %v4031_v33, %v3568_v9  ;;  %4431 = vst.msk [vmem:[%s10974_s2 + $0x278] sm:$0xff] %vm135_vm0, %v4307_v18  ;;  %v4997_v9 = vld [vmem:[%s10972_s0 + $0x2c8] sm:$0xff]  ;;  %v4998_v33 = vld [vmem:[%s10972_s0 + $0x2f0] sm:$0xff] }
 0x527   :  { %v4016_v39 = vpop.permute.xlu1 %4015  ;;  %v3573_v18 = vmul.f32 %v4997_v9, %v12462_v40 }
 0x528   :  { %4436 = vst.msk [vmem:[%s10974_s2 + $0x2a0] sm:$0xff] %vm135_vm0, %v4312_v55  ;;  %v4309_v19 = vadd.f32 %v4016_v39, %v3565_v52  ;;  %v12463_v55 = vld [vmem:[#allocation83_spill] sm:$0xff]  ;;  %v12464_v39 = vld [vmem:[#allocation106_spill] sm:$0xff] }
 0x529   :  { %v4041_v30 = vpop.permute.xlu0 %4040  ;;  %v3578_v54 = vmul.f32 %v4998_v33, %v12463_v55  ;;  %v12470_v33 = vld [vmem:[#allocation27_spill] sm:$0xff] }
 0x52a   :  { %v4314_v7 = vadd.f32 %v4041_v30, %v3570_v14  ;;  %4433 = vst.msk [vmem:[%s10974_s2 + $0x288] sm:$0xff] %vm135_vm0, %v4309_v19  ;;  %v4999_v14 = vld [vmem:[%s10972_s0 + $0x2d8] sm:$0xff]  ;;  %v5000_v30 = vld [vmem:[%s10972_s0 + $0x300] sm:$0xff] }
 0x52b   :  { %v4026_v53 = vpop.permute.xlu1 %4025  ;;  %v3575_v19 = vmul.f32 %v4999_v14, %v12464_v39  ;;  %v5009_v14 = vld [vmem:[%s10972_s0 + $0x328] sm:$0xff]  ;;  %v12471_v39 = vld [vmem:[#allocation124_spill] sm:$0xff] }
 0x52c   :  { %4438 = vst.msk [vmem:[%s10974_s2 + $0x2b0] sm:$0xff] %vm135_vm0, %v4314_v7  ;;  %v4311_v22 = vadd.f32 %v4026_v53, %v3567_v44  ;;  %v12465_v7 = vld [vmem:[#allocation193_spill] sm:$0xff]  ;;  %v12466_v53 = vld [vmem:[#allocation34_spill] sm:$0xff] }
 0x52d   :  { %v4051_v24 = vpop.permute.xlu0 %4050  ;;  %v3580_v29 = vmul.f32 %v5000_v30, %v12465_v7 }
 0x52e   :  { %v4316_v60 = vadd.f32 %v4051_v24, %v3572_v63  ;;  %4435 = vst.msk [vmem:[%s10974_s2 + $0x298] sm:$0xff] %vm135_vm0, %v4311_v22  ;;  %v5001_v63 = vld [vmem:[%s10972_s0 + $0x2e8] sm:$0xff]  ;;  %v5002_v24 = vld [vmem:[%s10972_s0 + $0x310] sm:$0xff] }
 0x52f   :  { %v4036_v8 = vpop.permute.xlu1 %4035  ;;  %v3577_v22 = vmul.f32 %v5001_v63, %v12466_v53 }
 0x530   :  { %4440 = vst.msk [vmem:[%s10974_s2 + $0x2c0] sm:$0xff] %vm135_vm0, %v4316_v60  ;;  %v4313_v49 = vadd.f32 %v4036_v8, %v3569_v13  ;;  %v12467_v60 = vld [vmem:[#allocation125_spill] sm:$0xff] }
 0x531   :  { %v4061_v37 = vpop.permute.xlu0 %4060  ;;  %v3582_v41 = vmul.f32 %v5002_v24, %v12467_v60  ;;  %v12468_v8 = vld [vmem:[#allocation81_spill] sm:$0xff] }
 0x532   :  { %v4318_v6 = vadd.f32 %v4061_v37, %v3574_v0  ;;  %4437 = vst.msk [vmem:[%s10974_s2 + $0x2a8] sm:$0xff] %vm135_vm0, %v4313_v49  ;;  %v5003_v0 = vld [vmem:[%s10972_s0 + $0x2f8] sm:$0xff]  ;;  %v5004_v37 = vld [vmem:[%s10972_s0 + $0x320] sm:$0xff] }
 0x533   :  { %v4046_v11 = vpop.permute.xlu1 %4045  ;;  %v3579_v49 = vmul.f32 %v5003_v0, %v12468_v8 }
 0x534   :  { %4442 = vst.msk [vmem:[%s10974_s2 + $0x2d0] sm:$0xff] %vm135_vm0, %v4318_v6  ;;  %v4315_v4 = vadd.f32 %v4046_v11, %v3571_v35  ;;  %v3584_v6 = vmul.f32 %v5004_v37, %v9602_v56  ;;  %v5006_v56 = vld [vmem:[%s10972_s0 + $0x330] sm:$0xff] }
 0x535   :  { %v4071_v20 = vpop.permute.xlu0 %4070 }
 0x536   :  { %v4320_v42 = vadd.f32 %v4071_v20, %v3576_v51  ;;  %4439 = vst.msk [vmem:[%s10974_s2 + $0x2b8] sm:$0xff] %vm135_vm0, %v4315_v4  ;;  %v12469_v51 = vld [vmem:[#allocation108_spill] sm:$0xff]  ;;  %v3586_v4 = vmul.f32 %v5006_v56, %v9614_v12  ;;  %v5008_v12 = vld [vmem:[%s10972_s0 + $0x340] sm:$0xff] }
 0x537   :  { %v4056_v2 = vpop.permute.xlu1 %4055  ;;  %v3581_v11 = vmul.f32 %v5005_v47, %v12469_v51 }
 0x538   :  { %4444 = vst.msk [vmem:[%s10974_s2 + $0x2e0] sm:$0xff] %vm135_vm0, %v4320_v42  ;;  %v4317_v52 = vadd.f32 %v4056_v2, %v3573_v18  ;;  %v5007_v18 = vld [vmem:[%s10972_s0 + $0x318] sm:$0xff] }
 0x539   :  { %v4081_v58 = vpop.permute.xlu0 %4080  ;;  %v3583_v55 = vmul.f32 %v5007_v18, %v12470_v33 }
 0x53a   :  { %v4322_v10 = vadd.f32 %v4081_v58, %v3578_v54  ;;  %4441 = vst.msk [vmem:[%s10974_s2 + $0x2c8] sm:$0xff] %vm135_vm0, %v4317_v52  ;;  %v3588_v54 = vmul.f32 %v5008_v12, %v9626_v61  ;;  %v5010_v61 = vld [vmem:[%s10972_s0 + $0x350] sm:$0xff] }
 0x53b   :  { %v4066_v48 = vpop.permute.xlu1 %4065  ;;  %v3590_v30 = vmul.f32 %v5010_v61, %v9638_v38  ;;  %v5012_v38 = vld [vmem:[%s10972_s0 + $0x360] sm:$0xff] }
 0x53c   :  { %4446 = vst.msk [vmem:[%s10974_s2 + $0x2f0] sm:$0xff] %vm135_vm0, %v4322_v10  ;;  %v4319_v44 = vadd.f32 %v4066_v48, %v3575_v19  ;;  %v3585_v19 = vmul.f32 %v5009_v14, %v12471_v39  ;;  %v3592_v53 = vmul.f32 %v5012_v38, %v9650_v34  ;;  %v5014_v34 = vld [vmem:[%s10972_s0 + $0x370] sm:$0xff] }
 0x53d   :  { %v4091_v16 = vpop.permute.xlu0 %4090  ;;  %v12473_v38 = vld [vmem:[#allocation128_spill] sm:$0xff] }
 0x53e   :  { %v4324_v62 = vadd.f32 %v4091_v16, %v3580_v29  ;;  %4443 = vst.msk [vmem:[%s10974_s2 + $0x2d8] sm:$0xff] %vm135_vm0, %v4319_v44  ;;  %v5011_v16 = vld [vmem:[%s10972_s0 + $0x338] sm:$0xff] }
 0x53f   :  { %v4076_v43 = vpop.permute.xlu1 %4075 }
 0x540   :  { %4448 = vst.msk [vmem:[%s10974_s2 + $0x300] sm:$0xff] %vm135_vm0, %v4324_v62  ;;  %v4321_v13 = vadd.f32 %v4076_v43, %v3577_v22  ;;  %v12472_v62 = vld [vmem:[#allocation121_spill] sm:$0xff]  ;;  %v5013_v43 = vld [vmem:[%s10972_s0 + $0x348] sm:$0xff] }
 0x541   :  { %v4101_v28 = vpop.permute.xlu0 %4100  ;;  %v3587_v63 = vmul.f32 %v5011_v16, %v12472_v62 }
 0x542   :  { %v4326_v32 = vadd.f32 %v4101_v28, %v3582_v41  ;;  %4445 = vst.msk [vmem:[%s10974_s2 + $0x2e8] sm:$0xff] %vm135_vm0, %v4321_v13  ;;  %v3589_v13 = vmul.f32 %v5013_v43, %v9616_v31  ;;  %v3594_v28 = vmul.f32 %v5014_v34, %v9662_v46  ;;  %v5016_v46 = vld [vmem:[%s10972_s0 + $0x380] sm:$0xff]  ;;  %v5029_v34 = vld [vmem:[%s10972_s0 + $0x3d8] sm:$0xff] }
 0x543   :  { %v4086_v50 = vpop.permute.xlu1 %4085 }
 0x544   :  { %4450 = vst.msk [vmem:[%s10974_s2 + $0x310] sm:$0xff] %vm135_vm0, %v4326_v32  ;;  %v4323_v57 = vadd.f32 %v4086_v50, %v3579_v49  ;;  %v5015_v49 = vld [vmem:[%s10972_s0 + $0x358] sm:$0xff] }
 0x545   :  { %v4111_v35 = vpop.permute.xlu0 %4110  ;;  %v3591_v37 = vmul.f32 %v5015_v49, %v9628_v17 }
 0x546   :  { %v4328_v26 = vadd.f32 %v4111_v35, %v3584_v6  ;;  %4447 = vst.msk [vmem:[%s10974_s2 + $0x2f8] sm:$0xff] %vm135_vm0, %v4323_v57  ;;  %v3596_v6 = vmul.f32 %v5016_v46, %v9674_v45  ;;  %v5018_v45 = vld [vmem:[%s10972_s0 + $0x390] sm:$0xff] }
 0x547   :  { %v4096_v20 = vpop.permute.xlu1 %4095  ;;  %v3598_v51 = vmul.f32 %v5018_v45, %v9686_v3  ;;  %v5020_v3 = vld [vmem:[%s10972_s0 + $0x3a0] sm:$0xff] }
 0x548   :  { %4452 = vst.msk [vmem:[%s10974_s2 + $0x320] sm:$0xff] %vm135_vm0, %v4328_v26  ;;  %v4325_v42 = vadd.f32 %v4096_v20, %v3581_v11  ;;  %v5017_v26 = vld [vmem:[%s10972_s0 + $0x368] sm:$0xff]  ;;  %v5019_v20 = vld [vmem:[%s10972_s0 + $0x378] sm:$0xff] }
 0x549   :  { %v4121_v9 = vpop.permute.xlu0 %4120  ;;  %v3593_v47 = vmul.f32 %v5017_v26, %v9640_v23 }
 0x54a   :  { %v4330_v40 = vadd.f32 %v4121_v9, %v3586_v4  ;;  %4449 = vst.msk [vmem:[%s10974_s2 + $0x308] sm:$0xff] %vm135_vm0, %v4325_v42  ;;  %v3595_v42 = vmul.f32 %v5019_v20, %v9652_v15  ;;  %v3600_v9 = vmul.f32 %v5020_v3, %v9698_v59  ;;  %v5022_v59 = vld [vmem:[%s10972_s0 + $0x3b0] sm:$0xff] }
 0x54b   :  { %v4106_v2 = vpop.permute.xlu1 %4105 }
 0x54c   :  { %4454 = vst.msk [vmem:[%s10974_s2 + $0x330] sm:$0xff] %vm135_vm0, %v4330_v40  ;;  %v4327_v52 = vadd.f32 %v4106_v2, %v3583_v55  ;;  %v5021_v55 = vld [vmem:[%s10972_s0 + $0x388] sm:$0xff] }
 0x54d   :  { %v4131_v58 = vpop.permute.xlu0 %4130  ;;  %v3597_v12 = vmul.f32 %v5021_v55, %v9664_v5 }
 0x54e   :  { %v4332_v10 = vadd.f32 %v4131_v58, %v3588_v54  ;;  %4451 = vst.msk [vmem:[%s10974_s2 + $0x318] sm:$0xff] %vm135_vm0, %v4327_v52  ;;  %v3602_v54 = vmul.f32 %v5022_v59, %v9710_v25  ;;  %v5024_v25 = vld [vmem:[%s10972_s0 + $0x3c0] sm:$0xff] }
 0x54f   :  { %v4116_v7 = vpop.permute.xlu1 %4115  ;;  %v3604_v39 = vmul.f32 %v5024_v25, %v9722_v27  ;;  %v5026_v27 = vld [vmem:[%s10972_s0 + $0x3d0] sm:$0xff] }
 0x550   :  { %4456 = vst.msk [vmem:[%s10974_s2 + $0x340] sm:$0xff] %vm135_vm0, %v4332_v10  ;;  %v4329_v29 = vadd.f32 %v4116_v7, %v3585_v19  ;;  %v5023_v10 = vld [vmem:[%s10972_s0 + $0x398] sm:$0xff]  ;;  %v5025_v7 = vld [vmem:[%s10972_s0 + $0x3a8] sm:$0xff] }
 0x551   :  { %v4141_v48 = vpop.permute.xlu0 %4140  ;;  %v3599_v14 = vmul.f32 %v5023_v10, %v9676_v1 }
 0x552   :  { %v4334_v44 = vadd.f32 %v4141_v48, %v3590_v30  ;;  %4453 = vst.msk [vmem:[%s10974_s2 + $0x328] sm:$0xff] %vm135_vm0, %v4329_v29  ;;  %v3601_v29 = vmul.f32 %v5025_v7, %v9688_v36  ;;  %v3606_v48 = vmul.f32 %v5026_v27, %v9738_v21 }
 0x553   :  { %v4126_v22 = vpop.permute.xlu1 %4125 }
 0x554   :  { %4458 = vst.msk [vmem:[%s10974_s2 + $0x350] sm:$0xff] %vm135_vm0, %v4334_v44  ;;  %v4331_v24 = vadd.f32 %v4126_v22, %v3587_v63  ;;  %v5027_v63 = vld [vmem:[%s10972_s0 + $0x3b8] sm:$0xff] }
 0x555   :  { %v4151_v60 = vpop.permute.xlu0 %4150 }
 0x556   :  { %v4336_v41 = vadd.f32 %v4151_v60, %v3592_v53  ;;  %4455 = vst.msk [vmem:[%s10974_s2 + $0x338] sm:$0xff] %vm135_vm0, %v4331_v24  ;;  %v3603_v53 = vmul.f32 %v5027_v63, %v12473_v38  ;;  %v5028_v24 = vld [vmem:[%s10972_s0 + $0x3c8] sm:$0xff]  ;;  %v12474_v60 = vld [vmem:[#allocation170_spill] sm:$0xff] }
 0x557   :  { %v4136_v32 = vpop.permute.xlu1 %4135 }
 0x558   :  { %4460 = vst.msk [vmem:[%s10974_s2 + $0x360] sm:$0xff] %vm135_vm0, %v4336_v41  ;;  %v4333_v0 = vadd.f32 %v4136_v32, %v3589_v13  ;;  %v3605_v41 = vmul.f32 %v5028_v24, %v12474_v60 }
 0x559   :  { %v4161_v8 = vpop.permute.xlu0 %4160 }
 0x55a   :  { %v4338_v31 = vadd.f32 %v4161_v8, %v3594_v28  ;;  %4457 = vst.msk [vmem:[%s10974_s2 + $0x348] sm:$0xff] %vm135_vm0, %v4333_v0  ;;  %v12475_v28 = vld [vmem:[#allocation112_spill] sm:$0xff] }
 0x55b   :  { %v4146_v50 = vpop.permute.xlu1 %4145  ;;  %v3607_v32 = vmul.f32 %v5029_v34, %v12475_v28 }
 0x55c   :  { %4462 = vst.msk [vmem:[%s10974_s2 + $0x370] sm:$0xff] %vm135_vm0, %v4338_v31  ;;  %v4335_v57 = vadd.f32 %v4146_v50, %v3591_v37 }
 0x55d   :  { %v4171_v35 = vpop.permute.xlu0 %4170 }
 0x55e   :  { %v4340_v17 = vadd.f32 %v4171_v35, %v3596_v6  ;;  %4459 = vst.msk [vmem:[%s10974_s2 + $0x358] sm:$0xff] %vm135_vm0, %v4335_v57 }
 0x55f   :  { %v4156_v11 = vpop.permute.xlu1 %4155 }
 0x560   :  { %4464 = vst.msk [vmem:[%s10974_s2 + $0x380] sm:$0xff] %vm135_vm0, %v4340_v17  ;;  %v4337_v56 = vadd.f32 %v4156_v11, %v3593_v47 }
 0x561   :  { %v4181_v4 = vpop.permute.xlu0 %4180 }
 0x562   :  { %v4342_v23 = vadd.f32 %v4181_v4, %v3598_v51  ;;  %4461 = vst.msk [vmem:[%s10974_s2 + $0x368] sm:$0xff] %vm135_vm0, %v4337_v56 }
 0x563   :  { %v4166_v40 = vpop.permute.xlu1 %4165 }
 0x564   :  { %4466 = vst.msk [vmem:[%s10974_s2 + $0x390] sm:$0xff] %vm135_vm0, %v4342_v23  ;;  %v4339_v18 = vadd.f32 %v4166_v40, %v3595_v42 }
 0x565   :  { %v4191_v33 = vpop.permute.xlu0 %4190 }
 0x566   :  { %v4344_v15 = vadd.f32 %v4191_v33, %v3600_v9  ;;  %4463 = vst.msk [vmem:[%s10974_s2 + $0x378] sm:$0xff] %vm135_vm0, %v4339_v18 }
 0x567   :  { %v4176_v2 = vpop.permute.xlu1 %4175 }
 0x568   :  { %4468 = vst.msk [vmem:[%s10974_s2 + $0x3a0] sm:$0xff] %vm135_vm0, %v4344_v15  ;;  %v4341_v52 = vadd.f32 %v4176_v2, %v3597_v12 }
 0x569   :  { %v4201_v58 = vpop.permute.xlu0 %4200 }
 0x56a   :  { %v4346_v5 = vadd.f32 %v4201_v58, %v3602_v54  ;;  %4465 = vst.msk [vmem:[%s10974_s2 + $0x388] sm:$0xff] %vm135_vm0, %v4341_v52 }
 0x56b   :  { %v4186_v19 = vpop.permute.xlu1 %4185 }
 0x56c   :  { %4470 = vst.msk [vmem:[%s10974_s2 + $0x3b0] sm:$0xff] %vm135_vm0, %v4346_v5  ;;  %v4343_v61 = vadd.f32 %v4186_v19, %v3599_v14 }
 0x56d   :  { %v4211_v30 = vpop.permute.xlu0 %4210 }
 0x56e   :  { %v4348_v1 = vadd.f32 %v4211_v30, %v3604_v39  ;;  %4467 = vst.msk [vmem:[%s10974_s2 + $0x398] sm:$0xff] %vm135_vm0, %v4343_v61 }
 0x56f   :  { %v4196_v44 = vpop.permute.xlu1 %4195 }
 0x570   :  { %4472 = vst.msk [vmem:[%s10974_s2 + $0x3c0] sm:$0xff] %vm135_vm0, %v4348_v1  ;;  %v4345_v16 = vadd.f32 %v4196_v44, %v3601_v29 }
 0x571   :  { %v4221_v62 = vpop.permute.xlu0 %4220 }
 0x572   :  { %v4350_v36 = vadd.f32 %v4221_v62, %v3606_v48  ;;  %4469 = vst.msk [vmem:[%s10974_s2 + $0x3a8] sm:$0xff] %vm135_vm0, %v4345_v16 }
 0x573   :  { %v4206_v21 = vpop.permute.xlu1 %4205 }
 0x574   :  { %4474 = vst.msk [vmem:[%s10974_s2 + $0x3d0] sm:$0xff] %vm135_vm0, %v4350_v36  ;;  %v4347_v22 = vadd.f32 %v4206_v21, %v3603_v53 }
 0x576   :  { %4471 = vst.msk [vmem:[%s10974_s2 + $0x3b8] sm:$0xff] %vm135_vm0, %v4347_v22 }
 0x577   :  { %v4216_v43 = vpop.permute.xlu1 %4215 }
 0x578   :  { %v4349_v13 = vadd.f32 %v4216_v43, %v3605_v41 }
 0x57a   :  { %4473 = vst.msk [vmem:[%s10974_s2 + $0x3c8] sm:$0xff] %vm135_vm0, %v4349_v13 }
 0x57b   :  { %v4226_v0 = vpop.permute.xlu1 %4225 }
 0x57c   :  { %v4351_v8 = vadd.f32 %v4226_v0, %v3607_v32 }
 0x57e   :  { %4475 = vst.msk [vmem:[%s10974_s2 + $0x3d8] sm:$0xff] %vm135_vm0, %v4351_v8 }

</bundles_post_ra>
